<compile_context>
chip_gen: v7x
topology: tpu7x:2x2x1
jax: 0.10.0
libtpu: 0.0.40
codegen_flags: <defaults>
</compile_context>

<pallas_src>
import functools

import jax
import jax.numpy as jnp
import numpy as np
from jax.experimental import pallas as pl
from jax.experimental.pallas import tpu as pltpu


def _round_up(x, m):
    return ((x + m - 1) // m) * m


C1, C2, FC_SIZE, NUM_CLASSES = 64, 128, 512, 10
CONV_OUT = C2 * 7 * 7   # 6272


# ----------------------------------------------------------------------------
# Pallas kernels
# ----------------------------------------------------------------------------
def _conv3x3_pool_kernel(a_ref, w_ref, b_ref, o_ref, *, rows):
    # a_ref: (1, 4*rows, K) bf16  im2col, 4 pool-offset row blocks
    # w_ref: (K, Cout)      bf16  flattened 3x3 filter (K padded with zeros)
    # b_ref: (1, Cout)      f32
    # o_ref: (1, rows, Cout) bf16  = maxpool2x2(conv(x)) + bias (bias is per
    #                               channel so it commutes with the max)
    w = w_ref[...]

    def tap(t):  # conv output for pool offset t, (rows, Cout) f32
        return jnp.dot(a_ref[0, pl.ds(t * rows, rows), :], w,
                       preferred_element_type=jnp.float32)

    p = jnp.maximum(jnp.maximum(tap(0), tap(1)), jnp.maximum(tap(2), tap(3)))
    o_ref[0] = (p + b_ref[...]).astype(o_ref.dtype)


def _fc1_kernel(a_ref, w_ref, b_ref, o_ref):
    # a: (Mp, K) bf16, w: (K, tn) bf16, b: (1, tn) f32, o: (Mp, tn) bf16.
    # Full K in one step -> no K grid axis, no accumulator epilogue.
    y = jnp.dot(a_ref[...], w_ref[...], preferred_element_type=jnp.float32)
    o_ref[...] = (y + b_ref[...]).astype(o_ref.dtype)


def _fc2_relu_softmax_kernel(h_ref, w_ref, b_ref, o_ref, *, valid_cols):
    # Fused Linear(512->10) + bias + ReLU + masked Softmax over the padded
    # 128-lane class axis.
    logits = jnp.dot(h_ref[...], w_ref[...],
                     preferred_element_type=jnp.float32) + b_ref[...]
    logits = jnp.maximum(logits, 0.0)                      # nn.ReLU()
    col = jax.lax.broadcasted_iota(jnp.int32, logits.shape, 1)
    mask = col < valid_cols
    lm = jnp.where(mask, logits, jnp.float32(-1e30))
    m = jnp.max(lm, axis=-1, keepdims=True)
    e = jnp.where(mask, jnp.exp(lm - m), 0.0)
    o_ref[...] = e / jnp.sum(e, axis=-1, keepdims=True)    # nn.Softmax(dim=1)


# ----------------------------------------------------------------------------
# Pallas wrappers
# ----------------------------------------------------------------------------
def _im2col_pooled(x, rows_pad, k_pad):
    """x: (N, H, W, C) bf16 with H, W even.  Returns (N, 4*rows_pad, k_pad)
    bf16 where row-block t (dh=t//2, dw=t%2) holds the flattened 3x3 patches
    of the 'same'-padded conv at output position (2i+dh, 2j+dw), rows ordered
    i*(W/2)+j; K ordered (kh*3+kw)*C + c (rest zero-padded)."""
    n, h, w, c = x.shape
    ho, wo = h // 2, w // 2
    xp = jnp.pad(x, ((0, 0), (1, 1), (1, 1), (0, 0)))
    blocks = []
    for dh in range(2):
        for dw in range(2):
            taps = [xp[:, dh + kh: dh + kh + h: 2, dw + kw: dw + kw + w: 2, :]
                    for kh in range(3) for kw in range(3)]
            blk = jnp.concatenate(taps, axis=-1).reshape(n, ho * wo, 9 * c)
            blk = jnp.pad(blk, ((0, 0), (0, rows_pad - ho * wo),
                                (0, k_pad - 9 * c)))
            blocks.append(blk)
    return jnp.concatenate(blocks, axis=1)


def conv3x3_pool(a, w, b, *, rows):
    """Fused 3x3 'same' conv + bias + 2x2 max-pool.
    a: (N, 4*rows, K) bf16 im2col; w: (K, Cout) bf16; b: (1, Cout) f32.
    Returns (N, rows, Cout) bf16 (pooled output rows, first Ho*Wo valid)."""
    n, lr, k = a.shape
    cout = w.shape[1]
    # TODO(synk): for large batches, block several samples per grid step to
    # deepen the DMA/MXU pipeline; at batch=2 the grid already has 2 parallel
    # steps (good for v7x's two TensorCores).
    return pl.pallas_call(
        functools.partial(_conv3x3_pool_kernel, rows=rows),
        out_shape=jax.ShapeDtypeStruct((n, rows, cout), jnp.bfloat16),
        grid=(n,),
        in_specs=[
            pl.BlockSpec((1, lr, k), lambda i: (i, 0, 0)),
            pl.BlockSpec((k, cout), lambda i: (0, 0)),
            pl.BlockSpec((1, cout), lambda i: (0, 0)),
        ],
        out_specs=pl.BlockSpec((1, rows, cout), lambda i: (i, 0, 0)),
        compiler_params=pltpu.CompilerParams(
            dimension_semantics=("parallel",)),
    )(a, w, b)


def fc1_linear(a, w, b, *, tn=256):
    """a: (Mp, K) bf16; w: (K, N) bf16; b: (1, N) f32 -> (Mp, N) bf16.
    Full K per step, grid only over N (tn=256 -> 2 parallel blocks)."""
    mp, k = a.shape
    nout = w.shape[1]
    return pl.pallas_call(
        _fc1_kernel,
        out_shape=jax.ShapeDtypeStruct((mp, nout), jnp.bfloat16),
        grid=(nout // tn,),
        in_specs=[
            pl.BlockSpec((mp, k), lambda j: (0, 0)),
            pl.BlockSpec((k, tn), lambda j: (0, j)),
            pl.BlockSpec((1, tn), lambda j: (0, j)),
        ],
        out_specs=pl.BlockSpec((mp, tn), lambda j: (0, j)),
        compiler_params=pltpu.CompilerParams(
            dimension_semantics=("parallel",)),
    )(a, w, b)


def fc2_relu_softmax(h, w, b):
    """h: (Mp, 512) bf16; w: (512, 128) bf16; b: (1, 128) f32 -> (Mp, 128) f32
    softmax probabilities (first NUM_CLASSES columns valid)."""
    mp = h.shape[0]
    npad = w.shape[1]
    return pl.pallas_call(
        functools.partial(_fc2_relu_softmax_kernel, valid_cols=NUM_CLASSES),
        out_shape=jax.ShapeDtypeStruct((mp, npad), jnp.float32),
    )(h, w, b)


# ----------------------------------------------------------------------------
# Parameters (weights pre-reshaped / pre-padded / bf16 at init)
# ----------------------------------------------------------------------------
def _prep_conv(kw, kb, cin, cout, k_pad):
    fan_in = 9 * cin
    wb = float(np.sqrt(6.0 / fan_in))                       # kaiming_uniform_
    w = jax.random.uniform(kw, (3, 3, cin, cout), jnp.float32, -wb, wb)
    bb = 1.0 / float(np.sqrt(fan_in))                       # default bias init
    b = jax.random.uniform(kb, (1, cout), jnp.float32, -bb, bb)
    w_flat = w.reshape(9 * cin, cout)                       # K = (kh*3+kw)*cin + c
    w_p = jnp.zeros((k_pad, cout), jnp.float32).at[:9 * cin].set(w_flat)
    return w_p.astype(jnp.bfloat16), b


def _prep_fc1(kw, kb):
    k, nout = CONV_OUT, FC_SIZE
    std = float(np.sqrt(2.0 / (k + nout)))                  # xavier_normal_
    w = jax.random.normal(kw, (k, nout), jnp.float32) * std # (in, out) = W^T
    bb = 1.0 / float(np.sqrt(k))                            # default bias init
    b = jax.random.uniform(kb, (1, nout), jnp.float32, -bb, bb)
    # Fold the NCHW flatten order (c*49 + hw) -> our NHWC order (hw*128 + c)
    # into the weight at init time, so the runtime skips a feature transpose.
    w = w.reshape(C2, 49, nout).transpose(1, 0, 2).reshape(k, nout)
    return w.astype(jnp.bfloat16), b


def _prep_fc2(kw, kb):
    k, nout, npad = FC_SIZE, NUM_CLASSES, 128
    std = float(np.sqrt(2.0 / (k + nout)))                  # xavier_normal_
    w = jax.random.normal(kw, (k, nout), jnp.float32) * std
    bb = 1.0 / float(np.sqrt(k))                            # default bias init
    b = jax.random.uniform(kb, (1, nout), jnp.float32, -bb, bb)
    w_p = jnp.zeros((k, npad), jnp.float32).at[:, :nout].set(w)
    b_p = jnp.zeros((1, npad), jnp.float32).at[:, :nout].set(b)
    return w_p.astype(jnp.bfloat16), b_p


def make_params(key):
    ks = jax.random.split(key, 8)
    p = {}
    p["conv1_w"], p["conv1_b"] = _prep_conv(ks[0], ks[1], 1, C1, k_pad=16)
    p["conv2_w"], p["conv2_b"] = _prep_conv(ks[2], ks[3], C1, C2, k_pad=640)
    p["fc1_w"], p["fc1_b"] = _prep_fc1(ks[4], ks[5])
    p["fc2_w"], p["fc2_b"] = _prep_fc2(ks[6], ks[7])
    return p


# ----------------------------------------------------------------------------
# Forward pass (matches MnistCNN2.forward)
# ----------------------------------------------------------------------------
CONV1_ROWS = 208   # 14*14=196 valid pooled rows, padded to a 16-multiple
CONV2_ROWS = 64    # 7*7 = 49 valid pooled rows, padded to a 16-multiple


def mnist_cnn2_forward(params, batch):
    x = batch.reshape(-1, 1, 28, 28).astype(jnp.float32)    # batch.view(-1,1,28,28)
    n = x.shape[0]
    x = jnp.transpose(x, (0, 2, 3, 1)).astype(jnp.bfloat16) # (N,28,28,1) NHWC

    # conv1 (1->64) + bias + maxpool -> (N,14,14,64)
    a1 = _im2col_pooled(x, rows_pad=CONV1_ROWS, k_pad=16)        # (N,832,16)
    y1 = conv3x3_pool(a1, params["conv1_w"], params["conv1_b"],
                      rows=CONV1_ROWS)                           # (N,208,64) bf16
    y1 = y1[:, :14 * 14, :].reshape(n, 14, 14, C1)

    # conv2 (64->128) + bias + maxpool -> (N,7,7,128)
    a2 = _im2col_pooled(y1, rows_pad=CONV2_ROWS, k_pad=640)      # (N,256,640)
    y2 = conv3x3_pool(a2, params["conv2_w"], params["conv2_b"],
                      rows=CONV2_ROWS)                           # (N,64,128) bf16

    # flatten in (hw, c) order; the NCHW permutation lives in fc1_w (init-time)
    feat = y2[:, :49, :].reshape(n, CONV_OUT)                    # (N,6272) bf16
    mp = max(16, _round_up(n, 16))
    feat_p = jnp.pad(feat, ((0, mp - n), (0, 0)))

    h = fc1_linear(feat_p, params["fc1_w"], params["fc1_b"])     # (Mp,512) bf16
    probs_p = fc2_relu_softmax(h, params["fc2_w"], params["fc2_b"])
    return probs_p[:n, :NUM_CLASSES]


if __name__ == "__main__":
    key = jax.random.PRNGKey(0)
    kx, kp = jax.random.split(key)

    x = jax.random.normal(kx, (2, 1, 28, 28), jnp.float32)   # NCHW, MNIST-shaped
    params = make_params(kp)

    fwd = jax.jit(mnist_cnn2_forward)
    probs = jax.block_until_ready(fwd(params, x))

    assert probs.shape == (2, NUM_CLASSES)
    assert bool(jnp.all(jnp.isfinite(probs)))
    assert bool(jnp.allclose(jnp.sum(probs, axis=1), 1.0, atol=1e-3))
    print("KERNEL_OK")
</pallas_src>

<mosaic_0001>
module attributes {stable_mosaic.version = 11 : i64} {
  func.func @_conv3x3_pool_kernel(%arg0: i32, %arg1: memref<1x832x16xbf16, #tpu.memory_space<vmem>>, %arg2: memref<16x64xbf16, #tpu.memory_space<vmem>>, %arg3: memref<1x64xf32, #tpu.memory_space<vmem>>, %arg4: memref<1x208x64xbf16, #tpu.memory_space<vmem>>) attributes {dimension_semantics = [#tpu.dimension_semantics<parallel>], iteration_bounds = array<i64: 2>, scalar_prefetch = 0 : i64, scratch_operands = 0 : i64, tpu.core_type = #tpu.core_type<tc>, window_params = [{transform_indices = @transform_0, window_bounds = array<i64: 1, 832, 16>}, {pipeline_mode = #tpu.pipeline_mode<synchronous>, transform_indices = @transform_1, window_bounds = array<i64: 16, 64>}, {pipeline_mode = #tpu.pipeline_mode<synchronous>, transform_indices = @transform_2, window_bounds = array<i64: 1, 64>}, {transform_indices = @transform_3, window_bounds = array<i64: 1, 208, 64>}]} {
    %c0 = arith.constant 0 : index
    %c0_0 = arith.constant 0 : index
    %0 = vector.load %arg2[%c0, %c0_0] : memref<16x64xbf16, #tpu.memory_space<vmem>>, vector<16x64xbf16>
    %c0_1 = arith.constant 0 : index
    %c0_2 = arith.constant 0 : index
    %c0_3 = arith.constant 0 : index
    %1 = vector.load %arg1[%c0_1, %c0_2, %c0_3] : memref<1x832x16xbf16, #tpu.memory_space<vmem>>, vector<1x208x16xbf16>
    %2 = vector.shape_cast %1 : vector<1x208x16xbf16> to vector<208x16xbf16>
    %cst = arith.constant dense<0.000000e+00> : vector<208x64xf32>
    %3 = tpu.matmul %2, %0, %cst {dimension_numbers = #tpu.dot_dimension_numbers<[1], [0], [0], [1], [0, 0, 1, 1], [], []>} : vector<208x16xbf16>, vector<16x64xbf16>, vector<208x64xf32> -> vector<208x64xf32>
    %c0_4 = arith.constant 0 : index
    %c208 = arith.constant 208 : index
    %c0_5 = arith.constant 0 : index
    %4 = vector.load %arg1[%c0_4, %c208, %c0_5] : memref<1x832x16xbf16, #tpu.memory_space<vmem>>, vector<1x208x16xbf16>
    %5 = vector.shape_cast %4 : vector<1x208x16xbf16> to vector<208x16xbf16>
    %cst_6 = arith.constant dense<0.000000e+00> : vector<208x64xf32>
    %6 = tpu.matmul %5, %0, %cst_6 {dimension_numbers = #tpu.dot_dimension_numbers<[1], [0], [0], [1], [0, 0, 1, 1], [], []>} : vector<208x16xbf16>, vector<16x64xbf16>, vector<208x64xf32> -> vector<208x64xf32>
    %7 = arith.maximumf %3, %6 : vector<208x64xf32>
    %c0_7 = arith.constant 0 : index
    %c416 = arith.constant 416 : index
    %c0_8 = arith.constant 0 : index
    %8 = vector.load %arg1[%c0_7, %c416, %c0_8] : memref<1x832x16xbf16, #tpu.memory_space<vmem>>, vector<1x208x16xbf16>
    %9 = vector.shape_cast %8 : vector<1x208x16xbf16> to vector<208x16xbf16>
    %cst_9 = arith.constant dense<0.000000e+00> : vector<208x64xf32>
    %10 = tpu.matmul %9, %0, %cst_9 {dimension_numbers = #tpu.dot_dimension_numbers<[1], [0], [0], [1], [0, 0, 1, 1], [], []>} : vector<208x16xbf16>, vector<16x64xbf16>, vector<208x64xf32> -> vector<208x64xf32>
    %c0_10 = arith.constant 0 : index
    %c624 = arith.constant 624 : index
    %c0_11 = arith.constant 0 : index
    %11 = vector.load %arg1[%c0_10, %c624, %c0_11] : memref<1x832x16xbf16, #tpu.memory_space<vmem>>, vector<1x208x16xbf16>
    %12 = vector.shape_cast %11 : vector<1x208x16xbf16> to vector<208x16xbf16>
    %cst_12 = arith.constant dense<0.000000e+00> : vector<208x64xf32>
    %13 = tpu.matmul %12, %0, %cst_12 {dimension_numbers = #tpu.dot_dimension_numbers<[1], [0], [0], [1], [0, 0, 1, 1], [], []>} : vector<208x16xbf16>, vector<16x64xbf16>, vector<208x64xf32> -> vector<208x64xf32>
    %14 = arith.maximumf %10, %13 : vector<208x64xf32>
    %15 = arith.maximumf %7, %14 : vector<208x64xf32>
    %c0_13 = arith.constant 0 : index
    %c0_14 = arith.constant 0 : index
    %16 = vector.load %arg3[%c0_13, %c0_14] : memref<1x64xf32, #tpu.memory_space<vmem>>, vector<1x64xf32>
    %17 = vector.broadcast %16 : vector<1x64xf32> to vector<208x64xf32>
    %18 = arith.addf %15, %17 : vector<208x64xf32>
    %19 = arith.truncf %18 : vector<208x64xf32> to vector<208x64xbf16>
    %c0_15 = arith.constant 0 : index
    %c0_16 = arith.constant 0 : index
    %c0_17 = arith.constant 0 : index
    %20 = vector.load %arg4[%c0_15, %c0_16, %c0_17] : memref<1x208x64xbf16, #tpu.memory_space<vmem>>, vector<1x208x64xbf16>
    %21 = vector.shape_cast %20 : vector<1x208x64xbf16> to vector<208x64xbf16>
    %22 = vector.shape_cast %19 : vector<208x64xbf16> to vector<1x208x64xbf16>
    tpu.vector_store %arg4[%c0_15, %c0_16, %c0_17], %22 {strides = array<i32>} : memref<1x208x64xbf16, #tpu.memory_space<vmem>>, vector<1x208x64xbf16>,
    return
  }
  func.func @transform_0(%arg0: i32) -> (i32, i32, i32) {
    %c0_i32 = arith.constant 0 : i32
    %c0_i32_0 = arith.constant 0 : i32
    %c0_i32_1 = arith.constant 0 : i32
    return %arg0, %c0_i32, %c0_i32_0 : i32, i32, i32
  }
  func.func @transform_1(%arg0: i32) -> (i32, i32) {
    %c0_i32 = arith.constant 0 : i32
    %c0_i32_0 = arith.constant 0 : i32
    %c0_i32_1 = arith.constant 0 : i32
    return %c0_i32, %c0_i32_0 : i32, i32
  }
  func.func @transform_2(%arg0: i32) -> (i32, i32) {
    %c0_i32 = arith.constant 0 : i32
    %c0_i32_0 = arith.constant 0 : i32
    %c0_i32_1 = arith.constant 0 : i32
    return %c0_i32, %c0_i32_0 : i32, i32
  }
  func.func @transform_3(%arg0: i32) -> (i32, i32, i32) {
    %c0_i32 = arith.constant 0 : i32
    %c0_i32_0 = arith.constant 0 : i32
    %c0_i32_1 = arith.constant 0 : i32
    return %arg0, %c0_i32, %c0_i32_0 : i32, i32, i32
  }
}

module attributes {stable_mosaic.version = 11 : i64} {
  func.func @_conv3x3_pool_kernel(%arg0: i32, %arg1: memref<1x256x640xbf16, #tpu.memory_space<vmem>>, %arg2: memref<640x128xbf16, #tpu.memory_space<vmem>>, %arg3: memref<1x128xf32, #tpu.memory_space<vmem>>, %arg4: memref<1x64x128xbf16, #tpu.memory_space<vmem>>) attributes {dimension_semantics = [#tpu.dimension_semantics<parallel>], iteration_bounds = array<i64: 2>, scalar_prefetch = 0 : i64, scratch_operands = 0 : i64, tpu.core_type = #tpu.core_type<tc>, window_params = [{transform_indices = @transform_0, window_bounds = array<i64: 1, 256, 640>}, {pipeline_mode = #tpu.pipeline_mode<synchronous>, transform_indices = @transform_1, window_bounds = array<i64: 640, 128>}, {pipeline_mode = #tpu.pipeline_mode<synchronous>, transform_indices = @transform_2, window_bounds = array<i64: 1, 128>}, {transform_indices = @transform_3, window_bounds = array<i64: 1, 64, 128>}]} {
    %c0 = arith.constant 0 : index
    %c0_0 = arith.constant 0 : index
    %0 = vector.load %arg2[%c0, %c0_0] : memref<640x128xbf16, #tpu.memory_space<vmem>>, vector<640x128xbf16>
    %c0_1 = arith.constant 0 : index
    %c0_2 = arith.constant 0 : index
    %c0_3 = arith.constant 0 : index
    %1 = vector.load %arg1[%c0_1, %c0_2, %c0_3] : memref<1x256x640xbf16, #tpu.memory_space<vmem>>, vector<1x64x640xbf16>
    %2 = vector.shape_cast %1 : vector<1x64x640xbf16> to vector<64x640xbf16>
    %cst = arith.constant dense<0.000000e+00> : vector<64x128xf32>
    %3 = tpu.matmul %2, %0, %cst {dimension_numbers = #tpu.dot_dimension_numbers<[1], [0], [0], [1], [0, 0, 1, 1], [], []>} : vector<64x640xbf16>, vector<640x128xbf16>, vector<64x128xf32> -> vector<64x128xf32>
    %c0_4 = arith.constant 0 : index
    %c64 = arith.constant 64 : index
    %c0_5 = arith.constant 0 : index
    %4 = vector.load %arg1[%c0_4, %c64, %c0_5] : memref<1x256x640xbf16, #tpu.memory_space<vmem>>, vector<1x64x640xbf16>
    %5 = vector.shape_cast %4 : vector<1x64x640xbf16> to vector<64x640xbf16>
    %cst_6 = arith.constant dense<0.000000e+00> : vector<64x128xf32>
    %6 = tpu.matmul %5, %0, %cst_6 {dimension_numbers = #tpu.dot_dimension_numbers<[1], [0], [0], [1], [0, 0, 1, 1], [], []>} : vector<64x640xbf16>, vector<640x128xbf16>, vector<64x128xf32> -> vector<64x128xf32>
    %7 = arith.maximumf %3, %6 : vector<64x128xf32>
    %c0_7 = arith.constant 0 : index
    %c128 = arith.constant 128 : index
    %c0_8 = arith.constant 0 : index
    %8 = vector.load %arg1[%c0_7, %c128, %c0_8] : memref<1x256x640xbf16, #tpu.memory_space<vmem>>, vector<1x64x640xbf16>
    %9 = vector.shape_cast %8 : vector<1x64x640xbf16> to vector<64x640xbf16>
    %cst_9 = arith.constant dense<0.000000e+00> : vector<64x128xf32>
    %10 = tpu.matmul %9, %0, %cst_9 {dimension_numbers = #tpu.dot_dimension_numbers<[1], [0], [0], [1], [0, 0, 1, 1], [], []>} : vector<64x640xbf16>, vector<640x128xbf16>, vector<64x128xf32> -> vector<64x128xf32>
    %c0_10 = arith.constant 0 : index
    %c192 = arith.constant 192 : index
    %c0_11 = arith.constant 0 : index
    %11 = vector.load %arg1[%c0_10, %c192, %c0_11] : memref<1x256x640xbf16, #tpu.memory_space<vmem>>, vector<1x64x640xbf16>
    %12 = vector.shape_cast %11 : vector<1x64x640xbf16> to vector<64x640xbf16>
    %cst_12 = arith.constant dense<0.000000e+00> : vector<64x128xf32>
    %13 = tpu.matmul %12, %0, %cst_12 {dimension_numbers = #tpu.dot_dimension_numbers<[1], [0], [0], [1], [0, 0, 1, 1], [], []>} : vector<64x640xbf16>, vector<640x128xbf16>, vector<64x128xf32> -> vector<64x128xf32>
    %14 = arith.maximumf %10, %13 : vector<64x128xf32>
    %15 = arith.maximumf %7, %14 : vector<64x128xf32>
    %c0_13 = arith.constant 0 : index
    %c0_14 = arith.constant 0 : index
    %16 = vector.load %arg3[%c0_13, %c0_14] : memref<1x128xf32, #tpu.memory_space<vmem>>, vector<1x128xf32>
    %17 = vector.broadcast %16 : vector<1x128xf32> to vector<64x128xf32>
    %18 = arith.addf %15, %17 : vector<64x128xf32>
    %19 = arith.truncf %18 : vector<64x128xf32> to vector<64x128xbf16>
    %c0_15 = arith.constant 0 : index
    %c0_16 = arith.constant 0 : index
    %c0_17 = arith.constant 0 : index
    %20 = vector.load %arg4[%c0_15, %c0_16, %c0_17] : memref<1x64x128xbf16, #tpu.memory_space<vmem>>, vector<1x64x128xbf16>
    %21 = vector.shape_cast %20 : vector<1x64x128xbf16> to vector<64x128xbf16>
    %22 = vector.shape_cast %19 : vector<64x128xbf16> to vector<1x64x128xbf16>
    tpu.vector_store %arg4[%c0_15, %c0_16, %c0_17], %22 {strides = array<i32>} : memref<1x64x128xbf16, #tpu.memory_space<vmem>>, vector<1x64x128xbf16>,
    return
  }
  func.func @transform_0(%arg0: i32) -> (i32, i32, i32) {
    %c0_i32 = arith.constant 0 : i32
    %c0_i32_0 = arith.constant 0 : i32
    %c0_i32_1 = arith.constant 0 : i32
    return %arg0, %c0_i32, %c0_i32_0 : i32, i32, i32
  }
  func.func @transform_1(%arg0: i32) -> (i32, i32) {
    %c0_i32 = arith.constant 0 : i32
    %c0_i32_0 = arith.constant 0 : i32
    %c0_i32_1 = arith.constant 0 : i32
    return %c0_i32, %c0_i32_0 : i32, i32
  }
  func.func @transform_2(%arg0: i32) -> (i32, i32) {
    %c0_i32 = arith.constant 0 : i32
    %c0_i32_0 = arith.constant 0 : i32
    %c0_i32_1 = arith.constant 0 : i32
    return %c0_i32, %c0_i32_0 : i32, i32
  }
  func.func @transform_3(%arg0: i32) -> (i32, i32, i32) {
    %c0_i32 = arith.constant 0 : i32
    %c0_i32_0 = arith.constant 0 : i32
    %c0_i32_1 = arith.constant 0 : i32
    return %arg0, %c0_i32, %c0_i32_0 : i32, i32, i32
  }
}

module attributes {stable_mosaic.version = 11 : i64} {
  func.func @_fc2_relu_softmax_kernel(%arg0: memref<16x512xbf16, #tpu.memory_space<vmem>>, %arg1: memref<512x128xbf16, #tpu.memory_space<vmem>>, %arg2: memref<1x128xf32, #tpu.memory_space<vmem>>, %arg3: memref<16x128xf32, #tpu.memory_space<vmem>>) attributes {dimension_semantics = [], scalar_prefetch = 0 : i64, scratch_operands = 0 : i64, tpu.core_type = #tpu.core_type<tc>} {
    %c0 = arith.constant 0 : index
    %c0_0 = arith.constant 0 : index
    %0 = vector.load %arg0[%c0, %c0_0] : memref<16x512xbf16, #tpu.memory_space<vmem>>, vector<16x512xbf16>
    %c0_1 = arith.constant 0 : index
    %c0_2 = arith.constant 0 : index
    %1 = vector.load %arg1[%c0_1, %c0_2] : memref<512x128xbf16, #tpu.memory_space<vmem>>, vector<512x128xbf16>
    %cst = arith.constant dense<0.000000e+00> : vector<16x128xf32>
    %2 = tpu.matmul %0, %1, %cst {dimension_numbers = #tpu.dot_dimension_numbers<[1], [0], [0], [1], [0, 0, 1, 1], [], []>} : vector<16x512xbf16>, vector<512x128xbf16>, vector<16x128xf32> -> vector<16x128xf32>
    %c0_3 = arith.constant 0 : index
    %c0_4 = arith.constant 0 : index
    %3 = vector.load %arg2[%c0_3, %c0_4] : memref<1x128xf32, #tpu.memory_space<vmem>>, vector<1x128xf32>
    %4 = vector.broadcast %3 : vector<1x128xf32> to vector<16x128xf32>
    %5 = arith.addf %2, %4 : vector<16x128xf32>
    %cst_5 = arith.constant 0.000000e+00 : f32
    %6 = vector.broadcast %cst_5 : f32 to vector<16x128xf32>
    %7 = arith.maximumf %5, %6 : vector<16x128xf32>
    %8 = tpu.iota {dimensions = array<i32: 1>} : vector<16x128xi32>
    %c10_i32 = arith.constant 10 : i32
    %9 = vector.broadcast %c10_i32 : i32 to vector<16x128xi32>
    %10 = arith.cmpi slt, %8, %9 : vector<16x128xi32>
    %cst_6 = arith.constant -1.000000e+30 : f32
    %11 = vector.broadcast %cst_6 : f32 to vector<16x128xf32>
    %12 = arith.select %10, %7, %11 : vector<16x128xi1>, vector<16x128xf32>
    %cst_7 = arith.constant dense<0xFF800000> : vector<16xf32>
    %13 = vector.multi_reduction <maximumf>, %12, %cst_7 [1] : vector<16x128xf32> to vector<16xf32>
    %14 = vector.shape_cast %13 : vector<16xf32> to vector<16x1xf32>
    %15 = vector.broadcast %14 : vector<16x1xf32> to vector<16x128xf32>
    %16 = arith.subf %12, %15 : vector<16x128xf32>
    %17 = math.exp %16 : vector<16x128xf32>
    %cst_8 = arith.constant 0.000000e+00 : f32
    %18 = vector.broadcast %cst_8 : f32 to vector<16x128xf32>
    %19 = arith.select %10, %17, %18 : vector<16x128xi1>, vector<16x128xf32>
    %cst_9 = arith.constant dense<0.000000e+00> : vector<16xf32>
    %20 = vector.multi_reduction <add>, %19, %cst_9 [1] : vector<16x128xf32> to vector<16xf32>
    %21 = vector.shape_cast %20 : vector<16xf32> to vector<16x1xf32>
    %22 = vector.broadcast %21 : vector<16x1xf32> to vector<16x128xf32>
    %23 = arith.divf %19, %22 : vector<16x128xf32>
    %c0_10 = arith.constant 0 : index
    %c0_11 = arith.constant 0 : index
    %24 = vector.load %arg3[%c0_10, %c0_11] : memref<16x128xf32, #tpu.memory_space<vmem>>, vector<16x128xf32>
    tpu.vector_store %arg3[%c0_10, %c0_11], %23 {strides = array<i32>} : memref<16x128xf32, #tpu.memory_space<vmem>>, vector<16x128xf32>,
    return
  }
}

module attributes {stable_mosaic.version = 11 : i64} {
  func.func @_fc1_kernel(%arg0: i32, %arg1: memref<16x6272xbf16, #tpu.memory_space<vmem>>, %arg2: memref<6272x256xbf16, #tpu.memory_space<vmem>>, %arg3: memref<1x256xf32, #tpu.memory_space<vmem>>, %arg4: memref<16x256xbf16, #tpu.memory_space<vmem>>) attributes {dimension_semantics = [#tpu.dimension_semantics<parallel>], iteration_bounds = array<i64: 2>, scalar_prefetch = 0 : i64, scratch_operands = 0 : i64, tpu.core_type = #tpu.core_type<tc>, window_params = [{pipeline_mode = #tpu.pipeline_mode<synchronous>, transform_indices = @transform_0, window_bounds = array<i64: 16, 6272>}, {transform_indices = @transform_1, window_bounds = array<i64: 6272, 256>}, {transform_indices = @transform_2, window_bounds = array<i64: 1, 256>}, {transform_indices = @transform_3, window_bounds = array<i64: 16, 256>}]} {
    %c0 = arith.constant 0 : index
    %c0_0 = arith.constant 0 : index
    %0 = vector.load %arg1[%c0, %c0_0] : memref<16x6272xbf16, #tpu.memory_space<vmem>>, vector<16x6272xbf16>
    %c0_1 = arith.constant 0 : index
    %c0_2 = arith.constant 0 : index
    %1 = vector.load %arg2[%c0_1, %c0_2] : memref<6272x256xbf16, #tpu.memory_space<vmem>>, vector<6272x256xbf16>
    %cst = arith.constant dense<0.000000e+00> : vector<16x256xf32>
    %2 = tpu.matmul %0, %1, %cst {dimension_numbers = #tpu.dot_dimension_numbers<[1], [0], [0], [1], [0, 0, 1, 1], [], []>} : vector<16x6272xbf16>, vector<6272x256xbf16>, vector<16x256xf32> -> vector<16x256xf32>
    %c0_3 = arith.constant 0 : index
    %c0_4 = arith.constant 0 : index
    %3 = vector.load %arg3[%c0_3, %c0_4] : memref<1x256xf32, #tpu.memory_space<vmem>>, vector<1x256xf32>
    %4 = vector.broadcast %3 : vector<1x256xf32> to vector<16x256xf32>
    %5 = arith.addf %2, %4 : vector<16x256xf32>
    %6 = arith.truncf %5 : vector<16x256xf32> to vector<16x256xbf16>
    %c0_5 = arith.constant 0 : index
    %c0_6 = arith.constant 0 : index
    %7 = vector.load %arg4[%c0_5, %c0_6] : memref<16x256xbf16, #tpu.memory_space<vmem>>, vector<16x256xbf16>
    tpu.vector_store %arg4[%c0_5, %c0_6], %6 {strides = array<i32>} : memref<16x256xbf16, #tpu.memory_space<vmem>>, vector<16x256xbf16>,
    return
  }
  func.func @transform_0(%arg0: i32) -> (i32, i32) {
    %c0_i32 = arith.constant 0 : i32
    %c0_i32_0 = arith.constant 0 : i32
    %c0_i32_1 = arith.constant 0 : i32
    return %c0_i32, %c0_i32_0 : i32, i32
  }
  func.func @transform_1(%arg0: i32) -> (i32, i32) {
    %c0_i32 = arith.constant 0 : i32
    %c0_i32_0 = arith.constant 0 : i32
    return %c0_i32, %arg0 : i32, i32
  }
  func.func @transform_2(%arg0: i32) -> (i32, i32) {
    %c0_i32 = arith.constant 0 : i32
    %c0_i32_0 = arith.constant 0 : i32
    return %c0_i32, %arg0 : i32, i32
  }
  func.func @transform_3(%arg0: i32) -> (i32, i32) {
    %c0_i32 = arith.constant 0 : i32
    %c0_i32_0 = arith.constant 0 : i32
    return %c0_i32, %arg0 : i32, i32
  }
}

</mosaic_0001>

<bundles_post_ra>
// kernel: mnist_cnn2_forward.4
= control target key start
LH: loop header
LB: loop body
LE: loop exit
PB: predicated region body
PF: predicated region fallthrough
CT: control target
= control target key end

     0   :  { %s2080_s12 = smov 0   ;;  %s2637_s0 = inlined_call_operand.vmem [shape: bf16[2,832,16], index: 0, kind: input, shape index: {}]   ;;  %s2638_s1 = inlined_call_operand.vmem [shape: bf16[16,64], index: 1, kind: input, shape index: {}]   ;;  %s2639_s2 = inlined_call_operand.vmem [shape: f32[1,64], index: 2, kind: input, shape index: {}]   ;;  %s2640_s3 = inlined_call_operand.vmem [shape: bf16[2,208,64], index: 3, kind: output, shape index: {}]  }
   0x1 LB: > { %s1546_s13 = sadd.s32 4294967295, %s2056_s12   ;;  %p1550_p0 = scmp.ge.s32.totalorder %s2056_s12, 1  ;;  %s2056_s12 = sphi %s2080_s12, %s13_s12  }
   0x2   : > { %p137_p1 = scmp.lt.s32.totalorder %s2056_s12, 3 }
   0x4   : > { %p138_p2 = pnand %p1550_p0, %p137_p1 }
   0x6   : > { %141 = sbr.rel (%p138_p2) target bundleno = 443 (0x1bb), region = 32 }
   0xd   : > { %v1997_v0 = vld [vmem:[%s2638_s1] sm:$0xff]   ;;  %v2058_v1 = vmov 0.0   ;;  %p161_p3 = scmp.lt.s32.totalorder %s1546_s13, 1  ;;  %vm2059_vm0 = vmmov 0   ;;  %vm271_vm1 = vcmask 130048   ;;  %vm1464_vm2 = vcmask 519168  }
   0xe   : > { %1769 = vmatprep.subr.bf16.mxu0 %v2058_v1  ;;  %1823 = vmatprep.subr.bf16.mxu1 %v2058_v1 }
   0xf   : > { %1770 = vmatpush3.bf16.msra.mxu0 %v1997_v0  ;;  %1824 = vmatpush3.bf16.msra.mxu1 %v1997_v0  ;;  %s2674_s13 = smov (!%p161_p3, %s1546_s13), 1 }
  0x10   : > { %1771 = vmatprep.mubr.msk.bf16.mxu0 %vm2059_vm0, %v2058_v1  ;;  %1825 = vmatprep.mubr.msk.bf16.mxu1 %vm2059_vm0, %v2058_v1  ;;  %s1985_s16 = smul.u32 416, %s2674_s13 }
  0x11   : > { %1877 = vmatprep.subr.bf16.mxu0 %v2058_v1  ;;  %1931 = vmatprep.subr.bf16.mxu1 %v2058_v1  ;;  %s1986_s20 = smul.u32 104, %s2674_s13 }
  0x12   : > { %s2105_s19 = scalar_lea.vmem %s2637_s0, %s1985_s16 }
  0x13   : > { %v1998_v2 = vld [vmem:[%s2105_s19] sm:$0xff]   ;;  %v1999_v3 = vld [vmem:[%s2105_s19 + $0x68] sm:$0xff]   ;;  %v2001_v5 = vld [vmem:[%s2105_s19 + $0x70] sm:$0xff]   ;;  %s2483_s25 = scalar_lea.vmem %s2640_s3, %s1986_s20 }
  0x14   : > { %1772 = vmatmul.mubr.msk.bf16.vlgmr.msra.gmra.mrb[0].mxu0 %vm271_vm1, %v1998_v2  ;;  %1826 = vmatmul.mubr.msk.bf16.vlgmr.msra.gmra.mrb[0].mxu1 %vm271_vm1, %v1999_v3  ;;  %v2000_v4 = vld [vmem:[%s2105_s19 + $0x8] sm:$0xff]   ;;  %v2002_v6 = vld [vmem:[%s2105_s19 + $0x10] sm:$0xff]   ;;  %v2003_v7 = vld [vmem:[%s2105_s19 + $0x78] sm:$0xff]  }
  0x15   : > { %1878 = vmatpush3.bf16.msra.mxu0 %v1997_v0  ;;  %1932 = vmatpush3.bf16.msra.mxu1 %v1997_v0  ;;  %v2004_v8 = vld [vmem:[%s2105_s19 + $0x18] sm:$0xff]   ;;  %v2005_v9 = vld [vmem:[%s2105_s19 + $0x80] sm:$0xff]   ;;  %v2007_v11 = vld [vmem:[%s2105_s19 + $0x88] sm:$0xff]  }
  0x16   : > { %1775 = vmatprep.mubr.msk.bf16.mxu0 %vm2059_vm0, %v2058_v1  ;;  %1829 = vmatprep.mubr.msk.bf16.mxu1 %vm2059_vm0, %v2058_v1  ;;  %v2006_v10 = vld [vmem:[%s2105_s19 + $0x20] sm:$0xff]   ;;  %v2008_v12 = vld [vmem:[%s2105_s19 + $0x28] sm:$0xff]   ;;  %v2009_v13 = vld [vmem:[%s2105_s19 + $0x90] sm:$0xff]  }
  0x17   : > { %v2010_v14 = vld [vmem:[%s2105_s19 + $0x30] sm:$0xff]   ;;  %v2011_v15 = vld [vmem:[%s2105_s19 + $0x98] sm:$0xff]   ;;  %v2013_v17 = vld [vmem:[%s2105_s19 + $0xa0] sm:$0xff]  }
  0x18   : > { %v2012_v16 = vld [vmem:[%s2105_s19 + $0x38] sm:$0xff]   ;;  %v2014_v18 = vld [vmem:[%s2105_s19 + $0x40] sm:$0xff]   ;;  %v2015_v19 = vld [vmem:[%s2105_s19 + $0xa8] sm:$0xff]  }
  0x19   : > { %v2016_v20 = vld [vmem:[%s2105_s19 + $0x48] sm:$0xff]   ;;  %v2017_v21 = vld [vmem:[%s2105_s19 + $0xb0] sm:$0xff]   ;;  %v2019_v23 = vld [vmem:[%s2105_s19 + $0xb8] sm:$0xff]  }
  0x1a   : > { %v2018_v22 = vld [vmem:[%s2105_s19 + $0x50] sm:$0xff]   ;;  %v2020_v24 = vld [vmem:[%s2105_s19 + $0x58] sm:$0xff]   ;;  %v2021_v25 = vld [vmem:[%s2105_s19 + $0xc0] sm:$0xff]  }
  0x1b   : > { %v2022_v26 = vld [vmem:[%s2105_s19 + $0x60] sm:$0xff]   ;;  %v2023_v27 = vld [vmem:[%s2105_s19 + $0xc8] sm:$0xff]   ;;  %v2024_v28 = vld [vmem:[%s2105_s19 + $0xd0] sm:$0xff]  }
  0x1c   : > { %1776 = vmatmul.mubr.msk.bf16.gmra.mrb[4].mxu0 %vm271_vm1, %v2000_v4  ;;  %1830 = vmatmul.mubr.msk.bf16.gmra.mrb[4].mxu1 %vm271_vm1, %v2001_v5  ;;  %v2025_v29 = vld [vmem:[%s2105_s19 + $0x138] sm:$0xff]   ;;  %v2027_v31 = vld [vmem:[%s2105_s19 + $0x140] sm:$0xff]   ;;  %v2029_v33 = vld [vmem:[%s2105_s19 + $0x148] sm:$0xff]  }
  0x1d   : > { %1779 = vmatprep.mubr.msk.bf16.mxu0 %vm2059_vm0, %v2058_v1  ;;  %1833 = vmatprep.mubr.msk.bf16.mxu1 %vm2059_vm0, %v2058_v1  ;;  %v2026_v30 = vld [vmem:[%s2105_s19 + $0xd8] sm:$0xff]   ;;  %v2028_v32 = vld [vmem:[%s2105_s19 + $0xe0] sm:$0xff]   ;;  %v2030_v34 = vld [vmem:[%s2105_s19 + $0xe8] sm:$0xff]  }
  0x1e   : > { %v2031_v35 = vld [vmem:[%s2105_s19 + $0x150] sm:$0xff]   ;;  %v2033_v37 = vld [vmem:[%s2105_s19 + $0x158] sm:$0xff]   ;;  %v2035_v39 = vld [vmem:[%s2105_s19 + $0x160] sm:$0xff]  }
  0x1f   : > { %v2032_v36 = vld [vmem:[%s2105_s19 + $0xf0] sm:$0xff]   ;;  %v2034_v38 = vld [vmem:[%s2105_s19 + $0xf8] sm:$0xff]   ;;  %v2036_v40 = vld [vmem:[%s2105_s19 + $0x100] sm:$0xff]  }
  0x20   : > { %v2037_v41 = vld [vmem:[%s2105_s19 + $0x168] sm:$0xff]   ;;  %v2039_v43 = vld [vmem:[%s2105_s19 + $0x170] sm:$0xff]   ;;  %v2041_v45 = vld [vmem:[%s2105_s19 + $0x178] sm:$0xff]  }
  0x21   : > { %v2038_v42 = vld [vmem:[%s2105_s19 + $0x108] sm:$0xff]   ;;  %v2040_v44 = vld [vmem:[%s2105_s19 + $0x110] sm:$0xff]   ;;  %v2042_v46 = vld [vmem:[%s2105_s19 + $0x118] sm:$0xff]  }
  0x22   : > { %v2043_v47 = vld [vmem:[%s2105_s19 + $0x180] sm:$0xff]   ;;  %v2045_v49 = vld [vmem:[%s2105_s19 + $0x188] sm:$0xff]   ;;  %v2047_v51 = vld [vmem:[%s2105_s19 + $0x190] sm:$0xff]  }
  0x23   : > { %v2044_v48 = vld [vmem:[%s2105_s19 + $0x120] sm:$0xff]   ;;  %v2046_v50 = vld [vmem:[%s2105_s19 + $0x128] sm:$0xff]   ;;  %v2048_v52 = vld [vmem:[%s2105_s19 + $0x130] sm:$0xff]  }
  0x24   : > { %1780 = vmatmul.mubr.msk.bf16.gmra.mrb[8].mxu0 %vm271_vm1, %v2002_v6  ;;  %1834 = vmatmul.mubr.msk.bf16.gmra.mrb[8].mxu1 %vm271_vm1, %v2003_v7  ;;  %v2049_v53 = vld [vmem:[%s2105_s19 + $0x198] sm:$0xff]  }
  0x25   : > { %1783 = vmatprep.mubr.msk.bf16.mxu0 %vm2059_vm0, %v2058_v1  ;;  %1837 = vmatprep.mubr.msk.bf16.mxu1 %vm2059_vm0, %v2058_v1 }
  0x2c   : > { %1784 = vmatmul.mubr.msk.bf16.gmra.mrb[12].mxu0 %vm271_vm1, %v2004_v8  ;;  %1838 = vmatmul.mubr.msk.bf16.gmra.mrb[12].mxu1 %vm271_vm1, %v2005_v9 }
  0x2d   : > { %1787 = vmatprep.mubr.msk.bf16.mxu0 %vm2059_vm0, %v2058_v1  ;;  %1841 = vmatprep.mubr.msk.bf16.mxu1 %vm2059_vm0, %v2058_v1 }
  0x34   : > { %1788 = vmatmul.mubr.msk.bf16.gmra.mrb[16].mxu0 %vm271_vm1, %v2006_v10  ;;  %1842 = vmatmul.mubr.msk.bf16.gmra.mrb[16].mxu1 %vm271_vm1, %v2007_v11 }
  0x35   : > { %1791 = vmatprep.mubr.msk.bf16.mxu0 %vm2059_vm0, %v2058_v1  ;;  %1845 = vmatprep.mubr.msk.bf16.mxu1 %vm2059_vm0, %v2058_v1 }
  0x3c   : > { %1792 = vmatmul.mubr.msk.bf16.gmra.mrb[20].mxu0 %vm271_vm1, %v2008_v12  ;;  %1846 = vmatmul.mubr.msk.bf16.gmra.mrb[20].mxu1 %vm271_vm1, %v2009_v13 }
  0x3d   : > { %1795 = vmatprep.mubr.msk.bf16.mxu0 %vm2059_vm0, %v2058_v1  ;;  %1849 = vmatprep.mubr.msk.bf16.mxu1 %vm2059_vm0, %v2058_v1 }
  0x44   : > { %1796 = vmatmul.mubr.msk.bf16.gmra.mrb[24].mxu0 %vm271_vm1, %v2010_v14  ;;  %1850 = vmatmul.mubr.msk.bf16.gmra.mrb[24].mxu1 %vm271_vm1, %v2011_v15 }
  0x45   : > { %1799 = vmatprep.mubr.msk.bf16.mxu0 %vm2059_vm0, %v2058_v1  ;;  %1853 = vmatprep.mubr.msk.bf16.mxu1 %vm2059_vm0, %v2058_v1 }
  0x4c   : > { %1800 = vmatmul.mubr.msk.bf16.gmra.mrb[28].mxu0 %vm271_vm1, %v2012_v16  ;;  %1854 = vmatmul.mubr.msk.bf16.gmra.mrb[28].mxu1 %vm271_vm1, %v2013_v17 }
  0x4d   : > { %1803 = vmatprep.mubr.msk.bf16.mxu0 %vm2059_vm0, %v2058_v1  ;;  %1857 = vmatprep.mubr.msk.bf16.mxu1 %vm2059_vm0, %v2058_v1 }
  0x54   : > { %1804 = vmatmul.mubr.msk.bf16.gmra.mrb[32].mxu0 %vm271_vm1, %v2014_v18  ;;  %1858 = vmatmul.mubr.msk.bf16.gmra.mrb[32].mxu1 %vm271_vm1, %v2015_v19 }
  0x55   : > { %1807 = vmatprep.mubr.msk.bf16.mxu0 %vm2059_vm0, %v2058_v1  ;;  %1861 = vmatprep.mubr.msk.bf16.mxu1 %vm2059_vm0, %v2058_v1 }
  0x5c   : > { %1808 = vmatmul.mubr.msk.bf16.gmra.mrb[36].mxu0 %vm271_vm1, %v2016_v20  ;;  %1862 = vmatmul.mubr.msk.bf16.gmra.mrb[36].mxu1 %vm271_vm1, %v2017_v21 }
  0x5d   : > { %1811 = vmatprep.mubr.msk.bf16.mxu0 %vm2059_vm0, %v2058_v1  ;;  %1865 = vmatprep.mubr.msk.bf16.mxu1 %vm2059_vm0, %v2058_v1 }
  0x64   : > { %1812 = vmatmul.mubr.msk.bf16.gmra.mrb[40].mxu0 %vm271_vm1, %v2018_v22  ;;  %1866 = vmatmul.mubr.msk.bf16.gmra.mrb[40].mxu1 %vm271_vm1, %v2019_v23 }
  0x65   : > { %1815 = vmatprep.mubr.msk.bf16.mxu0 %vm2059_vm0, %v2058_v1  ;;  %1869 = vmatprep.mubr.msk.bf16.mxu1 %vm2059_vm0, %v2058_v1 }
  0x6c   : > { %1816 = vmatmul.mubr.msk.bf16.gmra.mrb[44].mxu0 %vm271_vm1, %v2020_v24  ;;  %1870 = vmatmul.mubr.msk.bf16.gmra.mrb[44].mxu1 %vm271_vm1, %v2021_v25 }
  0x6d   : > { %1819 = vmatprep.mubr.msk.bf16.mxu0 %vm2059_vm0, %v2058_v1  ;;  %1873 = vmatprep.mubr.msk.bf16.mxu1 %vm2059_vm0, %v2058_v1 }
  0x74   : > { %1820 = vmatmul.mubr.msk.bf16.gmra.mrb[48].mxu0 %vm271_vm1, %v2022_v26  ;;  %1874 = vmatmul.mubr.msk.bf16.gmra.mrb[48].mxu1 %vm271_vm1, %v2023_v27 }
  0x75   : > { %1879 = vmatprep.mubr.msk.bf16.mxu0 %vm2059_vm0, %v2058_v1  ;;  %1933 = vmatprep.mubr.msk.bf16.mxu1 %vm2059_vm0, %v2058_v1 }
  0x7c   : > { %1880 = vmatmul.mubr.msk.bf16.vlgmr.msra.gmra.mrb[52].mxu0 %vm271_vm1, %v2024_v28  ;;  %1934 = vmatmul.mubr.msk.bf16.vlgmr.msra.gmra.mrb[52].mxu1 %vm271_vm1, %v2025_v29 }
  0x7d   : > { %1883 = vmatprep.mubr.msk.bf16.mxu0 %vm2059_vm0, %v2058_v1  ;;  %1937 = vmatprep.mubr.msk.bf16.mxu1 %vm2059_vm0, %v2058_v1 }
  0x84   : > { %1884 = vmatmul.mubr.msk.bf16.gmra.mrb[56].mxu0 %vm271_vm1, %v2026_v30  ;;  %1938 = vmatmul.mubr.msk.bf16.gmra.mrb[56].mxu1 %vm271_vm1, %v2027_v31 }
  0x85   : > { %1887 = vmatprep.mubr.msk.bf16.mxu0 %vm2059_vm0, %v2058_v1  ;;  %1941 = vmatprep.mubr.msk.bf16.mxu1 %vm2059_vm0, %v2058_v1 }
  0x8c   : > { %1888 = vmatmul.mubr.msk.bf16.gmra.mrb[60].mxu0 %vm271_vm1, %v2028_v32  ;;  %1942 = vmatmul.mubr.msk.bf16.gmra.mrb[60].mxu1 %vm271_vm1, %v2029_v33 }
  0x8d   : > { %1891 = vmatprep.mubr.msk.bf16.mxu0 %vm2059_vm0, %v2058_v1  ;;  %1945 = vmatprep.mubr.msk.bf16.mxu1 %vm2059_vm0, %v2058_v1 }
  0x94   : > { %1892 = vmatmul.mubr.msk.bf16.gmra.mrb[64].mxu0 %vm271_vm1, %v2030_v34  ;;  %1946 = vmatmul.mubr.msk.bf16.gmra.mrb[64].mxu1 %vm271_vm1, %v2031_v35 }
  0x95   : > { %1895 = vmatprep.mubr.msk.bf16.mxu0 %vm2059_vm0, %v2058_v1  ;;  %1949 = vmatprep.mubr.msk.bf16.mxu1 %vm2059_vm0, %v2058_v1 }
  0x9c   : > { %1896 = vmatmul.mubr.msk.bf16.gmra.mrb[68].mxu0 %vm271_vm1, %v2032_v36  ;;  %1950 = vmatmul.mubr.msk.bf16.gmra.mrb[68].mxu1 %vm271_vm1, %v2033_v37 }
  0x9d   : > { %1899 = vmatprep.mubr.msk.bf16.mxu0 %vm2059_vm0, %v2058_v1  ;;  %1953 = vmatprep.mubr.msk.bf16.mxu1 %vm2059_vm0, %v2058_v1 }
  0xa4   : > { %1900 = vmatmul.mubr.msk.bf16.gmra.mrb[72].mxu0 %vm271_vm1, %v2034_v38  ;;  %1954 = vmatmul.mubr.msk.bf16.gmra.mrb[72].mxu1 %vm271_vm1, %v2035_v39 }
  0xa5   : > { %1903 = vmatprep.mubr.msk.bf16.mxu0 %vm2059_vm0, %v2058_v1  ;;  %1957 = vmatprep.mubr.msk.bf16.mxu1 %vm2059_vm0, %v2058_v1 }
  0xac   : > { %1904 = vmatmul.mubr.msk.bf16.gmra.mrb[76].mxu0 %vm271_vm1, %v2036_v40  ;;  %1958 = vmatmul.mubr.msk.bf16.gmra.mrb[76].mxu1 %vm271_vm1, %v2037_v41 }
  0xad   : > { %1907 = vmatprep.mubr.msk.bf16.mxu0 %vm2059_vm0, %v2058_v1  ;;  %1961 = vmatprep.mubr.msk.bf16.mxu1 %vm2059_vm0, %v2058_v1 }
  0xb4   : > { %1908 = vmatmul.mubr.msk.bf16.gmra.mrb[80].mxu0 %vm271_vm1, %v2038_v42  ;;  %1962 = vmatmul.mubr.msk.bf16.gmra.mrb[80].mxu1 %vm271_vm1, %v2039_v43 }
  0xb5   : > { %1911 = vmatprep.mubr.msk.bf16.mxu0 %vm2059_vm0, %v2058_v1  ;;  %1965 = vmatprep.mubr.msk.bf16.mxu1 %vm2059_vm0, %v2058_v1 }
  0xbc   : > { %1912 = vmatmul.mubr.msk.bf16.gmra.mrb[84].mxu0 %vm271_vm1, %v2040_v44  ;;  %1966 = vmatmul.mubr.msk.bf16.gmra.mrb[84].mxu1 %vm271_vm1, %v2041_v45 }
  0xbd   : > { %1915 = vmatprep.mubr.msk.bf16.mxu0 %vm2059_vm0, %v2058_v1  ;;  %1969 = vmatprep.mubr.msk.bf16.mxu1 %vm2059_vm0, %v2058_v1 }
  0xc4   : > { %1916 = vmatmul.mubr.msk.bf16.gmra.mrb[88].mxu0 %vm271_vm1, %v2042_v46  ;;  %1970 = vmatmul.mubr.msk.bf16.gmra.mrb[88].mxu1 %vm271_vm1, %v2043_v47 }
  0xc5   : > { %1919 = vmatprep.mubr.msk.bf16.mxu0 %vm2059_vm0, %v2058_v1  ;;  %1973 = vmatprep.mubr.msk.bf16.mxu1 %vm2059_vm0, %v2058_v1 }
  0xcc   : > { %1920 = vmatmul.mubr.msk.bf16.gmra.mrb[92].mxu0 %vm271_vm1, %v2044_v48  ;;  %1974 = vmatmul.mubr.msk.bf16.gmra.mrb[92].mxu1 %vm271_vm1, %v2045_v49 }
  0xcd   : > { %1923 = vmatprep.mubr.msk.bf16.mxu0 %vm2059_vm0, %v2058_v1  ;;  %1977 = vmatprep.mubr.msk.bf16.mxu1 %vm2059_vm0, %v2058_v1 }
  0xd4   : > { %1924 = vmatmul.mubr.msk.bf16.gmra.mrb[96].mxu0 %vm271_vm1, %v2046_v50  ;;  %1978 = vmatmul.mubr.msk.bf16.gmra.mrb[96].mxu1 %vm271_vm1, %v2047_v51 }
  0xd5   : > { %1927 = vmatprep.mubr.msk.bf16.mxu0 %vm2059_vm0, %v2058_v1  ;;  %1981 = vmatprep.mubr.msk.bf16.mxu1 %vm2059_vm0, %v2058_v1 }
  0xdc   : > { %1928 = vmatmul.mubr.msk.bf16.gmra.mrb[100].mxu0 %vm271_vm1, %v2048_v52  ;;  %1982 = vmatmul.mubr.msk.bf16.gmra.mrb[100].mxu1 %vm271_vm1, %v2049_v53 }
  0xe7   : > { %v2311_v54 = vpop.f32.mrb[0].mxu0  ;;  %v2313_v55 = vpop.f32.mrb[0].mxu1 }
  0xe8   : > { %v1773_v56 = vpop.f32.mrb[1].mxu0  ;;  %v1827_v58 = vpop.f32.mrb[1].mxu1 }
  0xe9   : > { %v2317_v59 = vpop.f32.mrb[2].mxu0  ;;  %v2319_v60 = vpop.f32.mrb[2].mxu1 }
  0xea   : > { %v1774_v61 = vpop.f32.mrb[3].mxu0  ;;  %v1828_v63 = vpop.f32.mrb[3].mxu1 }
  0xef   : > { %v2323_v0 = vpop.f32.mrb[4].mxu0  ;;  %v2325_v1 = vpop.f32.mrb[4].mxu1 }
  0xf0   : > { %v1777_v2 = vpop.f32.mrb[5].mxu0  ;;  %v1831_v4 = vpop.f32.mrb[5].mxu1 }
  0xf1   : > { %v2329_v5 = vpop.f32.mrb[6].mxu0  ;;  %v2331_v6 = vpop.f32.mrb[6].mxu1 }
  0xf2   : > { %v1778_v7 = vpop.f32.mrb[7].mxu0  ;;  %v1832_v9 = vpop.f32.mrb[7].mxu1 }
  0xf7   : > { %v2335_v10 = vpop.f32.mrb[8].mxu0  ;;  %v2337_v11 = vpop.f32.mrb[8].mxu1 }
  0xf8   : > { %v1781_v12 = vpop.f32.mrb[9].mxu0  ;;  %v1835_v14 = vpop.f32.mrb[9].mxu1 }
  0xf9   : > { %v2341_v15 = vpop.f32.mrb[10].mxu0  ;;  %v2343_v16 = vpop.f32.mrb[10].mxu1 }
  0xfa   : > { %v1782_v17 = vpop.f32.mrb[11].mxu0  ;;  %v1836_v19 = vpop.f32.mrb[11].mxu1 }
  0xff   : > { %v2347_v20 = vpop.f32.mrb[12].mxu0  ;;  %v2349_v21 = vpop.f32.mrb[12].mxu1 }
 0x100   : > { %v1785_v22 = vpop.f32.mrb[13].mxu0  ;;  %v1839_v24 = vpop.f32.mrb[13].mxu1 }
 0x101   : > { %v2353_v25 = vpop.f32.mrb[14].mxu0  ;;  %v2355_v26 = vpop.f32.mrb[14].mxu1 }
 0x102   : > { %v1786_v27 = vpop.f32.mrb[15].mxu0  ;;  %v1840_v29 = vpop.f32.mrb[15].mxu1 }
 0x107   : > { %v2359_v30 = vpop.f32.mrb[16].mxu0  ;;  %v2361_v31 = vpop.f32.mrb[16].mxu1 }
 0x108   : > { %v1789_v32 = vpop.f32.mrb[17].mxu0  ;;  %v1843_v34 = vpop.f32.mrb[17].mxu1 }
 0x109   : > { %v2365_v35 = vpop.f32.mrb[18].mxu0  ;;  %v2367_v36 = vpop.f32.mrb[18].mxu1 }
 0x10a   : > { %v1790_v37 = vpop.f32.mrb[19].mxu0  ;;  %v1844_v39 = vpop.f32.mrb[19].mxu1 }
 0x10f   : > { %v2371_v40 = vpop.f32.mrb[20].mxu0  ;;  %v2373_v41 = vpop.f32.mrb[20].mxu1 }
 0x110   : > { %v1793_v42 = vpop.f32.mrb[21].mxu0  ;;  %v1847_v44 = vpop.f32.mrb[21].mxu1 }
 0x111   : > { %v2377_v45 = vpop.f32.mrb[22].mxu0  ;;  %v2379_v46 = vpop.f32.mrb[22].mxu1 }
 0x112   : > { %v1794_v47 = vpop.f32.mrb[23].mxu0  ;;  %v1848_v49 = vpop.f32.mrb[23].mxu1 }
 0x117   : > { %v2383_v50 = vpop.f32.mrb[24].mxu0  ;;  %v2385_v51 = vpop.f32.mrb[24].mxu1 }
 0x118   : > { %v1797_v52 = vpop.f32.mrb[25].mxu0  ;;  %v1851_v56 = vpop.f32.mrb[25].mxu1 }
 0x119   : > { %v2389_v58 = vpop.f32.mrb[26].mxu0  ;;  %v2391_v61 = vpop.f32.mrb[26].mxu1 }
 0x11a   : > { %v1798_v63 = vpop.f32.mrb[27].mxu0  ;;  %v1852_v4 = vpop.f32.mrb[27].mxu1 }
 0x11f   : > { %v2395_v7 = vpop.f32.mrb[28].mxu0  ;;  %v2397_v9 = vpop.f32.mrb[28].mxu1 }
 0x120   : > { %v1801_v12 = vpop.f32.mrb[29].mxu0  ;;  %v1855_v17 = vpop.f32.mrb[29].mxu1 }
 0x121   : > { %v2401_v19 = vpop.f32.mrb[30].mxu0  ;;  %v2403_v22 = vpop.f32.mrb[30].mxu1 }
 0x122   : > { %v1802_v24 = vpop.f32.mrb[31].mxu0  ;;  %v1856_v29 = vpop.f32.mrb[31].mxu1 }
 0x127   : > { %v2407_v32 = vpop.f32.mrb[32].mxu0  ;;  %v2409_v34 = vpop.f32.mrb[32].mxu1 }
 0x128   : > { %v1805_v37 = vpop.f32.mrb[33].mxu0  ;;  %v1859_v42 = vpop.f32.mrb[33].mxu1 }
 0x129   : > { %v2413_v44 = vpop.f32.mrb[34].mxu0  ;;  %v2415_v47 = vpop.f32.mrb[34].mxu1 }
 0x12a   : > { %v1806_v49 = vpop.f32.mrb[35].mxu0  ;;  %v1860_v56 = vpop.f32.mrb[35].mxu1 }
 0x12f   : > { %v2419_v63 = vpop.f32.mrb[36].mxu0  ;;  %v2421_v4 = vpop.f32.mrb[36].mxu1 }
 0x130   : > { %v1809_v12 = vpop.f32.mrb[37].mxu0  ;;  %v1863_v24 = vpop.f32.mrb[37].mxu1 }
 0x131   : > { %v2425_v29 = vpop.f32.mrb[38].mxu0  ;;  %v2427_v37 = vpop.f32.mrb[38].mxu1 }
 0x132   : > { %v1810_v42 = vpop.f32.mrb[39].mxu0  ;;  %v1864_v39 = vpop.f32.mrb[39].mxu1 }
 0x137   : > { %v2431_v52 = vpop.f32.mrb[40].mxu0  ;;  %v2433_v56 = vpop.f32.mrb[40].mxu1 }
 0x138   : > { %v1813_v27 = vpop.f32.mrb[41].mxu0  ;;  %v1867_v14 = vpop.f32.mrb[41].mxu1 }
 0x139   : > { %v2437_v17 = vpop.f32.mrb[42].mxu0  ;;  %v2439_v24 = vpop.f32.mrb[42].mxu1 }
 0x13a   : > { %v1814_v2 = vpop.f32.mrb[43].mxu0  ;;  %v1868_v53 = vpop.f32.mrb[43].mxu1 }
 0x13f   : > { %v2443_v49 = vpop.f32.mrb[44].mxu0  ;;  %v2445_v39 = vpop.f32.mrb[44].mxu1 }
 0x140   : > { %v1817_v48 = vpop.f32.mrb[45].mxu0  ;;  %v1871_v43 = vpop.f32.mrb[45].mxu1 }
 0x141   : > { %v2449_v12 = vpop.f32.mrb[46].mxu0  ;;  %v2451_v14 = vpop.f32.mrb[46].mxu1 }
 0x142   : > { %v1818_v38 = vpop.f32.mrb[47].mxu0  ;;  %v1872_v33 = vpop.f32.mrb[47].mxu1 }
 0x147   : > { %v2455_v42 = vpop.f32.mrb[48].mxu0  ;;  %v2457_v53 = vpop.f32.mrb[48].mxu1 }
 0x148   : > { %2643 = vst [vmem:[#allocation2_spill] sm:$0xff] %v2457_v53  ;;  %v1821_v28 = vpop.f32.mrb[49].mxu0  ;;  %v1875_v27 = vpop.f32.mrb[49].mxu1 }
 0x149   : > { %v2461_v43 = vpop.f32.mrb[50].mxu0  ;;  %v2463_v23 = vpop.f32.mrb[50].mxu1  ;;  %v2471_v28 = vld [vmem:[%s2639_s2] ss:$0 sm:$0xff] }
 0x14a   : > { %2644 = vst [vmem:[#allocation3_spill] sm:$0xff] %v2463_v23  ;;  %v1822_v18 = vpop.f32.mrb[51].mxu0  ;;  %v1876_v2 = vpop.f32.mrb[51].mxu1 }
 0x14b   : > { %v2645_v18 = vmax.f32 %v2311_v54, %v2313_v55 }
 0x14f   : > { %v905_v33 = vpop.f32.mrb[52].mxu0  ;;  %v1172_v13 = vpop.f32.mrb[52].mxu1 }
 0x150   : > { %v1881_v8 = vpop.f32.mrb[53].mxu0  ;;  %v1275_v3 = vmax.f32 %v905_v33, %v1172_v13  ;;  %v1935_v62 = vpop.f32.mrb[53].mxu1 }
 0x151   : > { %v908_v57 = vpop.f32.mrb[54].mxu0  ;;  %v1175_v27 = vpop.f32.mrb[54].mxu1  ;;  %v2646_v62 = vmax.f32 %v2317_v59, %v2319_v60 }
 0x152   : > { %v1882_v48 = vpop.f32.mrb[55].mxu0  ;;  %v1301_v53 = vmax.f32 %v2645_v18, %v1275_v3  ;;  %v1276_v38 = vmax.f32 %v908_v57, %v1175_v27  ;;  %v1936_v2 = vpop.f32.mrb[55].mxu1  ;;  %v2647_v27 = vmax.f32 %v2323_v0, %v2325_v1 }
 0x154   : > { %v1334_v23 = vadd.f32 %v2471_v28, %v1301_v53  ;;  %v1302_v8 = vmax.f32 %v2646_v62, %v1276_v38 }
 0x156   : > { %v1687_v13 = vpack.c.bf16 %v1334_v23, %v1334_v23  ;;  %v1335_v54 = vadd.f32 %v2471_v28, %v1302_v8  ;;  %v2648_v8 = vmax.f32 %v2329_v5, %v2331_v6  ;;  %v2649_v5 = vmax.f32 %v2335_v10, %v2337_v11 }
 0x157   : > { %v913_v55 = vpop.f32.mrb[56].mxu0  ;;  %v1180_v57 = vpop.f32.mrb[56].mxu1 }
 0x158   : > { %v1885_v3 = vpop.f32.mrb[57].mxu0  ;;  %1465 = vst.msk [vmem:[%s2483_s25] sm:$0xf] %vm1464_vm2, %v1687_v13  ;;  %v1688_v53 = vpack.c.bf16 %v1335_v54, %v1335_v54  ;;  %v1277_v48 = vmax.f32 %v913_v55, %v1180_v57  ;;  %v1939_v59 = vpop.f32.mrb[57].mxu1 }
 0x159   : > { %v916_v60 = vpop.f32.mrb[58].mxu0  ;;  %v1183_v38 = vpop.f32.mrb[58].mxu1 }
 0x15a   : > { %v1886_v33 = vpop.f32.mrb[59].mxu0  ;;  %1466 = vst.msk [vmem:[%s2483_s25 + $0x4] sm:$0xf] %vm1464_vm2, %v1688_v53  ;;  %v1303_v23 = vmax.f32 %v2647_v27, %v1277_v48  ;;  %v1278_v18 = vmax.f32 %v916_v60, %v1183_v38  ;;  %v1940_v2 = vpop.f32.mrb[59].mxu1 }
 0x15c   : > { %v1336_v62 = vadd.f32 %v2471_v28, %v1303_v23  ;;  %v1304_v13 = vmax.f32 %v2648_v8, %v1278_v18  ;;  %v2650_v18 = vmax.f32 %v2341_v15, %v2343_v16  ;;  %v2651_v15 = vmax.f32 %v2347_v20, %v2349_v21 }
 0x15e   : > { %v1689_v54 = vpack.c.bf16 %v1336_v62, %v1336_v62  ;;  %v1337_v55 = vadd.f32 %v2471_v28, %v1304_v13 }
 0x15f   : > { %v921_v57 = vpop.f32.mrb[60].mxu0  ;;  %v1188_v3 = vpop.f32.mrb[60].mxu1 }
 0x160   : > { %v1889_v59 = vpop.f32.mrb[61].mxu0  ;;  %1467 = vst.msk [vmem:[%s2483_s25 + $0x8] sm:$0xf] %vm1464_vm2, %v1689_v54  ;;  %v1690_v53 = vpack.c.bf16 %v1337_v55, %v1337_v55  ;;  %v1279_v0 = vmax.f32 %v921_v57, %v1188_v3  ;;  %v1943_v1 = vpop.f32.mrb[61].mxu1 }
 0x161   : > { %v924_v48 = vpop.f32.mrb[62].mxu0  ;;  %v1191_v60 = vpop.f32.mrb[62].mxu1 }
 0x162   : > { %v1890_v38 = vpop.f32.mrb[63].mxu0  ;;  %1468 = vst.msk [vmem:[%s2483_s25 + $0xc] sm:$0xf] %vm1464_vm2, %v1690_v53  ;;  %v1305_v6 = vmax.f32 %v2649_v5, %v1279_v0  ;;  %v1280_v33 = vmax.f32 %v924_v48, %v1191_v60  ;;  %v1944_v27 = vpop.f32.mrb[63].mxu1  ;;  %v2652_v60 = vmax.f32 %v2353_v25, %v2355_v26  ;;  %v2653_v25 = vmax.f32 %v2359_v30, %v2361_v31 }
 0x164   : > { %v1338_v23 = vadd.f32 %v2471_v28, %v1305_v6  ;;  %v1306_v2 = vmax.f32 %v2650_v18, %v1280_v33 }
 0x166   : > { %v1691_v62 = vpack.c.bf16 %v1338_v23, %v1338_v23  ;;  %v1339_v8 = vadd.f32 %v2471_v28, %v1306_v2 }
 0x167   : > { %v929_v13 = vpop.f32.mrb[64].mxu0  ;;  %v1196_v54 = vpop.f32.mrb[64].mxu1 }
 0x168   : > { %v1893_v55 = vpop.f32.mrb[65].mxu0  ;;  %1469 = vst.msk [vmem:[%s2483_s25 + $0x10] sm:$0xf] %vm1464_vm2, %v1691_v62  ;;  %v1692_v57 = vpack.c.bf16 %v1339_v8, %v1339_v8  ;;  %v1281_v10 = vmax.f32 %v929_v13, %v1196_v54  ;;  %v1947_v11 = vpop.f32.mrb[65].mxu1 }
 0x169   : > { %v932_v3 = vpop.f32.mrb[66].mxu0  ;;  %v1199_v59 = vpop.f32.mrb[66].mxu1 }
 0x16a   : > { %v1894_v53 = vpop.f32.mrb[67].mxu0  ;;  %1470 = vst.msk [vmem:[%s2483_s25 + $0x14] sm:$0xf] %vm1464_vm2, %v1692_v57  ;;  %v1307_v16 = vmax.f32 %v2651_v15, %v1281_v10  ;;  %v1282_v0 = vmax.f32 %v932_v3, %v1199_v59  ;;  %v1948_v1 = vpop.f32.mrb[67].mxu1  ;;  %v2654_v57 = vmax.f32 %v2365_v35, %v2367_v36  ;;  %v2655_v35 = vmax.f32 %v2371_v40, %v2373_v41 }
 0x16c   : > { %v1340_v48 = vadd.f32 %v2471_v28, %v1307_v16  ;;  %v1308_v38 = vmax.f32 %v2652_v60, %v1282_v0 }
 0x16e   : > { %v1693_v5 = vpack.c.bf16 %v1340_v48, %v1340_v48  ;;  %v1341_v6 = vadd.f32 %v2471_v28, %v1308_v38 }
 0x16f   : > { %v937_v33 = vpop.f32.mrb[68].mxu0  ;;  %v1204_v27 = vpop.f32.mrb[68].mxu1 }
 0x170   : > { %v1897_v23 = vpop.f32.mrb[69].mxu0  ;;  %1471 = vst.msk [vmem:[%s2483_s25 + $0x18] sm:$0xf] %vm1464_vm2, %v1693_v5  ;;  %v1694_v18 = vpack.c.bf16 %v1341_v6, %v1341_v6  ;;  %v1283_v20 = vmax.f32 %v937_v33, %v1204_v27  ;;  %v1951_v21 = vpop.f32.mrb[69].mxu1  ;;  %v2656_v6 = vmax.f32 %v2377_v45, %v2379_v46  ;;  %v2657_v45 = vmax.f32 %v2383_v50, %v2385_v51 }
 0x171   : > { %v940_v2 = vpop.f32.mrb[70].mxu0  ;;  %v1207_v62 = vpop.f32.mrb[70].mxu1 }
 0x172   : > { %v1898_v8 = vpop.f32.mrb[71].mxu0  ;;  %1472 = vst.msk [vmem:[%s2483_s25 + $0x1c] sm:$0xf] %vm1464_vm2, %v1694_v18  ;;  %v1309_v26 = vmax.f32 %v2653_v25, %v1283_v20  ;;  %v1284_v13 = vmax.f32 %v940_v2, %v1207_v62  ;;  %v1952_v54 = vpop.f32.mrb[71].mxu1 }
 0x174   : > { %v1342_v55 = vadd.f32 %v2471_v28, %v1309_v26  ;;  %v1310_v10 = vmax.f32 %v2654_v57, %v1284_v13 }
 0x176   : > { %v1695_v11 = vpack.c.bf16 %v1342_v55, %v1342_v55  ;;  %v1343_v3 = vadd.f32 %v2471_v28, %v1310_v10  ;;  %v2658_v55 = vmax.f32 %v2389_v58, %v2391_v61  ;;  %v2659_v58 = vmax.f32 %v2395_v7, %v2397_v9 }
 0x177   : > { %v945_v59 = vpop.f32.mrb[72].mxu0  ;;  %v1212_v53 = vpop.f32.mrb[72].mxu1 }
 0x178   : > { %v1901_v15 = vpop.f32.mrb[73].mxu0  ;;  %1473 = vst.msk [vmem:[%s2483_s25 + $0x20] sm:$0xf] %vm1464_vm2, %v1695_v11  ;;  %v1696_v16 = vpack.c.bf16 %v1343_v3, %v1343_v3  ;;  %v1285_v30 = vmax.f32 %v945_v59, %v1212_v53  ;;  %v1955_v31 = vpop.f32.mrb[73].mxu1 }
 0x179   : > { %v948_v0 = vpop.f32.mrb[74].mxu0  ;;  %v1215_v1 = vpop.f32.mrb[74].mxu1 }
 0x17a   : > { %v1902_v48 = vpop.f32.mrb[75].mxu0  ;;  %1474 = vst.msk [vmem:[%s2483_s25 + $0x24] sm:$0xf] %vm1464_vm2, %v1696_v16  ;;  %v1311_v36 = vmax.f32 %v2655_v35, %v1285_v30  ;;  %v1286_v60 = vmax.f32 %v948_v0, %v1215_v1  ;;  %v1956_v38 = vpop.f32.mrb[75].mxu1  ;;  %v2660_v35 = vmax.f32 %v2401_v19, %v2403_v22  ;;  %v2661_v19 = vmax.f32 %v2407_v32, %v2409_v34 }
 0x17c   : > { %v1344_v5 = vadd.f32 %v2471_v28, %v1311_v36  ;;  %v1312_v33 = vmax.f32 %v2656_v6, %v1286_v60 }
 0x17e   : > { %v1697_v27 = vpack.c.bf16 %v1344_v5, %v1344_v5  ;;  %v1345_v23 = vadd.f32 %v2471_v28, %v1312_v33 }
 0x17f   : > { %v953_v18 = vpop.f32.mrb[76].mxu0  ;;  %v1220_v20 = vpop.f32.mrb[76].mxu1 }
 0x180   : > { %v1905_v21 = vpop.f32.mrb[77].mxu0  ;;  %1475 = vst.msk [vmem:[%s2483_s25 + $0x28] sm:$0xf] %vm1464_vm2, %v1697_v27  ;;  %v1698_v2 = vpack.c.bf16 %v1345_v23, %v1345_v23  ;;  %v1287_v40 = vmax.f32 %v953_v18, %v1220_v20  ;;  %v1959_v41 = vpop.f32.mrb[77].mxu1 }
 0x181   : > { %v956_v62 = vpop.f32.mrb[78].mxu0  ;;  %v1223_v8 = vpop.f32.mrb[78].mxu1  ;;  %v2662_v41 = vmax.f32 %v2413_v44, %v2415_v47  ;;  %v2663_v44 = vmax.f32 %v2419_v63, %v2421_v4 }
 0x182   : > { %v1906_v25 = vpop.f32.mrb[79].mxu0  ;;  %1476 = vst.msk [vmem:[%s2483_s25 + $0x2c] sm:$0xf] %vm1464_vm2, %v1698_v2  ;;  %v1313_v46 = vmax.f32 %v2657_v45, %v1287_v40  ;;  %v1288_v26 = vmax.f32 %v956_v62, %v1223_v8  ;;  %v1960_v13 = vpop.f32.mrb[79].mxu1 }
 0x184   : > { %v1346_v54 = vadd.f32 %v2471_v28, %v1313_v46  ;;  %v1314_v57 = vmax.f32 %v2658_v55, %v1288_v26 }
 0x186   : > { %v1699_v10 = vpack.c.bf16 %v1346_v54, %v1346_v54  ;;  %v1347_v11 = vadd.f32 %v2471_v28, %v1314_v57 }
 0x187   : > { %v961_v3 = vpop.f32.mrb[80].mxu0  ;;  %v1228_v59 = vpop.f32.mrb[80].mxu1 }
 0x188   : > { %v1909_v53 = vpop.f32.mrb[81].mxu0  ;;  %1477 = vst.msk [vmem:[%s2483_s25 + $0x30] sm:$0xf] %vm1464_vm2, %v1699_v10  ;;  %v1700_v15 = vpack.c.bf16 %v1347_v11, %v1347_v11  ;;  %v1289_v50 = vmax.f32 %v961_v3, %v1228_v59  ;;  %v1963_v51 = vpop.f32.mrb[81].mxu1  ;;  %v2664_v59 = vmax.f32 %v2425_v29, %v2427_v37  ;;  %v2665_v29 = vmax.f32 %v2431_v52, %v2433_v56 }
 0x189   : > { %v964_v16 = vpop.f32.mrb[82].mxu0  ;;  %v1231_v30 = vpop.f32.mrb[82].mxu1 }
 0x18a   : > { %v1910_v31 = vpop.f32.mrb[83].mxu0  ;;  %1478 = vst.msk [vmem:[%s2483_s25 + $0x34] sm:$0xf] %vm1464_vm2, %v1700_v15  ;;  %v1315_v61 = vmax.f32 %v2659_v58, %v1289_v50  ;;  %v1290_v0 = vmax.f32 %v964_v16, %v1231_v30  ;;  %v1964_v1 = vpop.f32.mrb[83].mxu1 }
 0x18c   : > { %v1348_v48 = vadd.f32 %v2471_v28, %v1315_v61  ;;  %v1316_v36 = vmax.f32 %v2660_v35, %v1290_v0 }
 0x18e   : > { %v1701_v60 = vpack.c.bf16 %v1348_v48, %v1348_v48  ;;  %v1349_v38 = vadd.f32 %v2471_v28, %v1316_v36  ;;  %v2666_v36 = vmax.f32 %v2437_v17, %v2439_v24  ;;  %v2667_v17 = vmax.f32 %v2443_v49, %v2445_v39 }
 0x18f   : > { %v969_v5 = vpop.f32.mrb[84].mxu0  ;;  %v1236_v6 = vpop.f32.mrb[84].mxu1 }
 0x190   : > { %v1913_v33 = vpop.f32.mrb[85].mxu0  ;;  %1479 = vst.msk [vmem:[%s2483_s25 + $0x38] sm:$0xf] %vm1464_vm2, %v1701_v60  ;;  %v1702_v27 = vpack.c.bf16 %v1349_v38, %v1349_v38  ;;  %v1291_v7 = vmax.f32 %v969_v5, %v1236_v6  ;;  %v1967_v9 = vpop.f32.mrb[85].mxu1 }
 0x191   : > { %v972_v23 = vpop.f32.mrb[86].mxu0  ;;  %v1239_v18 = vpop.f32.mrb[86].mxu1 }
 0x192   : > { %v1914_v20 = vpop.f32.mrb[87].mxu0  ;;  %1480 = vst.msk [vmem:[%s2483_s25 + $0x3c] sm:$0xf] %vm1464_vm2, %v1702_v27  ;;  %v1317_v22 = vmax.f32 %v2661_v19, %v1291_v7  ;;  %v1292_v21 = vmax.f32 %v972_v23, %v1239_v18  ;;  %v1968_v2 = vpop.f32.mrb[87].mxu1 }
 0x194   : > { %v1350_v40 = vadd.f32 %v2471_v28, %v1317_v22  ;;  %v1318_v62 = vmax.f32 %v2662_v41, %v1292_v21  ;;  %v2668_v21 = vmax.f32 %v2449_v12, %v2451_v14  ;;  %v2669_v12 = vld [vmem:[#allocation2_spill] sm:$0xff] }
 0x195   : > { %v2670_v14 = vmax.f32 %v2455_v42, %v2669_v12 }
 0x196   : > { %v1703_v8 = vpack.c.bf16 %v1350_v40, %v1350_v40  ;;  %v1351_v25 = vadd.f32 %v2471_v28, %v1318_v62 }
 0x197   : > { %v977_v45 = vpop.f32.mrb[88].mxu0  ;;  %v1244_v46 = vpop.f32.mrb[88].mxu1 }
 0x198   : > { %v1917_v26 = vpop.f32.mrb[89].mxu0  ;;  %1481 = vst.msk [vmem:[%s2483_s25 + $0x40] sm:$0xf] %vm1464_vm2, %v1703_v8  ;;  %v1704_v13 = vpack.c.bf16 %v1351_v25, %v1351_v25  ;;  %v1293_v32 = vmax.f32 %v977_v45, %v1244_v46  ;;  %v1971_v34 = vpop.f32.mrb[89].mxu1 }
 0x199   : > { %v980_v54 = vpop.f32.mrb[90].mxu0  ;;  %v1247_v55 = vpop.f32.mrb[90].mxu1 }
 0x19a   : > { %v1918_v57 = vpop.f32.mrb[91].mxu0  ;;  %1482 = vst.msk [vmem:[%s2483_s25 + $0x44] sm:$0xf] %vm1464_vm2, %v1704_v13  ;;  %v1319_v47 = vmax.f32 %v2663_v44, %v1293_v32  ;;  %v1294_v10 = vmax.f32 %v980_v54, %v1247_v55  ;;  %v1972_v11 = vpop.f32.mrb[91].mxu1 }
 0x19b   : > { %v2671_v57 = vld [vmem:[#allocation3_spill] sm:$0xff] }
 0x19c   : > { %v1352_v3 = vadd.f32 %v2471_v28, %v1319_v47  ;;  %v1320_v53 = vmax.f32 %v2664_v59, %v1294_v10  ;;  %v2672_v44 = vmax.f32 %v2461_v43, %v2671_v57 }
 0x19e   : > { %v1705_v15 = vpack.c.bf16 %v1352_v3, %v1352_v3  ;;  %v1353_v50 = vadd.f32 %v2471_v28, %v1320_v53 }
 0x19f   : > { %v985_v51 = vpop.f32.mrb[92].mxu0  ;;  %v1252_v16 = vpop.f32.mrb[92].mxu1 }
 0x1a0   : > { %v1921_v30 = vpop.f32.mrb[93].mxu0  ;;  %1483 = vst.msk [vmem:[%s2483_s25 + $0x48] sm:$0xf] %vm1464_vm2, %v1705_v15  ;;  %v1706_v31 = vpack.c.bf16 %v1353_v50, %v1353_v50  ;;  %v1295_v63 = vmax.f32 %v985_v51, %v1252_v16  ;;  %v1975_v4 = vpop.f32.mrb[93].mxu1 }
 0x1a1   : > { %v988_v58 = vpop.f32.mrb[94].mxu0  ;;  %v1255_v61 = vpop.f32.mrb[94].mxu1 }
 0x1a2   : > { %v1922_v0 = vpop.f32.mrb[95].mxu0  ;;  %1484 = vst.msk [vmem:[%s2483_s25 + $0x4c] sm:$0xf] %vm1464_vm2, %v1706_v31  ;;  %v1321_v37 = vmax.f32 %v2665_v29, %v1295_v63  ;;  %v1296_v1 = vmax.f32 %v988_v58, %v1255_v61  ;;  %v1976_v48 = vpop.f32.mrb[95].mxu1 }
 0x1a4   : > { %v1354_v35 = vadd.f32 %v2471_v28, %v1321_v37  ;;  %v1322_v60 = vmax.f32 %v2666_v36, %v1296_v1 }
 0x1a6   : > { %v1707_v38 = vpack.c.bf16 %v1354_v35, %v1354_v35  ;;  %v1355_v5 = vadd.f32 %v2471_v28, %v1322_v60 }
 0x1a7   : > { %v993_v6 = vpop.f32.mrb[96].mxu0  ;;  %v1260_v33 = vpop.f32.mrb[96].mxu1 }
 0x1a8   : > { %v1925_v27 = vpop.f32.mrb[97].mxu0  ;;  %1485 = vst.msk [vmem:[%s2483_s25 + $0x50] sm:$0xf] %vm1464_vm2, %v1707_v38  ;;  %v1708_v7 = vpack.c.bf16 %v1355_v5, %v1355_v5  ;;  %v1297_v52 = vmax.f32 %v993_v6, %v1260_v33  ;;  %v1979_v56 = vpop.f32.mrb[97].mxu1 }
 0x1a9   : > { %v996_v9 = vpop.f32.mrb[98].mxu0  ;;  %v1263_v23 = vpop.f32.mrb[98].mxu1 }
 0x1aa   : > { %v1926_v18 = vpop.f32.mrb[99].mxu0  ;;  %1486 = vst.msk [vmem:[%s2483_s25 + $0x54] sm:$0xf] %vm1464_vm2, %v1708_v7  ;;  %v1323_v24 = vmax.f32 %v2667_v17, %v1297_v52  ;;  %v1298_v20 = vmax.f32 %v996_v9, %v1263_v23  ;;  %v1980_v19 = vpop.f32.mrb[99].mxu1 }
 0x1ac   : > { %v1356_v22 = vadd.f32 %v2471_v28, %v1323_v24  ;;  %v1324_v2 = vmax.f32 %v2668_v21, %v1298_v20 }
 0x1ae   : > { %v1709_v40 = vpack.c.bf16 %v1356_v22, %v1356_v22  ;;  %v1357_v41 = vadd.f32 %v2471_v28, %v1324_v2 }
 0x1af   : > { %v1001_v62 = vpop.f32.mrb[100].mxu0  ;;  %v1268_v8 = vpop.f32.mrb[100].mxu1 }
 0x1b0   : > { %v1929_v25 = vpop.f32.mrb[101].mxu0  ;;  %1487 = vst.msk [vmem:[%s2483_s25 + $0x58] sm:$0xf] %vm1464_vm2, %v1709_v40  ;;  %v1710_v49 = vpack.c.bf16 %v1357_v41, %v1357_v41  ;;  %v1299_v39 = vmax.f32 %v1001_v62, %v1268_v8  ;;  %v1983_v45 = vpop.f32.mrb[101].mxu1 }
 0x1b1   : > { %v1004_v46 = vpop.f32.mrb[102].mxu0  ;;  %v1271_v26 = vpop.f32.mrb[102].mxu1 }
 0x1b2   : > { %v1930_v13 = vpop.f32.mrb[103].mxu0  ;;  %1488 = vst.msk [vmem:[%s2483_s25 + $0x5c] sm:$0xf] %vm1464_vm2, %v1710_v49  ;;  %v1325_v32 = vmax.f32 %v2670_v14, %v1299_v39  ;;  %v1300_v34 = vmax.f32 %v1004_v46, %v1271_v26  ;;  %v1984_v54 = vpop.f32.mrb[103].mxu1 }
 0x1b4   : > { %v1358_v55 = vadd.f32 %v2471_v28, %v1325_v32  ;;  %v1326_v47 = vmax.f32 %v2672_v44, %v1300_v34 }
 0x1b6   : > { %v1711_v10 = vpack.c.bf16 %v1358_v55, %v1358_v55  ;;  %v1359_v11 = vadd.f32 %v2471_v28, %v1326_v47 }
 0x1b8   : > { %1489 = vst.msk [vmem:[%s2483_s25 + $0x60] sm:$0xf] %vm1464_vm2, %v1711_v10  ;;  %v1712_v3 = vpack.c.bf16 %v1359_v11, %v1359_v11 }
 0x1ba   : > { %1490 = vst.msk [vmem:[%s2483_s25 + $0x64] sm:$0xf] %vm1464_vm2, %v1712_v3 }
 0x1bb PF: > { %s13_s12 = sadd.s32 1, %s2056_s12  }
 0x1bc   : > { %p10_p4 = scmp.ge.s32.totalorder %s13_s12, 4  }
 0x1be   :  { %12 = sbr.rel (!%p10_p4) target bundleno = 1 (0x1), region = 62 }

// kernel: mnist_cnn2_forward.5
= control target key start
LH: loop header
LB: loop body
LE: loop exit
PB: predicated region body
PF: predicated region fallthrough
CT: control target
= control target key end

     0   :  { %s2742_s12 = smov 0   ;;  %s3346_s0 = inlined_call_operand.vmem [shape: bf16[2,256,640], index: 0, kind: input, shape index: {}]   ;;  %s3347_s1 = inlined_call_operand.vmem [shape: bf16[640,128], index: 1, kind: input, shape index: {}]   ;;  %s3348_s2 = inlined_call_operand.vmem [shape: f32[1,128], index: 2, kind: input, shape index: {}]   ;;  %s3349_s3 = inlined_call_operand.vmem [shape: bf16[2,64,128], index: 3, kind: output, shape index: {}]  }
   0x1 LB: > { %s1918_s13 = sadd.s32 4294967295, %s2720_s12   ;;  %p1922_p0 = scmp.ge.s32.totalorder %s2720_s12, 1  ;;  %s2720_s12 = sphi %s2742_s12, %s13_s12  }
   0x2   : > { %p137_p1 = scmp.lt.s32.totalorder %s2720_s12, 3 }
   0x4   : > { %p138_p2 = pnand %p1922_p0, %p137_p1 }
   0x5   : > { %v2753_v0 = vld [vmem:[%s3347_s1 + $0x40] sm:$0xff] (!%p138_p2)   ;;  %v2776_v4 = vld [vmem:[%s3347_s1 + $0x48] sm:$0xff] (!%p138_p2)   ;;  %v2800_v8 = vld [vmem:[%s3347_s1 + $0x50] sm:$0xff] (!%p138_p2)   ;;  %p161_p3 = scmp.lt.s32.totalorder (!%p138_p2), %s1918_s13, 1 }
   0x6   : > { %141 = sbr.rel (%p138_p2) target bundleno = 454 (0x1c6), region = 32  ;;  %v2758_v1 = vld [vmem:[%s3347_s1 + $0xc0] sm:$0xff] (!%p138_p2)   ;;  %2089 = vmatprep.subr.bf16.mxu0 (!%p138_p2), %v2753_v0  ;;  %v2782_v5 = vld [vmem:[%s3347_s1 + $0xc8] sm:$0xff] (!%p138_p2)   ;;  %v2806_v9 = vld [vmem:[%s3347_s1 + $0xd0] sm:$0xff] (!%p138_p2)  }
   0x7   : > { %v2764_v2 = vld [vmem:[%s3347_s1] sm:$0xff] (!%p138_p2)   ;;  %2129 = vmatprep.subr.bf16.mxu1 (!%p138_p2), %v2758_v1  ;;  %v2788_v6 = vld [vmem:[%s3347_s1 + $0x8] sm:$0xff] (!%p138_p2)   ;;  %v2812_v10 = vld [vmem:[%s3347_s1 + $0x10] sm:$0xff] (!%p138_p2)  }
   0x8   : > { %v2770_v3 = vld [vmem:[%s3347_s1 + $0x80] sm:$0xff] (!%p138_p2)   ;;  %2090 = vmatpush3.bf16.msra.mxu0 (!%p138_p2), %v2764_v2  ;;  %v2794_v7 = vld [vmem:[%s3347_s1 + $0x88] sm:$0xff] (!%p138_p2)   ;;  %v2818_v11 = vld [vmem:[%s3347_s1 + $0x90] sm:$0xff] (!%p138_p2)  }
   0x9   : > { %2130 = vmatpush3.bf16.msra.mxu1 (!%p138_p2), %v2770_v3  ;;  %2091 = vmatprep.subr.bf16.mxu0 (!%p138_p2), %v2776_v4  ;;  %v2824_v12 = vld [vmem:[%s3347_s1 + $0x58] sm:$0xff] (!%p138_p2)   ;;  %v2848_v16 = vld [vmem:[%s3347_s1 + $0x60] sm:$0xff] (!%p138_p2)   ;;  %v2874_v20 = vld [vmem:[%s3347_s1 + $0x68] sm:$0xff] (!%p138_p2)  }
   0xa   : > { %2131 = vmatprep.subr.bf16.mxu1 (!%p138_p2), %v2782_v5  ;;  %v2830_v13 = vld [vmem:[%s3347_s1 + $0xd8] sm:$0xff] (!%p138_p2)   ;;  %v2854_v17 = vld [vmem:[%s3347_s1 + $0xe0] sm:$0xff] (!%p138_p2)   ;;  %v2880_v21 = vld [vmem:[%s3347_s1 + $0xe8] sm:$0xff] (!%p138_p2)  }
   0xb   : > { %v2836_v14 = vld [vmem:[%s3347_s1 + $0x18] sm:$0xff] (!%p138_p2)   ;;  %v2862_v18 = vld [vmem:[%s3347_s1 + $0x20] sm:$0xff] (!%p138_p2)   ;;  %v2890_v22 = vld [vmem:[%s3347_s1 + $0x28] sm:$0xff] (!%p138_p2)  }
   0xc   : > { %2092 = vmatpush3.bf16.msra.mxu0 (!%p138_p2), %v2788_v6  ;;  %v2842_v15 = vld [vmem:[%s3347_s1 + $0x98] sm:$0xff] (!%p138_p2)   ;;  %v2868_v19 = vld [vmem:[%s3347_s1 + $0xa0] sm:$0xff] (!%p138_p2)   ;;  %v2896_v23 = vld [vmem:[%s3347_s1 + $0xa8] sm:$0xff] (!%p138_p2)  }
   0xd   : > { %2132 = vmatpush3.bf16.msra.mxu1 %v2794_v7  ;;  %2093 = vmatprep.subr.bf16.mxu0 %v2800_v8  ;;  %s3351_s13 = smov (!%p161_p3, %s1918_s13), 1  ;;  %v2902_v24 = vld [vmem:[%s3347_s1 + $0x70] sm:$0xff]   ;;  %v2927_v28 = vld [vmem:[%s3347_s1 + $0x78] sm:$0xff]   ;;  %v2962_v36 = vld [vmem:[%s3347_s1 + $0x100] sm:$0xff]  }
   0xe   : > { %2133 = vmatprep.subr.bf16.mxu1 %v2806_v9  ;;  %v2908_v25 = vld [vmem:[%s3347_s1 + $0xf0] sm:$0xff]   ;;  %s2553_s16 = smul.u32 640, %s3351_s13  ;;  %v2933_v29 = vld [vmem:[%s3347_s1 + $0xf8] sm:$0xff]   ;;  %v2967_v37 = vld [vmem:[%s3347_s1 + $0x108] sm:$0xff]   ;;  %s2057_s25 = sshll.u32 %s3351_s13, 5 }
   0xf   : > { %v2915_v26 = vld [vmem:[%s3347_s1 + $0x30] sm:$0xff]   ;;  %v2944_v30 = vld [vmem:[%s3347_s1 + $0x38] sm:$0xff]   ;;  %v3001_v46 = vld [vmem:[%s3347_s1 + $0x120] sm:$0xff]   ;;  %s3311_s28 = scalar_lea.vmem %s3349_s3, %s2057_s25 }
  0x10   : > { %2094 = vmatpush3.bf16.msra.mxu0 %v2812_v10  ;;  %v2921_v27 = vld [vmem:[%s3347_s1 + $0xb0] sm:$0xff]   ;;  %s2938_s27 = scalar_lea.vmem %s3346_s0, %s2553_s16  ;;  %v2950_v31 = vld [vmem:[%s3347_s1 + $0xb8] sm:$0xff]   ;;  %v3013_v50 = vld [vmem:[%s3347_s1 + $0x128] sm:$0xff]  }
  0x11   : > { %2134 = vmatpush3.bf16.msra.mxu1 %v2818_v11  ;;  %2095 = vmatprep.subr.bf16.mxu0 %v2824_v12  ;;  %v2594_v32 = vld [vmem:[%s2938_s27] ss:$20 sps:$4 sm:$0xff]   ;;  %v2596_v33 = vld [vmem:[%s2938_s27 + $0x4] ss:$20 sps:$4 sm:$0xff]   ;;  %v2597_v34 = vld [vmem:[%s2938_s27 + $0x8] ss:$20 sps:$4 sm:$0xff]  }
  0x12   : > { %2135 = vmatprep.subr.bf16.mxu1 %v2830_v13  ;;  %v2599_v35 = vld [vmem:[%s2938_s27 + $0xc] ss:$20 sps:$4 sm:$0xff]   ;;  %652 = vmatprep.mubr.bf16.mxu0 %v2596_v33  ;;  %v2604_v39 = vld [vmem:[%s2938_s27 + $0x34] ss:$20 sps:$4 sm:$0xff]   ;;  %v2607_v42 = vld [vmem:[%s2938_s27 + $0x30] ss:$20 sps:$4 sm:$0xff]  }
  0x13   : > { %717 = vmatprep.mubr.bf16.mxu1 %v2599_v35  ;;  %v2602_v38 = vld [vmem:[%s2938_s27 + $0x2c] ss:$20 sps:$4 sm:$0xff]   ;;  %v2606_v40 = vld [vmem:[%s2938_s27 + $0x28] ss:$20 sps:$4 sm:$0xff]   ;;  %v2980_v41 = vld [vmem:[%s3347_s1 + $0x110] sm:$0xff]  }
  0x14   : > { %2096 = vmatpush3.bf16.msra.mxu0 %v2836_v14  ;;  %v2610_v43 = vld [vmem:[%s2938_s27 + $0x54] ss:$20 sps:$4 sm:$0xff]   ;;  %v2991_v44 = vld [vmem:[%s3347_s1 + $0x118] sm:$0xff]   ;;  %v2614_v47 = vld [vmem:[%s2938_s27 + $0x50] ss:$20 sps:$4 sm:$0xff]  }
  0x15   : > { %2136 = vmatpush3.bf16.msra.mxu1 %v2842_v15  ;;  %2097 = vmatprep.subr.bf16.mxu0 %v2848_v16  ;;  %v2612_v45 = vld [vmem:[%s2938_s27 + $0x5c] ss:$20 sps:$4 sm:$0xff]   ;;  %v2615_v48 = vld [vmem:[%s2938_s27 + $0x58] ss:$20 sps:$4 sm:$0xff]   ;;  %v2623_v54 = vld [vmem:[%s2938_s27 + $0x80] ss:$20 sps:$4 sm:$0xff]  }
  0x16   : > { %2137 = vmatprep.subr.bf16.mxu1 %v2854_v17  ;;  %v2618_v49 = vld [vmem:[%s2938_s27 + $0x7c] ss:$20 sps:$4 sm:$0xff]   ;;  %v2620_v51 = vld [vmem:[%s2938_s27 + $0x84] ss:$20 sps:$4 sm:$0xff]   ;;  %v2628_v59 = vld [vmem:[%s2938_s27 + $0xa0] ss:$20 sps:$4 sm:$0xff]  }
  0x17   : > { %v2622_v52 = vld [vmem:[%s2938_s27 + $0x78] ss:$20 sps:$4 sm:$0xff]   ;;  %v3024_v53 = vld [vmem:[%s3347_s1 + $0x130] sm:$0xff]   ;;  %v2632_v62 = vld [vmem:[%s2938_s27 + $0x88] ss:$20 sps:$4 sm:$0xff]  }
  0x18   : > { %2098 = vmatpush3.bf16.msra.mxu0 %v2862_v18  ;;  %v2626_v55 = vld [vmem:[%s2938_s27 + $0x10] ss:$20 sps:$4 sm:$0xff]   ;;  %v3035_v56 = vld [vmem:[%s3347_s1 + $0x138] sm:$0xff]   ;;  %v2631_v60 = vld [vmem:[%s2938_s27 + $0x60] ss:$20 sps:$4 sm:$0xff]  }
  0x19   : > { %2138 = vmatpush3.bf16.msra.mxu1 %v2868_v19  ;;  %2099 = vmatprep.subr.bf16.mxu0 %v2874_v20  ;;  %v2630_v57 = vld [vmem:[%s2938_s27 + $0xa4] ss:$20 sps:$4 sm:$0xff]   ;;  %v2633_v61 = vld [vmem:[%s2938_s27 + $0xcc] ss:$20 sps:$4 sm:$0xff]   ;;  %v2635_v63 = vld [vmem:[%s2938_s27 + $0xc8] ss:$20 sps:$4 sm:$0xff]  }
  0x1a   : > { %2139 = vmatprep.subr.bf16.mxu1 %v2880_v21  ;;  %v2627_v58 = vld [vmem:[%s2938_s27 + $0x38] ss:$20 sps:$4 sm:$0xff]   ;;  %v2639_v35 = vld [vmem:[%s2938_s27 + $0x11c] ss:$20 sps:$4 sm:$0xff]  }
  0x1b   : > { %v2644_v33 = vld [vmem:[%s2938_s27 + $0xac] ss:$20 sps:$4 sm:$0xff]  }
  0x1c   : > { %2100 = vmatpush3.bf16.msra.mxu0 %v2890_v22 }
  0x1d   : > { %2140 = vmatpush3.bf16.msra.mxu1 %v2896_v23  ;;  %2101 = vmatprep.subr.bf16.mxu0 %v2902_v24 }
  0x1e   : > { %2141 = vmatprep.subr.bf16.mxu1 %v2908_v25 }
  0x20   : > { %2102 = vmatpush3.bf16.msra.mxu0 %v2915_v26 }
  0x21   : > { %2142 = vmatpush3.bf16.msra.mxu1 %v2921_v27  ;;  %2103 = vmatprep.subr.bf16.mxu0 %v2927_v28 }
  0x22   : > { %2143 = vmatprep.subr.bf16.mxu1 %v2933_v29 }
  0x24   : > { %2104 = vmatpush3.bf16.msra.mxu0 %v2944_v30 }
  0x25   : > { %2144 = vmatpush3.bf16.msra.mxu1 %v2950_v31  ;;  %2457 = vmatprep.subr.bf16.mxu0 %v2962_v36 }
  0x26   : > { %2181 = vmatprep.subr.bf16.mxu1 %v2753_v0 }
  0x27   : > { %653 = vmatmul.mubr.bf16.vlgmr.msra.gmra.mrb[0].mxu0 %v2594_v32  ;;  %v2636_v32 = vld [vmem:[%s2938_s27 + $0xf4] ss:$20 sps:$4 sm:$0xff]  }
  0x28   : > { %718 = vmatmul.mubr.bf16.vlgmr.msra.gmra.mrb[0].mxu1 %v2597_v34  ;;  %2458 = vmatpush3.bf16.msra.mxu0 %v2962_v36  ;;  %v2638_v34 = vld [vmem:[%s2938_s27 + $0xf0] ss:$20 sps:$4 sm:$0xff]  }
  0x29   : > { %2182 = vmatpush3.bf16.msra.mxu1 %v2764_v2  ;;  %2459 = vmatprep.subr.bf16.mxu0 %v2967_v37 }
  0x2a   : > { %2183 = vmatprep.subr.bf16.mxu1 %v2776_v4  ;;  %660 = vmatprep.mubr.bf16.mxu0 %v2602_v38  ;;  %v2641_v38 = vld [vmem:[%s2938_s27 + $0x118] ss:$20 sps:$4 sm:$0xff]  }
  0x2b   : > { %725 = vmatprep.mubr.bf16.mxu1 %v2604_v39  ;;  %v2645_v39 = vld [vmem:[%s2938_s27 + $0xb0] ss:$20 sps:$4 sm:$0xff]  }
  0x2c   : > { %2460 = vmatpush3.bf16.msra.mxu0 %v2967_v37 }
  0x2d   : > { %2184 = vmatpush3.bf16.msra.mxu1 %v2788_v6  ;;  %2461 = vmatprep.subr.bf16.mxu0 %v2980_v41 }
  0x2e   : > { %2185 = vmatprep.subr.bf16.mxu1 %v2800_v8 }
  0x2f   : > { %661 = vmatmul.mubr.bf16.gmra.mrb[4].mxu0 %v2606_v40  ;;  %v2642_v40 = vld [vmem:[%s2938_s27 + $0xa8] ss:$20 sps:$4 sm:$0xff]  }
  0x30   : > { %726 = vmatmul.mubr.bf16.gmra.mrb[4].mxu1 %v2607_v42  ;;  %668 = vmatprep.mubr.bf16.mxu0 %v2610_v43  ;;  %v2646_v42 = vld [vmem:[%s2938_s27 + $0xd8] ss:$20 sps:$4 sm:$0xff]   ;;  %v2647_v43 = vld [vmem:[%s2938_s27 + $0xd4] ss:$20 sps:$4 sm:$0xff]  }
  0x31   : > { %2462 = vmatpush3.bf16.msra.mxu0 %v2980_v41  ;;  %2186 = vmatpush3.bf16.msra.mxu1 %v2812_v10 }
  0x32   : > { %2463 = vmatprep.subr.bf16.mxu0 %v2991_v44  ;;  %2187 = vmatprep.subr.bf16.mxu1 %v2824_v12 }
  0x33   : > { %733 = vmatprep.mubr.bf16.mxu1 %v2612_v45  ;;  %v2653_v45 = vld [vmem:[%s2938_s27 + $0x100] ss:$20 sps:$4 sm:$0xff]  }
  0x35   : > { %2464 = vmatpush3.bf16.msra.mxu0 %v2991_v44  ;;  %2188 = vmatpush3.bf16.msra.mxu1 %v2836_v14 }
  0x36   : > { %2465 = vmatprep.subr.bf16.mxu0 %v3001_v46  ;;  %2189 = vmatprep.subr.bf16.mxu1 %v2848_v16 }
  0x37   : > { %669 = vmatmul.mubr.bf16.gmra.mrb[8].mxu0 %v2614_v47  ;;  %v2649_v47 = vld [vmem:[%s2938_s27 + $0xd0] ss:$20 sps:$4 sm:$0xff]  }
  0x38   : > { %734 = vmatmul.mubr.bf16.gmra.mrb[8].mxu1 %v2615_v48  ;;  %676 = vmatprep.mubr.bf16.mxu0 %v2618_v49  ;;  %v2654_v48 = vld [vmem:[%s2938_s27 + $0x128] ss:$20 sps:$4 sm:$0xff]  }
  0x39   : > { %2466 = vmatpush3.bf16.msra.mxu0 %v3001_v46  ;;  %2190 = vmatpush3.bf16.msra.mxu1 %v2862_v18  ;;  %v2650_v49 = vld [vmem:[%s2938_s27 + $0xfc] ss:$20 sps:$4 sm:$0xff]  }
  0x3a   : > { %2467 = vmatprep.subr.bf16.mxu0 %v3013_v50  ;;  %2191 = vmatprep.subr.bf16.mxu1 %v2874_v20 }
  0x3b   : > { %741 = vmatprep.mubr.bf16.mxu1 %v2620_v51  ;;  %v2663_v51 = vld [vmem:[%s2938_s27 + $0x14c] ss:$20 sps:$4 sm:$0xff]  }
  0x3d   : > { %2468 = vmatpush3.bf16.msra.mxu0 %v3013_v50  ;;  %2192 = vmatpush3.bf16.msra.mxu1 %v2890_v22 }
  0x3e   : > { %2469 = vmatprep.subr.bf16.mxu0 %v3024_v53  ;;  %2193 = vmatprep.subr.bf16.mxu1 %v2902_v24 }
  0x3f   : > { %677 = vmatmul.mubr.bf16.gmra.mrb[12].mxu0 %v2622_v52  ;;  %v2652_v52 = vld [vmem:[%s2938_s27 + $0xf8] ss:$20 sps:$4 sm:$0xff]  }
  0x40   : > { %742 = vmatmul.mubr.bf16.gmra.mrb[12].mxu1 %v2623_v54  ;;  %2473 = vmatprep.mubr.bf16.mxu0 %v2626_v55  ;;  %v2655_v54 = vld [vmem:[%s2938_s27 + $0x124] ss:$20 sps:$4 sm:$0xff]   ;;  %v2657_v55 = vld [vmem:[%s2938_s27 + $0x120] ss:$20 sps:$4 sm:$0xff]  }
  0x41   : > { %2470 = vmatpush3.bf16.msra.mxu0 %v3024_v53  ;;  %2194 = vmatpush3.bf16.msra.mxu1 %v2915_v26 }
  0x42   : > { %2471 = vmatprep.subr.bf16.mxu0 %v3035_v56  ;;  %2195 = vmatprep.subr.bf16.mxu1 %v2927_v28 }
  0x43   : > { %975 = vmatprep.mubr.bf16.mxu1 %v2630_v57  ;;  %v2660_v57 = vld [vmem:[%s2938_s27 + $0x144] ss:$20 sps:$4 sm:$0xff]  }
  0x45   : > { %2472 = vmatpush3.bf16.msra.mxu0 %v3035_v56  ;;  %2196 = vmatpush3.bf16.msra.mxu1 %v2944_v30 }
  0x46   : > { %2221 = vmatprep.subr.bf16.mxu0 %v2758_v1  ;;  %2481 = vmatprep.subr.bf16.mxu1 %v2962_v36 }
  0x48   : > { %2474 = vmatmul.mubr.bf16.vlgmr.msra.gmra.mrb[16].mxu0 %v2627_v58  ;;  %976 = vmatmul.mubr.bf16.vlgmr.msra.gmra.mrb[16].mxu1 %v2628_v59  ;;  %v2658_v58 = vld [vmem:[%s2938_s27 + $0x140] ss:$20 sps:$4 sm:$0xff]   ;;  %v2661_v59 = vld [vmem:[%s2938_s27 + $0x148] ss:$20 sps:$4 sm:$0xff]  }
  0x49   : > { %2222 = vmatpush3.bf16.msra.mxu0 %v2770_v3  ;;  %2482 = vmatpush3.bf16.msra.mxu1 %v2962_v36 }
  0x4a   : > { %2223 = vmatprep.subr.bf16.mxu0 %v2782_v5  ;;  %2483 = vmatprep.subr.bf16.mxu1 %v2967_v37 }
  0x4b   : > { %2477 = vmatprep.mubr.bf16.mxu0 %v2631_v60  ;;  %983 = vmatprep.mubr.bf16.mxu1 %v2633_v61  ;;  %v2664_v60 = vld [vmem:[%s2938_s27 + $0x16c] ss:$20 sps:$4 sm:$0xff]   ;;  %v2666_v61 = vld [vmem:[%s2938_s27 + $0x174] ss:$20 sps:$4 sm:$0xff]  }
  0x4d   : > { %2224 = vmatpush3.bf16.msra.mxu0 %v2794_v7  ;;  %2484 = vmatpush3.bf16.msra.mxu1 %v2967_v37 }
  0x4e   : > { %2225 = vmatprep.subr.bf16.mxu0 %v2806_v9  ;;  %2485 = vmatprep.subr.bf16.mxu1 %v2980_v41 }
  0x50   : > { %2478 = vmatmul.mubr.bf16.gmra.mrb[20].mxu0 %v2632_v62  ;;  %984 = vmatmul.mubr.bf16.gmra.mrb[20].mxu1 %v2635_v63  ;;  %v2668_v62 = vld [vmem:[%s2938_s27 + $0x168] ss:$20 sps:$4 sm:$0xff]   ;;  %v2669_v63 = vld [vmem:[%s2938_s27 + $0x170] ss:$20 sps:$4 sm:$0xff]  }
  0x51   : > { %2226 = vmatpush3.bf16.msra.mxu0 %v2818_v11  ;;  %2486 = vmatpush3.bf16.msra.mxu1 %v2980_v41 }
  0x52   : > { %2227 = vmatprep.subr.bf16.mxu0 %v2830_v13  ;;  %2487 = vmatprep.subr.bf16.mxu1 %v2991_v44 }
  0x53   : > { %991 = vmatprep.mubr.bf16.mxu1 %v2636_v32  ;;  %1040 = vmatprep.mubr.bf16.mxu0 %v2644_v33 }
  0x55   : > { %2228 = vmatpush3.bf16.msra.mxu0 %v2842_v15  ;;  %2488 = vmatpush3.bf16.msra.mxu1 %v2991_v44 }
  0x56   : > { %2229 = vmatprep.subr.bf16.mxu0 %v2854_v17  ;;  %2489 = vmatprep.subr.bf16.mxu1 %v3001_v46 }
  0x58   : > { %992 = vmatmul.mubr.bf16.gmra.mrb[24].mxu1 %v2638_v34 }
  0x59   : > { %2230 = vmatpush3.bf16.msra.mxu0 %v2868_v19  ;;  %2490 = vmatpush3.bf16.msra.mxu1 %v3001_v46 }
  0x5a   : > { %2231 = vmatprep.subr.bf16.mxu0 %v2880_v21  ;;  %2491 = vmatprep.subr.bf16.mxu1 %v3013_v50 }
  0x5b   : > { %999 = vmatprep.mubr.bf16.mxu1 %v2639_v35 }
  0x5d   : > { %2232 = vmatpush3.bf16.msra.mxu0 %v2896_v23  ;;  %2492 = vmatpush3.bf16.msra.mxu1 %v3013_v50 }
  0x5e   : > { %2233 = vmatprep.subr.bf16.mxu0 %v2908_v25  ;;  %2493 = vmatprep.subr.bf16.mxu1 %v3024_v53 }
  0x60   : > { %1000 = vmatmul.mubr.bf16.gmra.mrb[28].mxu1 %v2641_v38 }
  0x61   : > { %2234 = vmatpush3.bf16.msra.mxu0 %v2921_v27  ;;  %2494 = vmatpush3.bf16.msra.mxu1 %v3024_v53 }
  0x62   : > { %2235 = vmatprep.subr.bf16.mxu0 %v2933_v29  ;;  %2495 = vmatprep.subr.bf16.mxu1 %v3035_v56 }
  0x63   : > { %2497 = vmatprep.mubr.bf16.mxu1 %v2645_v39 }
  0x65   : > { %2236 = vmatpush3.bf16.msra.mxu0 %v2950_v31  ;;  %2496 = vmatpush3.bf16.msra.mxu1 %v3035_v56 }
  0x66   : > { %2273 = vmatprep.subr.bf16.mxu0 %v2753_v0  ;;  %2313 = vmatprep.subr.bf16.mxu1 %v2758_v1 }
  0x68   : > { %1041 = vmatmul.mubr.bf16.vlgmr.msra.gmra.mrb[24].mxu0 %v2642_v40  ;;  %2498 = vmatmul.mubr.bf16.vlgmr.msra.gmra.mrb[32].mxu1 %v2646_v42 }
  0x69   : > { %2274 = vmatpush3.bf16.msra.mxu0 %v2764_v2  ;;  %2314 = vmatpush3.bf16.msra.mxu1 %v2770_v3 }
  0x6a   : > { %2275 = vmatprep.subr.bf16.mxu0 %v2776_v4  ;;  %2315 = vmatprep.subr.bf16.mxu1 %v2782_v5 }
  0x6b   : > { %1048 = vmatprep.mubr.bf16.mxu0 %v2647_v43  ;;  %2501 = vmatprep.mubr.bf16.mxu1 %v2653_v45 }
  0x6d   : > { %2276 = vmatpush3.bf16.msra.mxu0 %v2788_v6  ;;  %2316 = vmatpush3.bf16.msra.mxu1 %v2794_v7 }
  0x6e   : > { %2277 = vmatprep.subr.bf16.mxu0 %v2800_v8  ;;  %2317 = vmatprep.subr.bf16.mxu1 %v2806_v9 }
  0x70   : > { %1049 = vmatmul.mubr.bf16.gmra.mrb[28].mxu0 %v2649_v47  ;;  %2502 = vmatmul.mubr.bf16.gmra.mrb[36].mxu1 %v2654_v48 }
  0x71   : > { %2278 = vmatpush3.bf16.msra.mxu0 %v2812_v10  ;;  %2318 = vmatpush3.bf16.msra.mxu1 %v2818_v11 }
  0x72   : > { %2279 = vmatprep.subr.bf16.mxu0 %v2824_v12  ;;  %2319 = vmatprep.subr.bf16.mxu1 %v2830_v13 }
  0x73   : > { %1056 = vmatprep.mubr.bf16.mxu0 %v2650_v49  ;;  %1371 = vmatprep.mubr.bf16.mxu1 %v2663_v51 }
  0x75   : > { %2280 = vmatpush3.bf16.msra.mxu0 %v2836_v14  ;;  %2320 = vmatpush3.bf16.msra.mxu1 %v2842_v15 }
  0x76   : > { %2281 = vmatprep.subr.bf16.mxu0 %v2848_v16  ;;  %2321 = vmatprep.subr.bf16.mxu1 %v2854_v17 }
  0x78   : > { %1057 = vmatmul.mubr.bf16.gmra.mrb[32].mxu0 %v2652_v52 }
  0x79   : > { %2282 = vmatpush3.bf16.msra.mxu0 %v2862_v18  ;;  %2322 = vmatpush3.bf16.msra.mxu1 %v2868_v19 }
  0x7a   : > { %2283 = vmatprep.subr.bf16.mxu0 %v2874_v20  ;;  %2323 = vmatprep.subr.bf16.mxu1 %v2880_v21 }
  0x7b   : > { %1064 = vmatprep.mubr.bf16.mxu0 %v2655_v54 }
  0x7d   : > { %2284 = vmatpush3.bf16.msra.mxu0 %v2890_v22  ;;  %2324 = vmatpush3.bf16.msra.mxu1 %v2896_v23 }
  0x7e   : > { %2285 = vmatprep.subr.bf16.mxu0 %v2902_v24  ;;  %2325 = vmatprep.subr.bf16.mxu1 %v2908_v25 }
  0x80   : > { %1065 = vmatmul.mubr.bf16.gmra.mrb[36].mxu0 %v2657_v55 }
  0x81   : > { %2286 = vmatpush3.bf16.msra.mxu0 %v2915_v26  ;;  %2326 = vmatpush3.bf16.msra.mxu1 %v2921_v27 }
  0x82   : > { %2287 = vmatprep.subr.bf16.mxu0 %v2927_v28  ;;  %2327 = vmatprep.subr.bf16.mxu1 %v2933_v29 }
  0x83   : > { %1306 = vmatprep.mubr.bf16.mxu0 %v2660_v57 }
  0x85   : > { %2288 = vmatpush3.bf16.msra.mxu0 %v2944_v30  ;;  %2328 = vmatpush3.bf16.msra.mxu1 %v2950_v31 }
  0x86   : > { %2505 = vmatprep.subr.bf16.mxu0 %v2962_v36  ;;  %2365 = vmatprep.subr.bf16.mxu1 %v2753_v0  ;;  %v2670_v0 = vld [vmem:[%s2938_s27 + $0x194] ss:$20 sps:$4 sm:$0xff]  }
  0x88   : > { %1307 = vmatmul.mubr.bf16.vlgmr.msra.gmra.mrb[40].mxu0 %v2658_v58  ;;  %1372 = vmatmul.mubr.bf16.vlgmr.msra.gmra.mrb[40].mxu1 %v2661_v59 }
  0x89   : > { %2506 = vmatpush3.bf16.msra.mxu0 %v2962_v36  ;;  %2366 = vmatpush3.bf16.msra.mxu1 %v2764_v2  ;;  %v2672_v2 = vld [vmem:[%s2938_s27 + $0x19c] ss:$20 sps:$4 sm:$0xff]  }
  0x8a   : > { %2507 = vmatprep.subr.bf16.mxu0 %v2967_v37  ;;  %1314 = vmatprep.mubr.bf16.mxu0 %v2664_v60 }
  0x8b   : > { %1379 = vmatprep.mubr.bf16.mxu1 %v2666_v61  ;;  %2367 = vmatprep.subr.bf16.mxu1 %v2776_v4  ;;  %v2674_v4 = vld [vmem:[%s2938_s27 + $0x190] ss:$20 sps:$4 sm:$0xff]  }
  0x8d   : > { %2508 = vmatpush3.bf16.msra.mxu0 %v2967_v37  ;;  %2368 = vmatpush3.bf16.msra.mxu1 %v2788_v6  ;;  %v2675_v6 = vld [vmem:[%s2938_s27 + $0x198] ss:$20 sps:$4 sm:$0xff]  }
  0x8e   : > { %2509 = vmatprep.subr.bf16.mxu0 %v2980_v41  ;;  %2369 = vmatprep.subr.bf16.mxu1 %v2800_v8  ;;  %v2676_v8 = vld [vmem:[%s2938_s27 + $0x1bc] ss:$20 sps:$4 sm:$0xff]  }
  0x90   : > { %1315 = vmatmul.mubr.bf16.gmra.mrb[44].mxu0 %v2668_v62  ;;  %1380 = vmatmul.mubr.bf16.gmra.mrb[44].mxu1 %v2669_v63 }
  0x91   : > { %2510 = vmatpush3.bf16.msra.mxu0 %v2980_v41  ;;  %2370 = vmatpush3.bf16.msra.mxu1 %v2812_v10  ;;  %v2678_v10 = vld [vmem:[%s2938_s27 + $0x1c4] ss:$20 sps:$4 sm:$0xff]  }
  0x92   : > { %2511 = vmatprep.subr.bf16.mxu0 %v2991_v44  ;;  %1322 = vmatprep.mubr.bf16.mxu0 %v2670_v0 }
  0x93   : > { %1387 = vmatprep.mubr.bf16.mxu1 %v2672_v2  ;;  %2371 = vmatprep.subr.bf16.mxu1 %v2824_v12  ;;  %v2680_v12 = vld [vmem:[%s2938_s27 + $0x1b8] ss:$20 sps:$4 sm:$0xff]  }
  0x95   : > { %2512 = vmatpush3.bf16.msra.mxu0 %v2991_v44  ;;  %2372 = vmatpush3.bf16.msra.mxu1 %v2836_v14  ;;  %v2681_v14 = vld [vmem:[%s2938_s27 + $0x1c0] ss:$20 sps:$4 sm:$0xff]  }
  0x96   : > { %2513 = vmatprep.subr.bf16.mxu0 %v3001_v46  ;;  %2373 = vmatprep.subr.bf16.mxu1 %v2848_v16  ;;  %v2682_v16 = vld [vmem:[%s2938_s27 + $0x150] ss:$20 sps:$4 sm:$0xff]  }
  0x98   : > { %1323 = vmatmul.mubr.bf16.gmra.mrb[48].mxu0 %v2674_v4  ;;  %1388 = vmatmul.mubr.bf16.gmra.mrb[48].mxu1 %v2675_v6 }
  0x99   : > { %2514 = vmatpush3.bf16.msra.mxu0 %v3001_v46  ;;  %2374 = vmatpush3.bf16.msra.mxu1 %v2862_v18  ;;  %v2686_v18 = vld [vmem:[%s2938_s27 + $0x1e4] ss:$20 sps:$4 sm:$0xff]  }
  0x9a   : > { %2515 = vmatprep.subr.bf16.mxu0 %v3013_v50  ;;  %1330 = vmatprep.mubr.bf16.mxu0 %v2676_v8 }
  0x9b   : > { %1395 = vmatprep.mubr.bf16.mxu1 %v2678_v10  ;;  %2375 = vmatprep.subr.bf16.mxu1 %v2874_v20  ;;  %v2683_v20 = vld [vmem:[%s2938_s27 + $0x178] ss:$20 sps:$4 sm:$0xff]  }
  0x9d   : > { %2516 = vmatpush3.bf16.msra.mxu0 %v3013_v50  ;;  %2376 = vmatpush3.bf16.msra.mxu1 %v2890_v22  ;;  %v2684_v22 = vld [vmem:[%s2938_s27 + $0x1e0] ss:$20 sps:$4 sm:$0xff]  }
  0x9e   : > { %2517 = vmatprep.subr.bf16.mxu0 %v3024_v53  ;;  %2377 = vmatprep.subr.bf16.mxu1 %v2902_v24  ;;  %v2687_v24 = vld [vmem:[%s2938_s27 + $0x1a0] ss:$20 sps:$4 sm:$0xff]  }
  0xa0   : > { %1331 = vmatmul.mubr.bf16.gmra.mrb[52].mxu0 %v2680_v12  ;;  %1396 = vmatmul.mubr.bf16.gmra.mrb[52].mxu1 %v2681_v14 }
  0xa1   : > { %2518 = vmatpush3.bf16.msra.mxu0 %v3024_v53  ;;  %2378 = vmatpush3.bf16.msra.mxu1 %v2915_v26  ;;  %v2689_v26 = vld [vmem:[%s2938_s27 + $0x20c] ss:$20 sps:$4 sm:$0xff]  }
  0xa2   : > { %2519 = vmatprep.subr.bf16.mxu0 %v3035_v56  ;;  %2521 = vmatprep.mubr.bf16.mxu0 %v2682_v16 }
  0xa3   : > { %2379 = vmatprep.subr.bf16.mxu1 %v2927_v28  ;;  %1629 = vmatprep.mubr.bf16.mxu1 %v2686_v18  ;;  %v2688_v28 = vld [vmem:[%s2938_s27 + $0x1c8] ss:$20 sps:$4 sm:$0xff]  }
  0xa5   : > { %2520 = vmatpush3.bf16.msra.mxu0 %v3035_v56  ;;  %2380 = vmatpush3.bf16.msra.mxu1 %v2944_v30  ;;  %v2700_v30 = vld [vmem:[%s2938_s27 + $0x1ec] ss:$20 sps:$4 sm:$0xff]  }
  0xa6   : > { %2405 = vmatprep.subr.bf16.mxu0 %v2758_v1  ;;  %2529 = vmatprep.subr.bf16.mxu1 %v2962_v36  ;;  %v2691_v1 = vld [vmem:[%s2938_s27 + $0x208] ss:$20 sps:$4 sm:$0xff]  }
  0xa8   : > { %2522 = vmatmul.mubr.bf16.vlgmr.msra.gmra.mrb[56].mxu0 %v2683_v20  ;;  %1630 = vmatmul.mubr.bf16.vlgmr.msra.gmra.mrb[56].mxu1 %v2684_v22 }
  0xa9   : > { %2406 = vmatpush3.bf16.msra.mxu0 %v2770_v3  ;;  %2530 = vmatpush3.bf16.msra.mxu1 %v2962_v36  ;;  %v2692_v3 = vld [vmem:[%s2938_s27 + $0x234] ss:$20 sps:$4 sm:$0xff]  }
  0xaa   : > { %2407 = vmatprep.subr.bf16.mxu0 %v2782_v5  ;;  %2525 = vmatprep.mubr.bf16.mxu0 %v2687_v24  ;;  %v2694_v5 = vld [vmem:[%s2938_s27 + $0x230] ss:$20 sps:$4 sm:$0xff]  }
  0xab   : > { %2531 = vmatprep.subr.bf16.mxu1 %v2967_v37  ;;  %1637 = vmatprep.mubr.bf16.mxu1 %v2689_v26 }
  0xad   : > { %2408 = vmatpush3.bf16.msra.mxu0 %v2794_v7  ;;  %2532 = vmatpush3.bf16.msra.mxu1 %v2967_v37  ;;  %v2695_v7 = vld [vmem:[%s2938_s27 + $0x25c] ss:$20 sps:$4 sm:$0xff]  }
  0xae   : > { %2409 = vmatprep.subr.bf16.mxu0 %v2806_v9  ;;  %2533 = vmatprep.subr.bf16.mxu1 %v2980_v41  ;;  %v2697_v9 = vld [vmem:[%s2938_s27 + $0x258] ss:$20 sps:$4 sm:$0xff]  }
  0xb0   : > { %2526 = vmatmul.mubr.bf16.gmra.mrb[60].mxu0 %v2688_v28  ;;  %1638 = vmatmul.mubr.bf16.gmra.mrb[60].mxu1 %v2691_v1 }
  0xb1   : > { %2410 = vmatpush3.bf16.msra.mxu0 %v2818_v11  ;;  %2534 = vmatpush3.bf16.msra.mxu1 %v2980_v41  ;;  %v2701_v11 = vld [vmem:[%s2938_s27 + $0x1f0] ss:$20 sps:$4 sm:$0xff]  }
  0xb2   : > { %2411 = vmatprep.subr.bf16.mxu0 %v2830_v13  ;;  %2535 = vmatprep.subr.bf16.mxu1 %v2991_v44  ;;  %v2698_v13 = vld [vmem:[%s2938_s27 + $0x1e8] ss:$20 sps:$4 sm:$0xff]  }
  0xb3   : > { %1645 = vmatprep.mubr.bf16.mxu1 %v2692_v3  ;;  %1694 = vmatprep.mubr.bf16.mxu0 %v2700_v30 }
  0xb5   : > { %2412 = vmatpush3.bf16.msra.mxu0 %v2842_v15  ;;  %2536 = vmatpush3.bf16.msra.mxu1 %v2991_v44  ;;  %v2702_v15 = vld [vmem:[%s2938_s27 + $0x218] ss:$20 sps:$4 sm:$0xff]  }
  0xb6   : > { %2413 = vmatprep.subr.bf16.mxu0 %v2854_v17  ;;  %2537 = vmatprep.subr.bf16.mxu1 %v3001_v46  ;;  %v2703_v17 = vld [vmem:[%s2938_s27 + $0x214] ss:$20 sps:$4 sm:$0xff]  }
  0xb8   : > { %1646 = vmatmul.mubr.bf16.gmra.mrb[64].mxu1 %v2694_v5 }
  0xb9   : > { %2414 = vmatpush3.bf16.msra.mxu0 %v2868_v19  ;;  %2538 = vmatpush3.bf16.msra.mxu1 %v3001_v46  ;;  %v2709_v19 = vld [vmem:[%s2938_s27 + $0x240] ss:$20 sps:$4 sm:$0xff]  }
  0xba   : > { %2415 = vmatprep.subr.bf16.mxu0 %v2880_v21  ;;  %2539 = vmatprep.subr.bf16.mxu1 %v3013_v50  ;;  %v2705_v21 = vld [vmem:[%s2938_s27 + $0x210] ss:$20 sps:$4 sm:$0xff]  }
  0xbb   : > { %1653 = vmatprep.mubr.bf16.mxu1 %v2695_v7 }
  0xbd   : > { %2416 = vmatpush3.bf16.msra.mxu0 %v2896_v23  ;;  %2540 = vmatpush3.bf16.msra.mxu1 %v3013_v50  ;;  %v2710_v23 = vld [vmem:[%s2938_s27 + $0x268] ss:$20 sps:$4 sm:$0xff]  }
  0xbe   : > { %2417 = vmatprep.subr.bf16.mxu0 %v2908_v25  ;;  %2541 = vmatprep.subr.bf16.mxu1 %v3024_v53  ;;  %v2706_v25 = vld [vmem:[%s2938_s27 + $0x23c] ss:$20 sps:$4 sm:$0xff]  }
  0xc0   : > { %1654 = vmatmul.mubr.bf16.gmra.mrb[68].mxu1 %v2697_v9 }
  0xc1   : > { %2418 = vmatpush3.bf16.msra.mxu0 %v2921_v27  ;;  %2542 = vmatpush3.bf16.msra.mxu1 %v3024_v53  ;;  %v2708_v27 = vld [vmem:[%s2938_s27 + $0x238] ss:$20 sps:$4 sm:$0xff]  }
  0xc2   : > { %2419 = vmatprep.subr.bf16.mxu0 %v2933_v29  ;;  %2543 = vmatprep.subr.bf16.mxu1 %v3035_v56  ;;  %v2711_v29 = vld [vmem:[%s2938_s27 + $0x264] ss:$20 sps:$4 sm:$0xff]  }
  0xc3   : > { %2545 = vmatprep.mubr.bf16.mxu1 %v2701_v11 }
  0xc5   : > { %2420 = vmatpush3.bf16.msra.mxu0 %v2950_v31  ;;  %2544 = vmatpush3.bf16.msra.mxu1 %v3035_v56  ;;  %v2713_v31 = vld [vmem:[%s2938_s27 + $0x260] ss:$20 sps:$4 sm:$0xff]  }
  0xc8   : > { %1695 = vmatmul.mubr.bf16.vlgmr.msra.gmra.mrb[64].mxu0 %v2698_v13  ;;  %2546 = vmatmul.mubr.bf16.vlgmr.msra.gmra.mrb[72].mxu1 %v2702_v15 }
  0xc9   : > { %1702 = vmatprep.mubr.bf16.mxu0 %v2703_v17  ;;  %2549 = vmatprep.mubr.bf16.mxu1 %v2709_v19 }
  0xd0   : > { %1703 = vmatmul.mubr.bf16.gmra.mrb[68].mxu0 %v2705_v21  ;;  %2550 = vmatmul.mubr.bf16.gmra.mrb[76].mxu1 %v2710_v23 }
  0xd1   : > { %1710 = vmatprep.mubr.bf16.mxu0 %v2706_v25 }
  0xd8   : > { %1711 = vmatmul.mubr.bf16.gmra.mrb[72].mxu0 %v2708_v27 }
  0xd9   : > { %1718 = vmatprep.mubr.bf16.mxu0 %v2711_v29 }
  0xe0   : > { %1719 = vmatmul.mubr.bf16.gmra.mrb[76].mxu0 %v2713_v31 }
  0xfa   : > { %v2105_v36 = vpop.f32.mrb[0].mxu0 }
  0xfb   : > { %v2145_v37 = vpop.f32.mrb[0].mxu1  ;;  %v2106_v41 = vpop.f32.mrb[1].mxu0 }
  0xfc   : > { %v2107_v44 = vadd.f32 %v2106_v41, %v2105_v36  ;;  %v2146_v46 = vpop.f32.mrb[1].mxu1  ;;  %v2108_v50 = vpop.f32.mrb[2].mxu0 }
  0xfd   : > { %v2147_v53 = vadd.f32 %v2146_v46, %v2145_v37  ;;  %v2148_v56 = vpop.f32.mrb[2].mxu1  ;;  %v2109_v32 = vpop.f32.mrb[3].mxu0 }
  0xfe   : > { %v2110_v33 = vadd.f32 %v2109_v32, %v2108_v50  ;;  %v2149_v34 = vpop.f32.mrb[3].mxu1 }
  0xff   : > { %v2150_v35 = vadd.f32 %v2149_v34, %v2148_v56  ;;  %v720_v38 = vadd.f32 %v2147_v53, %v2107_v44 }
 0x101   : > { %v723_v39 = vadd.f32 %v2150_v35, %v2110_v33 }
 0x102   : > { %v2111_v40 = vpop.f32.mrb[4].mxu0 }
 0x103   : > { %v2151_v42 = vpop.f32.mrb[4].mxu1  ;;  %v2112_v43 = vpop.f32.mrb[5].mxu0 }
 0x104   : > { %v2113_v45 = vadd.f32 %v2112_v43, %v2111_v40  ;;  %v2152_v47 = vpop.f32.mrb[5].mxu1  ;;  %v2114_v48 = vpop.f32.mrb[6].mxu0 }
 0x105   : > { %v2153_v49 = vadd.f32 %v2152_v47, %v2151_v42  ;;  %v2154_v51 = vpop.f32.mrb[6].mxu1  ;;  %v2115_v52 = vpop.f32.mrb[7].mxu0 }
 0x106   : > { %v2116_v54 = vadd.f32 %v2115_v52, %v2114_v48  ;;  %v2155_v55 = vpop.f32.mrb[7].mxu1 }
 0x107   : > { %v2156_v57 = vadd.f32 %v2155_v55, %v2154_v51  ;;  %v728_v58 = vadd.f32 %v2153_v49, %v2113_v45 }
 0x109   : > { %v731_v59 = vadd.f32 %v2156_v57, %v2116_v54 }
 0x10a   : > { %v2117_v60 = vpop.f32.mrb[8].mxu0 }
 0x10b   : > { %v2157_v61 = vpop.f32.mrb[8].mxu1  ;;  %v2118_v62 = vpop.f32.mrb[9].mxu0 }
 0x10c   : > { %v2119_v63 = vadd.f32 %v2118_v62, %v2117_v60  ;;  %v2158_v0 = vpop.f32.mrb[9].mxu1  ;;  %v2120_v2 = vpop.f32.mrb[10].mxu0 }
 0x10d   : > { %v2159_v4 = vadd.f32 %v2158_v0, %v2157_v61  ;;  %v2160_v6 = vpop.f32.mrb[10].mxu1  ;;  %v2121_v8 = vpop.f32.mrb[11].mxu0 }
 0x10e   : > { %v2122_v10 = vadd.f32 %v2121_v8, %v2120_v2  ;;  %v2161_v12 = vpop.f32.mrb[11].mxu1 }
 0x10f   : > { %v2162_v14 = vadd.f32 %v2161_v12, %v2160_v6  ;;  %v736_v16 = vadd.f32 %v2159_v4, %v2119_v63 }
 0x111   : > { %v739_v18 = vadd.f32 %v2162_v14, %v2122_v10 }
 0x112   : > { %v2123_v20 = vpop.f32.mrb[12].mxu0 }
 0x113   : > { %v2163_v22 = vpop.f32.mrb[12].mxu1  ;;  %v2124_v24 = vpop.f32.mrb[13].mxu0 }
 0x114   : > { %v2125_v26 = vadd.f32 %v2124_v24, %v2123_v20  ;;  %v2164_v28 = vpop.f32.mrb[13].mxu1  ;;  %v2126_v1 = vpop.f32.mrb[14].mxu0 }
 0x115   : > { %v2165_v3 = vadd.f32 %v2164_v28, %v2163_v22  ;;  %v2166_v30 = vpop.f32.mrb[14].mxu1  ;;  %v2127_v5 = vpop.f32.mrb[15].mxu0 }
 0x116   : > { %v2128_v7 = vadd.f32 %v2127_v5, %v2126_v1  ;;  %v2167_v9 = vpop.f32.mrb[15].mxu1 }
 0x117   : > { %v2168_v11 = vadd.f32 %v2167_v9, %v2166_v30  ;;  %v744_v13 = vadd.f32 %v2165_v3, %v2125_v26 }
 0x119   : > { %v747_v15 = vadd.f32 %v2168_v11, %v2128_v7 }
 0x11b   : > { %v2475_v17 = vpop.f32.mrb[16].mxu0  ;;  %v2197_v19 = vpop.f32.mrb[16].mxu1 }
 0x11c   : > { %v3234_v21 = vadd.f32 %v2475_v17, %v728_v58  ;;  %v784_v23 = vpop.f32.mrb[17].mxu0  ;;  %v2198_v25 = vpop.f32.mrb[17].mxu1 }
 0x11d   : > { %v3236_v27 = vadd.f32 %v784_v23, %v720_v38  ;;  %v2476_v29 = vpop.f32.mrb[18].mxu0  ;;  %v2199_v31 = vadd.f32 %v2198_v25, %v2197_v19  ;;  %v2200_v36 = vpop.f32.mrb[18].mxu1 }
 0x11e   : > { %v3238_v37 = vadd.f32 %v2476_v29, %v731_v59  ;;  %v787_v41 = vpop.f32.mrb[19].mxu0  ;;  %v2201_v44 = vpop.f32.mrb[19].mxu1 }
 0x11f   : > { %v3240_v46 = vadd.f32 %v787_v41, %v723_v39  ;;  %v2202_v50 = vadd.f32 %v2201_v44, %v2200_v36 }
 0x123   : > { %v2479_v53 = vpop.f32.mrb[20].mxu0  ;;  %v2203_v56 = vpop.f32.mrb[20].mxu1 }
 0x124   : > { %v3242_v32 = vadd.f32 %v2479_v53, %v744_v13  ;;  %v800_v33 = vpop.f32.mrb[21].mxu0  ;;  %v2204_v34 = vpop.f32.mrb[21].mxu1 }
 0x125   : > { %v3244_v35 = vadd.f32 %v800_v33, %v736_v16  ;;  %v2480_v38 = vpop.f32.mrb[22].mxu0  ;;  %v2205_v40 = vadd.f32 %v2204_v34, %v2203_v56  ;;  %v2206_v42 = vpop.f32.mrb[22].mxu1 }
 0x126   : > { %v3246_v43 = vadd.f32 %v2480_v38, %v747_v15  ;;  %v803_v45 = vpop.f32.mrb[23].mxu0  ;;  %v2207_v47 = vpop.f32.mrb[23].mxu1 }
 0x127   : > { %v3248_v48 = vadd.f32 %v803_v45, %v739_v18  ;;  %v2208_v39 = vadd.f32 %v2207_v47, %v2206_v42 }
 0x12b   : > { %v2209_v49 = vpop.f32.mrb[24].mxu1 }
 0x12c   : > { %v2210_v51 = vpop.f32.mrb[25].mxu1 }
 0x12d   : > { %v2211_v52 = vadd.f32 %v2210_v51, %v2209_v49  ;;  %v2212_v54 = vpop.f32.mrb[26].mxu1 }
 0x12e   : > { %v2213_v55 = vpop.f32.mrb[27].mxu1 }
 0x12f   : > { %v2214_v57 = vadd.f32 %v2213_v55, %v2212_v54 }
 0x133   : > { %v2215_v58 = vpop.f32.mrb[28].mxu1 }
 0x134   : > { %v2216_v59 = vpop.f32.mrb[29].mxu1 }
 0x135   : > { %v2217_v60 = vadd.f32 %v2216_v59, %v2215_v58  ;;  %v2218_v61 = vpop.f32.mrb[30].mxu1 }
 0x136   : > { %v2219_v62 = vpop.f32.mrb[31].mxu1 }
 0x137   : > { %v2220_v63 = vadd.f32 %v2219_v62, %v2218_v61 }
 0x13b   : > { %v2237_v0 = vpop.f32.mrb[24].mxu0  ;;  %v2499_v2 = vpop.f32.mrb[32].mxu1 }
 0x13c   : > { %v2238_v4 = vpop.f32.mrb[25].mxu0  ;;  %v1107_v6 = vpop.f32.mrb[33].mxu1 }
 0x13d   : > { %v2239_v8 = vadd.f32 %v2238_v4, %v2237_v0  ;;  %v2240_v10 = vpop.f32.mrb[26].mxu0  ;;  %v2500_v12 = vpop.f32.mrb[34].mxu1 }
 0x13e   : > { %v2241_v14 = vpop.f32.mrb[27].mxu0  ;;  %v1110_v16 = vpop.f32.mrb[35].mxu1 }
 0x13f   : > { %v2242_v18 = vadd.f32 %v2241_v14, %v2240_v10  ;;  %v1043_v20 = vadd.f32 %v2239_v8, %v2199_v31 }
 0x141   : > { %v3250_v22 = vadd.f32 %v1107_v6, %v1043_v20  ;;  %v1046_v24 = vadd.f32 %v2242_v18, %v2202_v50 }
 0x143   : > { %v1138_v26 = vmax.f32 %v3236_v27, %v3250_v22  ;;  %v3254_v28 = vadd.f32 %v1110_v16, %v1046_v24  ;;  %v2243_v1 = vpop.f32.mrb[28].mxu0  ;;  %v2503_v3 = vpop.f32.mrb[36].mxu1 }
 0x144   : > { %v2244_v30 = vpop.f32.mrb[29].mxu0  ;;  %v1123_v5 = vpop.f32.mrb[37].mxu1 }
 0x145   : > { %v1139_v7 = vmax.f32 %v3240_v46, %v3254_v28  ;;  %v2245_v9 = vadd.f32 %v2244_v30, %v2243_v1  ;;  %v2246_v11 = vpop.f32.mrb[30].mxu0  ;;  %v2504_v13 = vpop.f32.mrb[38].mxu1 }
 0x146   : > { %v2247_v15 = vpop.f32.mrb[31].mxu0  ;;  %v1126_v17 = vpop.f32.mrb[39].mxu1 }
 0x147   : > { %v1051_v19 = vadd.f32 %v2245_v9, %v2205_v40  ;;  %v2248_v23 = vadd.f32 %v2247_v15, %v2246_v11 }
 0x149   : > { %v3258_v25 = vadd.f32 %v2499_v2, %v1051_v19  ;;  %v1054_v29 = vadd.f32 %v2248_v23, %v2208_v39 }
 0x14b   : > { %v1140_v31 = vmax.f32 %v3234_v21, %v3258_v25  ;;  %v3262_v36 = vadd.f32 %v2500_v12, %v1054_v29  ;;  %v2249_v41 = vpop.f32.mrb[32].mxu0 }
 0x14c   : > { %v2250_v44 = vpop.f32.mrb[33].mxu0 }
 0x14d   : > { %v1141_v50 = vmax.f32 %v3238_v37, %v3262_v36  ;;  %v2251_v53 = vadd.f32 %v2250_v44, %v2249_v41  ;;  %v2252_v56 = vpop.f32.mrb[34].mxu0 }
 0x14e   : > { %v2253_v33 = vpop.f32.mrb[35].mxu0 }
 0x14f   : > { %v2254_v34 = vadd.f32 %v2253_v33, %v2252_v56  ;;  %v1059_v38 = vadd.f32 %v2251_v53, %v2211_v52 }
 0x151   : > { %v3266_v40 = vadd.f32 %v1123_v5, %v1059_v38  ;;  %v1062_v42 = vadd.f32 %v2254_v34, %v2214_v57 }
 0x153   : > { %v1142_v45 = vmax.f32 %v3244_v35, %v3266_v40  ;;  %v3270_v47 = vadd.f32 %v1126_v17, %v1062_v42  ;;  %v2255_v39 = vpop.f32.mrb[36].mxu0 }
 0x154   : > { %v2256_v49 = vpop.f32.mrb[37].mxu0 }
 0x155   : > { %v1143_v51 = vmax.f32 %v3248_v48, %v3270_v47  ;;  %v2257_v54 = vadd.f32 %v2256_v49, %v2255_v39  ;;  %v2258_v55 = vpop.f32.mrb[38].mxu0 }
 0x156   : > { %v2259_v58 = vpop.f32.mrb[39].mxu0 }
 0x157   : > { %v1067_v59 = vadd.f32 %v2257_v54, %v2217_v60  ;;  %v2260_v61 = vadd.f32 %v2259_v58, %v2258_v55 }
 0x159   : > { %v3274_v62 = vadd.f32 %v2503_v3, %v1067_v59  ;;  %v1070_v52 = vadd.f32 %v2260_v61, %v2220_v63 }
 0x15b   : > { %v1144_v57 = vmax.f32 %v3242_v32, %v3274_v62  ;;  %v3278_v0 = vadd.f32 %v2504_v13, %v1070_v52  ;;  %v2289_v2 = vpop.f32.mrb[40].mxu0  ;;  %v2329_v4 = vpop.f32.mrb[40].mxu1 }
 0x15c   : > { %v2290_v6 = vpop.f32.mrb[41].mxu0  ;;  %v2330_v8 = vpop.f32.mrb[41].mxu1 }
 0x15d   : > { %v1145_v10 = vmax.f32 %v3246_v43, %v3278_v0  ;;  %v2291_v12 = vadd.f32 %v2290_v6, %v2289_v2  ;;  %v2331_v14 = vadd.f32 %v2330_v8, %v2329_v4  ;;  %v2292_v16 = vpop.f32.mrb[42].mxu0  ;;  %v2332_v60 = vpop.f32.mrb[42].mxu1 }
 0x15e   : > { %v2293_v18 = vpop.f32.mrb[43].mxu0  ;;  %v2333_v20 = vpop.f32.mrb[43].mxu1 }
 0x15f   : > { %v2294_v24 = vadd.f32 %v2293_v18, %v2292_v16  ;;  %v2334_v63 = vadd.f32 %v2333_v20, %v2332_v60  ;;  %v1374_v1 = vadd.f32 %v2331_v14, %v2291_v12 }
 0x161   : > { %v1377_v3 = vadd.f32 %v2334_v63, %v2294_v24 }
 0x163   : > { %v2295_v30 = vpop.f32.mrb[44].mxu0  ;;  %v2335_v5 = vpop.f32.mrb[44].mxu1 }
 0x164   : > { %v2296_v9 = vpop.f32.mrb[45].mxu0  ;;  %v2336_v11 = vpop.f32.mrb[45].mxu1 }
 0x165   : > { %v2297_v13 = vadd.f32 %v2296_v9, %v2295_v30  ;;  %v2337_v15 = vadd.f32 %v2336_v11, %v2335_v5  ;;  %v2298_v17 = vpop.f32.mrb[46].mxu0  ;;  %v2338_v19 = vpop.f32.mrb[46].mxu1 }
 0x166   : > { %v2299_v23 = vpop.f32.mrb[47].mxu0  ;;  %v2339_v29 = vpop.f32.mrb[47].mxu1 }
 0x167   : > { %v2300_v41 = vadd.f32 %v2299_v23, %v2298_v17  ;;  %v2340_v44 = vadd.f32 %v2339_v29, %v2338_v19  ;;  %v1382_v53 = vadd.f32 %v2337_v15, %v2297_v13 }
 0x169   : > { %v1385_v56 = vadd.f32 %v2340_v44, %v2300_v41 }
 0x16b   : > { %v2301_v33 = vpop.f32.mrb[48].mxu0  ;;  %v2341_v34 = vpop.f32.mrb[48].mxu1 }
 0x16c   : > { %v2302_v38 = vpop.f32.mrb[49].mxu0  ;;  %v2342_v42 = vpop.f32.mrb[49].mxu1 }
 0x16d   : > { %v2303_v39 = vadd.f32 %v2302_v38, %v2301_v33  ;;  %v2343_v49 = vadd.f32 %v2342_v42, %v2341_v34  ;;  %v2304_v54 = vpop.f32.mrb[50].mxu0  ;;  %v2344_v55 = vpop.f32.mrb[50].mxu1 }
 0x16e   : > { %v2305_v58 = vpop.f32.mrb[51].mxu0  ;;  %v2345_v59 = vpop.f32.mrb[51].mxu1 }
 0x16f   : > { %v2306_v61 = vadd.f32 %v2305_v58, %v2304_v54  ;;  %v2346_v52 = vadd.f32 %v2345_v59, %v2344_v55  ;;  %v1390_v2 = vadd.f32 %v2343_v49, %v2303_v39 }
 0x171   : > { %v1393_v4 = vadd.f32 %v2346_v52, %v2306_v61 }
 0x173   : > { %v2307_v6 = vpop.f32.mrb[52].mxu0  ;;  %v2347_v8 = vpop.f32.mrb[52].mxu1 }
 0x174   : > { %v2308_v12 = vpop.f32.mrb[53].mxu0  ;;  %v2348_v14 = vpop.f32.mrb[53].mxu1 }
 0x175   : > { %v2309_v16 = vadd.f32 %v2308_v12, %v2307_v6  ;;  %v2349_v60 = vadd.f32 %v2348_v14, %v2347_v8  ;;  %v2310_v18 = vpop.f32.mrb[54].mxu0  ;;  %v2350_v20 = vpop.f32.mrb[54].mxu1 }
 0x176   : > { %v2311_v24 = vpop.f32.mrb[55].mxu0  ;;  %v2351_v63 = vpop.f32.mrb[55].mxu1 }
 0x177   : > { %v2312_v30 = vadd.f32 %v2311_v24, %v2310_v18  ;;  %v2352_v5 = vadd.f32 %v2351_v63, %v2350_v20  ;;  %v1398_v9 = vadd.f32 %v2349_v60, %v2309_v16 }
 0x179   : > { %v1401_v11 = vadd.f32 %v2352_v5, %v2312_v30 }
 0x17b   : > { %v2523_v13 = vpop.f32.mrb[56].mxu0  ;;  %v2381_v15 = vpop.f32.mrb[56].mxu1 }
 0x17c   : > { %v3282_v17 = vadd.f32 %v2523_v13, %v1382_v53  ;;  %v1438_v19 = vpop.f32.mrb[57].mxu0  ;;  %v2382_v23 = vpop.f32.mrb[57].mxu1 }
 0x17d   : > { %v1439_v29 = vadd.f32 %v1438_v19, %v1374_v1  ;;  %v2524_v41 = vpop.f32.mrb[58].mxu0  ;;  %v2383_v44 = vadd.f32 %v2382_v23, %v2381_v15  ;;  %v2384_v33 = vpop.f32.mrb[58].mxu1 }
 0x17e   : > { %v3284_v34 = vadd.f32 %v2524_v41, %v1385_v56  ;;  %v1441_v38 = vpop.f32.mrb[59].mxu0  ;;  %v2385_v42 = vpop.f32.mrb[59].mxu1 }
 0x17f   : > { %v1442_v39 = vadd.f32 %v1441_v38, %v1377_v3  ;;  %v2386_v49 = vadd.f32 %v2385_v42, %v2384_v33 }
 0x183   : > { %v2527_v54 = vpop.f32.mrb[60].mxu0  ;;  %v2387_v55 = vpop.f32.mrb[60].mxu1 }
 0x184   : > { %v3286_v58 = vadd.f32 %v2527_v54, %v1398_v9  ;;  %v1454_v59 = vpop.f32.mrb[61].mxu0  ;;  %v2388_v61 = vpop.f32.mrb[61].mxu1 }
 0x185   : > { %v3288_v53 = vadd.f32 %v1454_v59, %v1390_v2  ;;  %v2528_v52 = vpop.f32.mrb[62].mxu0  ;;  %v2389_v6 = vadd.f32 %v2388_v61, %v2387_v55  ;;  %v2390_v1 = vpop.f32.mrb[62].mxu1 }
 0x186   : > { %v3290_v8 = vadd.f32 %v2528_v52, %v1401_v11  ;;  %v1457_v12 = vpop.f32.mrb[63].mxu0  ;;  %v2391_v56 = vpop.f32.mrb[63].mxu1 }
 0x187   : > { %v3292_v14 = vadd.f32 %v1457_v12, %v1393_v4  ;;  %v2392_v16 = vadd.f32 %v2391_v56, %v2390_v1 }
 0x18b   : > { %v2393_v3 = vpop.f32.mrb[64].mxu1 }
 0x18c   : > { %v2394_v60 = vpop.f32.mrb[65].mxu1 }
 0x18d   : > { %v2395_v18 = vadd.f32 %v2394_v60, %v2393_v3  ;;  %v2396_v20 = vpop.f32.mrb[66].mxu1 }
 0x18e   : > { %v2397_v24 = vpop.f32.mrb[67].mxu1 }
 0x18f   : > { %v2398_v63 = vadd.f32 %v2397_v24, %v2396_v20 }
 0x193   : > { %v2399_v30 = vpop.f32.mrb[68].mxu1 }
 0x194   : > { %v2400_v5 = vpop.f32.mrb[69].mxu1 }
 0x195   : > { %v3294_v2 = vadd.f32 %v2400_v5, %v2399_v30  ;;  %v2402_v9 = vpop.f32.mrb[70].mxu1 }
 0x196   : > { %v2403_v13 = vpop.f32.mrb[71].mxu1 }
 0x197   : > { %v3296_v15 = vadd.f32 %v2403_v13, %v2402_v9 }
 0x19b   : > { %v2421_v11 = vpop.f32.mrb[64].mxu0  ;;  %v2547_v19 = vpop.f32.mrb[72].mxu1 }
 0x19c   : > { %v2422_v23 = vpop.f32.mrb[65].mxu0  ;;  %v1761_v4 = vpop.f32.mrb[73].mxu1 }
 0x19d   : > { %v2423_v41 = vadd.f32 %v2422_v23, %v2421_v11  ;;  %v2424_v33 = vpop.f32.mrb[66].mxu0  ;;  %v2548_v38 = vpop.f32.mrb[74].mxu1 }
 0x19e   : > { %v2425_v42 = vpop.f32.mrb[67].mxu0  ;;  %v1764_v54 = vpop.f32.mrb[75].mxu1 }
 0x19f   : > { %v2426_v55 = vadd.f32 %v2425_v42, %v2424_v33  ;;  %v1697_v59 = vadd.f32 %v2423_v41, %v2383_v44  ;;  %v2046_v44 = vld [vmem:[%s3348_s2] ss:$0 sm:$0xff] }
 0x1a1   : > { %v1762_v61 = vadd.f32 %v1761_v4, %v1697_v59  ;;  %v1700_v52 = vadd.f32 %v2426_v55, %v2386_v49 }
 0x1a3   : > { %v1792_v1 = vmax.f32 %v1439_v29, %v1762_v61  ;;  %v1765_v12 = vadd.f32 %v1764_v54, %v1700_v52  ;;  %v2427_v56 = vpop.f32.mrb[68].mxu0  ;;  %v2551_v3 = vpop.f32.mrb[76].mxu1 }
 0x1a4   : > { %v2428_v60 = vpop.f32.mrb[69].mxu0  ;;  %v1777_v20 = vpop.f32.mrb[77].mxu1 }
 0x1a5   : > { %v1800_v24 = vmax.f32 %v1138_v26, %v1792_v1  ;;  %v1793_v30 = vmax.f32 %v1442_v39, %v1765_v12  ;;  %v2429_v5 = vadd.f32 %v2428_v60, %v2427_v56  ;;  %v2430_v9 = vpop.f32.mrb[70].mxu0  ;;  %v2552_v13 = vpop.f32.mrb[78].mxu1 }
 0x1a6   : > { %v2431_v11 = vpop.f32.mrb[71].mxu0  ;;  %v1780_v49 = vpop.f32.mrb[79].mxu1 }
 0x1a7   : > { %v1801_v29 = vmax.f32 %v1139_v7, %v1793_v30  ;;  %v1705_v23 = vadd.f32 %v2429_v5, %v2389_v6  ;;  %v2432_v4 = vadd.f32 %v2431_v11, %v2430_v9  ;;  %v1815_v41 = vadd.f32 %v2046_v44, %v1800_v24 }
 0x1a9   : > { %v1816_v27 = vadd.f32 %v2046_v44, %v1801_v29  ;;  %v1770_v22 = vadd.f32 %v2547_v19, %v1705_v23  ;;  %v1708_v26 = vadd.f32 %v2432_v4, %v2392_v16 }
 0x1ab   : > { %v2069_v39 = vpack.c.bf16 %v1816_v27, %v1815_v41  ;;  %v1794_v33 = vmax.f32 %v3282_v17, %v1770_v22  ;;  %v1773_v42 = vadd.f32 %v2548_v38, %v1708_v26  ;;  %v2433_v54 = vpop.f32.mrb[72].mxu0 }
 0x1ac   : > { %v2434_v55 = vpop.f32.mrb[73].mxu0 }
 0x1ad   : > { %2070 = vst [vmem:[%s3311_s28] sm:$0xff] %v2069_v39   ;;  %v1802_v46 = vmax.f32 %v1140_v31, %v1794_v33  ;;  %v1795_v28 = vmax.f32 %v3284_v34, %v1773_v42  ;;  %v2435_v7 = vadd.f32 %v2434_v55, %v2433_v54  ;;  %v2436_v6 = vpop.f32.mrb[74].mxu0 }
 0x1ae   : > { %v2437_v16 = vpop.f32.mrb[75].mxu0 }
 0x1af   : > { %v1803_v19 = vmax.f32 %v1141_v50, %v1795_v28  ;;  %v2438_v59 = vadd.f32 %v2437_v16, %v2436_v6  ;;  %v1713_v17 = vadd.f32 %v2435_v7, %v2395_v18  ;;  %v1817_v38 = vadd.f32 %v2046_v44, %v1802_v46 }
 0x1b1   : > { %v1818_v61 = vadd.f32 %v2046_v44, %v1803_v19  ;;  %v1778_v52 = vadd.f32 %v1777_v20, %v1713_v17  ;;  %v1716_v1 = vadd.f32 %v2438_v59, %v2398_v63 }
 0x1b3   : > { %v2074_v12 = vpack.c.bf16 %v1818_v61, %v1817_v38  ;;  %v1796_v21 = vmax.f32 %v3288_v53, %v1778_v52  ;;  %v1781_v25 = vadd.f32 %v1780_v49, %v1716_v1  ;;  %v2439_v31 = vpop.f32.mrb[76].mxu0 }
 0x1b4   : > { %v2440_v34 = vpop.f32.mrb[77].mxu0 }
 0x1b5   : > { %2086 = vst [vmem:[%s3311_s28 + $0x8] sm:$0xff] %v2074_v12   ;;  %v1804_v56 = vmax.f32 %v1142_v45, %v1796_v21  ;;  %v1797_v37 = vmax.f32 %v3292_v14, %v1781_v25  ;;  %v2441_v36 = vadd.f32 %v2440_v34, %v2439_v31  ;;  %v2442_v50 = vpop.f32.mrb[78].mxu0 }
 0x1b6   : > { %v2443_v18 = vpop.f32.mrb[79].mxu0 }
 0x1b7   : > { %v1805_v63 = vmax.f32 %v1143_v51, %v1797_v37  ;;  %v1721_v53 = vadd.f32 %v2441_v36, %v3294_v2  ;;  %v2444_v60 = vadd.f32 %v2443_v18, %v2442_v50  ;;  %v1819_v20 = vadd.f32 %v2046_v44, %v1804_v56 }
 0x1b9   : > { %v1820_v24 = vadd.f32 %v2046_v44, %v1805_v63  ;;  %v1786_v30 = vadd.f32 %v2551_v3, %v1721_v53  ;;  %v1724_v35 = vadd.f32 %v2444_v60, %v3296_v15 }
 0x1bb   : > { %v2079_v40 = vpack.c.bf16 %v1820_v24, %v1819_v20  ;;  %v1798_v45 = vmax.f32 %v3286_v58, %v1786_v30  ;;  %v1789_v14 = vadd.f32 %v2552_v13, %v1724_v35 }
 0x1bd   : > { %2087 = vst [vmem:[%s3311_s28 + $0x10] sm:$0xff] %v2079_v40   ;;  %v1806_v5 = vmax.f32 %v1144_v57, %v1798_v45  ;;  %v1799_v48 = vmax.f32 %v3290_v8, %v1789_v14 }
 0x1bf   : > { %v1807_v47 = vmax.f32 %v1145_v10, %v1799_v48  ;;  %v1821_v51 = vadd.f32 %v2046_v44, %v1806_v5 }
 0x1c1   : > { %v1822_v2 = vadd.f32 %v2046_v44, %v1807_v47 }
 0x1c3   : > { %v2084_v3 = vpack.c.bf16 %v1822_v2, %v1821_v51 }
 0x1c5   : > { %2088 = vst [vmem:[%s3311_s28 + $0x18] sm:$0xff] %v2084_v3  }
 0x1c6 PF: > { %s13_s12 = sadd.s32 1, %s2720_s12  }
 0x1c7   : > { %p10_p4 = scmp.ge.s32.totalorder %s13_s12, 4  }
 0x1c9   :  { %12 = sbr.rel (!%p10_p4) target bundleno = 1 (0x1), region = 62 }

// kernel: mnist_cnn2_forward.7
= control target key start
LH: loop header
LB: loop body
LE: loop exit
PB: predicated region body
PF: predicated region fallthrough
CT: control target
= control target key end

     0   :  { %v386_v36 = vlaneseq  ;;  %s685_s1 = inlined_call_operand.vmem [shape: bf16[512,128], index: 1, kind: input, shape index: {}]   ;;  %s686_s0 = inlined_call_operand.vmem [shape: bf16[16,512], index: 0, kind: input, shape index: {}]   ;;  %s687_s2 = inlined_call_operand.vmem [shape: f32[1,128], index: 2, kind: input, shape index: {}]   ;;  %s688_s3 = inlined_call_operand.vmem [shape: f32[16,128], index: 3, kind: output, shape index: {}]  }
   0x1   :  { %v498_v0 = vld [vmem:[%s685_s1 + $0x40] sm:$0xff]   ;;  %v502_v4 = vld [vmem:[%s685_s1 + $0x48] sm:$0xff]   ;;  %v506_v8 = vld [vmem:[%s685_s1 + $0x50] sm:$0xff]  }
   0x2   :  { %v499_v1 = vld [vmem:[%s685_s1 + $0xc0] sm:$0xff]   ;;  %454 = vmatprep.subr.bf16.mxu0 %v498_v0  ;;  %v503_v5 = vld [vmem:[%s685_s1 + $0xc8] sm:$0xff]   ;;  %v507_v9 = vld [vmem:[%s685_s1 + $0xd0] sm:$0xff]   ;;  %v387_v47 = vand.u32 127, %v386_v36 }
   0x3   :  { %v500_v2 = vld [vmem:[%s685_s1] sm:$0xff]   ;;  %476 = vmatprep.subr.bf16.mxu1 %v499_v1  ;;  %v504_v6 = vld [vmem:[%s685_s1 + $0x8] sm:$0xff]   ;;  %v508_v10 = vld [vmem:[%s685_s1 + $0x10] sm:$0xff]  }
   0x4   :  { %v501_v3 = vld [vmem:[%s685_s1 + $0x80] sm:$0xff]   ;;  %455 = vmatpush3.bf16.msra.mxu0 %v500_v2  ;;  %v505_v7 = vld [vmem:[%s685_s1 + $0x88] sm:$0xff]   ;;  %v509_v11 = vld [vmem:[%s685_s1 + $0x90] sm:$0xff]   ;;  %vm388_vm0 = vcmp.lt.s32.totalorder %v387_v47, 10 }
   0x5   :  { %477 = vmatpush3.bf16.msra.mxu1 %v501_v3  ;;  %456 = vmatprep.subr.bf16.mxu0 %v502_v4  ;;  %v510_v12 = vld [vmem:[%s685_s1 + $0x58] sm:$0xff]   ;;  %v514_v16 = vld [vmem:[%s685_s1 + $0x60] sm:$0xff]   ;;  %v518_v20 = vld [vmem:[%s685_s1 + $0x68] sm:$0xff]  }
   0x6   :  { %478 = vmatprep.subr.bf16.mxu1 %v503_v5  ;;  %v511_v13 = vld [vmem:[%s685_s1 + $0xd8] sm:$0xff]   ;;  %v515_v17 = vld [vmem:[%s685_s1 + $0xe0] sm:$0xff]   ;;  %v519_v21 = vld [vmem:[%s685_s1 + $0xe8] sm:$0xff]  }
   0x7   :  { %v512_v14 = vld [vmem:[%s685_s1 + $0x18] sm:$0xff]   ;;  %v516_v18 = vld [vmem:[%s685_s1 + $0x20] sm:$0xff]   ;;  %v520_v22 = vld [vmem:[%s685_s1 + $0x28] sm:$0xff]  }
   0x8   :  { %457 = vmatpush3.bf16.msra.mxu0 %v504_v6  ;;  %v513_v15 = vld [vmem:[%s685_s1 + $0x98] sm:$0xff]   ;;  %v517_v19 = vld [vmem:[%s685_s1 + $0xa0] sm:$0xff]   ;;  %v521_v23 = vld [vmem:[%s685_s1 + $0xa8] sm:$0xff]  }
   0x9   :  { %479 = vmatpush3.bf16.msra.mxu1 %v505_v7  ;;  %458 = vmatprep.subr.bf16.mxu0 %v506_v8  ;;  %v522_v24 = vld [vmem:[%s685_s1 + $0x70] sm:$0xff]   ;;  %v526_v28 = vld [vmem:[%s685_s1 + $0x78] sm:$0xff]   ;;  %v417_v39 = vld [vmem:[%s687_s2] ss:$0 sm:$0xff] }
   0xa   :  { %480 = vmatprep.subr.bf16.mxu1 %v507_v9  ;;  %v523_v25 = vld [vmem:[%s685_s1 + $0xf0] sm:$0xff]   ;;  %v527_v29 = vld [vmem:[%s685_s1 + $0xf8] sm:$0xff]  }
   0xb   :  { %v524_v26 = vld [vmem:[%s685_s1 + $0x30] sm:$0xff]   ;;  %v528_v30 = vld [vmem:[%s685_s1 + $0x38] sm:$0xff]  }
   0xc   :  { %459 = vmatpush3.bf16.msra.mxu0 %v508_v10  ;;  %v525_v27 = vld [vmem:[%s685_s1 + $0xb0] sm:$0xff]   ;;  %v529_v31 = vld [vmem:[%s685_s1 + $0xb8] sm:$0xff]  }
   0xd   :  { %481 = vmatpush3.bf16.msra.mxu1 %v509_v11  ;;  %460 = vmatprep.subr.bf16.mxu0 %v510_v12  ;;  %v530_v32 = vld [vmem:[%s686_s0] ss:$16 sps:$4 sm:$0xff]   ;;  %v532_v33 = vld [vmem:[%s686_s0 + $0x4] ss:$16 sps:$4 sm:$0xff]   ;;  %v533_v34 = vld [vmem:[%s686_s0 + $0x8] ss:$16 sps:$4 sm:$0xff]  }
   0xe   :  { %482 = vmatprep.subr.bf16.mxu1 %v511_v13  ;;  %v535_v35 = vld [vmem:[%s686_s0 + $0xc] ss:$16 sps:$4 sm:$0xff]   ;;  %334 = vmatprep.mubr.bf16.mxu0 %v532_v33 }
   0xf   :  { %375 = vmatprep.mubr.bf16.mxu1 %v535_v35 }
  0x10   :  { %461 = vmatpush3.bf16.msra.mxu0 %v512_v14 }
  0x11   :  { %483 = vmatpush3.bf16.msra.mxu1 %v513_v15  ;;  %462 = vmatprep.subr.bf16.mxu0 %v514_v16 }
  0x12   :  { %484 = vmatprep.subr.bf16.mxu1 %v515_v17 }
  0x14   :  { %463 = vmatpush3.bf16.msra.mxu0 %v516_v18 }
  0x15   :  { %485 = vmatpush3.bf16.msra.mxu1 %v517_v19  ;;  %464 = vmatprep.subr.bf16.mxu0 %v518_v20 }
  0x16   :  { %486 = vmatprep.subr.bf16.mxu1 %v519_v21 }
  0x18   :  { %465 = vmatpush3.bf16.msra.mxu0 %v520_v22 }
  0x19   :  { %487 = vmatpush3.bf16.msra.mxu1 %v521_v23  ;;  %466 = vmatprep.subr.bf16.mxu0 %v522_v24 }
  0x1a   :  { %488 = vmatprep.subr.bf16.mxu1 %v523_v25 }
  0x1c   :  { %467 = vmatpush3.bf16.msra.mxu0 %v524_v26 }
  0x1d   :  { %489 = vmatpush3.bf16.msra.mxu1 %v525_v27  ;;  %468 = vmatprep.subr.bf16.mxu0 %v526_v28 }
  0x1e   :  { %490 = vmatprep.subr.bf16.mxu1 %v527_v29 }
  0x20   :  { %469 = vmatpush3.bf16.msra.mxu0 %v528_v30 }
  0x21   :  { %491 = vmatpush3.bf16.msra.mxu1 %v529_v31 }
  0x23   :  { %335 = vmatmul.mubr.bf16.vlgmr.msra.gmra.mrb[0].mxu0 %v530_v32 }
  0x24   :  { %376 = vmatmul.mubr.bf16.vlgmr.msra.gmra.mrb[0].mxu1 %v533_v34 }
  0xf6   :  { %v470_v37 = vpop.f32.mrb[0].mxu0 }
  0xf7   :  { %v492_v38 = vpop.f32.mrb[0].mxu1  ;;  %v471_v40 = vpop.f32.mrb[1].mxu0 }
  0xf8   :  { %v472_v41 = vadd.f32 %v471_v40, %v470_v37  ;;  %v493_v42 = vpop.f32.mrb[1].mxu1  ;;  %v473_v43 = vpop.f32.mrb[2].mxu0 }
  0xf9   :  { %v494_v44 = vadd.f32 %v493_v42, %v492_v38  ;;  %v495_v45 = vpop.f32.mrb[2].mxu1  ;;  %v474_v46 = vpop.f32.mrb[3].mxu0 }
  0xfa   :  { %v337_v48 = vadd.f32 %v472_v41, %v417_v39  ;;  %v475_v49 = vadd.f32 %v474_v46, %v473_v43  ;;  %v496_v50 = vpop.f32.mrb[3].mxu1 }
  0xfb   :  { %v497_v51 = vadd.f32 %v496_v50, %v495_v45 }
  0xfc   :  { %v378_v52 = vadd.f32 %v494_v44, %v337_v48  ;;  %v340_v53 = vadd.f32 %v475_v49, %v417_v39 }
  0xfe   :  { %v381_v54 = vadd.f32 %v497_v51, %v340_v53  ;;  %v384_v55 = vmax.f32 %v378_v52, 0.0 }
 0x100   :  { %v389_v56 = vsel %vm388_vm0, %v384_v55, -1e+30  ;;  %v385_v57 = vmax.f32 %v381_v54, 0.0 }
 0x101   :  { %391 = vmax.xlane.f32.xlu0 %v389_v56 }
 0x102   :  { %v390_v58 = vsel %vm388_vm0, %v385_v57, -1e+30 }
 0x105   :  { %393 = vmax.xlane.f32.xlu0 %v390_v58 }
 0x18e   :  { %v392_v59 = vpop.xlane.xlu0 %391 }
 0x18f   :  { %v395_v60 = vsub.f32 %v389_v56, %v392_v59 }
 0x191   :  { %v397_v61 = vmul.f32 1.442695, %v395_v60 }
 0x192   :  { %v394_v62 = vpop.xlane.xlu0 %393 }
 0x193   :  { %536 = vpow2.f32 %v397_v61  ;;  %v396_v63 = vsub.f32 %v390_v58, %v394_v62 }
 0x195   :  { %v399_v0 = vmul.f32 1.442695, %v396_v63 }
 0x197   :  { %538 = vpow2.f32 %v399_v0 }
 0x19d   :  { %v537_v1 = vpop.eup %536 }
 0x19e   :  { %v401_v2 = vsel %vm388_vm0, %v537_v1, 0.0 }
 0x19f   :  { %403 = vadd.xlane.f32.xlu1 %v401_v2 }
 0x1a1   :  { %v539_v3 = vpop.eup %538 }
 0x1a2   :  { %v402_v4 = vsel %vm388_vm0, %v539_v3, 0.0 }
 0x1a3   :  { %405 = vadd.xlane.f32.xlu1 %v402_v4 }
 0x22c   :  { %v404_v5 = vpop.xlane.xlu1 %403 }
 0x22d   :  { %540 = vrcp.f32 %v404_v5 }
 0x230   :  { %v406_v6 = vpop.xlane.xlu1 %405 }
 0x231   :  { %542 = vrcp.f32 %v406_v6 }
 0x237   :  { %v541_v7 = vpop.eup %540 }
 0x238   :  { %v408_v8 = vmul.f32 %v541_v7, %v401_v2 }
 0x23a   :  { %411 = vst [vmem:[%s688_s3] sm:$0xff] %v408_v8 }
 0x23b   :  { %v543_v9 = vpop.eup %542 }
 0x23c   :  { %v410_v10 = vmul.f32 %v543_v9, %v402_v4 }
 0x23e   :  { %412 = vst [vmem:[%s688_s3 + $0x8] sm:$0xff] %v410_v10 }

// kernel: mnist_cnn2_forward.6
= control target key start
LH: loop header
LB: loop body
LE: loop exit
PB: predicated region body
PF: predicated region fallthrough
CT: control target
= control target key end

     0   :  { %s15024_s12 = smov 0   ;;  %s15026_s13 = smov 0   ;;  %s17597_s0 = inlined_call_operand.vmem [shape: bf16[16,6272], index: 0, kind: input, shape index: {}]   ;;  %s17598_s1 = inlined_call_operand.vmem [shape: bf16[6272,512], index: 1, kind: input, shape index: {}]   ;;  %s17599_s2 = inlined_call_operand.vmem [shape: f32[1,512], index: 2, kind: input, shape index: {}]   ;;  %s17600_s3 = inlined_call_operand.vmem [shape: bf16[16,512], index: 3, kind: output, shape index: {}]  }
   0x1   :  { %s15028_s14 = smov 0  }
   0x2 LB: > { %s15040_s15 = sadd.s32 4294967295, %s15001_s14   ;;  %s15043_s16 = sadd.s32 1, %s15001_s14   ;;  %s15001_s14 = sphi %s15028_s14, %s17604_s14   ;;  %s14997_s13 = sphi %s15026_s13, %s17603_s13   ;;  %s14993_s12 = sphi %s15024_s12, %s17602_s12  }
   0x3   : > { %s38_s17 = ssub.s32 %s15001_s14, %s15043_s16  ;;  %s41_s18 = sadd.s32 1, %s14997_s13 }
   0x4   : > { %p39_p0 = scmp.eq.s32.totalorder %s38_s17, 0  ;;  %p48_p1 = scmp.ne.s32.totalorder %s14997_s13, %s14993_s12 }
   0x5   : > { %p49_p2 = scmp.eq.s32.totalorder %s15001_s14, 0  ;;  %p104_p3 = scmp.eq.s32.totalorder %s15040_s15, 1 }
   0x6   : > { %s15053_s19 = scalar_select %p39_p0, %s14997_s13, %s41_s18  }
   0x7   : > { %p50_p4 = por %p49_p2, %p48_p1  ;;  %p15055_p5 = por %p104_p3, %p48_p1 }
   0x8   : > { %p12753_p6 = scmp.ge.s32.totalorder %s15001_s14, 2 }
   0xa   : > { %129 = sbr.rel (%p12753_p6) target bundleno = 413 (0x19d), region = 20 }
  0x11   : > { %132 = sbr.rel (!%p50_p4) target bundleno = 413 (0x19d), region = 24  ;;  %s134_s21 = sand.u32 (%p50_p4), 1, %s14997_s13  }
  0x12   : > { %s13599_s22 = sshll.u32 (%p50_p4), %s15001_s14, 3  ;;  %s13703_s23 = smul.u32 (%p50_p4), 6272, %s134_s21 }
  0x13   : > { %s15065_s26 = scalar_lea.vmem (%p50_p4), %s17598_s1, %s13599_s22 }
  0x14   : > { %v1736_v0 = vld [vmem:[%s15065_s26] sm:$0xff] (%p50_p4)  ;;  %v1738_v1 = vld [vmem:[%s15065_s26 + $0x10] sm:$0xff] (%p50_p4)  ;;  %s15073_s27 = scalar_lea.vmem (%p50_p4), [#allocation2], %s13703_s23 }
  0x15   : > { %v1740_v2 = vld [vmem:[%s15065_s26 + $0x20] sm:$0xff] (%p50_p4)  ;;  %v1742_v3 = vld [vmem:[%s15065_s26 + $0x30] sm:$0xff] (%p50_p4)  ;;  %1737 = vst [vmem:[%s15073_s27] sm:$0xff] (%p50_p4), %v1736_v0  ;;  %1739 = vst [vmem:[%s15073_s27 + $0x8] sm:$0xff] (%p50_p4), %v1738_v1 }
  0x16   : > { %v1744_v4 = vld [vmem:[%s15065_s26 + $0x40] sm:$0xff] (%p50_p4)  ;;  %v1746_v5 = vld [vmem:[%s15065_s26 + $0x50] sm:$0xff] (%p50_p4)  ;;  %1741 = vst [vmem:[%s15073_s27 + $0x10] sm:$0xff] (%p50_p4), %v1740_v2  ;;  %1743 = vst [vmem:[%s15073_s27 + $0x18] sm:$0xff] (%p50_p4), %v1742_v3 }
  0x17   : > { %1745 = vst [vmem:[%s15073_s27 + $0x20] sm:$0xff] (%p50_p4), %v1744_v4  ;;  %1747 = vst [vmem:[%s15073_s27 + $0x28] sm:$0xff] (%p50_p4), %v1746_v5  ;;  %v1748_v6 = vld [vmem:[%s15065_s26 + $0x60] sm:$0xff] (%p50_p4)  ;;  %v1750_v7 = vld [vmem:[%s15065_s26 + $0x70] sm:$0xff] (%p50_p4) }
  0x18   : > { %v1752_v8 = vld [vmem:[%s15065_s26 + $0x80] sm:$0xff]  ;;  %1749 = vst [vmem:[%s15073_s27 + $0x30] sm:$0xff] %v1748_v6  ;;  %1751 = vst [vmem:[%s15073_s27 + $0x38] sm:$0xff] %v1750_v7  ;;  %v1754_v9 = vld [vmem:[%s15065_s26 + $0x90] sm:$0xff] }
  0x19   : > { %1753 = vst [vmem:[%s15073_s27 + $0x40] sm:$0xff] %v1752_v8  ;;  %v1756_v10 = vld [vmem:[%s15065_s26 + $0xa0] sm:$0xff]  ;;  %v1758_v11 = vld [vmem:[%s15065_s26 + $0xb0] sm:$0xff]  ;;  %1755 = vst [vmem:[%s15073_s27 + $0x48] sm:$0xff] %v1754_v9 }
  0x1a   : > { %1757 = vst [vmem:[%s15073_s27 + $0x50] sm:$0xff] %v1756_v10  ;;  %1759 = vst [vmem:[%s15073_s27 + $0x58] sm:$0xff] %v1758_v11  ;;  %v1760_v12 = vld [vmem:[%s15065_s26 + $0xc0] sm:$0xff]  ;;  %v1762_v13 = vld [vmem:[%s15065_s26 + $0xd0] sm:$0xff] }
  0x1b   : > { %v1764_v14 = vld [vmem:[%s15065_s26 + $0xe0] sm:$0xff]  ;;  %1761 = vst [vmem:[%s15073_s27 + $0x60] sm:$0xff] %v1760_v12  ;;  %1763 = vst [vmem:[%s15073_s27 + $0x68] sm:$0xff] %v1762_v13  ;;  %v1766_v15 = vld [vmem:[%s15065_s26 + $0xf0] sm:$0xff] }
  0x1c   : > { %1765 = vst [vmem:[%s15073_s27 + $0x70] sm:$0xff] %v1764_v14  ;;  %v1768_v16 = vld [vmem:[%s15065_s26 + $0x100] sm:$0xff]  ;;  %v1770_v17 = vld [vmem:[%s15065_s26 + $0x110] sm:$0xff]  ;;  %1767 = vst [vmem:[%s15073_s27 + $0x78] sm:$0xff] %v1766_v15 }
  0x1d   : > { %1769 = vst [vmem:[%s15073_s27 + $0x80] sm:$0xff] %v1768_v16  ;;  %1771 = vst [vmem:[%s15073_s27 + $0x88] sm:$0xff] %v1770_v17  ;;  %v1772_v18 = vld [vmem:[%s15065_s26 + $0x120] sm:$0xff]  ;;  %v1774_v19 = vld [vmem:[%s15065_s26 + $0x130] sm:$0xff] }
  0x1e   : > { %v1776_v20 = vld [vmem:[%s15065_s26 + $0x140] sm:$0xff]  ;;  %1773 = vst [vmem:[%s15073_s27 + $0x90] sm:$0xff] %v1772_v18  ;;  %1775 = vst [vmem:[%s15073_s27 + $0x98] sm:$0xff] %v1774_v19  ;;  %v1778_v21 = vld [vmem:[%s15065_s26 + $0x150] sm:$0xff] }
  0x1f   : > { %1777 = vst [vmem:[%s15073_s27 + $0xa0] sm:$0xff] %v1776_v20  ;;  %v1780_v22 = vld [vmem:[%s15065_s26 + $0x160] sm:$0xff]  ;;  %v1782_v23 = vld [vmem:[%s15065_s26 + $0x170] sm:$0xff]  ;;  %1779 = vst [vmem:[%s15073_s27 + $0xa8] sm:$0xff] %v1778_v21 }
  0x20   : > { %1781 = vst [vmem:[%s15073_s27 + $0xb0] sm:$0xff] %v1780_v22  ;;  %1783 = vst [vmem:[%s15073_s27 + $0xb8] sm:$0xff] %v1782_v23  ;;  %v1784_v24 = vld [vmem:[%s15065_s26 + $0x180] sm:$0xff]  ;;  %v1786_v25 = vld [vmem:[%s15065_s26 + $0x190] sm:$0xff] }
  0x21   : > { %v1788_v26 = vld [vmem:[%s15065_s26 + $0x1a0] sm:$0xff]  ;;  %1785 = vst [vmem:[%s15073_s27 + $0xc0] sm:$0xff] %v1784_v24  ;;  %1787 = vst [vmem:[%s15073_s27 + $0xc8] sm:$0xff] %v1786_v25  ;;  %v1790_v27 = vld [vmem:[%s15065_s26 + $0x1b0] sm:$0xff] }
  0x22   : > { %1789 = vst [vmem:[%s15073_s27 + $0xd0] sm:$0xff] %v1788_v26  ;;  %v1792_v28 = vld [vmem:[%s15065_s26 + $0x1c0] sm:$0xff]  ;;  %v1794_v29 = vld [vmem:[%s15065_s26 + $0x1d0] sm:$0xff]  ;;  %1791 = vst [vmem:[%s15073_s27 + $0xd8] sm:$0xff] %v1790_v27 }
  0x23   : > { %1793 = vst [vmem:[%s15073_s27 + $0xe0] sm:$0xff] %v1792_v28  ;;  %1795 = vst [vmem:[%s15073_s27 + $0xe8] sm:$0xff] %v1794_v29  ;;  %v1796_v30 = vld [vmem:[%s15065_s26 + $0x1e0] sm:$0xff]  ;;  %v1798_v31 = vld [vmem:[%s15065_s26 + $0x1f0] sm:$0xff] }
  0x24   : > { %v1800_v32 = vld [vmem:[%s15065_s26 + $0x200] sm:$0xff]  ;;  %1797 = vst [vmem:[%s15073_s27 + $0xf0] sm:$0xff] %v1796_v30  ;;  %1799 = vst [vmem:[%s15073_s27 + $0xf8] sm:$0xff] %v1798_v31  ;;  %v1802_v33 = vld [vmem:[%s15065_s26 + $0x210] sm:$0xff] }
  0x25   : > { %1801 = vst [vmem:[%s15073_s27 + $0x100] sm:$0xff] %v1800_v32  ;;  %v1804_v34 = vld [vmem:[%s15065_s26 + $0x220] sm:$0xff]  ;;  %v1806_v35 = vld [vmem:[%s15065_s26 + $0x230] sm:$0xff]  ;;  %1803 = vst [vmem:[%s15073_s27 + $0x108] sm:$0xff] %v1802_v33 }
  0x26   : > { %1805 = vst [vmem:[%s15073_s27 + $0x110] sm:$0xff] %v1804_v34  ;;  %1807 = vst [vmem:[%s15073_s27 + $0x118] sm:$0xff] %v1806_v35  ;;  %v1808_v36 = vld [vmem:[%s15065_s26 + $0x240] sm:$0xff]  ;;  %v1810_v37 = vld [vmem:[%s15065_s26 + $0x250] sm:$0xff] }
  0x27   : > { %v1812_v38 = vld [vmem:[%s15065_s26 + $0x260] sm:$0xff]  ;;  %1809 = vst [vmem:[%s15073_s27 + $0x120] sm:$0xff] %v1808_v36  ;;  %1811 = vst [vmem:[%s15073_s27 + $0x128] sm:$0xff] %v1810_v37  ;;  %v1814_v39 = vld [vmem:[%s15065_s26 + $0x270] sm:$0xff] }
  0x28   : > { %1813 = vst [vmem:[%s15073_s27 + $0x130] sm:$0xff] %v1812_v38  ;;  %v1816_v40 = vld [vmem:[%s15065_s26 + $0x280] sm:$0xff]  ;;  %v1818_v41 = vld [vmem:[%s15065_s26 + $0x290] sm:$0xff]  ;;  %1815 = vst [vmem:[%s15073_s27 + $0x138] sm:$0xff] %v1814_v39 }
  0x29   : > { %1817 = vst [vmem:[%s15073_s27 + $0x140] sm:$0xff] %v1816_v40  ;;  %1819 = vst [vmem:[%s15073_s27 + $0x148] sm:$0xff] %v1818_v41  ;;  %v1820_v42 = vld [vmem:[%s15065_s26 + $0x2a0] sm:$0xff]  ;;  %v1822_v43 = vld [vmem:[%s15065_s26 + $0x2b0] sm:$0xff] }
  0x2a   : > { %v1824_v44 = vld [vmem:[%s15065_s26 + $0x2c0] sm:$0xff]  ;;  %1821 = vst [vmem:[%s15073_s27 + $0x150] sm:$0xff] %v1820_v42  ;;  %1823 = vst [vmem:[%s15073_s27 + $0x158] sm:$0xff] %v1822_v43  ;;  %v1826_v45 = vld [vmem:[%s15065_s26 + $0x2d0] sm:$0xff] }
  0x2b   : > { %1825 = vst [vmem:[%s15073_s27 + $0x160] sm:$0xff] %v1824_v44  ;;  %v1828_v46 = vld [vmem:[%s15065_s26 + $0x2e0] sm:$0xff]  ;;  %v1830_v47 = vld [vmem:[%s15065_s26 + $0x2f0] sm:$0xff]  ;;  %1827 = vst [vmem:[%s15073_s27 + $0x168] sm:$0xff] %v1826_v45 }
  0x2c   : > { %1829 = vst [vmem:[%s15073_s27 + $0x170] sm:$0xff] %v1828_v46  ;;  %1831 = vst [vmem:[%s15073_s27 + $0x178] sm:$0xff] %v1830_v47  ;;  %v1832_v48 = vld [vmem:[%s15065_s26 + $0x300] sm:$0xff]  ;;  %v1834_v49 = vld [vmem:[%s15065_s26 + $0x310] sm:$0xff] }
  0x2d   : > { %v1836_v50 = vld [vmem:[%s15065_s26 + $0x320] sm:$0xff]  ;;  %1833 = vst [vmem:[%s15073_s27 + $0x180] sm:$0xff] %v1832_v48  ;;  %1835 = vst [vmem:[%s15073_s27 + $0x188] sm:$0xff] %v1834_v49  ;;  %v1838_v51 = vld [vmem:[%s15065_s26 + $0x330] sm:$0xff] }
  0x2e   : > { %1837 = vst [vmem:[%s15073_s27 + $0x190] sm:$0xff] %v1836_v50  ;;  %v1840_v52 = vld [vmem:[%s15065_s26 + $0x340] sm:$0xff]  ;;  %v1842_v53 = vld [vmem:[%s15065_s26 + $0x350] sm:$0xff]  ;;  %1839 = vst [vmem:[%s15073_s27 + $0x198] sm:$0xff] %v1838_v51 }
  0x2f   : > { %1841 = vst [vmem:[%s15073_s27 + $0x1a0] sm:$0xff] %v1840_v52  ;;  %1843 = vst [vmem:[%s15073_s27 + $0x1a8] sm:$0xff] %v1842_v53  ;;  %v1844_v54 = vld [vmem:[%s15065_s26 + $0x360] sm:$0xff]  ;;  %v1846_v55 = vld [vmem:[%s15065_s26 + $0x370] sm:$0xff] }
  0x30   : > { %v1848_v56 = vld [vmem:[%s15065_s26 + $0x380] sm:$0xff]  ;;  %1845 = vst [vmem:[%s15073_s27 + $0x1b0] sm:$0xff] %v1844_v54  ;;  %1847 = vst [vmem:[%s15073_s27 + $0x1b8] sm:$0xff] %v1846_v55  ;;  %v1850_v57 = vld [vmem:[%s15065_s26 + $0x390] sm:$0xff] }
  0x31   : > { %1849 = vst [vmem:[%s15073_s27 + $0x1c0] sm:$0xff] %v1848_v56  ;;  %v1852_v58 = vld [vmem:[%s15065_s26 + $0x3a0] sm:$0xff]  ;;  %v1854_v59 = vld [vmem:[%s15065_s26 + $0x3b0] sm:$0xff]  ;;  %1851 = vst [vmem:[%s15073_s27 + $0x1c8] sm:$0xff] %v1850_v57 }
  0x32   : > { %1853 = vst [vmem:[%s15073_s27 + $0x1d0] sm:$0xff] %v1852_v58  ;;  %1855 = vst [vmem:[%s15073_s27 + $0x1d8] sm:$0xff] %v1854_v59  ;;  %v1856_v60 = vld [vmem:[%s15065_s26 + $0x3c0] sm:$0xff]  ;;  %v1858_v61 = vld [vmem:[%s15065_s26 + $0x3d0] sm:$0xff] }
  0x33   : > { %v1860_v62 = vld [vmem:[%s15065_s26 + $0x3e0] sm:$0xff]  ;;  %1857 = vst [vmem:[%s15073_s27 + $0x1e0] sm:$0xff] %v1856_v60  ;;  %1859 = vst [vmem:[%s15073_s27 + $0x1e8] sm:$0xff] %v1858_v61  ;;  %v1862_v63 = vld [vmem:[%s15065_s26 + $0x3f0] sm:$0xff] }
  0x34   : > { %1861 = vst [vmem:[%s15073_s27 + $0x1f0] sm:$0xff] %v1860_v62  ;;  %v1864_v0 = vld [vmem:[%s15065_s26 + $0x400] sm:$0xff]  ;;  %v1866_v1 = vld [vmem:[%s15065_s26 + $0x410] sm:$0xff]  ;;  %1863 = vst [vmem:[%s15073_s27 + $0x1f8] sm:$0xff] %v1862_v63 }
  0x35   : > { %1865 = vst [vmem:[%s15073_s27 + $0x200] sm:$0xff] %v1864_v0  ;;  %1867 = vst [vmem:[%s15073_s27 + $0x208] sm:$0xff] %v1866_v1  ;;  %v1868_v2 = vld [vmem:[%s15065_s26 + $0x420] sm:$0xff]  ;;  %v1870_v3 = vld [vmem:[%s15065_s26 + $0x430] sm:$0xff] }
  0x36   : > { %v1872_v4 = vld [vmem:[%s15065_s26 + $0x440] sm:$0xff]  ;;  %1869 = vst [vmem:[%s15073_s27 + $0x210] sm:$0xff] %v1868_v2  ;;  %1871 = vst [vmem:[%s15073_s27 + $0x218] sm:$0xff] %v1870_v3  ;;  %v1874_v5 = vld [vmem:[%s15065_s26 + $0x450] sm:$0xff] }
  0x37   : > { %1873 = vst [vmem:[%s15073_s27 + $0x220] sm:$0xff] %v1872_v4  ;;  %v1876_v6 = vld [vmem:[%s15065_s26 + $0x460] sm:$0xff]  ;;  %v1878_v7 = vld [vmem:[%s15065_s26 + $0x470] sm:$0xff]  ;;  %1875 = vst [vmem:[%s15073_s27 + $0x228] sm:$0xff] %v1874_v5 }
  0x38   : > { %1877 = vst [vmem:[%s15073_s27 + $0x230] sm:$0xff] %v1876_v6  ;;  %1879 = vst [vmem:[%s15073_s27 + $0x238] sm:$0xff] %v1878_v7  ;;  %v1880_v8 = vld [vmem:[%s15065_s26 + $0x480] sm:$0xff]  ;;  %v1882_v9 = vld [vmem:[%s15065_s26 + $0x490] sm:$0xff] }
  0x39   : > { %v1884_v10 = vld [vmem:[%s15065_s26 + $0x4a0] sm:$0xff]  ;;  %1881 = vst [vmem:[%s15073_s27 + $0x240] sm:$0xff] %v1880_v8  ;;  %1883 = vst [vmem:[%s15073_s27 + $0x248] sm:$0xff] %v1882_v9  ;;  %v1886_v11 = vld [vmem:[%s15065_s26 + $0x4b0] sm:$0xff] }
  0x3a   : > { %1885 = vst [vmem:[%s15073_s27 + $0x250] sm:$0xff] %v1884_v10  ;;  %v1888_v12 = vld [vmem:[%s15065_s26 + $0x4c0] sm:$0xff]  ;;  %v1890_v13 = vld [vmem:[%s15065_s26 + $0x4d0] sm:$0xff]  ;;  %1887 = vst [vmem:[%s15073_s27 + $0x258] sm:$0xff] %v1886_v11 }
  0x3b   : > { %1889 = vst [vmem:[%s15073_s27 + $0x260] sm:$0xff] %v1888_v12  ;;  %1891 = vst [vmem:[%s15073_s27 + $0x268] sm:$0xff] %v1890_v13  ;;  %v1892_v14 = vld [vmem:[%s15065_s26 + $0x4e0] sm:$0xff]  ;;  %v1894_v15 = vld [vmem:[%s15065_s26 + $0x4f0] sm:$0xff] }
  0x3c   : > { %v1896_v16 = vld [vmem:[%s15065_s26 + $0x500] sm:$0xff]  ;;  %1893 = vst [vmem:[%s15073_s27 + $0x270] sm:$0xff] %v1892_v14  ;;  %1895 = vst [vmem:[%s15073_s27 + $0x278] sm:$0xff] %v1894_v15  ;;  %v1898_v17 = vld [vmem:[%s15065_s26 + $0x510] sm:$0xff] }
  0x3d   : > { %1897 = vst [vmem:[%s15073_s27 + $0x280] sm:$0xff] %v1896_v16  ;;  %v1900_v18 = vld [vmem:[%s15065_s26 + $0x520] sm:$0xff]  ;;  %v1902_v19 = vld [vmem:[%s15065_s26 + $0x530] sm:$0xff]  ;;  %1899 = vst [vmem:[%s15073_s27 + $0x288] sm:$0xff] %v1898_v17 }
  0x3e   : > { %1901 = vst [vmem:[%s15073_s27 + $0x290] sm:$0xff] %v1900_v18  ;;  %1903 = vst [vmem:[%s15073_s27 + $0x298] sm:$0xff] %v1902_v19  ;;  %v1904_v20 = vld [vmem:[%s15065_s26 + $0x540] sm:$0xff]  ;;  %v1906_v21 = vld [vmem:[%s15065_s26 + $0x550] sm:$0xff] }
  0x3f   : > { %v1908_v22 = vld [vmem:[%s15065_s26 + $0x560] sm:$0xff]  ;;  %1905 = vst [vmem:[%s15073_s27 + $0x2a0] sm:$0xff] %v1904_v20  ;;  %1907 = vst [vmem:[%s15073_s27 + $0x2a8] sm:$0xff] %v1906_v21  ;;  %v1910_v23 = vld [vmem:[%s15065_s26 + $0x570] sm:$0xff] }
  0x40   : > { %1909 = vst [vmem:[%s15073_s27 + $0x2b0] sm:$0xff] %v1908_v22  ;;  %v1912_v24 = vld [vmem:[%s15065_s26 + $0x580] sm:$0xff]  ;;  %v1914_v25 = vld [vmem:[%s15065_s26 + $0x590] sm:$0xff]  ;;  %1911 = vst [vmem:[%s15073_s27 + $0x2b8] sm:$0xff] %v1910_v23 }
  0x41   : > { %1913 = vst [vmem:[%s15073_s27 + $0x2c0] sm:$0xff] %v1912_v24  ;;  %1915 = vst [vmem:[%s15073_s27 + $0x2c8] sm:$0xff] %v1914_v25  ;;  %v1916_v26 = vld [vmem:[%s15065_s26 + $0x5a0] sm:$0xff]  ;;  %v1918_v27 = vld [vmem:[%s15065_s26 + $0x5b0] sm:$0xff] }
  0x42   : > { %v1920_v28 = vld [vmem:[%s15065_s26 + $0x5c0] sm:$0xff]  ;;  %1917 = vst [vmem:[%s15073_s27 + $0x2d0] sm:$0xff] %v1916_v26  ;;  %1919 = vst [vmem:[%s15073_s27 + $0x2d8] sm:$0xff] %v1918_v27  ;;  %v1922_v29 = vld [vmem:[%s15065_s26 + $0x5d0] sm:$0xff] }
  0x43   : > { %1921 = vst [vmem:[%s15073_s27 + $0x2e0] sm:$0xff] %v1920_v28  ;;  %v1924_v30 = vld [vmem:[%s15065_s26 + $0x5e0] sm:$0xff]  ;;  %v1926_v31 = vld [vmem:[%s15065_s26 + $0x5f0] sm:$0xff]  ;;  %1923 = vst [vmem:[%s15073_s27 + $0x2e8] sm:$0xff] %v1922_v29 }
  0x44   : > { %1925 = vst [vmem:[%s15073_s27 + $0x2f0] sm:$0xff] %v1924_v30  ;;  %1927 = vst [vmem:[%s15073_s27 + $0x2f8] sm:$0xff] %v1926_v31  ;;  %v1928_v32 = vld [vmem:[%s15065_s26 + $0x600] sm:$0xff]  ;;  %v1930_v33 = vld [vmem:[%s15065_s26 + $0x610] sm:$0xff] }
  0x45   : > { %v1932_v34 = vld [vmem:[%s15065_s26 + $0x620] sm:$0xff]  ;;  %1929 = vst [vmem:[%s15073_s27 + $0x300] sm:$0xff] %v1928_v32  ;;  %1931 = vst [vmem:[%s15073_s27 + $0x308] sm:$0xff] %v1930_v33  ;;  %v1934_v35 = vld [vmem:[%s15065_s26 + $0x630] sm:$0xff] }
  0x46   : > { %1933 = vst [vmem:[%s15073_s27 + $0x310] sm:$0xff] %v1932_v34  ;;  %v1936_v36 = vld [vmem:[%s15065_s26 + $0x640] sm:$0xff]  ;;  %v1938_v37 = vld [vmem:[%s15065_s26 + $0x650] sm:$0xff]  ;;  %1935 = vst [vmem:[%s15073_s27 + $0x318] sm:$0xff] %v1934_v35 }
  0x47   : > { %1937 = vst [vmem:[%s15073_s27 + $0x320] sm:$0xff] %v1936_v36  ;;  %1939 = vst [vmem:[%s15073_s27 + $0x328] sm:$0xff] %v1938_v37  ;;  %v1940_v38 = vld [vmem:[%s15065_s26 + $0x660] sm:$0xff]  ;;  %v1942_v39 = vld [vmem:[%s15065_s26 + $0x670] sm:$0xff] }
  0x48   : > { %v1944_v40 = vld [vmem:[%s15065_s26 + $0x680] sm:$0xff]  ;;  %1941 = vst [vmem:[%s15073_s27 + $0x330] sm:$0xff] %v1940_v38  ;;  %1943 = vst [vmem:[%s15073_s27 + $0x338] sm:$0xff] %v1942_v39  ;;  %v1946_v41 = vld [vmem:[%s15065_s26 + $0x690] sm:$0xff] }
  0x49   : > { %1945 = vst [vmem:[%s15073_s27 + $0x340] sm:$0xff] %v1944_v40  ;;  %v1948_v42 = vld [vmem:[%s15065_s26 + $0x6a0] sm:$0xff]  ;;  %v1950_v43 = vld [vmem:[%s15065_s26 + $0x6b0] sm:$0xff]  ;;  %1947 = vst [vmem:[%s15073_s27 + $0x348] sm:$0xff] %v1946_v41 }
  0x4a   : > { %1949 = vst [vmem:[%s15073_s27 + $0x350] sm:$0xff] %v1948_v42  ;;  %1951 = vst [vmem:[%s15073_s27 + $0x358] sm:$0xff] %v1950_v43  ;;  %v1952_v44 = vld [vmem:[%s15065_s26 + $0x6c0] sm:$0xff]  ;;  %v1954_v45 = vld [vmem:[%s15065_s26 + $0x6d0] sm:$0xff] }
  0x4b   : > { %v1956_v46 = vld [vmem:[%s15065_s26 + $0x6e0] sm:$0xff]  ;;  %1953 = vst [vmem:[%s15073_s27 + $0x360] sm:$0xff] %v1952_v44  ;;  %1955 = vst [vmem:[%s15073_s27 + $0x368] sm:$0xff] %v1954_v45  ;;  %v1958_v47 = vld [vmem:[%s15065_s26 + $0x6f0] sm:$0xff] }
  0x4c   : > { %1957 = vst [vmem:[%s15073_s27 + $0x370] sm:$0xff] %v1956_v46  ;;  %v1960_v48 = vld [vmem:[%s15065_s26 + $0x700] sm:$0xff]  ;;  %v1962_v49 = vld [vmem:[%s15065_s26 + $0x710] sm:$0xff]  ;;  %1959 = vst [vmem:[%s15073_s27 + $0x378] sm:$0xff] %v1958_v47 }
  0x4d   : > { %1961 = vst [vmem:[%s15073_s27 + $0x380] sm:$0xff] %v1960_v48  ;;  %1963 = vst [vmem:[%s15073_s27 + $0x388] sm:$0xff] %v1962_v49  ;;  %v1964_v50 = vld [vmem:[%s15065_s26 + $0x720] sm:$0xff]  ;;  %v1966_v51 = vld [vmem:[%s15065_s26 + $0x730] sm:$0xff] }
  0x4e   : > { %v1968_v52 = vld [vmem:[%s15065_s26 + $0x740] sm:$0xff]  ;;  %1965 = vst [vmem:[%s15073_s27 + $0x390] sm:$0xff] %v1964_v50  ;;  %1967 = vst [vmem:[%s15073_s27 + $0x398] sm:$0xff] %v1966_v51  ;;  %v1970_v53 = vld [vmem:[%s15065_s26 + $0x750] sm:$0xff] }
  0x4f   : > { %1969 = vst [vmem:[%s15073_s27 + $0x3a0] sm:$0xff] %v1968_v52  ;;  %v1972_v54 = vld [vmem:[%s15065_s26 + $0x760] sm:$0xff]  ;;  %v1974_v55 = vld [vmem:[%s15065_s26 + $0x770] sm:$0xff]  ;;  %1971 = vst [vmem:[%s15073_s27 + $0x3a8] sm:$0xff] %v1970_v53 }
  0x50   : > { %1973 = vst [vmem:[%s15073_s27 + $0x3b0] sm:$0xff] %v1972_v54  ;;  %1975 = vst [vmem:[%s15073_s27 + $0x3b8] sm:$0xff] %v1974_v55  ;;  %v1976_v56 = vld [vmem:[%s15065_s26 + $0x780] sm:$0xff]  ;;  %v1978_v57 = vld [vmem:[%s15065_s26 + $0x790] sm:$0xff] }
  0x51   : > { %v1980_v58 = vld [vmem:[%s15065_s26 + $0x7a0] sm:$0xff]  ;;  %1977 = vst [vmem:[%s15073_s27 + $0x3c0] sm:$0xff] %v1976_v56  ;;  %1979 = vst [vmem:[%s15073_s27 + $0x3c8] sm:$0xff] %v1978_v57  ;;  %v1982_v59 = vld [vmem:[%s15065_s26 + $0x7b0] sm:$0xff] }
  0x52   : > { %1981 = vst [vmem:[%s15073_s27 + $0x3d0] sm:$0xff] %v1980_v58  ;;  %v1984_v60 = vld [vmem:[%s15065_s26 + $0x7c0] sm:$0xff]  ;;  %v1986_v61 = vld [vmem:[%s15065_s26 + $0x7d0] sm:$0xff]  ;;  %1983 = vst [vmem:[%s15073_s27 + $0x3d8] sm:$0xff] %v1982_v59 }
  0x53   : > { %1985 = vst [vmem:[%s15073_s27 + $0x3e0] sm:$0xff] %v1984_v60  ;;  %1987 = vst [vmem:[%s15073_s27 + $0x3e8] sm:$0xff] %v1986_v61  ;;  %v1988_v62 = vld [vmem:[%s15065_s26 + $0x7e0] sm:$0xff]  ;;  %v1990_v63 = vld [vmem:[%s15065_s26 + $0x7f0] sm:$0xff] }
  0x54   : > { %v1992_v0 = vld [vmem:[%s15065_s26 + $0x800] sm:$0xff]  ;;  %1989 = vst [vmem:[%s15073_s27 + $0x3f0] sm:$0xff] %v1988_v62  ;;  %1991 = vst [vmem:[%s15073_s27 + $0x3f8] sm:$0xff] %v1990_v63  ;;  %v1994_v1 = vld [vmem:[%s15065_s26 + $0x810] sm:$0xff] }
  0x55   : > { %1993 = vst [vmem:[%s15073_s27 + $0x400] sm:$0xff] %v1992_v0  ;;  %v1996_v2 = vld [vmem:[%s15065_s26 + $0x820] sm:$0xff]  ;;  %v1998_v3 = vld [vmem:[%s15065_s26 + $0x830] sm:$0xff]  ;;  %1995 = vst [vmem:[%s15073_s27 + $0x408] sm:$0xff] %v1994_v1 }
  0x56   : > { %1997 = vst [vmem:[%s15073_s27 + $0x410] sm:$0xff] %v1996_v2  ;;  %1999 = vst [vmem:[%s15073_s27 + $0x418] sm:$0xff] %v1998_v3  ;;  %v2000_v4 = vld [vmem:[%s15065_s26 + $0x840] sm:$0xff]  ;;  %v2002_v5 = vld [vmem:[%s15065_s26 + $0x850] sm:$0xff] }
  0x57   : > { %v2004_v6 = vld [vmem:[%s15065_s26 + $0x860] sm:$0xff]  ;;  %2001 = vst [vmem:[%s15073_s27 + $0x420] sm:$0xff] %v2000_v4  ;;  %2003 = vst [vmem:[%s15073_s27 + $0x428] sm:$0xff] %v2002_v5  ;;  %v2006_v7 = vld [vmem:[%s15065_s26 + $0x870] sm:$0xff] }
  0x58   : > { %2005 = vst [vmem:[%s15073_s27 + $0x430] sm:$0xff] %v2004_v6  ;;  %v2008_v8 = vld [vmem:[%s15065_s26 + $0x880] sm:$0xff]  ;;  %v2010_v9 = vld [vmem:[%s15065_s26 + $0x890] sm:$0xff]  ;;  %2007 = vst [vmem:[%s15073_s27 + $0x438] sm:$0xff] %v2006_v7 }
  0x59   : > { %2009 = vst [vmem:[%s15073_s27 + $0x440] sm:$0xff] %v2008_v8  ;;  %2011 = vst [vmem:[%s15073_s27 + $0x448] sm:$0xff] %v2010_v9  ;;  %v2012_v10 = vld [vmem:[%s15065_s26 + $0x8a0] sm:$0xff]  ;;  %v2014_v11 = vld [vmem:[%s15065_s26 + $0x8b0] sm:$0xff] }
  0x5a   : > { %v2016_v12 = vld [vmem:[%s15065_s26 + $0x8c0] sm:$0xff]  ;;  %2013 = vst [vmem:[%s15073_s27 + $0x450] sm:$0xff] %v2012_v10  ;;  %2015 = vst [vmem:[%s15073_s27 + $0x458] sm:$0xff] %v2014_v11  ;;  %v2018_v13 = vld [vmem:[%s15065_s26 + $0x8d0] sm:$0xff] }
  0x5b   : > { %2017 = vst [vmem:[%s15073_s27 + $0x460] sm:$0xff] %v2016_v12  ;;  %v2020_v14 = vld [vmem:[%s15065_s26 + $0x8e0] sm:$0xff]  ;;  %v2022_v15 = vld [vmem:[%s15065_s26 + $0x8f0] sm:$0xff]  ;;  %2019 = vst [vmem:[%s15073_s27 + $0x468] sm:$0xff] %v2018_v13 }
  0x5c   : > { %2021 = vst [vmem:[%s15073_s27 + $0x470] sm:$0xff] %v2020_v14  ;;  %2023 = vst [vmem:[%s15073_s27 + $0x478] sm:$0xff] %v2022_v15  ;;  %v2024_v16 = vld [vmem:[%s15065_s26 + $0x900] sm:$0xff]  ;;  %v2026_v17 = vld [vmem:[%s15065_s26 + $0x910] sm:$0xff] }
  0x5d   : > { %v2028_v18 = vld [vmem:[%s15065_s26 + $0x920] sm:$0xff]  ;;  %2025 = vst [vmem:[%s15073_s27 + $0x480] sm:$0xff] %v2024_v16  ;;  %2027 = vst [vmem:[%s15073_s27 + $0x488] sm:$0xff] %v2026_v17  ;;  %v2030_v19 = vld [vmem:[%s15065_s26 + $0x930] sm:$0xff] }
  0x5e   : > { %2029 = vst [vmem:[%s15073_s27 + $0x490] sm:$0xff] %v2028_v18  ;;  %v2032_v20 = vld [vmem:[%s15065_s26 + $0x940] sm:$0xff]  ;;  %v2034_v21 = vld [vmem:[%s15065_s26 + $0x950] sm:$0xff]  ;;  %2031 = vst [vmem:[%s15073_s27 + $0x498] sm:$0xff] %v2030_v19 }
  0x5f   : > { %2033 = vst [vmem:[%s15073_s27 + $0x4a0] sm:$0xff] %v2032_v20  ;;  %2035 = vst [vmem:[%s15073_s27 + $0x4a8] sm:$0xff] %v2034_v21  ;;  %v2036_v22 = vld [vmem:[%s15065_s26 + $0x960] sm:$0xff]  ;;  %v2038_v23 = vld [vmem:[%s15065_s26 + $0x970] sm:$0xff] }
  0x60   : > { %v2040_v24 = vld [vmem:[%s15065_s26 + $0x980] sm:$0xff]  ;;  %2037 = vst [vmem:[%s15073_s27 + $0x4b0] sm:$0xff] %v2036_v22  ;;  %2039 = vst [vmem:[%s15073_s27 + $0x4b8] sm:$0xff] %v2038_v23  ;;  %v2042_v25 = vld [vmem:[%s15065_s26 + $0x990] sm:$0xff] }
  0x61   : > { %2041 = vst [vmem:[%s15073_s27 + $0x4c0] sm:$0xff] %v2040_v24  ;;  %v2044_v26 = vld [vmem:[%s15065_s26 + $0x9a0] sm:$0xff]  ;;  %v2046_v27 = vld [vmem:[%s15065_s26 + $0x9b0] sm:$0xff]  ;;  %2043 = vst [vmem:[%s15073_s27 + $0x4c8] sm:$0xff] %v2042_v25 }
  0x62   : > { %2045 = vst [vmem:[%s15073_s27 + $0x4d0] sm:$0xff] %v2044_v26  ;;  %2047 = vst [vmem:[%s15073_s27 + $0x4d8] sm:$0xff] %v2046_v27  ;;  %v2048_v28 = vld [vmem:[%s15065_s26 + $0x9c0] sm:$0xff]  ;;  %v2050_v29 = vld [vmem:[%s15065_s26 + $0x9d0] sm:$0xff] }
  0x63   : > { %v2052_v30 = vld [vmem:[%s15065_s26 + $0x9e0] sm:$0xff]  ;;  %2049 = vst [vmem:[%s15073_s27 + $0x4e0] sm:$0xff] %v2048_v28  ;;  %2051 = vst [vmem:[%s15073_s27 + $0x4e8] sm:$0xff] %v2050_v29  ;;  %v2054_v31 = vld [vmem:[%s15065_s26 + $0x9f0] sm:$0xff] }
  0x64   : > { %2053 = vst [vmem:[%s15073_s27 + $0x4f0] sm:$0xff] %v2052_v30  ;;  %v2056_v32 = vld [vmem:[%s15065_s26 + $0xa00] sm:$0xff]  ;;  %v2058_v33 = vld [vmem:[%s15065_s26 + $0xa10] sm:$0xff]  ;;  %2055 = vst [vmem:[%s15073_s27 + $0x4f8] sm:$0xff] %v2054_v31 }
  0x65   : > { %2057 = vst [vmem:[%s15073_s27 + $0x500] sm:$0xff] %v2056_v32  ;;  %2059 = vst [vmem:[%s15073_s27 + $0x508] sm:$0xff] %v2058_v33  ;;  %v2060_v34 = vld [vmem:[%s15065_s26 + $0xa20] sm:$0xff]  ;;  %v2062_v35 = vld [vmem:[%s15065_s26 + $0xa30] sm:$0xff] }
  0x66   : > { %v2064_v36 = vld [vmem:[%s15065_s26 + $0xa40] sm:$0xff]  ;;  %2061 = vst [vmem:[%s15073_s27 + $0x510] sm:$0xff] %v2060_v34  ;;  %2063 = vst [vmem:[%s15073_s27 + $0x518] sm:$0xff] %v2062_v35  ;;  %v2066_v37 = vld [vmem:[%s15065_s26 + $0xa50] sm:$0xff] }
  0x67   : > { %2065 = vst [vmem:[%s15073_s27 + $0x520] sm:$0xff] %v2064_v36  ;;  %v2068_v38 = vld [vmem:[%s15065_s26 + $0xa60] sm:$0xff]  ;;  %v2070_v39 = vld [vmem:[%s15065_s26 + $0xa70] sm:$0xff]  ;;  %2067 = vst [vmem:[%s15073_s27 + $0x528] sm:$0xff] %v2066_v37 }
  0x68   : > { %2069 = vst [vmem:[%s15073_s27 + $0x530] sm:$0xff] %v2068_v38  ;;  %2071 = vst [vmem:[%s15073_s27 + $0x538] sm:$0xff] %v2070_v39  ;;  %v2072_v40 = vld [vmem:[%s15065_s26 + $0xa80] sm:$0xff]  ;;  %v2074_v41 = vld [vmem:[%s15065_s26 + $0xa90] sm:$0xff] }
  0x69   : > { %v2076_v42 = vld [vmem:[%s15065_s26 + $0xaa0] sm:$0xff]  ;;  %2073 = vst [vmem:[%s15073_s27 + $0x540] sm:$0xff] %v2072_v40  ;;  %2075 = vst [vmem:[%s15073_s27 + $0x548] sm:$0xff] %v2074_v41  ;;  %v2078_v43 = vld [vmem:[%s15065_s26 + $0xab0] sm:$0xff] }
  0x6a   : > { %2077 = vst [vmem:[%s15073_s27 + $0x550] sm:$0xff] %v2076_v42  ;;  %v2080_v44 = vld [vmem:[%s15065_s26 + $0xac0] sm:$0xff]  ;;  %v2082_v45 = vld [vmem:[%s15065_s26 + $0xad0] sm:$0xff]  ;;  %2079 = vst [vmem:[%s15073_s27 + $0x558] sm:$0xff] %v2078_v43 }
  0x6b   : > { %2081 = vst [vmem:[%s15073_s27 + $0x560] sm:$0xff] %v2080_v44  ;;  %2083 = vst [vmem:[%s15073_s27 + $0x568] sm:$0xff] %v2082_v45  ;;  %v2084_v46 = vld [vmem:[%s15065_s26 + $0xae0] sm:$0xff]  ;;  %v2086_v47 = vld [vmem:[%s15065_s26 + $0xaf0] sm:$0xff] }
  0x6c   : > { %v2088_v48 = vld [vmem:[%s15065_s26 + $0xb00] sm:$0xff]  ;;  %2085 = vst [vmem:[%s15073_s27 + $0x570] sm:$0xff] %v2084_v46  ;;  %2087 = vst [vmem:[%s15073_s27 + $0x578] sm:$0xff] %v2086_v47  ;;  %v2090_v49 = vld [vmem:[%s15065_s26 + $0xb10] sm:$0xff] }
  0x6d   : > { %2089 = vst [vmem:[%s15073_s27 + $0x580] sm:$0xff] %v2088_v48  ;;  %v2092_v50 = vld [vmem:[%s15065_s26 + $0xb20] sm:$0xff]  ;;  %v2094_v51 = vld [vmem:[%s15065_s26 + $0xb30] sm:$0xff]  ;;  %2091 = vst [vmem:[%s15073_s27 + $0x588] sm:$0xff] %v2090_v49 }
  0x6e   : > { %2093 = vst [vmem:[%s15073_s27 + $0x590] sm:$0xff] %v2092_v50  ;;  %2095 = vst [vmem:[%s15073_s27 + $0x598] sm:$0xff] %v2094_v51  ;;  %v2096_v52 = vld [vmem:[%s15065_s26 + $0xb40] sm:$0xff]  ;;  %v2098_v53 = vld [vmem:[%s15065_s26 + $0xb50] sm:$0xff] }
  0x6f   : > { %v2100_v54 = vld [vmem:[%s15065_s26 + $0xb60] sm:$0xff]  ;;  %2097 = vst [vmem:[%s15073_s27 + $0x5a0] sm:$0xff] %v2096_v52  ;;  %2099 = vst [vmem:[%s15073_s27 + $0x5a8] sm:$0xff] %v2098_v53  ;;  %v2102_v55 = vld [vmem:[%s15065_s26 + $0xb70] sm:$0xff] }
  0x70   : > { %2101 = vst [vmem:[%s15073_s27 + $0x5b0] sm:$0xff] %v2100_v54  ;;  %v2104_v56 = vld [vmem:[%s15065_s26 + $0xb80] sm:$0xff]  ;;  %v2106_v57 = vld [vmem:[%s15065_s26 + $0xb90] sm:$0xff]  ;;  %2103 = vst [vmem:[%s15073_s27 + $0x5b8] sm:$0xff] %v2102_v55 }
  0x71   : > { %2105 = vst [vmem:[%s15073_s27 + $0x5c0] sm:$0xff] %v2104_v56  ;;  %2107 = vst [vmem:[%s15073_s27 + $0x5c8] sm:$0xff] %v2106_v57  ;;  %v2108_v58 = vld [vmem:[%s15065_s26 + $0xba0] sm:$0xff]  ;;  %v2110_v59 = vld [vmem:[%s15065_s26 + $0xbb0] sm:$0xff] }
  0x72   : > { %v2112_v60 = vld [vmem:[%s15065_s26 + $0xbc0] sm:$0xff]  ;;  %2109 = vst [vmem:[%s15073_s27 + $0x5d0] sm:$0xff] %v2108_v58  ;;  %2111 = vst [vmem:[%s15073_s27 + $0x5d8] sm:$0xff] %v2110_v59  ;;  %v2114_v61 = vld [vmem:[%s15065_s26 + $0xbd0] sm:$0xff] }
  0x73   : > { %2113 = vst [vmem:[%s15073_s27 + $0x5e0] sm:$0xff] %v2112_v60  ;;  %v2116_v62 = vld [vmem:[%s15065_s26 + $0xbe0] sm:$0xff]  ;;  %v2118_v63 = vld [vmem:[%s15065_s26 + $0xbf0] sm:$0xff]  ;;  %2115 = vst [vmem:[%s15073_s27 + $0x5e8] sm:$0xff] %v2114_v61 }
  0x74   : > { %2117 = vst [vmem:[%s15073_s27 + $0x5f0] sm:$0xff] %v2116_v62  ;;  %2119 = vst [vmem:[%s15073_s27 + $0x5f8] sm:$0xff] %v2118_v63  ;;  %v2120_v0 = vld [vmem:[%s15065_s26 + $0xc00] sm:$0xff]  ;;  %v2122_v1 = vld [vmem:[%s15065_s26 + $0xc10] sm:$0xff] }
  0x75   : > { %v2124_v2 = vld [vmem:[%s15065_s26 + $0xc20] sm:$0xff]  ;;  %2121 = vst [vmem:[%s15073_s27 + $0x600] sm:$0xff] %v2120_v0  ;;  %2123 = vst [vmem:[%s15073_s27 + $0x608] sm:$0xff] %v2122_v1  ;;  %v2126_v3 = vld [vmem:[%s15065_s26 + $0xc30] sm:$0xff] }
  0x76   : > { %2125 = vst [vmem:[%s15073_s27 + $0x610] sm:$0xff] %v2124_v2  ;;  %v2128_v4 = vld [vmem:[%s15065_s26 + $0xc40] sm:$0xff]  ;;  %v2130_v5 = vld [vmem:[%s15065_s26 + $0xc50] sm:$0xff]  ;;  %2127 = vst [vmem:[%s15073_s27 + $0x618] sm:$0xff] %v2126_v3 }
  0x77   : > { %2129 = vst [vmem:[%s15073_s27 + $0x620] sm:$0xff] %v2128_v4  ;;  %2131 = vst [vmem:[%s15073_s27 + $0x628] sm:$0xff] %v2130_v5  ;;  %v2132_v6 = vld [vmem:[%s15065_s26 + $0xc60] sm:$0xff]  ;;  %v2134_v7 = vld [vmem:[%s15065_s26 + $0xc70] sm:$0xff] }
  0x78   : > { %v2136_v8 = vld [vmem:[%s15065_s26 + $0xc80] sm:$0xff]  ;;  %2133 = vst [vmem:[%s15073_s27 + $0x630] sm:$0xff] %v2132_v6  ;;  %2135 = vst [vmem:[%s15073_s27 + $0x638] sm:$0xff] %v2134_v7  ;;  %v2138_v9 = vld [vmem:[%s15065_s26 + $0xc90] sm:$0xff] }
  0x79   : > { %2137 = vst [vmem:[%s15073_s27 + $0x640] sm:$0xff] %v2136_v8  ;;  %v2140_v10 = vld [vmem:[%s15065_s26 + $0xca0] sm:$0xff]  ;;  %v2142_v11 = vld [vmem:[%s15065_s26 + $0xcb0] sm:$0xff]  ;;  %2139 = vst [vmem:[%s15073_s27 + $0x648] sm:$0xff] %v2138_v9 }
  0x7a   : > { %2141 = vst [vmem:[%s15073_s27 + $0x650] sm:$0xff] %v2140_v10  ;;  %2143 = vst [vmem:[%s15073_s27 + $0x658] sm:$0xff] %v2142_v11  ;;  %v2144_v12 = vld [vmem:[%s15065_s26 + $0xcc0] sm:$0xff]  ;;  %v2146_v13 = vld [vmem:[%s15065_s26 + $0xcd0] sm:$0xff] }
  0x7b   : > { %v2148_v14 = vld [vmem:[%s15065_s26 + $0xce0] sm:$0xff]  ;;  %2145 = vst [vmem:[%s15073_s27 + $0x660] sm:$0xff] %v2144_v12  ;;  %2147 = vst [vmem:[%s15073_s27 + $0x668] sm:$0xff] %v2146_v13  ;;  %v2150_v15 = vld [vmem:[%s15065_s26 + $0xcf0] sm:$0xff] }
  0x7c   : > { %2149 = vst [vmem:[%s15073_s27 + $0x670] sm:$0xff] %v2148_v14  ;;  %v2152_v16 = vld [vmem:[%s15065_s26 + $0xd00] sm:$0xff]  ;;  %v2154_v17 = vld [vmem:[%s15065_s26 + $0xd10] sm:$0xff]  ;;  %2151 = vst [vmem:[%s15073_s27 + $0x678] sm:$0xff] %v2150_v15 }
  0x7d   : > { %2153 = vst [vmem:[%s15073_s27 + $0x680] sm:$0xff] %v2152_v16  ;;  %2155 = vst [vmem:[%s15073_s27 + $0x688] sm:$0xff] %v2154_v17  ;;  %v2156_v18 = vld [vmem:[%s15065_s26 + $0xd20] sm:$0xff]  ;;  %v2158_v19 = vld [vmem:[%s15065_s26 + $0xd30] sm:$0xff] }
  0x7e   : > { %v2160_v20 = vld [vmem:[%s15065_s26 + $0xd40] sm:$0xff]  ;;  %2157 = vst [vmem:[%s15073_s27 + $0x690] sm:$0xff] %v2156_v18  ;;  %2159 = vst [vmem:[%s15073_s27 + $0x698] sm:$0xff] %v2158_v19  ;;  %v2162_v21 = vld [vmem:[%s15065_s26 + $0xd50] sm:$0xff] }
  0x7f   : > { %2161 = vst [vmem:[%s15073_s27 + $0x6a0] sm:$0xff] %v2160_v20  ;;  %v2164_v22 = vld [vmem:[%s15065_s26 + $0xd60] sm:$0xff]  ;;  %v2166_v23 = vld [vmem:[%s15065_s26 + $0xd70] sm:$0xff]  ;;  %2163 = vst [vmem:[%s15073_s27 + $0x6a8] sm:$0xff] %v2162_v21 }
  0x80   : > { %2165 = vst [vmem:[%s15073_s27 + $0x6b0] sm:$0xff] %v2164_v22  ;;  %2167 = vst [vmem:[%s15073_s27 + $0x6b8] sm:$0xff] %v2166_v23  ;;  %v2168_v24 = vld [vmem:[%s15065_s26 + $0xd80] sm:$0xff]  ;;  %v2170_v25 = vld [vmem:[%s15065_s26 + $0xd90] sm:$0xff] }
  0x81   : > { %v2172_v26 = vld [vmem:[%s15065_s26 + $0xda0] sm:$0xff]  ;;  %2169 = vst [vmem:[%s15073_s27 + $0x6c0] sm:$0xff] %v2168_v24  ;;  %2171 = vst [vmem:[%s15073_s27 + $0x6c8] sm:$0xff] %v2170_v25  ;;  %v2174_v27 = vld [vmem:[%s15065_s26 + $0xdb0] sm:$0xff] }
  0x82   : > { %2173 = vst [vmem:[%s15073_s27 + $0x6d0] sm:$0xff] %v2172_v26  ;;  %v2176_v28 = vld [vmem:[%s15065_s26 + $0xdc0] sm:$0xff]  ;;  %v2178_v29 = vld [vmem:[%s15065_s26 + $0xdd0] sm:$0xff]  ;;  %2175 = vst [vmem:[%s15073_s27 + $0x6d8] sm:$0xff] %v2174_v27 }
  0x83   : > { %2177 = vst [vmem:[%s15073_s27 + $0x6e0] sm:$0xff] %v2176_v28  ;;  %2179 = vst [vmem:[%s15073_s27 + $0x6e8] sm:$0xff] %v2178_v29  ;;  %v2180_v30 = vld [vmem:[%s15065_s26 + $0xde0] sm:$0xff]  ;;  %v2182_v31 = vld [vmem:[%s15065_s26 + $0xdf0] sm:$0xff] }
  0x84   : > { %v2184_v32 = vld [vmem:[%s15065_s26 + $0xe00] sm:$0xff]  ;;  %2181 = vst [vmem:[%s15073_s27 + $0x6f0] sm:$0xff] %v2180_v30  ;;  %2183 = vst [vmem:[%s15073_s27 + $0x6f8] sm:$0xff] %v2182_v31  ;;  %v2186_v33 = vld [vmem:[%s15065_s26 + $0xe10] sm:$0xff] }
  0x85   : > { %2185 = vst [vmem:[%s15073_s27 + $0x700] sm:$0xff] %v2184_v32  ;;  %v2188_v34 = vld [vmem:[%s15065_s26 + $0xe20] sm:$0xff]  ;;  %v2190_v35 = vld [vmem:[%s15065_s26 + $0xe30] sm:$0xff]  ;;  %2187 = vst [vmem:[%s15073_s27 + $0x708] sm:$0xff] %v2186_v33 }
  0x86   : > { %2189 = vst [vmem:[%s15073_s27 + $0x710] sm:$0xff] %v2188_v34  ;;  %2191 = vst [vmem:[%s15073_s27 + $0x718] sm:$0xff] %v2190_v35  ;;  %v2192_v36 = vld [vmem:[%s15065_s26 + $0xe40] sm:$0xff]  ;;  %v2194_v37 = vld [vmem:[%s15065_s26 + $0xe50] sm:$0xff] }
  0x87   : > { %v2196_v38 = vld [vmem:[%s15065_s26 + $0xe60] sm:$0xff]  ;;  %2193 = vst [vmem:[%s15073_s27 + $0x720] sm:$0xff] %v2192_v36  ;;  %2195 = vst [vmem:[%s15073_s27 + $0x728] sm:$0xff] %v2194_v37  ;;  %v2198_v39 = vld [vmem:[%s15065_s26 + $0xe70] sm:$0xff] }
  0x88   : > { %2197 = vst [vmem:[%s15073_s27 + $0x730] sm:$0xff] %v2196_v38  ;;  %v2200_v40 = vld [vmem:[%s15065_s26 + $0xe80] sm:$0xff]  ;;  %v2202_v41 = vld [vmem:[%s15065_s26 + $0xe90] sm:$0xff]  ;;  %2199 = vst [vmem:[%s15073_s27 + $0x738] sm:$0xff] %v2198_v39 }
  0x89   : > { %2201 = vst [vmem:[%s15073_s27 + $0x740] sm:$0xff] %v2200_v40  ;;  %2203 = vst [vmem:[%s15073_s27 + $0x748] sm:$0xff] %v2202_v41  ;;  %v2204_v42 = vld [vmem:[%s15065_s26 + $0xea0] sm:$0xff]  ;;  %v2206_v43 = vld [vmem:[%s15065_s26 + $0xeb0] sm:$0xff] }
  0x8a   : > { %v2208_v44 = vld [vmem:[%s15065_s26 + $0xec0] sm:$0xff]  ;;  %2205 = vst [vmem:[%s15073_s27 + $0x750] sm:$0xff] %v2204_v42  ;;  %2207 = vst [vmem:[%s15073_s27 + $0x758] sm:$0xff] %v2206_v43  ;;  %v2210_v45 = vld [vmem:[%s15065_s26 + $0xed0] sm:$0xff] }
  0x8b   : > { %2209 = vst [vmem:[%s15073_s27 + $0x760] sm:$0xff] %v2208_v44  ;;  %v2212_v46 = vld [vmem:[%s15065_s26 + $0xee0] sm:$0xff]  ;;  %v2214_v47 = vld [vmem:[%s15065_s26 + $0xef0] sm:$0xff]  ;;  %2211 = vst [vmem:[%s15073_s27 + $0x768] sm:$0xff] %v2210_v45 }
  0x8c   : > { %2213 = vst [vmem:[%s15073_s27 + $0x770] sm:$0xff] %v2212_v46  ;;  %2215 = vst [vmem:[%s15073_s27 + $0x778] sm:$0xff] %v2214_v47  ;;  %v2216_v48 = vld [vmem:[%s15065_s26 + $0xf00] sm:$0xff]  ;;  %v2218_v49 = vld [vmem:[%s15065_s26 + $0xf10] sm:$0xff] }
  0x8d   : > { %v2220_v50 = vld [vmem:[%s15065_s26 + $0xf20] sm:$0xff]  ;;  %2217 = vst [vmem:[%s15073_s27 + $0x780] sm:$0xff] %v2216_v48  ;;  %2219 = vst [vmem:[%s15073_s27 + $0x788] sm:$0xff] %v2218_v49  ;;  %v2222_v51 = vld [vmem:[%s15065_s26 + $0xf30] sm:$0xff] }
  0x8e   : > { %2221 = vst [vmem:[%s15073_s27 + $0x790] sm:$0xff] %v2220_v50  ;;  %v2224_v52 = vld [vmem:[%s15065_s26 + $0xf40] sm:$0xff]  ;;  %v2226_v53 = vld [vmem:[%s15065_s26 + $0xf50] sm:$0xff]  ;;  %2223 = vst [vmem:[%s15073_s27 + $0x798] sm:$0xff] %v2222_v51 }
  0x8f   : > { %2225 = vst [vmem:[%s15073_s27 + $0x7a0] sm:$0xff] %v2224_v52  ;;  %2227 = vst [vmem:[%s15073_s27 + $0x7a8] sm:$0xff] %v2226_v53  ;;  %v2228_v54 = vld [vmem:[%s15065_s26 + $0xf60] sm:$0xff]  ;;  %v2230_v55 = vld [vmem:[%s15065_s26 + $0xf70] sm:$0xff] }
  0x90   : > { %v2232_v56 = vld [vmem:[%s15065_s26 + $0xf80] sm:$0xff]  ;;  %2229 = vst [vmem:[%s15073_s27 + $0x7b0] sm:$0xff] %v2228_v54  ;;  %2231 = vst [vmem:[%s15073_s27 + $0x7b8] sm:$0xff] %v2230_v55  ;;  %v2234_v57 = vld [vmem:[%s15065_s26 + $0xf90] sm:$0xff] }
  0x91   : > { %2233 = vst [vmem:[%s15073_s27 + $0x7c0] sm:$0xff] %v2232_v56  ;;  %v2236_v58 = vld [vmem:[%s15065_s26 + $0xfa0] sm:$0xff]  ;;  %v2238_v59 = vld [vmem:[%s15065_s26 + $0xfb0] sm:$0xff]  ;;  %2235 = vst [vmem:[%s15073_s27 + $0x7c8] sm:$0xff] %v2234_v57 }
  0x92   : > { %2237 = vst [vmem:[%s15073_s27 + $0x7d0] sm:$0xff] %v2236_v58  ;;  %2239 = vst [vmem:[%s15073_s27 + $0x7d8] sm:$0xff] %v2238_v59  ;;  %v2240_v60 = vld [vmem:[%s15065_s26 + $0xfc0] sm:$0xff]  ;;  %v2242_v61 = vld [vmem:[%s15065_s26 + $0xfd0] sm:$0xff] }
  0x93   : > { %v2244_v62 = vld [vmem:[%s15065_s26 + $0xfe0] sm:$0xff]  ;;  %2241 = vst [vmem:[%s15073_s27 + $0x7e0] sm:$0xff] %v2240_v60  ;;  %2243 = vst [vmem:[%s15073_s27 + $0x7e8] sm:$0xff] %v2242_v61  ;;  %v2246_v63 = vld [vmem:[%s15065_s26 + $0xff0] sm:$0xff] }
  0x94   : > { %2245 = vst [vmem:[%s15073_s27 + $0x7f0] sm:$0xff] %v2244_v62  ;;  %v2248_v0 = vld [vmem:[%s15065_s26 + $0x1000] sm:$0xff]  ;;  %v2250_v1 = vld [vmem:[%s15065_s26 + $0x1010] sm:$0xff]  ;;  %2247 = vst [vmem:[%s15073_s27 + $0x7f8] sm:$0xff] %v2246_v63 }
  0x95   : > { %2249 = vst [vmem:[%s15073_s27 + $0x800] sm:$0xff] %v2248_v0  ;;  %2251 = vst [vmem:[%s15073_s27 + $0x808] sm:$0xff] %v2250_v1  ;;  %v2252_v2 = vld [vmem:[%s15065_s26 + $0x1020] sm:$0xff]  ;;  %v2254_v3 = vld [vmem:[%s15065_s26 + $0x1030] sm:$0xff] }
  0x96   : > { %v2256_v4 = vld [vmem:[%s15065_s26 + $0x1040] sm:$0xff]  ;;  %2253 = vst [vmem:[%s15073_s27 + $0x810] sm:$0xff] %v2252_v2  ;;  %2255 = vst [vmem:[%s15073_s27 + $0x818] sm:$0xff] %v2254_v3  ;;  %v2258_v5 = vld [vmem:[%s15065_s26 + $0x1050] sm:$0xff] }
  0x97   : > { %2257 = vst [vmem:[%s15073_s27 + $0x820] sm:$0xff] %v2256_v4  ;;  %v2260_v6 = vld [vmem:[%s15065_s26 + $0x1060] sm:$0xff]  ;;  %v2262_v7 = vld [vmem:[%s15065_s26 + $0x1070] sm:$0xff]  ;;  %2259 = vst [vmem:[%s15073_s27 + $0x828] sm:$0xff] %v2258_v5 }
  0x98   : > { %2261 = vst [vmem:[%s15073_s27 + $0x830] sm:$0xff] %v2260_v6  ;;  %2263 = vst [vmem:[%s15073_s27 + $0x838] sm:$0xff] %v2262_v7  ;;  %v2264_v8 = vld [vmem:[%s15065_s26 + $0x1080] sm:$0xff]  ;;  %v2266_v9 = vld [vmem:[%s15065_s26 + $0x1090] sm:$0xff] }
  0x99   : > { %v2268_v10 = vld [vmem:[%s15065_s26 + $0x10a0] sm:$0xff]  ;;  %2265 = vst [vmem:[%s15073_s27 + $0x840] sm:$0xff] %v2264_v8  ;;  %2267 = vst [vmem:[%s15073_s27 + $0x848] sm:$0xff] %v2266_v9  ;;  %v2270_v11 = vld [vmem:[%s15065_s26 + $0x10b0] sm:$0xff] }
  0x9a   : > { %2269 = vst [vmem:[%s15073_s27 + $0x850] sm:$0xff] %v2268_v10  ;;  %v2272_v12 = vld [vmem:[%s15065_s26 + $0x10c0] sm:$0xff]  ;;  %v2274_v13 = vld [vmem:[%s15065_s26 + $0x10d0] sm:$0xff]  ;;  %2271 = vst [vmem:[%s15073_s27 + $0x858] sm:$0xff] %v2270_v11 }
  0x9b   : > { %2273 = vst [vmem:[%s15073_s27 + $0x860] sm:$0xff] %v2272_v12  ;;  %2275 = vst [vmem:[%s15073_s27 + $0x868] sm:$0xff] %v2274_v13  ;;  %v2276_v14 = vld [vmem:[%s15065_s26 + $0x10e0] sm:$0xff]  ;;  %v2278_v15 = vld [vmem:[%s15065_s26 + $0x10f0] sm:$0xff] }
  0x9c   : > { %v2280_v16 = vld [vmem:[%s15065_s26 + $0x1100] sm:$0xff]  ;;  %2277 = vst [vmem:[%s15073_s27 + $0x870] sm:$0xff] %v2276_v14  ;;  %2279 = vst [vmem:[%s15073_s27 + $0x878] sm:$0xff] %v2278_v15  ;;  %v2282_v17 = vld [vmem:[%s15065_s26 + $0x1110] sm:$0xff] }
  0x9d   : > { %2281 = vst [vmem:[%s15073_s27 + $0x880] sm:$0xff] %v2280_v16  ;;  %v2284_v18 = vld [vmem:[%s15065_s26 + $0x1120] sm:$0xff]  ;;  %v2286_v19 = vld [vmem:[%s15065_s26 + $0x1130] sm:$0xff]  ;;  %2283 = vst [vmem:[%s15073_s27 + $0x888] sm:$0xff] %v2282_v17 }
  0x9e   : > { %2285 = vst [vmem:[%s15073_s27 + $0x890] sm:$0xff] %v2284_v18  ;;  %2287 = vst [vmem:[%s15073_s27 + $0x898] sm:$0xff] %v2286_v19  ;;  %v2288_v20 = vld [vmem:[%s15065_s26 + $0x1140] sm:$0xff]  ;;  %v2290_v21 = vld [vmem:[%s15065_s26 + $0x1150] sm:$0xff] }
  0x9f   : > { %v2292_v22 = vld [vmem:[%s15065_s26 + $0x1160] sm:$0xff]  ;;  %2289 = vst [vmem:[%s15073_s27 + $0x8a0] sm:$0xff] %v2288_v20  ;;  %2291 = vst [vmem:[%s15073_s27 + $0x8a8] sm:$0xff] %v2290_v21  ;;  %v2294_v23 = vld [vmem:[%s15065_s26 + $0x1170] sm:$0xff] }
  0xa0   : > { %2293 = vst [vmem:[%s15073_s27 + $0x8b0] sm:$0xff] %v2292_v22  ;;  %v2296_v24 = vld [vmem:[%s15065_s26 + $0x1180] sm:$0xff]  ;;  %v2298_v25 = vld [vmem:[%s15065_s26 + $0x1190] sm:$0xff]  ;;  %2295 = vst [vmem:[%s15073_s27 + $0x8b8] sm:$0xff] %v2294_v23 }
  0xa1   : > { %2297 = vst [vmem:[%s15073_s27 + $0x8c0] sm:$0xff] %v2296_v24  ;;  %2299 = vst [vmem:[%s15073_s27 + $0x8c8] sm:$0xff] %v2298_v25  ;;  %v2300_v26 = vld [vmem:[%s15065_s26 + $0x11a0] sm:$0xff]  ;;  %v2302_v27 = vld [vmem:[%s15065_s26 + $0x11b0] sm:$0xff] }
  0xa2   : > { %v2304_v28 = vld [vmem:[%s15065_s26 + $0x11c0] sm:$0xff]  ;;  %2301 = vst [vmem:[%s15073_s27 + $0x8d0] sm:$0xff] %v2300_v26  ;;  %2303 = vst [vmem:[%s15073_s27 + $0x8d8] sm:$0xff] %v2302_v27  ;;  %v2306_v29 = vld [vmem:[%s15065_s26 + $0x11d0] sm:$0xff] }
  0xa3   : > { %2305 = vst [vmem:[%s15073_s27 + $0x8e0] sm:$0xff] %v2304_v28  ;;  %v2308_v30 = vld [vmem:[%s15065_s26 + $0x11e0] sm:$0xff]  ;;  %v2310_v31 = vld [vmem:[%s15065_s26 + $0x11f0] sm:$0xff]  ;;  %2307 = vst [vmem:[%s15073_s27 + $0x8e8] sm:$0xff] %v2306_v29 }
  0xa4   : > { %2309 = vst [vmem:[%s15073_s27 + $0x8f0] sm:$0xff] %v2308_v30  ;;  %2311 = vst [vmem:[%s15073_s27 + $0x8f8] sm:$0xff] %v2310_v31  ;;  %v2312_v32 = vld [vmem:[%s15065_s26 + $0x1200] sm:$0xff]  ;;  %v2314_v33 = vld [vmem:[%s15065_s26 + $0x1210] sm:$0xff] }
  0xa5   : > { %v2316_v34 = vld [vmem:[%s15065_s26 + $0x1220] sm:$0xff]  ;;  %2313 = vst [vmem:[%s15073_s27 + $0x900] sm:$0xff] %v2312_v32  ;;  %2315 = vst [vmem:[%s15073_s27 + $0x908] sm:$0xff] %v2314_v33  ;;  %v2318_v35 = vld [vmem:[%s15065_s26 + $0x1230] sm:$0xff] }
  0xa6   : > { %2317 = vst [vmem:[%s15073_s27 + $0x910] sm:$0xff] %v2316_v34  ;;  %v2320_v36 = vld [vmem:[%s15065_s26 + $0x1240] sm:$0xff]  ;;  %v2322_v37 = vld [vmem:[%s15065_s26 + $0x1250] sm:$0xff]  ;;  %2319 = vst [vmem:[%s15073_s27 + $0x918] sm:$0xff] %v2318_v35 }
  0xa7   : > { %2321 = vst [vmem:[%s15073_s27 + $0x920] sm:$0xff] %v2320_v36  ;;  %2323 = vst [vmem:[%s15073_s27 + $0x928] sm:$0xff] %v2322_v37  ;;  %v2324_v38 = vld [vmem:[%s15065_s26 + $0x1260] sm:$0xff]  ;;  %v2326_v39 = vld [vmem:[%s15065_s26 + $0x1270] sm:$0xff] }
  0xa8   : > { %v2328_v40 = vld [vmem:[%s15065_s26 + $0x1280] sm:$0xff]  ;;  %2325 = vst [vmem:[%s15073_s27 + $0x930] sm:$0xff] %v2324_v38  ;;  %2327 = vst [vmem:[%s15073_s27 + $0x938] sm:$0xff] %v2326_v39  ;;  %v2330_v41 = vld [vmem:[%s15065_s26 + $0x1290] sm:$0xff] }
  0xa9   : > { %2329 = vst [vmem:[%s15073_s27 + $0x940] sm:$0xff] %v2328_v40  ;;  %v2332_v42 = vld [vmem:[%s15065_s26 + $0x12a0] sm:$0xff]  ;;  %v2334_v43 = vld [vmem:[%s15065_s26 + $0x12b0] sm:$0xff]  ;;  %2331 = vst [vmem:[%s15073_s27 + $0x948] sm:$0xff] %v2330_v41 }
  0xaa   : > { %2333 = vst [vmem:[%s15073_s27 + $0x950] sm:$0xff] %v2332_v42  ;;  %2335 = vst [vmem:[%s15073_s27 + $0x958] sm:$0xff] %v2334_v43  ;;  %v2336_v44 = vld [vmem:[%s15065_s26 + $0x12c0] sm:$0xff]  ;;  %v2338_v45 = vld [vmem:[%s15065_s26 + $0x12d0] sm:$0xff] }
  0xab   : > { %v2340_v46 = vld [vmem:[%s15065_s26 + $0x12e0] sm:$0xff]  ;;  %2337 = vst [vmem:[%s15073_s27 + $0x960] sm:$0xff] %v2336_v44  ;;  %2339 = vst [vmem:[%s15073_s27 + $0x968] sm:$0xff] %v2338_v45  ;;  %v2342_v47 = vld [vmem:[%s15065_s26 + $0x12f0] sm:$0xff] }
  0xac   : > { %2341 = vst [vmem:[%s15073_s27 + $0x970] sm:$0xff] %v2340_v46  ;;  %v2344_v48 = vld [vmem:[%s15065_s26 + $0x1300] sm:$0xff]  ;;  %v2346_v49 = vld [vmem:[%s15065_s26 + $0x1310] sm:$0xff]  ;;  %2343 = vst [vmem:[%s15073_s27 + $0x978] sm:$0xff] %v2342_v47 }
  0xad   : > { %2345 = vst [vmem:[%s15073_s27 + $0x980] sm:$0xff] %v2344_v48  ;;  %2347 = vst [vmem:[%s15073_s27 + $0x988] sm:$0xff] %v2346_v49  ;;  %v2348_v50 = vld [vmem:[%s15065_s26 + $0x1320] sm:$0xff]  ;;  %v2350_v51 = vld [vmem:[%s15065_s26 + $0x1330] sm:$0xff] }
  0xae   : > { %v2352_v52 = vld [vmem:[%s15065_s26 + $0x1340] sm:$0xff]  ;;  %2349 = vst [vmem:[%s15073_s27 + $0x990] sm:$0xff] %v2348_v50  ;;  %2351 = vst [vmem:[%s15073_s27 + $0x998] sm:$0xff] %v2350_v51  ;;  %v2354_v53 = vld [vmem:[%s15065_s26 + $0x1350] sm:$0xff] }
  0xaf   : > { %2353 = vst [vmem:[%s15073_s27 + $0x9a0] sm:$0xff] %v2352_v52  ;;  %v2356_v54 = vld [vmem:[%s15065_s26 + $0x1360] sm:$0xff]  ;;  %v2358_v55 = vld [vmem:[%s15065_s26 + $0x1370] sm:$0xff]  ;;  %2355 = vst [vmem:[%s15073_s27 + $0x9a8] sm:$0xff] %v2354_v53 }
  0xb0   : > { %2357 = vst [vmem:[%s15073_s27 + $0x9b0] sm:$0xff] %v2356_v54  ;;  %2359 = vst [vmem:[%s15073_s27 + $0x9b8] sm:$0xff] %v2358_v55  ;;  %v2360_v56 = vld [vmem:[%s15065_s26 + $0x1380] sm:$0xff]  ;;  %v2362_v57 = vld [vmem:[%s15065_s26 + $0x1390] sm:$0xff] }
  0xb1   : > { %v2364_v58 = vld [vmem:[%s15065_s26 + $0x13a0] sm:$0xff]  ;;  %2361 = vst [vmem:[%s15073_s27 + $0x9c0] sm:$0xff] %v2360_v56  ;;  %2363 = vst [vmem:[%s15073_s27 + $0x9c8] sm:$0xff] %v2362_v57  ;;  %v2366_v59 = vld [vmem:[%s15065_s26 + $0x13b0] sm:$0xff] }
  0xb2   : > { %2365 = vst [vmem:[%s15073_s27 + $0x9d0] sm:$0xff] %v2364_v58  ;;  %v2368_v60 = vld [vmem:[%s15065_s26 + $0x13c0] sm:$0xff]  ;;  %v2370_v61 = vld [vmem:[%s15065_s26 + $0x13d0] sm:$0xff]  ;;  %2367 = vst [vmem:[%s15073_s27 + $0x9d8] sm:$0xff] %v2366_v59 }
  0xb3   : > { %2369 = vst [vmem:[%s15073_s27 + $0x9e0] sm:$0xff] %v2368_v60  ;;  %2371 = vst [vmem:[%s15073_s27 + $0x9e8] sm:$0xff] %v2370_v61  ;;  %v2372_v62 = vld [vmem:[%s15065_s26 + $0x13e0] sm:$0xff]  ;;  %v2374_v63 = vld [vmem:[%s15065_s26 + $0x13f0] sm:$0xff] }
  0xb4   : > { %v2376_v0 = vld [vmem:[%s15065_s26 + $0x1400] sm:$0xff]  ;;  %2373 = vst [vmem:[%s15073_s27 + $0x9f0] sm:$0xff] %v2372_v62  ;;  %2375 = vst [vmem:[%s15073_s27 + $0x9f8] sm:$0xff] %v2374_v63  ;;  %v2378_v1 = vld [vmem:[%s15065_s26 + $0x1410] sm:$0xff] }
  0xb5   : > { %2377 = vst [vmem:[%s15073_s27 + $0xa00] sm:$0xff] %v2376_v0  ;;  %v2380_v2 = vld [vmem:[%s15065_s26 + $0x1420] sm:$0xff]  ;;  %v2382_v3 = vld [vmem:[%s15065_s26 + $0x1430] sm:$0xff]  ;;  %2379 = vst [vmem:[%s15073_s27 + $0xa08] sm:$0xff] %v2378_v1 }
  0xb6   : > { %2381 = vst [vmem:[%s15073_s27 + $0xa10] sm:$0xff] %v2380_v2  ;;  %2383 = vst [vmem:[%s15073_s27 + $0xa18] sm:$0xff] %v2382_v3  ;;  %v2384_v4 = vld [vmem:[%s15065_s26 + $0x1440] sm:$0xff]  ;;  %v2386_v5 = vld [vmem:[%s15065_s26 + $0x1450] sm:$0xff] }
  0xb7   : > { %v2388_v6 = vld [vmem:[%s15065_s26 + $0x1460] sm:$0xff]  ;;  %2385 = vst [vmem:[%s15073_s27 + $0xa20] sm:$0xff] %v2384_v4  ;;  %2387 = vst [vmem:[%s15073_s27 + $0xa28] sm:$0xff] %v2386_v5  ;;  %v2390_v7 = vld [vmem:[%s15065_s26 + $0x1470] sm:$0xff] }
  0xb8   : > { %2389 = vst [vmem:[%s15073_s27 + $0xa30] sm:$0xff] %v2388_v6  ;;  %v2392_v8 = vld [vmem:[%s15065_s26 + $0x1480] sm:$0xff]  ;;  %v2394_v9 = vld [vmem:[%s15065_s26 + $0x1490] sm:$0xff]  ;;  %2391 = vst [vmem:[%s15073_s27 + $0xa38] sm:$0xff] %v2390_v7 }
  0xb9   : > { %2393 = vst [vmem:[%s15073_s27 + $0xa40] sm:$0xff] %v2392_v8  ;;  %2395 = vst [vmem:[%s15073_s27 + $0xa48] sm:$0xff] %v2394_v9  ;;  %v2396_v10 = vld [vmem:[%s15065_s26 + $0x14a0] sm:$0xff]  ;;  %v2398_v11 = vld [vmem:[%s15065_s26 + $0x14b0] sm:$0xff] }
  0xba   : > { %v2400_v12 = vld [vmem:[%s15065_s26 + $0x14c0] sm:$0xff]  ;;  %2397 = vst [vmem:[%s15073_s27 + $0xa50] sm:$0xff] %v2396_v10  ;;  %2399 = vst [vmem:[%s15073_s27 + $0xa58] sm:$0xff] %v2398_v11  ;;  %v2402_v13 = vld [vmem:[%s15065_s26 + $0x14d0] sm:$0xff] }
  0xbb   : > { %2401 = vst [vmem:[%s15073_s27 + $0xa60] sm:$0xff] %v2400_v12  ;;  %v2404_v14 = vld [vmem:[%s15065_s26 + $0x14e0] sm:$0xff]  ;;  %v2406_v15 = vld [vmem:[%s15065_s26 + $0x14f0] sm:$0xff]  ;;  %2403 = vst [vmem:[%s15073_s27 + $0xa68] sm:$0xff] %v2402_v13 }
  0xbc   : > { %2405 = vst [vmem:[%s15073_s27 + $0xa70] sm:$0xff] %v2404_v14  ;;  %2407 = vst [vmem:[%s15073_s27 + $0xa78] sm:$0xff] %v2406_v15  ;;  %v2408_v16 = vld [vmem:[%s15065_s26 + $0x1500] sm:$0xff]  ;;  %v2410_v17 = vld [vmem:[%s15065_s26 + $0x1510] sm:$0xff] }
  0xbd   : > { %v2412_v18 = vld [vmem:[%s15065_s26 + $0x1520] sm:$0xff]  ;;  %2409 = vst [vmem:[%s15073_s27 + $0xa80] sm:$0xff] %v2408_v16  ;;  %2411 = vst [vmem:[%s15073_s27 + $0xa88] sm:$0xff] %v2410_v17  ;;  %v2414_v19 = vld [vmem:[%s15065_s26 + $0x1530] sm:$0xff] }
  0xbe   : > { %2413 = vst [vmem:[%s15073_s27 + $0xa90] sm:$0xff] %v2412_v18  ;;  %v2416_v20 = vld [vmem:[%s15065_s26 + $0x1540] sm:$0xff]  ;;  %v2418_v21 = vld [vmem:[%s15065_s26 + $0x1550] sm:$0xff]  ;;  %2415 = vst [vmem:[%s15073_s27 + $0xa98] sm:$0xff] %v2414_v19 }
  0xbf   : > { %2417 = vst [vmem:[%s15073_s27 + $0xaa0] sm:$0xff] %v2416_v20  ;;  %2419 = vst [vmem:[%s15073_s27 + $0xaa8] sm:$0xff] %v2418_v21  ;;  %v2420_v22 = vld [vmem:[%s15065_s26 + $0x1560] sm:$0xff]  ;;  %v2422_v23 = vld [vmem:[%s15065_s26 + $0x1570] sm:$0xff] }
  0xc0   : > { %v2424_v24 = vld [vmem:[%s15065_s26 + $0x1580] sm:$0xff]  ;;  %2421 = vst [vmem:[%s15073_s27 + $0xab0] sm:$0xff] %v2420_v22  ;;  %2423 = vst [vmem:[%s15073_s27 + $0xab8] sm:$0xff] %v2422_v23  ;;  %v2426_v25 = vld [vmem:[%s15065_s26 + $0x1590] sm:$0xff] }
  0xc1   : > { %2425 = vst [vmem:[%s15073_s27 + $0xac0] sm:$0xff] %v2424_v24  ;;  %v2428_v26 = vld [vmem:[%s15065_s26 + $0x15a0] sm:$0xff]  ;;  %v2430_v27 = vld [vmem:[%s15065_s26 + $0x15b0] sm:$0xff]  ;;  %2427 = vst [vmem:[%s15073_s27 + $0xac8] sm:$0xff] %v2426_v25 }
  0xc2   : > { %2429 = vst [vmem:[%s15073_s27 + $0xad0] sm:$0xff] %v2428_v26  ;;  %2431 = vst [vmem:[%s15073_s27 + $0xad8] sm:$0xff] %v2430_v27  ;;  %v2432_v28 = vld [vmem:[%s15065_s26 + $0x15c0] sm:$0xff]  ;;  %v2434_v29 = vld [vmem:[%s15065_s26 + $0x15d0] sm:$0xff] }
  0xc3   : > { %v2436_v30 = vld [vmem:[%s15065_s26 + $0x15e0] sm:$0xff]  ;;  %2433 = vst [vmem:[%s15073_s27 + $0xae0] sm:$0xff] %v2432_v28  ;;  %2435 = vst [vmem:[%s15073_s27 + $0xae8] sm:$0xff] %v2434_v29  ;;  %v2438_v31 = vld [vmem:[%s15065_s26 + $0x15f0] sm:$0xff] }
  0xc4   : > { %2437 = vst [vmem:[%s15073_s27 + $0xaf0] sm:$0xff] %v2436_v30  ;;  %v2440_v32 = vld [vmem:[%s15065_s26 + $0x1600] sm:$0xff]  ;;  %v2442_v33 = vld [vmem:[%s15065_s26 + $0x1610] sm:$0xff]  ;;  %2439 = vst [vmem:[%s15073_s27 + $0xaf8] sm:$0xff] %v2438_v31 }
  0xc5   : > { %2441 = vst [vmem:[%s15073_s27 + $0xb00] sm:$0xff] %v2440_v32  ;;  %2443 = vst [vmem:[%s15073_s27 + $0xb08] sm:$0xff] %v2442_v33  ;;  %v2444_v34 = vld [vmem:[%s15065_s26 + $0x1620] sm:$0xff]  ;;  %v2446_v35 = vld [vmem:[%s15065_s26 + $0x1630] sm:$0xff] }
  0xc6   : > { %v2448_v36 = vld [vmem:[%s15065_s26 + $0x1640] sm:$0xff]  ;;  %2445 = vst [vmem:[%s15073_s27 + $0xb10] sm:$0xff] %v2444_v34  ;;  %2447 = vst [vmem:[%s15073_s27 + $0xb18] sm:$0xff] %v2446_v35  ;;  %v2450_v37 = vld [vmem:[%s15065_s26 + $0x1650] sm:$0xff] }
  0xc7   : > { %2449 = vst [vmem:[%s15073_s27 + $0xb20] sm:$0xff] %v2448_v36  ;;  %v2452_v38 = vld [vmem:[%s15065_s26 + $0x1660] sm:$0xff]  ;;  %v2454_v39 = vld [vmem:[%s15065_s26 + $0x1670] sm:$0xff]  ;;  %2451 = vst [vmem:[%s15073_s27 + $0xb28] sm:$0xff] %v2450_v37 }
  0xc8   : > { %2453 = vst [vmem:[%s15073_s27 + $0xb30] sm:$0xff] %v2452_v38  ;;  %2455 = vst [vmem:[%s15073_s27 + $0xb38] sm:$0xff] %v2454_v39  ;;  %v2456_v40 = vld [vmem:[%s15065_s26 + $0x1680] sm:$0xff]  ;;  %v2458_v41 = vld [vmem:[%s15065_s26 + $0x1690] sm:$0xff] }
  0xc9   : > { %v2460_v42 = vld [vmem:[%s15065_s26 + $0x16a0] sm:$0xff]  ;;  %2457 = vst [vmem:[%s15073_s27 + $0xb40] sm:$0xff] %v2456_v40  ;;  %2459 = vst [vmem:[%s15073_s27 + $0xb48] sm:$0xff] %v2458_v41  ;;  %v2462_v43 = vld [vmem:[%s15065_s26 + $0x16b0] sm:$0xff] }
  0xca   : > { %2461 = vst [vmem:[%s15073_s27 + $0xb50] sm:$0xff] %v2460_v42  ;;  %v2464_v44 = vld [vmem:[%s15065_s26 + $0x16c0] sm:$0xff]  ;;  %v2466_v45 = vld [vmem:[%s15065_s26 + $0x16d0] sm:$0xff]  ;;  %2463 = vst [vmem:[%s15073_s27 + $0xb58] sm:$0xff] %v2462_v43 }
  0xcb   : > { %2465 = vst [vmem:[%s15073_s27 + $0xb60] sm:$0xff] %v2464_v44  ;;  %2467 = vst [vmem:[%s15073_s27 + $0xb68] sm:$0xff] %v2466_v45  ;;  %v2468_v46 = vld [vmem:[%s15065_s26 + $0x16e0] sm:$0xff]  ;;  %v2470_v47 = vld [vmem:[%s15065_s26 + $0x16f0] sm:$0xff] }
  0xcc   : > { %v2472_v48 = vld [vmem:[%s15065_s26 + $0x1700] sm:$0xff]  ;;  %2469 = vst [vmem:[%s15073_s27 + $0xb70] sm:$0xff] %v2468_v46  ;;  %2471 = vst [vmem:[%s15073_s27 + $0xb78] sm:$0xff] %v2470_v47  ;;  %v2474_v49 = vld [vmem:[%s15065_s26 + $0x1710] sm:$0xff] }
  0xcd   : > { %2473 = vst [vmem:[%s15073_s27 + $0xb80] sm:$0xff] %v2472_v48  ;;  %v2476_v50 = vld [vmem:[%s15065_s26 + $0x1720] sm:$0xff]  ;;  %v2478_v51 = vld [vmem:[%s15065_s26 + $0x1730] sm:$0xff]  ;;  %2475 = vst [vmem:[%s15073_s27 + $0xb88] sm:$0xff] %v2474_v49 }
  0xce   : > { %2477 = vst [vmem:[%s15073_s27 + $0xb90] sm:$0xff] %v2476_v50  ;;  %2479 = vst [vmem:[%s15073_s27 + $0xb98] sm:$0xff] %v2478_v51  ;;  %v2480_v52 = vld [vmem:[%s15065_s26 + $0x1740] sm:$0xff]  ;;  %v2482_v53 = vld [vmem:[%s15065_s26 + $0x1750] sm:$0xff] }
  0xcf   : > { %v2484_v54 = vld [vmem:[%s15065_s26 + $0x1760] sm:$0xff]  ;;  %2481 = vst [vmem:[%s15073_s27 + $0xba0] sm:$0xff] %v2480_v52  ;;  %2483 = vst [vmem:[%s15073_s27 + $0xba8] sm:$0xff] %v2482_v53  ;;  %v2486_v55 = vld [vmem:[%s15065_s26 + $0x1770] sm:$0xff] }
  0xd0   : > { %2485 = vst [vmem:[%s15073_s27 + $0xbb0] sm:$0xff] %v2484_v54  ;;  %v2488_v56 = vld [vmem:[%s15065_s26 + $0x1780] sm:$0xff]  ;;  %v2490_v57 = vld [vmem:[%s15065_s26 + $0x1790] sm:$0xff]  ;;  %2487 = vst [vmem:[%s15073_s27 + $0xbb8] sm:$0xff] %v2486_v55 }
  0xd1   : > { %2489 = vst [vmem:[%s15073_s27 + $0xbc0] sm:$0xff] %v2488_v56  ;;  %2491 = vst [vmem:[%s15073_s27 + $0xbc8] sm:$0xff] %v2490_v57  ;;  %v2492_v58 = vld [vmem:[%s15065_s26 + $0x17a0] sm:$0xff]  ;;  %v2494_v59 = vld [vmem:[%s15065_s26 + $0x17b0] sm:$0xff] }
  0xd2   : > { %v2496_v60 = vld [vmem:[%s15065_s26 + $0x17c0] sm:$0xff]  ;;  %2493 = vst [vmem:[%s15073_s27 + $0xbd0] sm:$0xff] %v2492_v58  ;;  %2495 = vst [vmem:[%s15073_s27 + $0xbd8] sm:$0xff] %v2494_v59  ;;  %v2498_v61 = vld [vmem:[%s15065_s26 + $0x17d0] sm:$0xff] }
  0xd3   : > { %2497 = vst [vmem:[%s15073_s27 + $0xbe0] sm:$0xff] %v2496_v60  ;;  %v2500_v62 = vld [vmem:[%s15065_s26 + $0x17e0] sm:$0xff]  ;;  %v2502_v63 = vld [vmem:[%s15065_s26 + $0x17f0] sm:$0xff]  ;;  %2499 = vst [vmem:[%s15073_s27 + $0xbe8] sm:$0xff] %v2498_v61 }
  0xd4   : > { %2501 = vst [vmem:[%s15073_s27 + $0xbf0] sm:$0xff] %v2500_v62  ;;  %2503 = vst [vmem:[%s15073_s27 + $0xbf8] sm:$0xff] %v2502_v63  ;;  %v2504_v0 = vld [vmem:[%s15065_s26 + $0x1800] sm:$0xff]  ;;  %v2506_v1 = vld [vmem:[%s15065_s26 + $0x1810] sm:$0xff] }
  0xd5   : > { %v2508_v2 = vld [vmem:[%s15065_s26 + $0x1820] sm:$0xff]  ;;  %2505 = vst [vmem:[%s15073_s27 + $0xc00] sm:$0xff] %v2504_v0  ;;  %2507 = vst [vmem:[%s15073_s27 + $0xc08] sm:$0xff] %v2506_v1  ;;  %v2510_v3 = vld [vmem:[%s15065_s26 + $0x1830] sm:$0xff] }
  0xd6   : > { %2509 = vst [vmem:[%s15073_s27 + $0xc10] sm:$0xff] %v2508_v2  ;;  %v2512_v4 = vld [vmem:[%s15065_s26 + $0x1840] sm:$0xff]  ;;  %v2514_v5 = vld [vmem:[%s15065_s26 + $0x1850] sm:$0xff]  ;;  %2511 = vst [vmem:[%s15073_s27 + $0xc18] sm:$0xff] %v2510_v3 }
  0xd7   : > { %2513 = vst [vmem:[%s15073_s27 + $0xc20] sm:$0xff] %v2512_v4  ;;  %2515 = vst [vmem:[%s15073_s27 + $0xc28] sm:$0xff] %v2514_v5  ;;  %v2516_v6 = vld [vmem:[%s15065_s26 + $0x1860] sm:$0xff]  ;;  %v2518_v7 = vld [vmem:[%s15065_s26 + $0x1870] sm:$0xff] }
  0xd8   : > { %v2520_v8 = vld [vmem:[%s15065_s26 + $0x1880] sm:$0xff]  ;;  %2517 = vst [vmem:[%s15073_s27 + $0xc30] sm:$0xff] %v2516_v6  ;;  %2519 = vst [vmem:[%s15073_s27 + $0xc38] sm:$0xff] %v2518_v7  ;;  %v2522_v9 = vld [vmem:[%s15065_s26 + $0x1890] sm:$0xff] }
  0xd9   : > { %2521 = vst [vmem:[%s15073_s27 + $0xc40] sm:$0xff] %v2520_v8  ;;  %v2524_v10 = vld [vmem:[%s15065_s26 + $0x18a0] sm:$0xff]  ;;  %v2526_v11 = vld [vmem:[%s15065_s26 + $0x18b0] sm:$0xff]  ;;  %2523 = vst [vmem:[%s15073_s27 + $0xc48] sm:$0xff] %v2522_v9 }
  0xda   : > { %2525 = vst [vmem:[%s15073_s27 + $0xc50] sm:$0xff] %v2524_v10  ;;  %2527 = vst [vmem:[%s15073_s27 + $0xc58] sm:$0xff] %v2526_v11  ;;  %v2528_v12 = vld [vmem:[%s15065_s26 + $0x18c0] sm:$0xff]  ;;  %v2530_v13 = vld [vmem:[%s15065_s26 + $0x18d0] sm:$0xff] }
  0xdb   : > { %v2532_v14 = vld [vmem:[%s15065_s26 + $0x18e0] sm:$0xff]  ;;  %2529 = vst [vmem:[%s15073_s27 + $0xc60] sm:$0xff] %v2528_v12  ;;  %2531 = vst [vmem:[%s15073_s27 + $0xc68] sm:$0xff] %v2530_v13  ;;  %v2534_v15 = vld [vmem:[%s15065_s26 + $0x18f0] sm:$0xff] }
  0xdc   : > { %2533 = vst [vmem:[%s15073_s27 + $0xc70] sm:$0xff] %v2532_v14  ;;  %v2536_v16 = vld [vmem:[%s15065_s26 + $0x1900] sm:$0xff]  ;;  %v2538_v17 = vld [vmem:[%s15065_s26 + $0x1910] sm:$0xff]  ;;  %2535 = vst [vmem:[%s15073_s27 + $0xc78] sm:$0xff] %v2534_v15 }
  0xdd   : > { %2537 = vst [vmem:[%s15073_s27 + $0xc80] sm:$0xff] %v2536_v16  ;;  %2539 = vst [vmem:[%s15073_s27 + $0xc88] sm:$0xff] %v2538_v17  ;;  %v2540_v18 = vld [vmem:[%s15065_s26 + $0x1920] sm:$0xff]  ;;  %v2542_v19 = vld [vmem:[%s15065_s26 + $0x1930] sm:$0xff] }
  0xde   : > { %v2544_v20 = vld [vmem:[%s15065_s26 + $0x1940] sm:$0xff]  ;;  %2541 = vst [vmem:[%s15073_s27 + $0xc90] sm:$0xff] %v2540_v18  ;;  %2543 = vst [vmem:[%s15073_s27 + $0xc98] sm:$0xff] %v2542_v19  ;;  %v2546_v21 = vld [vmem:[%s15065_s26 + $0x1950] sm:$0xff] }
  0xdf   : > { %2545 = vst [vmem:[%s15073_s27 + $0xca0] sm:$0xff] %v2544_v20  ;;  %v2548_v22 = vld [vmem:[%s15065_s26 + $0x1960] sm:$0xff]  ;;  %v2550_v23 = vld [vmem:[%s15065_s26 + $0x1970] sm:$0xff]  ;;  %2547 = vst [vmem:[%s15073_s27 + $0xca8] sm:$0xff] %v2546_v21 }
  0xe0   : > { %2549 = vst [vmem:[%s15073_s27 + $0xcb0] sm:$0xff] %v2548_v22  ;;  %2551 = vst [vmem:[%s15073_s27 + $0xcb8] sm:$0xff] %v2550_v23  ;;  %v2552_v24 = vld [vmem:[%s15065_s26 + $0x1980] sm:$0xff]  ;;  %v2554_v25 = vld [vmem:[%s15065_s26 + $0x1990] sm:$0xff] }
  0xe1   : > { %v2556_v26 = vld [vmem:[%s15065_s26 + $0x19a0] sm:$0xff]  ;;  %2553 = vst [vmem:[%s15073_s27 + $0xcc0] sm:$0xff] %v2552_v24  ;;  %2555 = vst [vmem:[%s15073_s27 + $0xcc8] sm:$0xff] %v2554_v25  ;;  %v2558_v27 = vld [vmem:[%s15065_s26 + $0x19b0] sm:$0xff] }
  0xe2   : > { %2557 = vst [vmem:[%s15073_s27 + $0xcd0] sm:$0xff] %v2556_v26  ;;  %v2560_v28 = vld [vmem:[%s15065_s26 + $0x19c0] sm:$0xff]  ;;  %v2562_v29 = vld [vmem:[%s15065_s26 + $0x19d0] sm:$0xff]  ;;  %2559 = vst [vmem:[%s15073_s27 + $0xcd8] sm:$0xff] %v2558_v27 }
  0xe3   : > { %2561 = vst [vmem:[%s15073_s27 + $0xce0] sm:$0xff] %v2560_v28  ;;  %2563 = vst [vmem:[%s15073_s27 + $0xce8] sm:$0xff] %v2562_v29  ;;  %v2564_v30 = vld [vmem:[%s15065_s26 + $0x19e0] sm:$0xff]  ;;  %v2566_v31 = vld [vmem:[%s15065_s26 + $0x19f0] sm:$0xff] }
  0xe4   : > { %v2568_v32 = vld [vmem:[%s15065_s26 + $0x1a00] sm:$0xff]  ;;  %2565 = vst [vmem:[%s15073_s27 + $0xcf0] sm:$0xff] %v2564_v30  ;;  %2567 = vst [vmem:[%s15073_s27 + $0xcf8] sm:$0xff] %v2566_v31  ;;  %v2570_v33 = vld [vmem:[%s15065_s26 + $0x1a10] sm:$0xff] }
  0xe5   : > { %2569 = vst [vmem:[%s15073_s27 + $0xd00] sm:$0xff] %v2568_v32  ;;  %v2572_v34 = vld [vmem:[%s15065_s26 + $0x1a20] sm:$0xff]  ;;  %v2574_v35 = vld [vmem:[%s15065_s26 + $0x1a30] sm:$0xff]  ;;  %2571 = vst [vmem:[%s15073_s27 + $0xd08] sm:$0xff] %v2570_v33 }
  0xe6   : > { %2573 = vst [vmem:[%s15073_s27 + $0xd10] sm:$0xff] %v2572_v34  ;;  %2575 = vst [vmem:[%s15073_s27 + $0xd18] sm:$0xff] %v2574_v35  ;;  %v2576_v36 = vld [vmem:[%s15065_s26 + $0x1a40] sm:$0xff]  ;;  %v2578_v37 = vld [vmem:[%s15065_s26 + $0x1a50] sm:$0xff] }
  0xe7   : > { %v2580_v38 = vld [vmem:[%s15065_s26 + $0x1a60] sm:$0xff]  ;;  %2577 = vst [vmem:[%s15073_s27 + $0xd20] sm:$0xff] %v2576_v36  ;;  %2579 = vst [vmem:[%s15073_s27 + $0xd28] sm:$0xff] %v2578_v37  ;;  %v2582_v39 = vld [vmem:[%s15065_s26 + $0x1a70] sm:$0xff] }
  0xe8   : > { %2581 = vst [vmem:[%s15073_s27 + $0xd30] sm:$0xff] %v2580_v38  ;;  %v2584_v40 = vld [vmem:[%s15065_s26 + $0x1a80] sm:$0xff]  ;;  %v2586_v41 = vld [vmem:[%s15065_s26 + $0x1a90] sm:$0xff]  ;;  %2583 = vst [vmem:[%s15073_s27 + $0xd38] sm:$0xff] %v2582_v39 }
  0xe9   : > { %2585 = vst [vmem:[%s15073_s27 + $0xd40] sm:$0xff] %v2584_v40  ;;  %2587 = vst [vmem:[%s15073_s27 + $0xd48] sm:$0xff] %v2586_v41  ;;  %v2588_v42 = vld [vmem:[%s15065_s26 + $0x1aa0] sm:$0xff]  ;;  %v2590_v43 = vld [vmem:[%s15065_s26 + $0x1ab0] sm:$0xff] }
  0xea   : > { %v2592_v44 = vld [vmem:[%s15065_s26 + $0x1ac0] sm:$0xff]  ;;  %2589 = vst [vmem:[%s15073_s27 + $0xd50] sm:$0xff] %v2588_v42  ;;  %2591 = vst [vmem:[%s15073_s27 + $0xd58] sm:$0xff] %v2590_v43  ;;  %v2594_v45 = vld [vmem:[%s15065_s26 + $0x1ad0] sm:$0xff] }
  0xeb   : > { %2593 = vst [vmem:[%s15073_s27 + $0xd60] sm:$0xff] %v2592_v44  ;;  %v2596_v46 = vld [vmem:[%s15065_s26 + $0x1ae0] sm:$0xff]  ;;  %v2598_v47 = vld [vmem:[%s15065_s26 + $0x1af0] sm:$0xff]  ;;  %2595 = vst [vmem:[%s15073_s27 + $0xd68] sm:$0xff] %v2594_v45 }
  0xec   : > { %2597 = vst [vmem:[%s15073_s27 + $0xd70] sm:$0xff] %v2596_v46  ;;  %2599 = vst [vmem:[%s15073_s27 + $0xd78] sm:$0xff] %v2598_v47  ;;  %v2600_v48 = vld [vmem:[%s15065_s26 + $0x1b00] sm:$0xff]  ;;  %v2602_v49 = vld [vmem:[%s15065_s26 + $0x1b10] sm:$0xff] }
  0xed   : > { %v2604_v50 = vld [vmem:[%s15065_s26 + $0x1b20] sm:$0xff]  ;;  %2601 = vst [vmem:[%s15073_s27 + $0xd80] sm:$0xff] %v2600_v48  ;;  %2603 = vst [vmem:[%s15073_s27 + $0xd88] sm:$0xff] %v2602_v49  ;;  %v2606_v51 = vld [vmem:[%s15065_s26 + $0x1b30] sm:$0xff] }
  0xee   : > { %2605 = vst [vmem:[%s15073_s27 + $0xd90] sm:$0xff] %v2604_v50  ;;  %v2608_v52 = vld [vmem:[%s15065_s26 + $0x1b40] sm:$0xff]  ;;  %v2610_v53 = vld [vmem:[%s15065_s26 + $0x1b50] sm:$0xff]  ;;  %2607 = vst [vmem:[%s15073_s27 + $0xd98] sm:$0xff] %v2606_v51 }
  0xef   : > { %2609 = vst [vmem:[%s15073_s27 + $0xda0] sm:$0xff] %v2608_v52  ;;  %2611 = vst [vmem:[%s15073_s27 + $0xda8] sm:$0xff] %v2610_v53  ;;  %v2612_v54 = vld [vmem:[%s15065_s26 + $0x1b60] sm:$0xff]  ;;  %v2614_v55 = vld [vmem:[%s15065_s26 + $0x1b70] sm:$0xff] }
  0xf0   : > { %v2616_v56 = vld [vmem:[%s15065_s26 + $0x1b80] sm:$0xff]  ;;  %2613 = vst [vmem:[%s15073_s27 + $0xdb0] sm:$0xff] %v2612_v54  ;;  %2615 = vst [vmem:[%s15073_s27 + $0xdb8] sm:$0xff] %v2614_v55  ;;  %v2618_v57 = vld [vmem:[%s15065_s26 + $0x1b90] sm:$0xff] }
  0xf1   : > { %2617 = vst [vmem:[%s15073_s27 + $0xdc0] sm:$0xff] %v2616_v56  ;;  %v2620_v58 = vld [vmem:[%s15065_s26 + $0x1ba0] sm:$0xff]  ;;  %v2622_v59 = vld [vmem:[%s15065_s26 + $0x1bb0] sm:$0xff]  ;;  %2619 = vst [vmem:[%s15073_s27 + $0xdc8] sm:$0xff] %v2618_v57 }
  0xf2   : > { %2621 = vst [vmem:[%s15073_s27 + $0xdd0] sm:$0xff] %v2620_v58  ;;  %2623 = vst [vmem:[%s15073_s27 + $0xdd8] sm:$0xff] %v2622_v59  ;;  %v2624_v60 = vld [vmem:[%s15065_s26 + $0x1bc0] sm:$0xff]  ;;  %v2626_v61 = vld [vmem:[%s15065_s26 + $0x1bd0] sm:$0xff] }
  0xf3   : > { %v2628_v62 = vld [vmem:[%s15065_s26 + $0x1be0] sm:$0xff]  ;;  %2625 = vst [vmem:[%s15073_s27 + $0xde0] sm:$0xff] %v2624_v60  ;;  %2627 = vst [vmem:[%s15073_s27 + $0xde8] sm:$0xff] %v2626_v61  ;;  %v2630_v63 = vld [vmem:[%s15065_s26 + $0x1bf0] sm:$0xff] }
  0xf4   : > { %2629 = vst [vmem:[%s15073_s27 + $0xdf0] sm:$0xff] %v2628_v62  ;;  %v2632_v0 = vld [vmem:[%s15065_s26 + $0x1c00] sm:$0xff]  ;;  %v2634_v1 = vld [vmem:[%s15065_s26 + $0x1c10] sm:$0xff]  ;;  %2631 = vst [vmem:[%s15073_s27 + $0xdf8] sm:$0xff] %v2630_v63 }
  0xf5   : > { %2633 = vst [vmem:[%s15073_s27 + $0xe00] sm:$0xff] %v2632_v0  ;;  %2635 = vst [vmem:[%s15073_s27 + $0xe08] sm:$0xff] %v2634_v1  ;;  %v2636_v2 = vld [vmem:[%s15065_s26 + $0x1c20] sm:$0xff]  ;;  %v2638_v3 = vld [vmem:[%s15065_s26 + $0x1c30] sm:$0xff] }
  0xf6   : > { %v2640_v4 = vld [vmem:[%s15065_s26 + $0x1c40] sm:$0xff]  ;;  %2637 = vst [vmem:[%s15073_s27 + $0xe10] sm:$0xff] %v2636_v2  ;;  %2639 = vst [vmem:[%s15073_s27 + $0xe18] sm:$0xff] %v2638_v3  ;;  %v2642_v5 = vld [vmem:[%s15065_s26 + $0x1c50] sm:$0xff] }
  0xf7   : > { %2641 = vst [vmem:[%s15073_s27 + $0xe20] sm:$0xff] %v2640_v4  ;;  %v2644_v6 = vld [vmem:[%s15065_s26 + $0x1c60] sm:$0xff]  ;;  %v2646_v7 = vld [vmem:[%s15065_s26 + $0x1c70] sm:$0xff]  ;;  %2643 = vst [vmem:[%s15073_s27 + $0xe28] sm:$0xff] %v2642_v5 }
  0xf8   : > { %2645 = vst [vmem:[%s15073_s27 + $0xe30] sm:$0xff] %v2644_v6  ;;  %2647 = vst [vmem:[%s15073_s27 + $0xe38] sm:$0xff] %v2646_v7  ;;  %v2648_v8 = vld [vmem:[%s15065_s26 + $0x1c80] sm:$0xff]  ;;  %v2650_v9 = vld [vmem:[%s15065_s26 + $0x1c90] sm:$0xff] }
  0xf9   : > { %v2652_v10 = vld [vmem:[%s15065_s26 + $0x1ca0] sm:$0xff]  ;;  %2649 = vst [vmem:[%s15073_s27 + $0xe40] sm:$0xff] %v2648_v8  ;;  %2651 = vst [vmem:[%s15073_s27 + $0xe48] sm:$0xff] %v2650_v9  ;;  %v2654_v11 = vld [vmem:[%s15065_s26 + $0x1cb0] sm:$0xff] }
  0xfa   : > { %2653 = vst [vmem:[%s15073_s27 + $0xe50] sm:$0xff] %v2652_v10  ;;  %v2656_v12 = vld [vmem:[%s15065_s26 + $0x1cc0] sm:$0xff]  ;;  %v2658_v13 = vld [vmem:[%s15065_s26 + $0x1cd0] sm:$0xff]  ;;  %2655 = vst [vmem:[%s15073_s27 + $0xe58] sm:$0xff] %v2654_v11 }
  0xfb   : > { %2657 = vst [vmem:[%s15073_s27 + $0xe60] sm:$0xff] %v2656_v12  ;;  %2659 = vst [vmem:[%s15073_s27 + $0xe68] sm:$0xff] %v2658_v13  ;;  %v2660_v14 = vld [vmem:[%s15065_s26 + $0x1ce0] sm:$0xff]  ;;  %v2662_v15 = vld [vmem:[%s15065_s26 + $0x1cf0] sm:$0xff] }
  0xfc   : > { %v2664_v16 = vld [vmem:[%s15065_s26 + $0x1d00] sm:$0xff]  ;;  %2661 = vst [vmem:[%s15073_s27 + $0xe70] sm:$0xff] %v2660_v14  ;;  %2663 = vst [vmem:[%s15073_s27 + $0xe78] sm:$0xff] %v2662_v15  ;;  %v2666_v17 = vld [vmem:[%s15065_s26 + $0x1d10] sm:$0xff] }
  0xfd   : > { %2665 = vst [vmem:[%s15073_s27 + $0xe80] sm:$0xff] %v2664_v16  ;;  %v2668_v18 = vld [vmem:[%s15065_s26 + $0x1d20] sm:$0xff]  ;;  %v2670_v19 = vld [vmem:[%s15065_s26 + $0x1d30] sm:$0xff]  ;;  %2667 = vst [vmem:[%s15073_s27 + $0xe88] sm:$0xff] %v2666_v17 }
  0xfe   : > { %2669 = vst [vmem:[%s15073_s27 + $0xe90] sm:$0xff] %v2668_v18  ;;  %2671 = vst [vmem:[%s15073_s27 + $0xe98] sm:$0xff] %v2670_v19  ;;  %v2672_v20 = vld [vmem:[%s15065_s26 + $0x1d40] sm:$0xff]  ;;  %v2674_v21 = vld [vmem:[%s15065_s26 + $0x1d50] sm:$0xff] }
  0xff   : > { %v2676_v22 = vld [vmem:[%s15065_s26 + $0x1d60] sm:$0xff]  ;;  %2673 = vst [vmem:[%s15073_s27 + $0xea0] sm:$0xff] %v2672_v20  ;;  %2675 = vst [vmem:[%s15073_s27 + $0xea8] sm:$0xff] %v2674_v21  ;;  %v2678_v23 = vld [vmem:[%s15065_s26 + $0x1d70] sm:$0xff] }
 0x100   : > { %2677 = vst [vmem:[%s15073_s27 + $0xeb0] sm:$0xff] %v2676_v22  ;;  %v2680_v24 = vld [vmem:[%s15065_s26 + $0x1d80] sm:$0xff]  ;;  %v2682_v25 = vld [vmem:[%s15065_s26 + $0x1d90] sm:$0xff]  ;;  %2679 = vst [vmem:[%s15073_s27 + $0xeb8] sm:$0xff] %v2678_v23 }
 0x101   : > { %2681 = vst [vmem:[%s15073_s27 + $0xec0] sm:$0xff] %v2680_v24  ;;  %2683 = vst [vmem:[%s15073_s27 + $0xec8] sm:$0xff] %v2682_v25  ;;  %v2684_v26 = vld [vmem:[%s15065_s26 + $0x1da0] sm:$0xff]  ;;  %v2686_v27 = vld [vmem:[%s15065_s26 + $0x1db0] sm:$0xff] }
 0x102   : > { %v2688_v28 = vld [vmem:[%s15065_s26 + $0x1dc0] sm:$0xff]  ;;  %2685 = vst [vmem:[%s15073_s27 + $0xed0] sm:$0xff] %v2684_v26  ;;  %2687 = vst [vmem:[%s15073_s27 + $0xed8] sm:$0xff] %v2686_v27  ;;  %v2690_v29 = vld [vmem:[%s15065_s26 + $0x1dd0] sm:$0xff] }
 0x103   : > { %2689 = vst [vmem:[%s15073_s27 + $0xee0] sm:$0xff] %v2688_v28  ;;  %v2692_v30 = vld [vmem:[%s15065_s26 + $0x1de0] sm:$0xff]  ;;  %v2694_v31 = vld [vmem:[%s15065_s26 + $0x1df0] sm:$0xff]  ;;  %2691 = vst [vmem:[%s15073_s27 + $0xee8] sm:$0xff] %v2690_v29 }
 0x104   : > { %2693 = vst [vmem:[%s15073_s27 + $0xef0] sm:$0xff] %v2692_v30  ;;  %2695 = vst [vmem:[%s15073_s27 + $0xef8] sm:$0xff] %v2694_v31  ;;  %v2696_v32 = vld [vmem:[%s15065_s26 + $0x1e00] sm:$0xff]  ;;  %v2698_v33 = vld [vmem:[%s15065_s26 + $0x1e10] sm:$0xff] }
 0x105   : > { %v2700_v34 = vld [vmem:[%s15065_s26 + $0x1e20] sm:$0xff]  ;;  %2697 = vst [vmem:[%s15073_s27 + $0xf00] sm:$0xff] %v2696_v32  ;;  %2699 = vst [vmem:[%s15073_s27 + $0xf08] sm:$0xff] %v2698_v33  ;;  %v2702_v35 = vld [vmem:[%s15065_s26 + $0x1e30] sm:$0xff] }
 0x106   : > { %2701 = vst [vmem:[%s15073_s27 + $0xf10] sm:$0xff] %v2700_v34  ;;  %v2704_v36 = vld [vmem:[%s15065_s26 + $0x1e40] sm:$0xff]  ;;  %v2706_v37 = vld [vmem:[%s15065_s26 + $0x1e50] sm:$0xff]  ;;  %2703 = vst [vmem:[%s15073_s27 + $0xf18] sm:$0xff] %v2702_v35 }
 0x107   : > { %2705 = vst [vmem:[%s15073_s27 + $0xf20] sm:$0xff] %v2704_v36  ;;  %2707 = vst [vmem:[%s15073_s27 + $0xf28] sm:$0xff] %v2706_v37  ;;  %v2708_v38 = vld [vmem:[%s15065_s26 + $0x1e60] sm:$0xff]  ;;  %v2710_v39 = vld [vmem:[%s15065_s26 + $0x1e70] sm:$0xff] }
 0x108   : > { %v2712_v40 = vld [vmem:[%s15065_s26 + $0x1e80] sm:$0xff]  ;;  %2709 = vst [vmem:[%s15073_s27 + $0xf30] sm:$0xff] %v2708_v38  ;;  %2711 = vst [vmem:[%s15073_s27 + $0xf38] sm:$0xff] %v2710_v39  ;;  %v2714_v41 = vld [vmem:[%s15065_s26 + $0x1e90] sm:$0xff] }
 0x109   : > { %2713 = vst [vmem:[%s15073_s27 + $0xf40] sm:$0xff] %v2712_v40  ;;  %v2716_v42 = vld [vmem:[%s15065_s26 + $0x1ea0] sm:$0xff]  ;;  %v2718_v43 = vld [vmem:[%s15065_s26 + $0x1eb0] sm:$0xff]  ;;  %2715 = vst [vmem:[%s15073_s27 + $0xf48] sm:$0xff] %v2714_v41 }
 0x10a   : > { %2717 = vst [vmem:[%s15073_s27 + $0xf50] sm:$0xff] %v2716_v42  ;;  %2719 = vst [vmem:[%s15073_s27 + $0xf58] sm:$0xff] %v2718_v43  ;;  %v2720_v44 = vld [vmem:[%s15065_s26 + $0x1ec0] sm:$0xff]  ;;  %v2722_v45 = vld [vmem:[%s15065_s26 + $0x1ed0] sm:$0xff] }
 0x10b   : > { %v2724_v46 = vld [vmem:[%s15065_s26 + $0x1ee0] sm:$0xff]  ;;  %2721 = vst [vmem:[%s15073_s27 + $0xf60] sm:$0xff] %v2720_v44  ;;  %2723 = vst [vmem:[%s15073_s27 + $0xf68] sm:$0xff] %v2722_v45  ;;  %v2726_v47 = vld [vmem:[%s15065_s26 + $0x1ef0] sm:$0xff] }
 0x10c   : > { %2725 = vst [vmem:[%s15073_s27 + $0xf70] sm:$0xff] %v2724_v46  ;;  %v2728_v48 = vld [vmem:[%s15065_s26 + $0x1f00] sm:$0xff]  ;;  %v2730_v49 = vld [vmem:[%s15065_s26 + $0x1f10] sm:$0xff]  ;;  %2727 = vst [vmem:[%s15073_s27 + $0xf78] sm:$0xff] %v2726_v47 }
 0x10d   : > { %2729 = vst [vmem:[%s15073_s27 + $0xf80] sm:$0xff] %v2728_v48  ;;  %2731 = vst [vmem:[%s15073_s27 + $0xf88] sm:$0xff] %v2730_v49  ;;  %v2732_v50 = vld [vmem:[%s15065_s26 + $0x1f20] sm:$0xff]  ;;  %v2734_v51 = vld [vmem:[%s15065_s26 + $0x1f30] sm:$0xff] }
 0x10e   : > { %v2736_v52 = vld [vmem:[%s15065_s26 + $0x1f40] sm:$0xff]  ;;  %2733 = vst [vmem:[%s15073_s27 + $0xf90] sm:$0xff] %v2732_v50  ;;  %2735 = vst [vmem:[%s15073_s27 + $0xf98] sm:$0xff] %v2734_v51  ;;  %v2738_v53 = vld [vmem:[%s15065_s26 + $0x1f50] sm:$0xff] }
 0x10f   : > { %2737 = vst [vmem:[%s15073_s27 + $0xfa0] sm:$0xff] %v2736_v52  ;;  %v2740_v54 = vld [vmem:[%s15065_s26 + $0x1f60] sm:$0xff]  ;;  %v2742_v55 = vld [vmem:[%s15065_s26 + $0x1f70] sm:$0xff]  ;;  %2739 = vst [vmem:[%s15073_s27 + $0xfa8] sm:$0xff] %v2738_v53 }
 0x110   : > { %2741 = vst [vmem:[%s15073_s27 + $0xfb0] sm:$0xff] %v2740_v54  ;;  %2743 = vst [vmem:[%s15073_s27 + $0xfb8] sm:$0xff] %v2742_v55  ;;  %v2744_v56 = vld [vmem:[%s15065_s26 + $0x1f80] sm:$0xff]  ;;  %v2746_v57 = vld [vmem:[%s15065_s26 + $0x1f90] sm:$0xff] }
 0x111   : > { %v2748_v58 = vld [vmem:[%s15065_s26 + $0x1fa0] sm:$0xff]  ;;  %2745 = vst [vmem:[%s15073_s27 + $0xfc0] sm:$0xff] %v2744_v56  ;;  %2747 = vst [vmem:[%s15073_s27 + $0xfc8] sm:$0xff] %v2746_v57  ;;  %v2750_v59 = vld [vmem:[%s15065_s26 + $0x1fb0] sm:$0xff] }
 0x112   : > { %2749 = vst [vmem:[%s15073_s27 + $0xfd0] sm:$0xff] %v2748_v58  ;;  %v2752_v60 = vld [vmem:[%s15065_s26 + $0x1fc0] sm:$0xff]  ;;  %v2754_v61 = vld [vmem:[%s15065_s26 + $0x1fd0] sm:$0xff]  ;;  %2751 = vst [vmem:[%s15073_s27 + $0xfd8] sm:$0xff] %v2750_v59 }
 0x113   : > { %2753 = vst [vmem:[%s15073_s27 + $0xfe0] sm:$0xff] %v2752_v60  ;;  %2755 = vst [vmem:[%s15073_s27 + $0xfe8] sm:$0xff] %v2754_v61  ;;  %v2756_v62 = vld [vmem:[%s15065_s26 + $0x1fe0] sm:$0xff]  ;;  %v2758_v63 = vld [vmem:[%s15065_s26 + $0x1ff0] sm:$0xff] }
 0x114   : > { %v2760_v0 = vld [vmem:[%s15065_s26 + $0x2000] sm:$0xff]  ;;  %2757 = vst [vmem:[%s15073_s27 + $0xff0] sm:$0xff] %v2756_v62  ;;  %2759 = vst [vmem:[%s15073_s27 + $0xff8] sm:$0xff] %v2758_v63  ;;  %v2762_v1 = vld [vmem:[%s15065_s26 + $0x2010] sm:$0xff] }
 0x115   : > { %2761 = vst [vmem:[%s15073_s27 + $0x1000] sm:$0xff] %v2760_v0  ;;  %v2764_v2 = vld [vmem:[%s15065_s26 + $0x2020] sm:$0xff]  ;;  %v2766_v3 = vld [vmem:[%s15065_s26 + $0x2030] sm:$0xff]  ;;  %2763 = vst [vmem:[%s15073_s27 + $0x1008] sm:$0xff] %v2762_v1 }
 0x116   : > { %2765 = vst [vmem:[%s15073_s27 + $0x1010] sm:$0xff] %v2764_v2  ;;  %2767 = vst [vmem:[%s15073_s27 + $0x1018] sm:$0xff] %v2766_v3  ;;  %v2768_v4 = vld [vmem:[%s15065_s26 + $0x2040] sm:$0xff]  ;;  %v2770_v5 = vld [vmem:[%s15065_s26 + $0x2050] sm:$0xff] }
 0x117   : > { %v2772_v6 = vld [vmem:[%s15065_s26 + $0x2060] sm:$0xff]  ;;  %2769 = vst [vmem:[%s15073_s27 + $0x1020] sm:$0xff] %v2768_v4  ;;  %2771 = vst [vmem:[%s15073_s27 + $0x1028] sm:$0xff] %v2770_v5  ;;  %v2774_v7 = vld [vmem:[%s15065_s26 + $0x2070] sm:$0xff] }
 0x118   : > { %2773 = vst [vmem:[%s15073_s27 + $0x1030] sm:$0xff] %v2772_v6  ;;  %v2776_v8 = vld [vmem:[%s15065_s26 + $0x2080] sm:$0xff]  ;;  %v2778_v9 = vld [vmem:[%s15065_s26 + $0x2090] sm:$0xff]  ;;  %2775 = vst [vmem:[%s15073_s27 + $0x1038] sm:$0xff] %v2774_v7 }
 0x119   : > { %2777 = vst [vmem:[%s15073_s27 + $0x1040] sm:$0xff] %v2776_v8  ;;  %2779 = vst [vmem:[%s15073_s27 + $0x1048] sm:$0xff] %v2778_v9  ;;  %v2780_v10 = vld [vmem:[%s15065_s26 + $0x20a0] sm:$0xff]  ;;  %v2782_v11 = vld [vmem:[%s15065_s26 + $0x20b0] sm:$0xff] }
 0x11a   : > { %v2784_v12 = vld [vmem:[%s15065_s26 + $0x20c0] sm:$0xff]  ;;  %2781 = vst [vmem:[%s15073_s27 + $0x1050] sm:$0xff] %v2780_v10  ;;  %2783 = vst [vmem:[%s15073_s27 + $0x1058] sm:$0xff] %v2782_v11  ;;  %v2786_v13 = vld [vmem:[%s15065_s26 + $0x20d0] sm:$0xff] }
 0x11b   : > { %2785 = vst [vmem:[%s15073_s27 + $0x1060] sm:$0xff] %v2784_v12  ;;  %v2788_v14 = vld [vmem:[%s15065_s26 + $0x20e0] sm:$0xff]  ;;  %v2790_v15 = vld [vmem:[%s15065_s26 + $0x20f0] sm:$0xff]  ;;  %2787 = vst [vmem:[%s15073_s27 + $0x1068] sm:$0xff] %v2786_v13 }
 0x11c   : > { %2789 = vst [vmem:[%s15073_s27 + $0x1070] sm:$0xff] %v2788_v14  ;;  %2791 = vst [vmem:[%s15073_s27 + $0x1078] sm:$0xff] %v2790_v15  ;;  %v2792_v16 = vld [vmem:[%s15065_s26 + $0x2100] sm:$0xff]  ;;  %v2794_v17 = vld [vmem:[%s15065_s26 + $0x2110] sm:$0xff] }
 0x11d   : > { %v2796_v18 = vld [vmem:[%s15065_s26 + $0x2120] sm:$0xff]  ;;  %2793 = vst [vmem:[%s15073_s27 + $0x1080] sm:$0xff] %v2792_v16  ;;  %2795 = vst [vmem:[%s15073_s27 + $0x1088] sm:$0xff] %v2794_v17  ;;  %v2798_v19 = vld [vmem:[%s15065_s26 + $0x2130] sm:$0xff] }
 0x11e   : > { %2797 = vst [vmem:[%s15073_s27 + $0x1090] sm:$0xff] %v2796_v18  ;;  %v2800_v20 = vld [vmem:[%s15065_s26 + $0x2140] sm:$0xff]  ;;  %v2802_v21 = vld [vmem:[%s15065_s26 + $0x2150] sm:$0xff]  ;;  %2799 = vst [vmem:[%s15073_s27 + $0x1098] sm:$0xff] %v2798_v19 }
 0x11f   : > { %2801 = vst [vmem:[%s15073_s27 + $0x10a0] sm:$0xff] %v2800_v20  ;;  %2803 = vst [vmem:[%s15073_s27 + $0x10a8] sm:$0xff] %v2802_v21  ;;  %v2804_v22 = vld [vmem:[%s15065_s26 + $0x2160] sm:$0xff]  ;;  %v2806_v23 = vld [vmem:[%s15065_s26 + $0x2170] sm:$0xff] }
 0x120   : > { %v2808_v24 = vld [vmem:[%s15065_s26 + $0x2180] sm:$0xff]  ;;  %2805 = vst [vmem:[%s15073_s27 + $0x10b0] sm:$0xff] %v2804_v22  ;;  %2807 = vst [vmem:[%s15073_s27 + $0x10b8] sm:$0xff] %v2806_v23  ;;  %v2810_v25 = vld [vmem:[%s15065_s26 + $0x2190] sm:$0xff] }
 0x121   : > { %2809 = vst [vmem:[%s15073_s27 + $0x10c0] sm:$0xff] %v2808_v24  ;;  %v2812_v26 = vld [vmem:[%s15065_s26 + $0x21a0] sm:$0xff]  ;;  %v2814_v27 = vld [vmem:[%s15065_s26 + $0x21b0] sm:$0xff]  ;;  %2811 = vst [vmem:[%s15073_s27 + $0x10c8] sm:$0xff] %v2810_v25 }
 0x122   : > { %2813 = vst [vmem:[%s15073_s27 + $0x10d0] sm:$0xff] %v2812_v26  ;;  %2815 = vst [vmem:[%s15073_s27 + $0x10d8] sm:$0xff] %v2814_v27  ;;  %v2816_v28 = vld [vmem:[%s15065_s26 + $0x21c0] sm:$0xff]  ;;  %v2818_v29 = vld [vmem:[%s15065_s26 + $0x21d0] sm:$0xff] }
 0x123   : > { %v2820_v30 = vld [vmem:[%s15065_s26 + $0x21e0] sm:$0xff]  ;;  %2817 = vst [vmem:[%s15073_s27 + $0x10e0] sm:$0xff] %v2816_v28  ;;  %2819 = vst [vmem:[%s15073_s27 + $0x10e8] sm:$0xff] %v2818_v29  ;;  %v2822_v31 = vld [vmem:[%s15065_s26 + $0x21f0] sm:$0xff] }
 0x124   : > { %2821 = vst [vmem:[%s15073_s27 + $0x10f0] sm:$0xff] %v2820_v30  ;;  %v2824_v32 = vld [vmem:[%s15065_s26 + $0x2200] sm:$0xff]  ;;  %v2826_v33 = vld [vmem:[%s15065_s26 + $0x2210] sm:$0xff]  ;;  %2823 = vst [vmem:[%s15073_s27 + $0x10f8] sm:$0xff] %v2822_v31 }
 0x125   : > { %2825 = vst [vmem:[%s15073_s27 + $0x1100] sm:$0xff] %v2824_v32  ;;  %2827 = vst [vmem:[%s15073_s27 + $0x1108] sm:$0xff] %v2826_v33  ;;  %v2828_v34 = vld [vmem:[%s15065_s26 + $0x2220] sm:$0xff]  ;;  %v2830_v35 = vld [vmem:[%s15065_s26 + $0x2230] sm:$0xff] }
 0x126   : > { %v2832_v36 = vld [vmem:[%s15065_s26 + $0x2240] sm:$0xff]  ;;  %2829 = vst [vmem:[%s15073_s27 + $0x1110] sm:$0xff] %v2828_v34  ;;  %2831 = vst [vmem:[%s15073_s27 + $0x1118] sm:$0xff] %v2830_v35  ;;  %v2834_v37 = vld [vmem:[%s15065_s26 + $0x2250] sm:$0xff] }
 0x127   : > { %2833 = vst [vmem:[%s15073_s27 + $0x1120] sm:$0xff] %v2832_v36  ;;  %v2836_v38 = vld [vmem:[%s15065_s26 + $0x2260] sm:$0xff]  ;;  %v2838_v39 = vld [vmem:[%s15065_s26 + $0x2270] sm:$0xff]  ;;  %2835 = vst [vmem:[%s15073_s27 + $0x1128] sm:$0xff] %v2834_v37 }
 0x128   : > { %2837 = vst [vmem:[%s15073_s27 + $0x1130] sm:$0xff] %v2836_v38  ;;  %2839 = vst [vmem:[%s15073_s27 + $0x1138] sm:$0xff] %v2838_v39  ;;  %v2840_v40 = vld [vmem:[%s15065_s26 + $0x2280] sm:$0xff]  ;;  %v2842_v41 = vld [vmem:[%s15065_s26 + $0x2290] sm:$0xff] }
 0x129   : > { %v2844_v42 = vld [vmem:[%s15065_s26 + $0x22a0] sm:$0xff]  ;;  %2841 = vst [vmem:[%s15073_s27 + $0x1140] sm:$0xff] %v2840_v40  ;;  %2843 = vst [vmem:[%s15073_s27 + $0x1148] sm:$0xff] %v2842_v41  ;;  %v2846_v43 = vld [vmem:[%s15065_s26 + $0x22b0] sm:$0xff] }
 0x12a   : > { %2845 = vst [vmem:[%s15073_s27 + $0x1150] sm:$0xff] %v2844_v42  ;;  %v2848_v44 = vld [vmem:[%s15065_s26 + $0x22c0] sm:$0xff]  ;;  %v2850_v45 = vld [vmem:[%s15065_s26 + $0x22d0] sm:$0xff]  ;;  %2847 = vst [vmem:[%s15073_s27 + $0x1158] sm:$0xff] %v2846_v43 }
 0x12b   : > { %2849 = vst [vmem:[%s15073_s27 + $0x1160] sm:$0xff] %v2848_v44  ;;  %2851 = vst [vmem:[%s15073_s27 + $0x1168] sm:$0xff] %v2850_v45  ;;  %v2852_v46 = vld [vmem:[%s15065_s26 + $0x22e0] sm:$0xff]  ;;  %v2854_v47 = vld [vmem:[%s15065_s26 + $0x22f0] sm:$0xff] }
 0x12c   : > { %v2856_v48 = vld [vmem:[%s15065_s26 + $0x2300] sm:$0xff]  ;;  %2853 = vst [vmem:[%s15073_s27 + $0x1170] sm:$0xff] %v2852_v46  ;;  %2855 = vst [vmem:[%s15073_s27 + $0x1178] sm:$0xff] %v2854_v47  ;;  %v2858_v49 = vld [vmem:[%s15065_s26 + $0x2310] sm:$0xff] }
 0x12d   : > { %2857 = vst [vmem:[%s15073_s27 + $0x1180] sm:$0xff] %v2856_v48  ;;  %v2860_v50 = vld [vmem:[%s15065_s26 + $0x2320] sm:$0xff]  ;;  %v2862_v51 = vld [vmem:[%s15065_s26 + $0x2330] sm:$0xff]  ;;  %2859 = vst [vmem:[%s15073_s27 + $0x1188] sm:$0xff] %v2858_v49 }
 0x12e   : > { %2861 = vst [vmem:[%s15073_s27 + $0x1190] sm:$0xff] %v2860_v50  ;;  %2863 = vst [vmem:[%s15073_s27 + $0x1198] sm:$0xff] %v2862_v51  ;;  %v2864_v52 = vld [vmem:[%s15065_s26 + $0x2340] sm:$0xff]  ;;  %v2866_v53 = vld [vmem:[%s15065_s26 + $0x2350] sm:$0xff] }
 0x12f   : > { %v2868_v54 = vld [vmem:[%s15065_s26 + $0x2360] sm:$0xff]  ;;  %2865 = vst [vmem:[%s15073_s27 + $0x11a0] sm:$0xff] %v2864_v52  ;;  %2867 = vst [vmem:[%s15073_s27 + $0x11a8] sm:$0xff] %v2866_v53  ;;  %v2870_v55 = vld [vmem:[%s15065_s26 + $0x2370] sm:$0xff] }
 0x130   : > { %2869 = vst [vmem:[%s15073_s27 + $0x11b0] sm:$0xff] %v2868_v54  ;;  %v2872_v56 = vld [vmem:[%s15065_s26 + $0x2380] sm:$0xff]  ;;  %v2874_v57 = vld [vmem:[%s15065_s26 + $0x2390] sm:$0xff]  ;;  %2871 = vst [vmem:[%s15073_s27 + $0x11b8] sm:$0xff] %v2870_v55 }
 0x131   : > { %2873 = vst [vmem:[%s15073_s27 + $0x11c0] sm:$0xff] %v2872_v56  ;;  %2875 = vst [vmem:[%s15073_s27 + $0x11c8] sm:$0xff] %v2874_v57  ;;  %v2876_v58 = vld [vmem:[%s15065_s26 + $0x23a0] sm:$0xff]  ;;  %v2878_v59 = vld [vmem:[%s15065_s26 + $0x23b0] sm:$0xff] }
 0x132   : > { %v2880_v60 = vld [vmem:[%s15065_s26 + $0x23c0] sm:$0xff]  ;;  %2877 = vst [vmem:[%s15073_s27 + $0x11d0] sm:$0xff] %v2876_v58  ;;  %2879 = vst [vmem:[%s15073_s27 + $0x11d8] sm:$0xff] %v2878_v59  ;;  %v2882_v61 = vld [vmem:[%s15065_s26 + $0x23d0] sm:$0xff] }
 0x133   : > { %2881 = vst [vmem:[%s15073_s27 + $0x11e0] sm:$0xff] %v2880_v60  ;;  %v2884_v62 = vld [vmem:[%s15065_s26 + $0x23e0] sm:$0xff]  ;;  %v2886_v63 = vld [vmem:[%s15065_s26 + $0x23f0] sm:$0xff]  ;;  %2883 = vst [vmem:[%s15073_s27 + $0x11e8] sm:$0xff] %v2882_v61 }
 0x134   : > { %2885 = vst [vmem:[%s15073_s27 + $0x11f0] sm:$0xff] %v2884_v62  ;;  %2887 = vst [vmem:[%s15073_s27 + $0x11f8] sm:$0xff] %v2886_v63  ;;  %v2888_v0 = vld [vmem:[%s15065_s26 + $0x2400] sm:$0xff]  ;;  %v2890_v1 = vld [vmem:[%s15065_s26 + $0x2410] sm:$0xff] }
 0x135   : > { %v2892_v2 = vld [vmem:[%s15065_s26 + $0x2420] sm:$0xff]  ;;  %2889 = vst [vmem:[%s15073_s27 + $0x1200] sm:$0xff] %v2888_v0  ;;  %2891 = vst [vmem:[%s15073_s27 + $0x1208] sm:$0xff] %v2890_v1  ;;  %v2894_v3 = vld [vmem:[%s15065_s26 + $0x2430] sm:$0xff] }
 0x136   : > { %2893 = vst [vmem:[%s15073_s27 + $0x1210] sm:$0xff] %v2892_v2  ;;  %v2896_v4 = vld [vmem:[%s15065_s26 + $0x2440] sm:$0xff]  ;;  %v2898_v5 = vld [vmem:[%s15065_s26 + $0x2450] sm:$0xff]  ;;  %2895 = vst [vmem:[%s15073_s27 + $0x1218] sm:$0xff] %v2894_v3 }
 0x137   : > { %2897 = vst [vmem:[%s15073_s27 + $0x1220] sm:$0xff] %v2896_v4  ;;  %2899 = vst [vmem:[%s15073_s27 + $0x1228] sm:$0xff] %v2898_v5  ;;  %v2900_v6 = vld [vmem:[%s15065_s26 + $0x2460] sm:$0xff]  ;;  %v2902_v7 = vld [vmem:[%s15065_s26 + $0x2470] sm:$0xff] }
 0x138   : > { %v2904_v8 = vld [vmem:[%s15065_s26 + $0x2480] sm:$0xff]  ;;  %2901 = vst [vmem:[%s15073_s27 + $0x1230] sm:$0xff] %v2900_v6  ;;  %2903 = vst [vmem:[%s15073_s27 + $0x1238] sm:$0xff] %v2902_v7  ;;  %v2906_v9 = vld [vmem:[%s15065_s26 + $0x2490] sm:$0xff] }
 0x139   : > { %2905 = vst [vmem:[%s15073_s27 + $0x1240] sm:$0xff] %v2904_v8  ;;  %v2908_v10 = vld [vmem:[%s15065_s26 + $0x24a0] sm:$0xff]  ;;  %v2910_v11 = vld [vmem:[%s15065_s26 + $0x24b0] sm:$0xff]  ;;  %2907 = vst [vmem:[%s15073_s27 + $0x1248] sm:$0xff] %v2906_v9 }
 0x13a   : > { %2909 = vst [vmem:[%s15073_s27 + $0x1250] sm:$0xff] %v2908_v10  ;;  %2911 = vst [vmem:[%s15073_s27 + $0x1258] sm:$0xff] %v2910_v11  ;;  %v2912_v12 = vld [vmem:[%s15065_s26 + $0x24c0] sm:$0xff]  ;;  %v2914_v13 = vld [vmem:[%s15065_s26 + $0x24d0] sm:$0xff] }
 0x13b   : > { %v2916_v14 = vld [vmem:[%s15065_s26 + $0x24e0] sm:$0xff]  ;;  %2913 = vst [vmem:[%s15073_s27 + $0x1260] sm:$0xff] %v2912_v12  ;;  %2915 = vst [vmem:[%s15073_s27 + $0x1268] sm:$0xff] %v2914_v13  ;;  %v2918_v15 = vld [vmem:[%s15065_s26 + $0x24f0] sm:$0xff] }
 0x13c   : > { %2917 = vst [vmem:[%s15073_s27 + $0x1270] sm:$0xff] %v2916_v14  ;;  %v2920_v16 = vld [vmem:[%s15065_s26 + $0x2500] sm:$0xff]  ;;  %v2922_v17 = vld [vmem:[%s15065_s26 + $0x2510] sm:$0xff]  ;;  %2919 = vst [vmem:[%s15073_s27 + $0x1278] sm:$0xff] %v2918_v15 }
 0x13d   : > { %2921 = vst [vmem:[%s15073_s27 + $0x1280] sm:$0xff] %v2920_v16  ;;  %2923 = vst [vmem:[%s15073_s27 + $0x1288] sm:$0xff] %v2922_v17  ;;  %v2924_v18 = vld [vmem:[%s15065_s26 + $0x2520] sm:$0xff]  ;;  %v2926_v19 = vld [vmem:[%s15065_s26 + $0x2530] sm:$0xff] }
 0x13e   : > { %v2928_v20 = vld [vmem:[%s15065_s26 + $0x2540] sm:$0xff]  ;;  %2925 = vst [vmem:[%s15073_s27 + $0x1290] sm:$0xff] %v2924_v18  ;;  %2927 = vst [vmem:[%s15073_s27 + $0x1298] sm:$0xff] %v2926_v19  ;;  %v2930_v21 = vld [vmem:[%s15065_s26 + $0x2550] sm:$0xff] }
 0x13f   : > { %2929 = vst [vmem:[%s15073_s27 + $0x12a0] sm:$0xff] %v2928_v20  ;;  %v2932_v22 = vld [vmem:[%s15065_s26 + $0x2560] sm:$0xff]  ;;  %v2934_v23 = vld [vmem:[%s15065_s26 + $0x2570] sm:$0xff]  ;;  %2931 = vst [vmem:[%s15073_s27 + $0x12a8] sm:$0xff] %v2930_v21 }
 0x140   : > { %2933 = vst [vmem:[%s15073_s27 + $0x12b0] sm:$0xff] %v2932_v22  ;;  %2935 = vst [vmem:[%s15073_s27 + $0x12b8] sm:$0xff] %v2934_v23  ;;  %v2936_v24 = vld [vmem:[%s15065_s26 + $0x2580] sm:$0xff]  ;;  %v2938_v25 = vld [vmem:[%s15065_s26 + $0x2590] sm:$0xff] }
 0x141   : > { %v2940_v26 = vld [vmem:[%s15065_s26 + $0x25a0] sm:$0xff]  ;;  %2937 = vst [vmem:[%s15073_s27 + $0x12c0] sm:$0xff] %v2936_v24  ;;  %2939 = vst [vmem:[%s15073_s27 + $0x12c8] sm:$0xff] %v2938_v25  ;;  %v2942_v27 = vld [vmem:[%s15065_s26 + $0x25b0] sm:$0xff] }
 0x142   : > { %2941 = vst [vmem:[%s15073_s27 + $0x12d0] sm:$0xff] %v2940_v26  ;;  %v2944_v28 = vld [vmem:[%s15065_s26 + $0x25c0] sm:$0xff]  ;;  %v2946_v29 = vld [vmem:[%s15065_s26 + $0x25d0] sm:$0xff]  ;;  %2943 = vst [vmem:[%s15073_s27 + $0x12d8] sm:$0xff] %v2942_v27 }
 0x143   : > { %2945 = vst [vmem:[%s15073_s27 + $0x12e0] sm:$0xff] %v2944_v28  ;;  %2947 = vst [vmem:[%s15073_s27 + $0x12e8] sm:$0xff] %v2946_v29  ;;  %v2948_v30 = vld [vmem:[%s15065_s26 + $0x25e0] sm:$0xff]  ;;  %v2950_v31 = vld [vmem:[%s15065_s26 + $0x25f0] sm:$0xff] }
 0x144   : > { %v2952_v32 = vld [vmem:[%s15065_s26 + $0x2600] sm:$0xff]  ;;  %2949 = vst [vmem:[%s15073_s27 + $0x12f0] sm:$0xff] %v2948_v30  ;;  %2951 = vst [vmem:[%s15073_s27 + $0x12f8] sm:$0xff] %v2950_v31  ;;  %v2954_v33 = vld [vmem:[%s15065_s26 + $0x2610] sm:$0xff] }
 0x145   : > { %2953 = vst [vmem:[%s15073_s27 + $0x1300] sm:$0xff] %v2952_v32  ;;  %v2956_v34 = vld [vmem:[%s15065_s26 + $0x2620] sm:$0xff]  ;;  %v2958_v35 = vld [vmem:[%s15065_s26 + $0x2630] sm:$0xff]  ;;  %2955 = vst [vmem:[%s15073_s27 + $0x1308] sm:$0xff] %v2954_v33 }
 0x146   : > { %2957 = vst [vmem:[%s15073_s27 + $0x1310] sm:$0xff] %v2956_v34  ;;  %2959 = vst [vmem:[%s15073_s27 + $0x1318] sm:$0xff] %v2958_v35  ;;  %v2960_v36 = vld [vmem:[%s15065_s26 + $0x2640] sm:$0xff]  ;;  %v2962_v37 = vld [vmem:[%s15065_s26 + $0x2650] sm:$0xff] }
 0x147   : > { %v2964_v38 = vld [vmem:[%s15065_s26 + $0x2660] sm:$0xff]  ;;  %2961 = vst [vmem:[%s15073_s27 + $0x1320] sm:$0xff] %v2960_v36  ;;  %2963 = vst [vmem:[%s15073_s27 + $0x1328] sm:$0xff] %v2962_v37  ;;  %v2966_v39 = vld [vmem:[%s15065_s26 + $0x2670] sm:$0xff] }
 0x148   : > { %2965 = vst [vmem:[%s15073_s27 + $0x1330] sm:$0xff] %v2964_v38  ;;  %v2968_v40 = vld [vmem:[%s15065_s26 + $0x2680] sm:$0xff]  ;;  %v2970_v41 = vld [vmem:[%s15065_s26 + $0x2690] sm:$0xff]  ;;  %2967 = vst [vmem:[%s15073_s27 + $0x1338] sm:$0xff] %v2966_v39 }
 0x149   : > { %2969 = vst [vmem:[%s15073_s27 + $0x1340] sm:$0xff] %v2968_v40  ;;  %2971 = vst [vmem:[%s15073_s27 + $0x1348] sm:$0xff] %v2970_v41  ;;  %v2972_v42 = vld [vmem:[%s15065_s26 + $0x26a0] sm:$0xff]  ;;  %v2974_v43 = vld [vmem:[%s15065_s26 + $0x26b0] sm:$0xff] }
 0x14a   : > { %v2976_v44 = vld [vmem:[%s15065_s26 + $0x26c0] sm:$0xff]  ;;  %2973 = vst [vmem:[%s15073_s27 + $0x1350] sm:$0xff] %v2972_v42  ;;  %2975 = vst [vmem:[%s15073_s27 + $0x1358] sm:$0xff] %v2974_v43  ;;  %v2978_v45 = vld [vmem:[%s15065_s26 + $0x26d0] sm:$0xff] }
 0x14b   : > { %2977 = vst [vmem:[%s15073_s27 + $0x1360] sm:$0xff] %v2976_v44  ;;  %v2980_v46 = vld [vmem:[%s15065_s26 + $0x26e0] sm:$0xff]  ;;  %v2982_v47 = vld [vmem:[%s15065_s26 + $0x26f0] sm:$0xff]  ;;  %2979 = vst [vmem:[%s15073_s27 + $0x1368] sm:$0xff] %v2978_v45 }
 0x14c   : > { %2981 = vst [vmem:[%s15073_s27 + $0x1370] sm:$0xff] %v2980_v46  ;;  %2983 = vst [vmem:[%s15073_s27 + $0x1378] sm:$0xff] %v2982_v47  ;;  %v2984_v48 = vld [vmem:[%s15065_s26 + $0x2700] sm:$0xff]  ;;  %v2986_v49 = vld [vmem:[%s15065_s26 + $0x2710] sm:$0xff] }
 0x14d   : > { %v2988_v50 = vld [vmem:[%s15065_s26 + $0x2720] sm:$0xff]  ;;  %2985 = vst [vmem:[%s15073_s27 + $0x1380] sm:$0xff] %v2984_v48  ;;  %2987 = vst [vmem:[%s15073_s27 + $0x1388] sm:$0xff] %v2986_v49  ;;  %v2990_v51 = vld [vmem:[%s15065_s26 + $0x2730] sm:$0xff] }
 0x14e   : > { %2989 = vst [vmem:[%s15073_s27 + $0x1390] sm:$0xff] %v2988_v50  ;;  %v2992_v52 = vld [vmem:[%s15065_s26 + $0x2740] sm:$0xff]  ;;  %v2994_v53 = vld [vmem:[%s15065_s26 + $0x2750] sm:$0xff]  ;;  %2991 = vst [vmem:[%s15073_s27 + $0x1398] sm:$0xff] %v2990_v51 }
 0x14f   : > { %2993 = vst [vmem:[%s15073_s27 + $0x13a0] sm:$0xff] %v2992_v52  ;;  %2995 = vst [vmem:[%s15073_s27 + $0x13a8] sm:$0xff] %v2994_v53  ;;  %v2996_v54 = vld [vmem:[%s15065_s26 + $0x2760] sm:$0xff]  ;;  %v2998_v55 = vld [vmem:[%s15065_s26 + $0x2770] sm:$0xff] }
 0x150   : > { %v3000_v56 = vld [vmem:[%s15065_s26 + $0x2780] sm:$0xff]  ;;  %2997 = vst [vmem:[%s15073_s27 + $0x13b0] sm:$0xff] %v2996_v54  ;;  %2999 = vst [vmem:[%s15073_s27 + $0x13b8] sm:$0xff] %v2998_v55  ;;  %v3002_v57 = vld [vmem:[%s15065_s26 + $0x2790] sm:$0xff] }
 0x151   : > { %3001 = vst [vmem:[%s15073_s27 + $0x13c0] sm:$0xff] %v3000_v56  ;;  %v3004_v58 = vld [vmem:[%s15065_s26 + $0x27a0] sm:$0xff]  ;;  %v3006_v59 = vld [vmem:[%s15065_s26 + $0x27b0] sm:$0xff]  ;;  %3003 = vst [vmem:[%s15073_s27 + $0x13c8] sm:$0xff] %v3002_v57 }
 0x152   : > { %3005 = vst [vmem:[%s15073_s27 + $0x13d0] sm:$0xff] %v3004_v58  ;;  %3007 = vst [vmem:[%s15073_s27 + $0x13d8] sm:$0xff] %v3006_v59  ;;  %v3008_v60 = vld [vmem:[%s15065_s26 + $0x27c0] sm:$0xff]  ;;  %v3010_v61 = vld [vmem:[%s15065_s26 + $0x27d0] sm:$0xff] }
 0x153   : > { %v3012_v62 = vld [vmem:[%s15065_s26 + $0x27e0] sm:$0xff]  ;;  %3009 = vst [vmem:[%s15073_s27 + $0x13e0] sm:$0xff] %v3008_v60  ;;  %3011 = vst [vmem:[%s15073_s27 + $0x13e8] sm:$0xff] %v3010_v61  ;;  %v3014_v63 = vld [vmem:[%s15065_s26 + $0x27f0] sm:$0xff] }
 0x154   : > { %3013 = vst [vmem:[%s15073_s27 + $0x13f0] sm:$0xff] %v3012_v62  ;;  %v3016_v0 = vld [vmem:[%s15065_s26 + $0x2800] sm:$0xff]  ;;  %v3018_v1 = vld [vmem:[%s15065_s26 + $0x2810] sm:$0xff]  ;;  %3015 = vst [vmem:[%s15073_s27 + $0x13f8] sm:$0xff] %v3014_v63 }
 0x155   : > { %3017 = vst [vmem:[%s15073_s27 + $0x1400] sm:$0xff] %v3016_v0  ;;  %3019 = vst [vmem:[%s15073_s27 + $0x1408] sm:$0xff] %v3018_v1  ;;  %v3020_v2 = vld [vmem:[%s15065_s26 + $0x2820] sm:$0xff]  ;;  %v3022_v3 = vld [vmem:[%s15065_s26 + $0x2830] sm:$0xff] }
 0x156   : > { %v3024_v4 = vld [vmem:[%s15065_s26 + $0x2840] sm:$0xff]  ;;  %3021 = vst [vmem:[%s15073_s27 + $0x1410] sm:$0xff] %v3020_v2  ;;  %3023 = vst [vmem:[%s15073_s27 + $0x1418] sm:$0xff] %v3022_v3  ;;  %v3026_v5 = vld [vmem:[%s15065_s26 + $0x2850] sm:$0xff] }
 0x157   : > { %3025 = vst [vmem:[%s15073_s27 + $0x1420] sm:$0xff] %v3024_v4  ;;  %v3028_v6 = vld [vmem:[%s15065_s26 + $0x2860] sm:$0xff]  ;;  %v3030_v7 = vld [vmem:[%s15065_s26 + $0x2870] sm:$0xff]  ;;  %3027 = vst [vmem:[%s15073_s27 + $0x1428] sm:$0xff] %v3026_v5 }
 0x158   : > { %3029 = vst [vmem:[%s15073_s27 + $0x1430] sm:$0xff] %v3028_v6  ;;  %3031 = vst [vmem:[%s15073_s27 + $0x1438] sm:$0xff] %v3030_v7  ;;  %v3032_v8 = vld [vmem:[%s15065_s26 + $0x2880] sm:$0xff]  ;;  %v3034_v9 = vld [vmem:[%s15065_s26 + $0x2890] sm:$0xff] }
 0x159   : > { %v3036_v10 = vld [vmem:[%s15065_s26 + $0x28a0] sm:$0xff]  ;;  %3033 = vst [vmem:[%s15073_s27 + $0x1440] sm:$0xff] %v3032_v8  ;;  %3035 = vst [vmem:[%s15073_s27 + $0x1448] sm:$0xff] %v3034_v9  ;;  %v3038_v11 = vld [vmem:[%s15065_s26 + $0x28b0] sm:$0xff] }
 0x15a   : > { %3037 = vst [vmem:[%s15073_s27 + $0x1450] sm:$0xff] %v3036_v10  ;;  %v3040_v12 = vld [vmem:[%s15065_s26 + $0x28c0] sm:$0xff]  ;;  %v3042_v13 = vld [vmem:[%s15065_s26 + $0x28d0] sm:$0xff]  ;;  %3039 = vst [vmem:[%s15073_s27 + $0x1458] sm:$0xff] %v3038_v11 }
 0x15b   : > { %3041 = vst [vmem:[%s15073_s27 + $0x1460] sm:$0xff] %v3040_v12  ;;  %3043 = vst [vmem:[%s15073_s27 + $0x1468] sm:$0xff] %v3042_v13  ;;  %v3044_v14 = vld [vmem:[%s15065_s26 + $0x28e0] sm:$0xff]  ;;  %v3046_v15 = vld [vmem:[%s15065_s26 + $0x28f0] sm:$0xff] }
 0x15c   : > { %v3048_v16 = vld [vmem:[%s15065_s26 + $0x2900] sm:$0xff]  ;;  %3045 = vst [vmem:[%s15073_s27 + $0x1470] sm:$0xff] %v3044_v14  ;;  %3047 = vst [vmem:[%s15073_s27 + $0x1478] sm:$0xff] %v3046_v15  ;;  %v3050_v17 = vld [vmem:[%s15065_s26 + $0x2910] sm:$0xff] }
 0x15d   : > { %3049 = vst [vmem:[%s15073_s27 + $0x1480] sm:$0xff] %v3048_v16  ;;  %v3052_v18 = vld [vmem:[%s15065_s26 + $0x2920] sm:$0xff]  ;;  %v3054_v19 = vld [vmem:[%s15065_s26 + $0x2930] sm:$0xff]  ;;  %3051 = vst [vmem:[%s15073_s27 + $0x1488] sm:$0xff] %v3050_v17 }
 0x15e   : > { %3053 = vst [vmem:[%s15073_s27 + $0x1490] sm:$0xff] %v3052_v18  ;;  %3055 = vst [vmem:[%s15073_s27 + $0x1498] sm:$0xff] %v3054_v19  ;;  %v3056_v20 = vld [vmem:[%s15065_s26 + $0x2940] sm:$0xff]  ;;  %v3058_v21 = vld [vmem:[%s15065_s26 + $0x2950] sm:$0xff] }
 0x15f   : > { %v3060_v22 = vld [vmem:[%s15065_s26 + $0x2960] sm:$0xff]  ;;  %3057 = vst [vmem:[%s15073_s27 + $0x14a0] sm:$0xff] %v3056_v20  ;;  %3059 = vst [vmem:[%s15073_s27 + $0x14a8] sm:$0xff] %v3058_v21  ;;  %v3062_v23 = vld [vmem:[%s15065_s26 + $0x2970] sm:$0xff] }
 0x160   : > { %3061 = vst [vmem:[%s15073_s27 + $0x14b0] sm:$0xff] %v3060_v22  ;;  %v3064_v24 = vld [vmem:[%s15065_s26 + $0x2980] sm:$0xff]  ;;  %v3066_v25 = vld [vmem:[%s15065_s26 + $0x2990] sm:$0xff]  ;;  %3063 = vst [vmem:[%s15073_s27 + $0x14b8] sm:$0xff] %v3062_v23 }
 0x161   : > { %3065 = vst [vmem:[%s15073_s27 + $0x14c0] sm:$0xff] %v3064_v24  ;;  %3067 = vst [vmem:[%s15073_s27 + $0x14c8] sm:$0xff] %v3066_v25  ;;  %v3068_v26 = vld [vmem:[%s15065_s26 + $0x29a0] sm:$0xff]  ;;  %v3070_v27 = vld [vmem:[%s15065_s26 + $0x29b0] sm:$0xff] }
 0x162   : > { %v3072_v28 = vld [vmem:[%s15065_s26 + $0x29c0] sm:$0xff]  ;;  %3069 = vst [vmem:[%s15073_s27 + $0x14d0] sm:$0xff] %v3068_v26  ;;  %3071 = vst [vmem:[%s15073_s27 + $0x14d8] sm:$0xff] %v3070_v27  ;;  %v3074_v29 = vld [vmem:[%s15065_s26 + $0x29d0] sm:$0xff] }
 0x163   : > { %3073 = vst [vmem:[%s15073_s27 + $0x14e0] sm:$0xff] %v3072_v28  ;;  %v3076_v30 = vld [vmem:[%s15065_s26 + $0x29e0] sm:$0xff]  ;;  %v3078_v31 = vld [vmem:[%s15065_s26 + $0x29f0] sm:$0xff]  ;;  %3075 = vst [vmem:[%s15073_s27 + $0x14e8] sm:$0xff] %v3074_v29 }
 0x164   : > { %3077 = vst [vmem:[%s15073_s27 + $0x14f0] sm:$0xff] %v3076_v30  ;;  %3079 = vst [vmem:[%s15073_s27 + $0x14f8] sm:$0xff] %v3078_v31  ;;  %v3080_v32 = vld [vmem:[%s15065_s26 + $0x2a00] sm:$0xff]  ;;  %v3082_v33 = vld [vmem:[%s15065_s26 + $0x2a10] sm:$0xff] }
 0x165   : > { %v3084_v34 = vld [vmem:[%s15065_s26 + $0x2a20] sm:$0xff]  ;;  %3081 = vst [vmem:[%s15073_s27 + $0x1500] sm:$0xff] %v3080_v32  ;;  %3083 = vst [vmem:[%s15073_s27 + $0x1508] sm:$0xff] %v3082_v33  ;;  %v3086_v35 = vld [vmem:[%s15065_s26 + $0x2a30] sm:$0xff] }
 0x166   : > { %3085 = vst [vmem:[%s15073_s27 + $0x1510] sm:$0xff] %v3084_v34  ;;  %v3088_v36 = vld [vmem:[%s15065_s26 + $0x2a40] sm:$0xff]  ;;  %v3090_v37 = vld [vmem:[%s15065_s26 + $0x2a50] sm:$0xff]  ;;  %3087 = vst [vmem:[%s15073_s27 + $0x1518] sm:$0xff] %v3086_v35 }
 0x167   : > { %3089 = vst [vmem:[%s15073_s27 + $0x1520] sm:$0xff] %v3088_v36  ;;  %3091 = vst [vmem:[%s15073_s27 + $0x1528] sm:$0xff] %v3090_v37  ;;  %v3092_v38 = vld [vmem:[%s15065_s26 + $0x2a60] sm:$0xff]  ;;  %v3094_v39 = vld [vmem:[%s15065_s26 + $0x2a70] sm:$0xff] }
 0x168   : > { %v3096_v40 = vld [vmem:[%s15065_s26 + $0x2a80] sm:$0xff]  ;;  %3093 = vst [vmem:[%s15073_s27 + $0x1530] sm:$0xff] %v3092_v38  ;;  %3095 = vst [vmem:[%s15073_s27 + $0x1538] sm:$0xff] %v3094_v39  ;;  %v3098_v41 = vld [vmem:[%s15065_s26 + $0x2a90] sm:$0xff] }
 0x169   : > { %3097 = vst [vmem:[%s15073_s27 + $0x1540] sm:$0xff] %v3096_v40  ;;  %v3100_v42 = vld [vmem:[%s15065_s26 + $0x2aa0] sm:$0xff]  ;;  %v3102_v43 = vld [vmem:[%s15065_s26 + $0x2ab0] sm:$0xff]  ;;  %3099 = vst [vmem:[%s15073_s27 + $0x1548] sm:$0xff] %v3098_v41 }
 0x16a   : > { %3101 = vst [vmem:[%s15073_s27 + $0x1550] sm:$0xff] %v3100_v42  ;;  %3103 = vst [vmem:[%s15073_s27 + $0x1558] sm:$0xff] %v3102_v43  ;;  %v3104_v44 = vld [vmem:[%s15065_s26 + $0x2ac0] sm:$0xff]  ;;  %v3106_v45 = vld [vmem:[%s15065_s26 + $0x2ad0] sm:$0xff] }
 0x16b   : > { %v3108_v46 = vld [vmem:[%s15065_s26 + $0x2ae0] sm:$0xff]  ;;  %3105 = vst [vmem:[%s15073_s27 + $0x1560] sm:$0xff] %v3104_v44  ;;  %3107 = vst [vmem:[%s15073_s27 + $0x1568] sm:$0xff] %v3106_v45  ;;  %v3110_v47 = vld [vmem:[%s15065_s26 + $0x2af0] sm:$0xff] }
 0x16c   : > { %3109 = vst [vmem:[%s15073_s27 + $0x1570] sm:$0xff] %v3108_v46  ;;  %v3112_v48 = vld [vmem:[%s15065_s26 + $0x2b00] sm:$0xff]  ;;  %v3114_v49 = vld [vmem:[%s15065_s26 + $0x2b10] sm:$0xff]  ;;  %3111 = vst [vmem:[%s15073_s27 + $0x1578] sm:$0xff] %v3110_v47 }
 0x16d   : > { %3113 = vst [vmem:[%s15073_s27 + $0x1580] sm:$0xff] %v3112_v48  ;;  %3115 = vst [vmem:[%s15073_s27 + $0x1588] sm:$0xff] %v3114_v49  ;;  %v3116_v50 = vld [vmem:[%s15065_s26 + $0x2b20] sm:$0xff]  ;;  %v3118_v51 = vld [vmem:[%s15065_s26 + $0x2b30] sm:$0xff] }
 0x16e   : > { %v3120_v52 = vld [vmem:[%s15065_s26 + $0x2b40] sm:$0xff]  ;;  %3117 = vst [vmem:[%s15073_s27 + $0x1590] sm:$0xff] %v3116_v50  ;;  %3119 = vst [vmem:[%s15073_s27 + $0x1598] sm:$0xff] %v3118_v51  ;;  %v3122_v53 = vld [vmem:[%s15065_s26 + $0x2b50] sm:$0xff] }
 0x16f   : > { %3121 = vst [vmem:[%s15073_s27 + $0x15a0] sm:$0xff] %v3120_v52  ;;  %v3124_v54 = vld [vmem:[%s15065_s26 + $0x2b60] sm:$0xff]  ;;  %v3126_v55 = vld [vmem:[%s15065_s26 + $0x2b70] sm:$0xff]  ;;  %3123 = vst [vmem:[%s15073_s27 + $0x15a8] sm:$0xff] %v3122_v53 }
 0x170   : > { %3125 = vst [vmem:[%s15073_s27 + $0x15b0] sm:$0xff] %v3124_v54  ;;  %3127 = vst [vmem:[%s15073_s27 + $0x15b8] sm:$0xff] %v3126_v55  ;;  %v3128_v56 = vld [vmem:[%s15065_s26 + $0x2b80] sm:$0xff]  ;;  %v3130_v57 = vld [vmem:[%s15065_s26 + $0x2b90] sm:$0xff] }
 0x171   : > { %v3132_v58 = vld [vmem:[%s15065_s26 + $0x2ba0] sm:$0xff]  ;;  %3129 = vst [vmem:[%s15073_s27 + $0x15c0] sm:$0xff] %v3128_v56  ;;  %3131 = vst [vmem:[%s15073_s27 + $0x15c8] sm:$0xff] %v3130_v57  ;;  %v3134_v59 = vld [vmem:[%s15065_s26 + $0x2bb0] sm:$0xff] }
 0x172   : > { %3133 = vst [vmem:[%s15073_s27 + $0x15d0] sm:$0xff] %v3132_v58  ;;  %v3136_v60 = vld [vmem:[%s15065_s26 + $0x2bc0] sm:$0xff]  ;;  %v3138_v61 = vld [vmem:[%s15065_s26 + $0x2bd0] sm:$0xff]  ;;  %3135 = vst [vmem:[%s15073_s27 + $0x15d8] sm:$0xff] %v3134_v59 }
 0x173   : > { %3137 = vst [vmem:[%s15073_s27 + $0x15e0] sm:$0xff] %v3136_v60  ;;  %3139 = vst [vmem:[%s15073_s27 + $0x15e8] sm:$0xff] %v3138_v61  ;;  %v3140_v62 = vld [vmem:[%s15065_s26 + $0x2be0] sm:$0xff]  ;;  %v3142_v63 = vld [vmem:[%s15065_s26 + $0x2bf0] sm:$0xff] }
 0x174   : > { %v3144_v0 = vld [vmem:[%s15065_s26 + $0x2c00] sm:$0xff]  ;;  %3141 = vst [vmem:[%s15073_s27 + $0x15f0] sm:$0xff] %v3140_v62  ;;  %3143 = vst [vmem:[%s15073_s27 + $0x15f8] sm:$0xff] %v3142_v63  ;;  %v3146_v1 = vld [vmem:[%s15065_s26 + $0x2c10] sm:$0xff] }
 0x175   : > { %3145 = vst [vmem:[%s15073_s27 + $0x1600] sm:$0xff] %v3144_v0  ;;  %v3148_v2 = vld [vmem:[%s15065_s26 + $0x2c20] sm:$0xff]  ;;  %v3150_v3 = vld [vmem:[%s15065_s26 + $0x2c30] sm:$0xff]  ;;  %3147 = vst [vmem:[%s15073_s27 + $0x1608] sm:$0xff] %v3146_v1 }
 0x176   : > { %3149 = vst [vmem:[%s15073_s27 + $0x1610] sm:$0xff] %v3148_v2  ;;  %3151 = vst [vmem:[%s15073_s27 + $0x1618] sm:$0xff] %v3150_v3  ;;  %v3152_v4 = vld [vmem:[%s15065_s26 + $0x2c40] sm:$0xff]  ;;  %v3154_v5 = vld [vmem:[%s15065_s26 + $0x2c50] sm:$0xff] }
 0x177   : > { %v3156_v6 = vld [vmem:[%s15065_s26 + $0x2c60] sm:$0xff]  ;;  %3153 = vst [vmem:[%s15073_s27 + $0x1620] sm:$0xff] %v3152_v4  ;;  %3155 = vst [vmem:[%s15073_s27 + $0x1628] sm:$0xff] %v3154_v5  ;;  %v3158_v7 = vld [vmem:[%s15065_s26 + $0x2c70] sm:$0xff] }
 0x178   : > { %3157 = vst [vmem:[%s15073_s27 + $0x1630] sm:$0xff] %v3156_v6  ;;  %v3160_v8 = vld [vmem:[%s15065_s26 + $0x2c80] sm:$0xff]  ;;  %v3162_v9 = vld [vmem:[%s15065_s26 + $0x2c90] sm:$0xff]  ;;  %3159 = vst [vmem:[%s15073_s27 + $0x1638] sm:$0xff] %v3158_v7 }
 0x179   : > { %3161 = vst [vmem:[%s15073_s27 + $0x1640] sm:$0xff] %v3160_v8  ;;  %3163 = vst [vmem:[%s15073_s27 + $0x1648] sm:$0xff] %v3162_v9  ;;  %v3164_v10 = vld [vmem:[%s15065_s26 + $0x2ca0] sm:$0xff]  ;;  %v3166_v11 = vld [vmem:[%s15065_s26 + $0x2cb0] sm:$0xff] }
 0x17a   : > { %v3168_v12 = vld [vmem:[%s15065_s26 + $0x2cc0] sm:$0xff]  ;;  %3165 = vst [vmem:[%s15073_s27 + $0x1650] sm:$0xff] %v3164_v10  ;;  %3167 = vst [vmem:[%s15073_s27 + $0x1658] sm:$0xff] %v3166_v11  ;;  %v3170_v13 = vld [vmem:[%s15065_s26 + $0x2cd0] sm:$0xff] }
 0x17b   : > { %3169 = vst [vmem:[%s15073_s27 + $0x1660] sm:$0xff] %v3168_v12  ;;  %v3172_v14 = vld [vmem:[%s15065_s26 + $0x2ce0] sm:$0xff]  ;;  %v3174_v15 = vld [vmem:[%s15065_s26 + $0x2cf0] sm:$0xff]  ;;  %3171 = vst [vmem:[%s15073_s27 + $0x1668] sm:$0xff] %v3170_v13 }
 0x17c   : > { %3173 = vst [vmem:[%s15073_s27 + $0x1670] sm:$0xff] %v3172_v14  ;;  %3175 = vst [vmem:[%s15073_s27 + $0x1678] sm:$0xff] %v3174_v15  ;;  %v3176_v16 = vld [vmem:[%s15065_s26 + $0x2d00] sm:$0xff]  ;;  %v3178_v17 = vld [vmem:[%s15065_s26 + $0x2d10] sm:$0xff] }
 0x17d   : > { %v3180_v18 = vld [vmem:[%s15065_s26 + $0x2d20] sm:$0xff]  ;;  %3177 = vst [vmem:[%s15073_s27 + $0x1680] sm:$0xff] %v3176_v16  ;;  %3179 = vst [vmem:[%s15073_s27 + $0x1688] sm:$0xff] %v3178_v17  ;;  %v3182_v19 = vld [vmem:[%s15065_s26 + $0x2d30] sm:$0xff] }
 0x17e   : > { %3181 = vst [vmem:[%s15073_s27 + $0x1690] sm:$0xff] %v3180_v18  ;;  %v3184_v20 = vld [vmem:[%s15065_s26 + $0x2d40] sm:$0xff]  ;;  %v3186_v21 = vld [vmem:[%s15065_s26 + $0x2d50] sm:$0xff]  ;;  %3183 = vst [vmem:[%s15073_s27 + $0x1698] sm:$0xff] %v3182_v19 }
 0x17f   : > { %3185 = vst [vmem:[%s15073_s27 + $0x16a0] sm:$0xff] %v3184_v20  ;;  %3187 = vst [vmem:[%s15073_s27 + $0x16a8] sm:$0xff] %v3186_v21  ;;  %v3188_v22 = vld [vmem:[%s15065_s26 + $0x2d60] sm:$0xff]  ;;  %v3190_v23 = vld [vmem:[%s15065_s26 + $0x2d70] sm:$0xff] }
 0x180   : > { %v3192_v24 = vld [vmem:[%s15065_s26 + $0x2d80] sm:$0xff]  ;;  %3189 = vst [vmem:[%s15073_s27 + $0x16b0] sm:$0xff] %v3188_v22  ;;  %3191 = vst [vmem:[%s15073_s27 + $0x16b8] sm:$0xff] %v3190_v23  ;;  %v3194_v25 = vld [vmem:[%s15065_s26 + $0x2d90] sm:$0xff] }
 0x181   : > { %3193 = vst [vmem:[%s15073_s27 + $0x16c0] sm:$0xff] %v3192_v24  ;;  %v3196_v26 = vld [vmem:[%s15065_s26 + $0x2da0] sm:$0xff]  ;;  %v3198_v27 = vld [vmem:[%s15065_s26 + $0x2db0] sm:$0xff]  ;;  %3195 = vst [vmem:[%s15073_s27 + $0x16c8] sm:$0xff] %v3194_v25 }
 0x182   : > { %3197 = vst [vmem:[%s15073_s27 + $0x16d0] sm:$0xff] %v3196_v26  ;;  %3199 = vst [vmem:[%s15073_s27 + $0x16d8] sm:$0xff] %v3198_v27  ;;  %v3200_v28 = vld [vmem:[%s15065_s26 + $0x2dc0] sm:$0xff]  ;;  %v3202_v29 = vld [vmem:[%s15065_s26 + $0x2dd0] sm:$0xff] }
 0x183   : > { %v3204_v30 = vld [vmem:[%s15065_s26 + $0x2de0] sm:$0xff]  ;;  %3201 = vst [vmem:[%s15073_s27 + $0x16e0] sm:$0xff] %v3200_v28  ;;  %3203 = vst [vmem:[%s15073_s27 + $0x16e8] sm:$0xff] %v3202_v29  ;;  %v3206_v31 = vld [vmem:[%s15065_s26 + $0x2df0] sm:$0xff] }
 0x184   : > { %3205 = vst [vmem:[%s15073_s27 + $0x16f0] sm:$0xff] %v3204_v30  ;;  %v3208_v32 = vld [vmem:[%s15065_s26 + $0x2e00] sm:$0xff]  ;;  %v3210_v33 = vld [vmem:[%s15065_s26 + $0x2e10] sm:$0xff]  ;;  %3207 = vst [vmem:[%s15073_s27 + $0x16f8] sm:$0xff] %v3206_v31 }
 0x185   : > { %3209 = vst [vmem:[%s15073_s27 + $0x1700] sm:$0xff] %v3208_v32  ;;  %3211 = vst [vmem:[%s15073_s27 + $0x1708] sm:$0xff] %v3210_v33  ;;  %v3212_v34 = vld [vmem:[%s15065_s26 + $0x2e20] sm:$0xff]  ;;  %v3214_v35 = vld [vmem:[%s15065_s26 + $0x2e30] sm:$0xff] }
 0x186   : > { %v3216_v36 = vld [vmem:[%s15065_s26 + $0x2e40] sm:$0xff]  ;;  %3213 = vst [vmem:[%s15073_s27 + $0x1710] sm:$0xff] %v3212_v34  ;;  %3215 = vst [vmem:[%s15073_s27 + $0x1718] sm:$0xff] %v3214_v35  ;;  %v3218_v37 = vld [vmem:[%s15065_s26 + $0x2e50] sm:$0xff] }
 0x187   : > { %3217 = vst [vmem:[%s15073_s27 + $0x1720] sm:$0xff] %v3216_v36  ;;  %v3220_v38 = vld [vmem:[%s15065_s26 + $0x2e60] sm:$0xff]  ;;  %v3222_v39 = vld [vmem:[%s15065_s26 + $0x2e70] sm:$0xff]  ;;  %3219 = vst [vmem:[%s15073_s27 + $0x1728] sm:$0xff] %v3218_v37 }
 0x188   : > { %3221 = vst [vmem:[%s15073_s27 + $0x1730] sm:$0xff] %v3220_v38  ;;  %3223 = vst [vmem:[%s15073_s27 + $0x1738] sm:$0xff] %v3222_v39  ;;  %v3224_v40 = vld [vmem:[%s15065_s26 + $0x2e80] sm:$0xff]  ;;  %v3226_v41 = vld [vmem:[%s15065_s26 + $0x2e90] sm:$0xff] }
 0x189   : > { %v3228_v42 = vld [vmem:[%s15065_s26 + $0x2ea0] sm:$0xff]  ;;  %3225 = vst [vmem:[%s15073_s27 + $0x1740] sm:$0xff] %v3224_v40  ;;  %3227 = vst [vmem:[%s15073_s27 + $0x1748] sm:$0xff] %v3226_v41  ;;  %v3230_v43 = vld [vmem:[%s15065_s26 + $0x2eb0] sm:$0xff] }
 0x18a   : > { %3229 = vst [vmem:[%s15073_s27 + $0x1750] sm:$0xff] %v3228_v42  ;;  %v3232_v44 = vld [vmem:[%s15065_s26 + $0x2ec0] sm:$0xff]  ;;  %v3234_v45 = vld [vmem:[%s15065_s26 + $0x2ed0] sm:$0xff]  ;;  %3231 = vst [vmem:[%s15073_s27 + $0x1758] sm:$0xff] %v3230_v43 }
 0x18b   : > { %3233 = vst [vmem:[%s15073_s27 + $0x1760] sm:$0xff] %v3232_v44  ;;  %3235 = vst [vmem:[%s15073_s27 + $0x1768] sm:$0xff] %v3234_v45  ;;  %v3236_v46 = vld [vmem:[%s15065_s26 + $0x2ee0] sm:$0xff]  ;;  %v3238_v47 = vld [vmem:[%s15065_s26 + $0x2ef0] sm:$0xff] }
 0x18c   : > { %v3240_v48 = vld [vmem:[%s15065_s26 + $0x2f00] sm:$0xff]  ;;  %3237 = vst [vmem:[%s15073_s27 + $0x1770] sm:$0xff] %v3236_v46  ;;  %3239 = vst [vmem:[%s15073_s27 + $0x1778] sm:$0xff] %v3238_v47  ;;  %v3242_v49 = vld [vmem:[%s15065_s26 + $0x2f10] sm:$0xff] }
 0x18d   : > { %3241 = vst [vmem:[%s15073_s27 + $0x1780] sm:$0xff] %v3240_v48  ;;  %v3244_v50 = vld [vmem:[%s15065_s26 + $0x2f20] sm:$0xff]  ;;  %v3246_v51 = vld [vmem:[%s15065_s26 + $0x2f30] sm:$0xff]  ;;  %3243 = vst [vmem:[%s15073_s27 + $0x1788] sm:$0xff] %v3242_v49 }
 0x18e   : > { %3245 = vst [vmem:[%s15073_s27 + $0x1790] sm:$0xff] %v3244_v50  ;;  %3247 = vst [vmem:[%s15073_s27 + $0x1798] sm:$0xff] %v3246_v51  ;;  %v3248_v52 = vld [vmem:[%s15065_s26 + $0x2f40] sm:$0xff]  ;;  %v3250_v53 = vld [vmem:[%s15065_s26 + $0x2f50] sm:$0xff] }
 0x18f   : > { %v3252_v54 = vld [vmem:[%s15065_s26 + $0x2f60] sm:$0xff]  ;;  %3249 = vst [vmem:[%s15073_s27 + $0x17a0] sm:$0xff] %v3248_v52  ;;  %3251 = vst [vmem:[%s15073_s27 + $0x17a8] sm:$0xff] %v3250_v53  ;;  %v3254_v55 = vld [vmem:[%s15065_s26 + $0x2f70] sm:$0xff] }
 0x190   : > { %3253 = vst [vmem:[%s15073_s27 + $0x17b0] sm:$0xff] %v3252_v54  ;;  %v3256_v56 = vld [vmem:[%s15065_s26 + $0x2f80] sm:$0xff]  ;;  %v3258_v57 = vld [vmem:[%s15065_s26 + $0x2f90] sm:$0xff]  ;;  %3255 = vst [vmem:[%s15073_s27 + $0x17b8] sm:$0xff] %v3254_v55 }
 0x191   : > { %3257 = vst [vmem:[%s15073_s27 + $0x17c0] sm:$0xff] %v3256_v56  ;;  %3259 = vst [vmem:[%s15073_s27 + $0x17c8] sm:$0xff] %v3258_v57  ;;  %v3260_v58 = vld [vmem:[%s15065_s26 + $0x2fa0] sm:$0xff]  ;;  %v3262_v59 = vld [vmem:[%s15065_s26 + $0x2fb0] sm:$0xff] }
 0x192   : > { %v3264_v60 = vld [vmem:[%s15065_s26 + $0x2fc0] sm:$0xff]  ;;  %3261 = vst [vmem:[%s15073_s27 + $0x17d0] sm:$0xff] %v3260_v58  ;;  %3263 = vst [vmem:[%s15073_s27 + $0x17d8] sm:$0xff] %v3262_v59  ;;  %v3266_v61 = vld [vmem:[%s15065_s26 + $0x2fd0] sm:$0xff] }
 0x193   : > { %3265 = vst [vmem:[%s15073_s27 + $0x17e0] sm:$0xff] %v3264_v60  ;;  %v3268_v62 = vld [vmem:[%s15065_s26 + $0x2fe0] sm:$0xff]  ;;  %v3270_v63 = vld [vmem:[%s15065_s26 + $0x2ff0] sm:$0xff]  ;;  %3267 = vst [vmem:[%s15073_s27 + $0x17e8] sm:$0xff] %v3266_v61 }
 0x194   : > { %3269 = vst [vmem:[%s15073_s27 + $0x17f0] sm:$0xff] %v3268_v62  ;;  %3271 = vst [vmem:[%s15073_s27 + $0x17f8] sm:$0xff] %v3270_v63  ;;  %v3272_v0 = vld [vmem:[%s15065_s26 + $0x3000] sm:$0xff]  ;;  %v3274_v1 = vld [vmem:[%s15065_s26 + $0x3010] sm:$0xff] }
 0x195   : > { %v3276_v2 = vld [vmem:[%s15065_s26 + $0x3020] sm:$0xff]  ;;  %3273 = vst [vmem:[%s15073_s27 + $0x1800] sm:$0xff] %v3272_v0  ;;  %3275 = vst [vmem:[%s15073_s27 + $0x1808] sm:$0xff] %v3274_v1  ;;  %v3278_v3 = vld [vmem:[%s15065_s26 + $0x3030] sm:$0xff] }
 0x196   : > { %3277 = vst [vmem:[%s15073_s27 + $0x1810] sm:$0xff] %v3276_v2  ;;  %v3280_v4 = vld [vmem:[%s15065_s26 + $0x3040] sm:$0xff]  ;;  %v3282_v5 = vld [vmem:[%s15065_s26 + $0x3050] sm:$0xff]  ;;  %3279 = vst [vmem:[%s15073_s27 + $0x1818] sm:$0xff] %v3278_v3 }
 0x197   : > { %3281 = vst [vmem:[%s15073_s27 + $0x1820] sm:$0xff] %v3280_v4  ;;  %3283 = vst [vmem:[%s15073_s27 + $0x1828] sm:$0xff] %v3282_v5  ;;  %v3284_v6 = vld [vmem:[%s15065_s26 + $0x3060] sm:$0xff]  ;;  %v3286_v7 = vld [vmem:[%s15065_s26 + $0x3070] sm:$0xff] }
 0x198   : > { %v3288_v8 = vld [vmem:[%s15065_s26 + $0x3080] sm:$0xff]  ;;  %3285 = vst [vmem:[%s15073_s27 + $0x1830] sm:$0xff] %v3284_v6  ;;  %3287 = vst [vmem:[%s15073_s27 + $0x1838] sm:$0xff] %v3286_v7  ;;  %v3290_v9 = vld [vmem:[%s15065_s26 + $0x3090] sm:$0xff] }
 0x199   : > { %3289 = vst [vmem:[%s15073_s27 + $0x1840] sm:$0xff] %v3288_v8  ;;  %v3292_v10 = vld [vmem:[%s15065_s26 + $0x30a0] sm:$0xff]  ;;  %v3294_v11 = vld [vmem:[%s15065_s26 + $0x30b0] sm:$0xff]  ;;  %3291 = vst [vmem:[%s15073_s27 + $0x1848] sm:$0xff] %v3290_v9 }
 0x19a   : > { %3293 = vst [vmem:[%s15073_s27 + $0x1850] sm:$0xff] %v3292_v10  ;;  %3295 = vst [vmem:[%s15073_s27 + $0x1858] sm:$0xff] %v3294_v11  ;;  %v3296_v12 = vld [vmem:[%s15065_s26 + $0x30c0] sm:$0xff]  ;;  %v3298_v13 = vld [vmem:[%s15065_s26 + $0x30d0] sm:$0xff] }
 0x19b   : > { %v3300_v14 = vld [vmem:[%s15065_s26 + $0x30e0] sm:$0xff]  ;;  %3297 = vst [vmem:[%s15073_s27 + $0x1860] sm:$0xff] %v3296_v12  ;;  %3299 = vst [vmem:[%s15073_s27 + $0x1868] sm:$0xff] %v3298_v13  ;;  %v3302_v15 = vld [vmem:[%s15065_s26 + $0x30f0] sm:$0xff] }
 0x19c   : > { %3301 = vst [vmem:[%s15073_s27 + $0x1870] sm:$0xff] %v3300_v14  ;;  %3303 = vst [vmem:[%s15073_s27 + $0x1878] sm:$0xff] %v3302_v15 }
 0x19d PF: > { %p12756_p7 = scmp.ge.s32.totalorder %s15001_s14, 1  ;;  %p6488_p8 = scmp.lt.s32.totalorder %s15001_s14, 3 }
 0x19f   : > { %p6489_p9 = pnand %p12756_p7, %p6488_p8 }
 0x1a0   : > { %s6495_s28 = sand.u32 (!%p6489_p9), 1, %s14993_s12   ;;  %v13828_v16 = vld [vmem:[%s17597_s0 + $0x4] ss:$196 sps:$4 sm:$0xff] (!%p6489_p9)   ;;  %s12758_s6 = sshll.u32 (!%p6489_p9), %s15040_s15, 1 }
 0x1a1   : > { %6492 = sbr.rel (%p6489_p9) target bundleno = 1451 (0x5ab), region = 80  ;;  %v13834_v17 = vld [vmem:[%s17597_s0 + $0x64] ss:$196 sps:$4 sm:$0xff] (!%p6489_p9)   ;;  %11573 = vmatprep.mubr.bf16.mxu1 (!%p6489_p9), %v13828_v16  ;;  %p6523_p10 = scmp.lt.s32.totalorder (!%p6489_p9), %s12758_s6, 3 }
 0x1a2   : > { %s13704_s29 = smul.u32 (!%p6489_p9), 6272, %s6495_s28  ;;  %12089 = vmatprep.mubr.bf16.mxu0 (!%p6489_p9), %v13834_v17  ;;  %s12757_s10 = sshll.u32 (!%p6489_p9), %s6495_s28, 4 }
 0x1a3   : > { %s6520_s11 = scalar_lea.vmem (!%p6489_p9), [#allocation3], %s12757_s10 }
 0x1a4   : > { %s16648_s7 = scalar_lea.vmem (!%p6489_p9), [#allocation2], %s13704_s29 }
 0x1a5   : > { %v13730_v18 = vld [vmem:[%s16648_s7 + $0x4] ss:$8 sps:$4 sm:$0xff] (!%p6489_p9)   ;;  %v13734_v20 = vld [vmem:[%s16648_s7] ss:$8 sps:$4 sm:$0xff] (!%p6489_p9)   ;;  %v13736_v22 = vld [vmem:[%s16648_s7 + $0x14] ss:$8 sps:$4 sm:$0xff] (!%p6489_p9)  }
 0x1a6   : > { %v13732_v19 = vld [vmem:[%s16648_s7 + $0xc04] ss:$8 sps:$4 sm:$0xff] (!%p6489_p9)   ;;  %11541 = vmatprep.subr.bf16.mxu1 (!%p6489_p9), %v13730_v18  ;;  %v13735_v21 = vld [vmem:[%s16648_s7 + $0xc00] ss:$8 sps:$4 sm:$0xff] (!%p6489_p9)   ;;  %v13738_v23 = vld [vmem:[%s16648_s7 + $0xc14] ss:$8 sps:$4 sm:$0xff] (!%p6489_p9)  }
 0x1a7   : > { %12057 = vmatprep.subr.bf16.mxu0 (!%p6489_p9), %v13732_v19  ;;  %11542 = vmatpush1.bf16.msra.mxu1 (!%p6489_p9), %v13734_v20  ;;  %v13740_v24 = vld [vmem:[%s16648_s7 + $0x10] ss:$8 sps:$4 sm:$0xff] (!%p6489_p9)   ;;  %v13742_v26 = vld [vmem:[%s16648_s7 + $0x24] ss:$8 sps:$4 sm:$0xff] (!%p6489_p9)   ;;  %v13746_v28 = vld [vmem:[%s16648_s7 + $0x20] ss:$8 sps:$4 sm:$0xff] (!%p6489_p9)  }
 0x1a8   : > { %12058 = vmatpush1.bf16.msra.mxu0 %v13735_v21  ;;  %11543 = vmatprep.subr.bf16.mxu1 %v13736_v22  ;;  %v13741_v25 = vld [vmem:[%s16648_s7 + $0xc10] ss:$8 sps:$4 sm:$0xff]   ;;  %v13744_v27 = vld [vmem:[%s16648_s7 + $0xc24] ss:$8 sps:$4 sm:$0xff]   ;;  %v13747_v29 = vld [vmem:[%s16648_s7 + $0xc20] ss:$8 sps:$4 sm:$0xff]  }
 0x1a9   : > { %12059 = vmatprep.subr.bf16.mxu0 %v13738_v23  ;;  %v13748_v30 = vld [vmem:[%s16648_s7 + $0x34] ss:$8 sps:$4 sm:$0xff]   ;;  %v13752_v32 = vld [vmem:[%s16648_s7 + $0x30] ss:$8 sps:$4 sm:$0xff]   ;;  %v13754_v34 = vld [vmem:[%s16648_s7 + $0x44] ss:$8 sps:$4 sm:$0xff]  }
 0x1aa   : > { %v13750_v31 = vld [vmem:[%s16648_s7 + $0xc34] ss:$8 sps:$4 sm:$0xff]   ;;  %v13753_v33 = vld [vmem:[%s16648_s7 + $0xc30] ss:$8 sps:$4 sm:$0xff]   ;;  %v13756_v35 = vld [vmem:[%s16648_s7 + $0xc44] ss:$8 sps:$4 sm:$0xff]  }
 0x1ab   : > { %11544 = vmatpush1.bf16.msra.mxu1 %v13740_v24  ;;  %v13758_v36 = vld [vmem:[%s16648_s7 + $0x40] ss:$8 sps:$4 sm:$0xff]   ;;  %v13760_v38 = vld [vmem:[%s16648_s7 + $0x54] ss:$8 sps:$4 sm:$0xff]   ;;  %v13764_v40 = vld [vmem:[%s16648_s7 + $0x50] ss:$8 sps:$4 sm:$0xff]  }
 0x1ac   : > { %12060 = vmatpush1.bf16.msra.mxu0 %v13741_v25  ;;  %11545 = vmatprep.subr.bf16.mxu1 %v13742_v26  ;;  %v13759_v37 = vld [vmem:[%s16648_s7 + $0xc40] ss:$8 sps:$4 sm:$0xff]   ;;  %v13762_v39 = vld [vmem:[%s16648_s7 + $0xc54] ss:$8 sps:$4 sm:$0xff]   ;;  %v13765_v41 = vld [vmem:[%s16648_s7 + $0xc50] ss:$8 sps:$4 sm:$0xff]  }
 0x1ad   : > { %12061 = vmatprep.subr.bf16.mxu0 %v13744_v27  ;;  %v13766_v42 = vld [vmem:[%s16648_s7 + $0x64] ss:$8 sps:$4 sm:$0xff]   ;;  %v13770_v44 = vld [vmem:[%s16648_s7 + $0x60] ss:$8 sps:$4 sm:$0xff]   ;;  %v13772_v46 = vld [vmem:[%s16648_s7 + $0x74] ss:$8 sps:$4 sm:$0xff]  }
 0x1ae   : > { %v13768_v43 = vld [vmem:[%s16648_s7 + $0xc64] ss:$8 sps:$4 sm:$0xff]   ;;  %v13771_v45 = vld [vmem:[%s16648_s7 + $0xc60] ss:$8 sps:$4 sm:$0xff]   ;;  %v13774_v47 = vld [vmem:[%s16648_s7 + $0xc74] ss:$8 sps:$4 sm:$0xff]  }
 0x1af   : > { %11546 = vmatpush1.bf16.msra.mxu1 %v13746_v28  ;;  %v13776_v48 = vld [vmem:[%s16648_s7 + $0x70] ss:$8 sps:$4 sm:$0xff]   ;;  %v13778_v50 = vld [vmem:[%s16648_s7 + $0x84] ss:$8 sps:$4 sm:$0xff]   ;;  %v13782_v52 = vld [vmem:[%s16648_s7 + $0x80] ss:$8 sps:$4 sm:$0xff]  }
 0x1b0   : > { %12062 = vmatpush1.bf16.msra.mxu0 %v13747_v29  ;;  %11547 = vmatprep.subr.bf16.mxu1 %v13748_v30  ;;  %v13777_v49 = vld [vmem:[%s16648_s7 + $0xc70] ss:$8 sps:$4 sm:$0xff]   ;;  %v13780_v51 = vld [vmem:[%s16648_s7 + $0xc84] ss:$8 sps:$4 sm:$0xff]   ;;  %v13783_v53 = vld [vmem:[%s16648_s7 + $0xc80] ss:$8 sps:$4 sm:$0xff]  }
 0x1b1   : > { %12063 = vmatprep.subr.bf16.mxu0 %v13750_v31  ;;  %v13784_v54 = vld [vmem:[%s16648_s7 + $0x94] ss:$8 sps:$4 sm:$0xff]   ;;  %v13788_v56 = vld [vmem:[%s16648_s7 + $0x90] ss:$8 sps:$4 sm:$0xff]   ;;  %v13790_v58 = vld [vmem:[%s16648_s7 + $0xa4] ss:$8 sps:$4 sm:$0xff]  }
 0x1b2   : > { %v13786_v55 = vld [vmem:[%s16648_s7 + $0xc94] ss:$8 sps:$4 sm:$0xff]   ;;  %v13789_v57 = vld [vmem:[%s16648_s7 + $0xc90] ss:$8 sps:$4 sm:$0xff]   ;;  %v13792_v59 = vld [vmem:[%s16648_s7 + $0xca4] ss:$8 sps:$4 sm:$0xff]  }
 0x1b3   : > { %11548 = vmatpush1.bf16.msra.mxu1 %v13752_v32  ;;  %v13794_v60 = vld [vmem:[%s16648_s7 + $0xa0] ss:$8 sps:$4 sm:$0xff]   ;;  %v13796_v62 = vld [vmem:[%s16648_s7 + $0xb4] ss:$8 sps:$4 sm:$0xff]   ;;  %v13800_v0 = vld [vmem:[%s16648_s7 + $0xb0] ss:$8 sps:$4 sm:$0xff]  }
 0x1b4   : > { %12064 = vmatpush1.bf16.msra.mxu0 %v13753_v33  ;;  %11549 = vmatprep.subr.bf16.mxu1 %v13754_v34  ;;  %v13795_v61 = vld [vmem:[%s16648_s7 + $0xca0] ss:$8 sps:$4 sm:$0xff]   ;;  %v13798_v63 = vld [vmem:[%s16648_s7 + $0xcb4] ss:$8 sps:$4 sm:$0xff]   ;;  %v13801_v1 = vld [vmem:[%s16648_s7 + $0xcb0] ss:$8 sps:$4 sm:$0xff]  }
 0x1b5   : > { %12065 = vmatprep.subr.bf16.mxu0 %v13756_v35  ;;  %v13802_v2 = vld [vmem:[%s16648_s7 + $0xc4] ss:$8 sps:$4 sm:$0xff]   ;;  %v13806_v4 = vld [vmem:[%s16648_s7 + $0xc0] ss:$8 sps:$4 sm:$0xff]   ;;  %v13808_v6 = vld [vmem:[%s16648_s7 + $0xd4] ss:$8 sps:$4 sm:$0xff]  }
 0x1b6   : > { %v13804_v3 = vld [vmem:[%s16648_s7 + $0xcc4] ss:$8 sps:$4 sm:$0xff]   ;;  %v13807_v5 = vld [vmem:[%s16648_s7 + $0xcc0] ss:$8 sps:$4 sm:$0xff]   ;;  %v13810_v7 = vld [vmem:[%s16648_s7 + $0xcd4] ss:$8 sps:$4 sm:$0xff]  }
 0x1b7   : > { %11550 = vmatpush1.bf16.msra.mxu1 %v13758_v36  ;;  %v13812_v8 = vld [vmem:[%s16648_s7 + $0xd0] ss:$8 sps:$4 sm:$0xff]   ;;  %v13814_v10 = vld [vmem:[%s16648_s7 + $0xe4] ss:$8 sps:$4 sm:$0xff]   ;;  %v13818_v12 = vld [vmem:[%s16648_s7 + $0xe0] ss:$8 sps:$4 sm:$0xff]  }
 0x1b8   : > { %12066 = vmatpush1.bf16.msra.mxu0 %v13759_v37  ;;  %11551 = vmatprep.subr.bf16.mxu1 %v13760_v38  ;;  %v13813_v9 = vld [vmem:[%s16648_s7 + $0xcd0] ss:$8 sps:$4 sm:$0xff]   ;;  %v13816_v11 = vld [vmem:[%s16648_s7 + $0xce4] ss:$8 sps:$4 sm:$0xff]   ;;  %v13819_v13 = vld [vmem:[%s16648_s7 + $0xce0] ss:$8 sps:$4 sm:$0xff]  }
 0x1b9   : > { %12067 = vmatprep.subr.bf16.mxu0 %v13762_v39  ;;  %v13820_v14 = vld [vmem:[%s16648_s7 + $0xf4] ss:$8 sps:$4 sm:$0xff]   ;;  %v13824_v16 = vld [vmem:[%s16648_s7 + $0xf0] ss:$8 sps:$4 sm:$0xff]   ;;  %v13831_v18 = vld [vmem:[%s16648_s7 + $0x104] ss:$8 sps:$4 sm:$0xff]  }
 0x1ba   : > { %v13822_v15 = vld [vmem:[%s16648_s7 + $0xcf4] ss:$8 sps:$4 sm:$0xff]   ;;  %v13825_v17 = vld [vmem:[%s16648_s7 + $0xcf0] ss:$8 sps:$4 sm:$0xff]   ;;  %v13837_v19 = vld [vmem:[%s16648_s7 + $0xd04] ss:$8 sps:$4 sm:$0xff]  }
 0x1bb   : > { %11552 = vmatpush1.bf16.msra.mxu1 %v13764_v40  ;;  %v13826_v20 = vld [vmem:[%s17597_s0] ss:$196 sps:$4 sm:$0xff]   ;;  %v13840_v24 = vld [vmem:[%s16648_s7 + $0x114] ss:$8 sps:$4 sm:$0xff]   ;;  %v13838_v26 = vld [vmem:[%s16648_s7 + $0x110] ss:$8 sps:$4 sm:$0xff]  }
 0x1bc   : > { %12068 = vmatpush1.bf16.msra.mxu0 %v13765_v41  ;;  %11553 = vmatprep.subr.bf16.mxu1 %v13766_v42  ;;  %v13832_v21 = vld [vmem:[%s17597_s0 + $0x60] ss:$196 sps:$4 sm:$0xff]   ;;  %v13843_v25 = vld [vmem:[%s16648_s7 + $0xd14] ss:$8 sps:$4 sm:$0xff]   ;;  %v13841_v27 = vld [vmem:[%s16648_s7 + $0xd10] ss:$8 sps:$4 sm:$0xff]  }
 0x1bd   : > { %12069 = vmatprep.subr.bf16.mxu0 %v13768_v43  ;;  %v13829_v22 = vld [vmem:[%s16648_s7 + $0x100] ss:$8 sps:$4 sm:$0xff]   ;;  %v13846_v28 = vld [vmem:[%s16648_s7 + $0x124] ss:$8 sps:$4 sm:$0xff]   ;;  %v13852_v32 = vld [vmem:[%s16648_s7 + $0x134] ss:$8 sps:$4 sm:$0xff]  }
 0x1be   : > { %v13835_v23 = vld [vmem:[%s16648_s7 + $0xd00] ss:$8 sps:$4 sm:$0xff]   ;;  %v13849_v29 = vld [vmem:[%s16648_s7 + $0xd24] ss:$8 sps:$4 sm:$0xff]   ;;  %v13855_v33 = vld [vmem:[%s16648_s7 + $0xd34] ss:$8 sps:$4 sm:$0xff]  }
 0x1bf   : > { %11554 = vmatpush1.bf16.msra.mxu1 %v13770_v44  ;;  %v13844_v30 = vld [vmem:[%s16648_s7 + $0x120] ss:$8 sps:$4 sm:$0xff]   ;;  %v13850_v34 = vld [vmem:[%s16648_s7 + $0x130] ss:$8 sps:$4 sm:$0xff]   ;;  %v13858_v36 = vld [vmem:[%s16648_s7 + $0x144] ss:$8 sps:$4 sm:$0xff]  }
 0x1c0   : > { %12070 = vmatpush1.bf16.msra.mxu0 %v13771_v45  ;;  %11555 = vmatprep.subr.bf16.mxu1 %v13772_v46  ;;  %v13847_v31 = vld [vmem:[%s16648_s7 + $0xd20] ss:$8 sps:$4 sm:$0xff]   ;;  %v13853_v35 = vld [vmem:[%s16648_s7 + $0xd30] ss:$8 sps:$4 sm:$0xff]   ;;  %v13861_v37 = vld [vmem:[%s16648_s7 + $0xd44] ss:$8 sps:$4 sm:$0xff]  }
 0x1c1   : > { %12071 = vmatprep.subr.bf16.mxu0 %v13774_v47  ;;  %v13856_v38 = vld [vmem:[%s16648_s7 + $0x140] ss:$8 sps:$4 sm:$0xff]   ;;  %v13864_v40 = vld [vmem:[%s16648_s7 + $0x154] ss:$8 sps:$4 sm:$0xff]   ;;  %v13862_v42 = vld [vmem:[%s16648_s7 + $0x150] ss:$8 sps:$4 sm:$0xff]  }
 0x1c2   : > { %v13859_v39 = vld [vmem:[%s16648_s7 + $0xd40] ss:$8 sps:$4 sm:$0xff]   ;;  %v13867_v41 = vld [vmem:[%s16648_s7 + $0xd54] ss:$8 sps:$4 sm:$0xff]   ;;  %v13865_v43 = vld [vmem:[%s16648_s7 + $0xd50] ss:$8 sps:$4 sm:$0xff]  }
 0x1c3   : > { %11556 = vmatpush1.bf16.msra.mxu1 %v13776_v48  ;;  %v13870_v44 = vld [vmem:[%s16648_s7 + $0x164] ss:$8 sps:$4 sm:$0xff]   ;;  %v13868_v47 = vld [vmem:[%s16648_s7 + $0x160] ss:$8 sps:$4 sm:$0xff]   ;;  %s17606_s6 = smov (!%p6523_p10, %s12758_s6), 3  ;;  %s13602_s12 = sshll.u32 (%p15055_p5), %s15040_s15, 3 }
 0x1c4   : > { %12072 = vmatpush1.bf16.msra.mxu0 %v13777_v49  ;;  %11557 = vmatprep.subr.bf16.mxu1 %v13778_v50  ;;  %v13873_v45 = vld [vmem:[%s16648_s7 + $0xd64] ss:$8 sps:$4 sm:$0xff]   ;;  %v13871_v48 = vld [vmem:[%s16648_s7 + $0xd60] ss:$8 sps:$4 sm:$0xff]   ;;  %v13876_v50 = vld [vmem:[%s16648_s7 + $0x174] ss:$8 sps:$4 sm:$0xff]   ;;  %s12639_s17 = scalar_lea.vmem (%p15055_p5), %s17600_s3, %s13602_s12 }
 0x1c5   : > { %12073 = vmatprep.subr.bf16.mxu0 %v13780_v51  ;;  %v13930_v46 = vld [vmem:[%s17597_s0 + $0xc] ss:$196 sps:$4 sm:$0xff]   ;;  %v13879_v51 = vld [vmem:[%s16648_s7 + $0xd74] ss:$8 sps:$4 sm:$0xff]  }
 0x1c6   : > { %v13936_v49 = vld [vmem:[%s17597_s0 + $0x6c] ss:$196 sps:$4 sm:$0xff]  }
 0x1c7   : > { %11558 = vmatpush1.bf16.msra.mxu1 %v13782_v52  ;;  %v13874_v52 = vld [vmem:[%s16648_s7 + $0x170] ss:$8 sps:$4 sm:$0xff]  }
 0x1c8   : > { %12074 = vmatpush1.bf16.msra.mxu0 %v13783_v53  ;;  %11559 = vmatprep.subr.bf16.mxu1 %v13784_v54  ;;  %v13877_v53 = vld [vmem:[%s16648_s7 + $0xd70] ss:$8 sps:$4 sm:$0xff]   ;;  %v13882_v54 = vld [vmem:[%s16648_s7 + $0x184] ss:$8 sps:$4 sm:$0xff]  }
 0x1c9   : > { %12075 = vmatprep.subr.bf16.mxu0 %v13786_v55  ;;  %v13885_v55 = vld [vmem:[%s16648_s7 + $0xd84] ss:$8 sps:$4 sm:$0xff]  }
 0x1cb   : > { %11560 = vmatpush1.bf16.msra.mxu1 %v13788_v56  ;;  %v13880_v56 = vld [vmem:[%s16648_s7 + $0x180] ss:$8 sps:$4 sm:$0xff]  }
 0x1cc   : > { %12076 = vmatpush1.bf16.msra.mxu0 %v13789_v57  ;;  %11561 = vmatprep.subr.bf16.mxu1 %v13790_v58  ;;  %v13883_v57 = vld [vmem:[%s16648_s7 + $0xd80] ss:$8 sps:$4 sm:$0xff]   ;;  %v13888_v58 = vld [vmem:[%s16648_s7 + $0x194] ss:$8 sps:$4 sm:$0xff]  }
 0x1cd   : > { %12077 = vmatprep.subr.bf16.mxu0 %v13792_v59  ;;  %v13891_v59 = vld [vmem:[%s16648_s7 + $0xd94] ss:$8 sps:$4 sm:$0xff]  }
 0x1cf   : > { %11562 = vmatpush1.bf16.msra.mxu1 %v13794_v60  ;;  %v13886_v60 = vld [vmem:[%s16648_s7 + $0x190] ss:$8 sps:$4 sm:$0xff]  }
 0x1d0   : > { %12078 = vmatpush1.bf16.msra.mxu0 %v13795_v61  ;;  %11563 = vmatprep.subr.bf16.mxu1 %v13796_v62  ;;  %v13889_v61 = vld [vmem:[%s16648_s7 + $0xd90] ss:$8 sps:$4 sm:$0xff]   ;;  %v13894_v62 = vld [vmem:[%s16648_s7 + $0x1a4] ss:$8 sps:$4 sm:$0xff]  }
 0x1d1   : > { %12079 = vmatprep.subr.bf16.mxu0 %v13798_v63  ;;  %v13897_v63 = vld [vmem:[%s16648_s7 + $0xda4] ss:$8 sps:$4 sm:$0xff]  }
 0x1d3   : > { %11564 = vmatpush1.bf16.msra.mxu1 %v13800_v0  ;;  %v13892_v0 = vld [vmem:[%s16648_s7 + $0x1a0] ss:$8 sps:$4 sm:$0xff]  }
 0x1d4   : > { %12080 = vmatpush1.bf16.msra.mxu0 %v13801_v1  ;;  %11565 = vmatprep.subr.bf16.mxu1 %v13802_v2  ;;  %v13895_v1 = vld [vmem:[%s16648_s7 + $0xda0] ss:$8 sps:$4 sm:$0xff]   ;;  %v13900_v2 = vld [vmem:[%s16648_s7 + $0x1b4] ss:$8 sps:$4 sm:$0xff]  }
 0x1d5   : > { %12081 = vmatprep.subr.bf16.mxu0 %v13804_v3  ;;  %v13903_v3 = vld [vmem:[%s16648_s7 + $0xdb4] ss:$8 sps:$4 sm:$0xff]  }
 0x1d7   : > { %11566 = vmatpush1.bf16.msra.mxu1 %v13806_v4  ;;  %v13898_v4 = vld [vmem:[%s16648_s7 + $0x1b0] ss:$8 sps:$4 sm:$0xff]  }
 0x1d8   : > { %12082 = vmatpush1.bf16.msra.mxu0 %v13807_v5  ;;  %11567 = vmatprep.subr.bf16.mxu1 %v13808_v6  ;;  %v13901_v5 = vld [vmem:[%s16648_s7 + $0xdb0] ss:$8 sps:$4 sm:$0xff]   ;;  %v13906_v6 = vld [vmem:[%s16648_s7 + $0x1c4] ss:$8 sps:$4 sm:$0xff]  }
 0x1d9   : > { %12083 = vmatprep.subr.bf16.mxu0 %v13810_v7  ;;  %v13909_v7 = vld [vmem:[%s16648_s7 + $0xdc4] ss:$8 sps:$4 sm:$0xff]  }
 0x1db   : > { %11568 = vmatpush1.bf16.msra.mxu1 %v13812_v8  ;;  %v13904_v8 = vld [vmem:[%s16648_s7 + $0x1c0] ss:$8 sps:$4 sm:$0xff]  }
 0x1dc   : > { %12084 = vmatpush1.bf16.msra.mxu0 %v13813_v9  ;;  %11569 = vmatprep.subr.bf16.mxu1 %v13814_v10  ;;  %v13907_v9 = vld [vmem:[%s16648_s7 + $0xdc0] ss:$8 sps:$4 sm:$0xff]   ;;  %v13912_v10 = vld [vmem:[%s16648_s7 + $0x1d4] ss:$8 sps:$4 sm:$0xff]  }
 0x1dd   : > { %12085 = vmatprep.subr.bf16.mxu0 %v13816_v11  ;;  %v13915_v11 = vld [vmem:[%s16648_s7 + $0xdd4] ss:$8 sps:$4 sm:$0xff]  }
 0x1df   : > { %11570 = vmatpush1.bf16.msra.mxu1 %v13818_v12  ;;  %v13910_v12 = vld [vmem:[%s16648_s7 + $0x1d0] ss:$8 sps:$4 sm:$0xff]  }
 0x1e0   : > { %12086 = vmatpush1.bf16.msra.mxu0 %v13819_v13  ;;  %11571 = vmatprep.subr.bf16.mxu1 %v13820_v14  ;;  %v13913_v13 = vld [vmem:[%s16648_s7 + $0xdd0] ss:$8 sps:$4 sm:$0xff]   ;;  %v13918_v14 = vld [vmem:[%s16648_s7 + $0x1e4] ss:$8 sps:$4 sm:$0xff]  }
 0x1e1   : > { %12087 = vmatprep.subr.bf16.mxu0 %v13822_v15  ;;  %v13921_v15 = vld [vmem:[%s16648_s7 + $0xde4] ss:$8 sps:$4 sm:$0xff]  }
 0x1e3   : > { %11572 = vmatpush1.bf16.msra.mxu1 %v13824_v16  ;;  %v13916_v16 = vld [vmem:[%s16648_s7 + $0x1e0] ss:$8 sps:$4 sm:$0xff]  }
 0x1e4   : > { %12088 = vmatpush1.bf16.msra.mxu0 %v13825_v17  ;;  %11584 = vmatprep.subr.bf16.mxu1 %v13831_v18  ;;  %v13919_v17 = vld [vmem:[%s16648_s7 + $0xde0] ss:$8 sps:$4 sm:$0xff]   ;;  %v13924_v18 = vld [vmem:[%s16648_s7 + $0x1f4] ss:$8 sps:$4 sm:$0xff]  }
 0x1e5   : > { %12100 = vmatprep.subr.bf16.mxu0 %v13837_v19  ;;  %v13927_v19 = vld [vmem:[%s16648_s7 + $0xdf4] ss:$8 sps:$4 sm:$0xff]  }
 0x1e6   : > { %11574 = vmatmul.mubr.bf16.vlgmr.msra.gmra.mrb[0].mxu1 %v13826_v20  ;;  %v13922_v20 = vld [vmem:[%s16648_s7 + $0x1f0] ss:$8 sps:$4 sm:$0xff]  }
 0x1e7   : > { %12090 = vmatmul.mubr.bf16.vlgmr.msra.gmra.mrb[0].mxu0 %v13832_v21  ;;  %11585 = vmatpush1.bf16.msra.mxu1 %v13829_v22  ;;  %v13925_v21 = vld [vmem:[%s16648_s7 + $0xdf0] ss:$8 sps:$4 sm:$0xff]   ;;  %v13933_v22 = vld [vmem:[%s16648_s7 + $0x204] ss:$8 sps:$4 sm:$0xff]  }
 0x1e8   : > { %12101 = vmatpush1.bf16.msra.mxu0 %v13835_v23  ;;  %11586 = vmatprep.subr.bf16.mxu1 %v13840_v24  ;;  %v13939_v23 = vld [vmem:[%s16648_s7 + $0xe04] ss:$8 sps:$4 sm:$0xff]  }
 0x1e9   : > { %12102 = vmatprep.subr.bf16.mxu0 %v13843_v25  ;;  %11616 = vmatprep.mubr.bf16.mxu1 %v13930_v46  ;;  %v13928_v24 = vld [vmem:[%s17597_s0 + $0x8] ss:$196 sps:$4 sm:$0xff]   ;;  %v13966_v46 = vld [vmem:[%s16648_s7 + $0x254] ss:$8 sps:$4 sm:$0xff]  }
 0x1ea   : > { %12132 = vmatprep.mubr.bf16.mxu0 %v13936_v49  ;;  %v13931_v25 = vld [vmem:[%s16648_s7 + $0x200] ss:$8 sps:$4 sm:$0xff]   ;;  %v13967_v49 = vld [vmem:[%s16648_s7 + $0xe50] ss:$8 sps:$4 sm:$0xff]  }
 0x1eb   : > { %11587 = vmatpush1.bf16.msra.mxu1 %v13838_v26  ;;  %v13934_v26 = vld [vmem:[%s17597_s0 + $0x68] ss:$196 sps:$4 sm:$0xff]  }
 0x1ec   : > { %12103 = vmatpush1.bf16.msra.mxu0 %v13841_v27  ;;  %11588 = vmatprep.subr.bf16.mxu1 %v13846_v28  ;;  %v13937_v27 = vld [vmem:[%s16648_s7 + $0xe00] ss:$8 sps:$4 sm:$0xff]   ;;  %v13942_v28 = vld [vmem:[%s16648_s7 + $0x214] ss:$8 sps:$4 sm:$0xff]  }
 0x1ed   : > { %12104 = vmatprep.subr.bf16.mxu0 %v13849_v29  ;;  %v13945_v29 = vld [vmem:[%s16648_s7 + $0xe14] ss:$8 sps:$4 sm:$0xff]  }
 0x1ef   : > { %11589 = vmatpush1.bf16.msra.mxu1 %v13844_v30  ;;  %v13940_v30 = vld [vmem:[%s16648_s7 + $0x210] ss:$8 sps:$4 sm:$0xff]  }
 0x1f0   : > { %12105 = vmatpush1.bf16.msra.mxu0 %v13847_v31  ;;  %11590 = vmatprep.subr.bf16.mxu1 %v13852_v32  ;;  %v14032_v31 = vld [vmem:[%s17597_s0 + $0x14] ss:$196 sps:$4 sm:$0xff]  }
 0x1f1   : > { %12106 = vmatprep.subr.bf16.mxu0 %v13855_v33  ;;  %v13943_v32 = vld [vmem:[%s16648_s7 + $0xe10] ss:$8 sps:$4 sm:$0xff]   ;;  %v13948_v33 = vld [vmem:[%s16648_s7 + $0x224] ss:$8 sps:$4 sm:$0xff]  }
 0x1f3   : > { %11591 = vmatpush1.bf16.msra.mxu1 %v13850_v34  ;;  %v13951_v34 = vld [vmem:[%s16648_s7 + $0xe24] ss:$8 sps:$4 sm:$0xff]  }
 0x1f4   : > { %12107 = vmatpush1.bf16.msra.mxu0 %v13853_v35  ;;  %11592 = vmatprep.subr.bf16.mxu1 %v13858_v36  ;;  %v14038_v35 = vld [vmem:[%s17597_s0 + $0x74] ss:$196 sps:$4 sm:$0xff]   ;;  %v13946_v36 = vld [vmem:[%s16648_s7 + $0x220] ss:$8 sps:$4 sm:$0xff]  }
 0x1f5   : > { %12108 = vmatprep.subr.bf16.mxu0 %v13861_v37  ;;  %v13949_v37 = vld [vmem:[%s16648_s7 + $0xe20] ss:$8 sps:$4 sm:$0xff]  }
 0x1f7   : > { %11593 = vmatpush1.bf16.msra.mxu1 %v13856_v38  ;;  %v13954_v38 = vld [vmem:[%s16648_s7 + $0x234] ss:$8 sps:$4 sm:$0xff]  }
 0x1f8   : > { %12109 = vmatpush1.bf16.msra.mxu0 %v13859_v39  ;;  %11594 = vmatprep.subr.bf16.mxu1 %v13864_v40  ;;  %v13957_v39 = vld [vmem:[%s16648_s7 + $0xe34] ss:$8 sps:$4 sm:$0xff]   ;;  %v13952_v40 = vld [vmem:[%s16648_s7 + $0x230] ss:$8 sps:$4 sm:$0xff]  }
 0x1f9   : > { %12110 = vmatprep.subr.bf16.mxu0 %v13867_v41  ;;  %v13955_v41 = vld [vmem:[%s16648_s7 + $0xe30] ss:$8 sps:$4 sm:$0xff]  }
 0x1fb   : > { %11595 = vmatpush1.bf16.msra.mxu1 %v13862_v42  ;;  %v13960_v42 = vld [vmem:[%s16648_s7 + $0x244] ss:$8 sps:$4 sm:$0xff]  }
 0x1fc   : > { %12111 = vmatpush1.bf16.msra.mxu0 %v13865_v43  ;;  %11596 = vmatprep.subr.bf16.mxu1 %v13870_v44  ;;  %v13963_v43 = vld [vmem:[%s16648_s7 + $0xe44] ss:$8 sps:$4 sm:$0xff]   ;;  %v13958_v44 = vld [vmem:[%s16648_s7 + $0x240] ss:$8 sps:$4 sm:$0xff]  }
 0x1fd   : > { %12112 = vmatprep.subr.bf16.mxu0 %v13873_v45  ;;  %v13961_v45 = vld [vmem:[%s16648_s7 + $0xe40] ss:$8 sps:$4 sm:$0xff]  }
 0x1ff   : > { %11597 = vmatpush1.bf16.msra.mxu1 %v13868_v47  ;;  %v13969_v47 = vld [vmem:[%s16648_s7 + $0xe54] ss:$8 sps:$4 sm:$0xff]  }
 0x200   : > { %12113 = vmatpush1.bf16.msra.mxu0 %v13871_v48  ;;  %11598 = vmatprep.subr.bf16.mxu1 %v13876_v50  ;;  %v13964_v48 = vld [vmem:[%s16648_s7 + $0x250] ss:$8 sps:$4 sm:$0xff]   ;;  %v13972_v50 = vld [vmem:[%s16648_s7 + $0x264] ss:$8 sps:$4 sm:$0xff]  }
 0x201   : > { %12114 = vmatprep.subr.bf16.mxu0 %v13879_v51  ;;  %v13975_v51 = vld [vmem:[%s16648_s7 + $0xe64] ss:$8 sps:$4 sm:$0xff]  }
 0x203   : > { %11599 = vmatpush1.bf16.msra.mxu1 %v13874_v52  ;;  %v13970_v52 = vld [vmem:[%s16648_s7 + $0x260] ss:$8 sps:$4 sm:$0xff]  }
 0x204   : > { %12115 = vmatpush1.bf16.msra.mxu0 %v13877_v53  ;;  %11600 = vmatprep.subr.bf16.mxu1 %v13882_v54  ;;  %v13973_v53 = vld [vmem:[%s16648_s7 + $0xe60] ss:$8 sps:$4 sm:$0xff]   ;;  %v13978_v54 = vld [vmem:[%s16648_s7 + $0x274] ss:$8 sps:$4 sm:$0xff]  }
 0x205   : > { %12116 = vmatprep.subr.bf16.mxu0 %v13885_v55  ;;  %v13981_v55 = vld [vmem:[%s16648_s7 + $0xe74] ss:$8 sps:$4 sm:$0xff]  }
 0x207   : > { %11601 = vmatpush1.bf16.msra.mxu1 %v13880_v56  ;;  %v13976_v56 = vld [vmem:[%s16648_s7 + $0x270] ss:$8 sps:$4 sm:$0xff]  }
 0x208   : > { %12117 = vmatpush1.bf16.msra.mxu0 %v13883_v57  ;;  %11602 = vmatprep.subr.bf16.mxu1 %v13888_v58  ;;  %v13979_v57 = vld [vmem:[%s16648_s7 + $0xe70] ss:$8 sps:$4 sm:$0xff]   ;;  %v13984_v58 = vld [vmem:[%s16648_s7 + $0x284] ss:$8 sps:$4 sm:$0xff]  }
 0x209   : > { %12118 = vmatprep.subr.bf16.mxu0 %v13891_v59  ;;  %v13987_v59 = vld [vmem:[%s16648_s7 + $0xe84] ss:$8 sps:$4 sm:$0xff]  }
 0x20b   : > { %11603 = vmatpush1.bf16.msra.mxu1 %v13886_v60  ;;  %v13982_v60 = vld [vmem:[%s16648_s7 + $0x280] ss:$8 sps:$4 sm:$0xff]  }
 0x20c   : > { %12119 = vmatpush1.bf16.msra.mxu0 %v13889_v61  ;;  %11604 = vmatprep.subr.bf16.mxu1 %v13894_v62  ;;  %v13985_v61 = vld [vmem:[%s16648_s7 + $0xe80] ss:$8 sps:$4 sm:$0xff]   ;;  %v13990_v62 = vld [vmem:[%s16648_s7 + $0x294] ss:$8 sps:$4 sm:$0xff]  }
 0x20d   : > { %12120 = vmatprep.subr.bf16.mxu0 %v13897_v63  ;;  %v13993_v63 = vld [vmem:[%s16648_s7 + $0xe94] ss:$8 sps:$4 sm:$0xff]  }
 0x20f   : > { %11605 = vmatpush1.bf16.msra.mxu1 %v13892_v0  ;;  %v13988_v0 = vld [vmem:[%s16648_s7 + $0x290] ss:$8 sps:$4 sm:$0xff]  }
 0x210   : > { %12121 = vmatpush1.bf16.msra.mxu0 %v13895_v1  ;;  %11606 = vmatprep.subr.bf16.mxu1 %v13900_v2  ;;  %v13991_v1 = vld [vmem:[%s16648_s7 + $0xe90] ss:$8 sps:$4 sm:$0xff]   ;;  %v13996_v2 = vld [vmem:[%s16648_s7 + $0x2a4] ss:$8 sps:$4 sm:$0xff]  }
 0x211   : > { %12122 = vmatprep.subr.bf16.mxu0 %v13903_v3  ;;  %v13999_v3 = vld [vmem:[%s16648_s7 + $0xea4] ss:$8 sps:$4 sm:$0xff]  }
 0x213   : > { %11607 = vmatpush1.bf16.msra.mxu1 %v13898_v4  ;;  %v13994_v4 = vld [vmem:[%s16648_s7 + $0x2a0] ss:$8 sps:$4 sm:$0xff]  }
 0x214   : > { %12123 = vmatpush1.bf16.msra.mxu0 %v13901_v5  ;;  %11608 = vmatprep.subr.bf16.mxu1 %v13906_v6  ;;  %v13997_v5 = vld [vmem:[%s16648_s7 + $0xea0] ss:$8 sps:$4 sm:$0xff]   ;;  %v14002_v6 = vld [vmem:[%s16648_s7 + $0x2b4] ss:$8 sps:$4 sm:$0xff]  }
 0x215   : > { %12124 = vmatprep.subr.bf16.mxu0 %v13909_v7  ;;  %v14005_v7 = vld [vmem:[%s16648_s7 + $0xeb4] ss:$8 sps:$4 sm:$0xff]  }
 0x217   : > { %11609 = vmatpush1.bf16.msra.mxu1 %v13904_v8  ;;  %v14000_v8 = vld [vmem:[%s16648_s7 + $0x2b0] ss:$8 sps:$4 sm:$0xff]  }
 0x218   : > { %12125 = vmatpush1.bf16.msra.mxu0 %v13907_v9  ;;  %11610 = vmatprep.subr.bf16.mxu1 %v13912_v10  ;;  %v14003_v9 = vld [vmem:[%s16648_s7 + $0xeb0] ss:$8 sps:$4 sm:$0xff]   ;;  %v14008_v10 = vld [vmem:[%s16648_s7 + $0x2c4] ss:$8 sps:$4 sm:$0xff]  }
 0x219   : > { %12126 = vmatprep.subr.bf16.mxu0 %v13915_v11  ;;  %v14011_v11 = vld [vmem:[%s16648_s7 + $0xec4] ss:$8 sps:$4 sm:$0xff]  }
 0x21b   : > { %11611 = vmatpush1.bf16.msra.mxu1 %v13910_v12  ;;  %v14006_v12 = vld [vmem:[%s16648_s7 + $0x2c0] ss:$8 sps:$4 sm:$0xff]  }
 0x21c   : > { %12127 = vmatpush1.bf16.msra.mxu0 %v13913_v13  ;;  %11612 = vmatprep.subr.bf16.mxu1 %v13918_v14  ;;  %v14009_v13 = vld [vmem:[%s16648_s7 + $0xec0] ss:$8 sps:$4 sm:$0xff]   ;;  %v14014_v14 = vld [vmem:[%s16648_s7 + $0x2d4] ss:$8 sps:$4 sm:$0xff]  }
 0x21d   : > { %12128 = vmatprep.subr.bf16.mxu0 %v13921_v15  ;;  %v14017_v15 = vld [vmem:[%s16648_s7 + $0xed4] ss:$8 sps:$4 sm:$0xff]  }
 0x21f   : > { %11613 = vmatpush1.bf16.msra.mxu1 %v13916_v16  ;;  %v14012_v16 = vld [vmem:[%s16648_s7 + $0x2d0] ss:$8 sps:$4 sm:$0xff]  }
 0x220   : > { %12129 = vmatpush1.bf16.msra.mxu0 %v13919_v17  ;;  %11614 = vmatprep.subr.bf16.mxu1 %v13924_v18  ;;  %v14015_v17 = vld [vmem:[%s16648_s7 + $0xed0] ss:$8 sps:$4 sm:$0xff]   ;;  %v14020_v18 = vld [vmem:[%s16648_s7 + $0x2e4] ss:$8 sps:$4 sm:$0xff]  }
 0x221   : > { %12130 = vmatprep.subr.bf16.mxu0 %v13927_v19  ;;  %v14023_v19 = vld [vmem:[%s16648_s7 + $0xee4] ss:$8 sps:$4 sm:$0xff]  }
 0x223   : > { %11615 = vmatpush1.bf16.msra.mxu1 %v13922_v20  ;;  %v14018_v20 = vld [vmem:[%s16648_s7 + $0x2e0] ss:$8 sps:$4 sm:$0xff]  }
 0x224   : > { %12131 = vmatpush1.bf16.msra.mxu0 %v13925_v21  ;;  %11627 = vmatprep.subr.bf16.mxu1 %v13933_v22  ;;  %v14021_v21 = vld [vmem:[%s16648_s7 + $0xee0] ss:$8 sps:$4 sm:$0xff]   ;;  %v14026_v22 = vld [vmem:[%s16648_s7 + $0x2f4] ss:$8 sps:$4 sm:$0xff]  }
 0x225   : > { %12143 = vmatprep.subr.bf16.mxu0 %v13939_v23  ;;  %v14029_v23 = vld [vmem:[%s16648_s7 + $0xef4] ss:$8 sps:$4 sm:$0xff]  }
 0x226   : > { %11617 = vmatmul.mubr.bf16.vlgmr.msra.gmra.mrb[0].mxu1 %v13928_v24  ;;  %v14024_v24 = vld [vmem:[%s16648_s7 + $0x2f0] ss:$8 sps:$4 sm:$0xff]  }
 0x227   : > { %12133 = vmatmul.mubr.bf16.vlgmr.msra.gmra.mrb[0].mxu0 %v13934_v26  ;;  %11628 = vmatpush1.bf16.msra.mxu1 %v13931_v25  ;;  %v14027_v25 = vld [vmem:[%s16648_s7 + $0xef0] ss:$8 sps:$4 sm:$0xff]   ;;  %v14035_v26 = vld [vmem:[%s16648_s7 + $0x304] ss:$8 sps:$4 sm:$0xff]  }
 0x228   : > { %12144 = vmatpush1.bf16.msra.mxu0 %v13937_v27  ;;  %11629 = vmatprep.subr.bf16.mxu1 %v13942_v28  ;;  %v14041_v27 = vld [vmem:[%s16648_s7 + $0xf04] ss:$8 sps:$4 sm:$0xff]   ;;  %v14030_v28 = vld [vmem:[%s17597_s0 + $0x10] ss:$196 sps:$4 sm:$0xff]  }
 0x229   : > { %12145 = vmatprep.subr.bf16.mxu0 %v13945_v29  ;;  %11659 = vmatprep.mubr.bf16.mxu1 %v14032_v31  ;;  %v14033_v29 = vld [vmem:[%s16648_s7 + $0x300] ss:$8 sps:$4 sm:$0xff]  }
 0x22a   : > { %12175 = vmatprep.mubr.bf16.mxu0 %v14038_v35  ;;  %v14039_v31 = vld [vmem:[%s16648_s7 + $0xf00] ss:$8 sps:$4 sm:$0xff]  }
 0x22b   : > { %11630 = vmatpush1.bf16.msra.mxu1 %v13940_v30  ;;  %v14036_v30 = vld [vmem:[%s17597_s0 + $0x70] ss:$196 sps:$4 sm:$0xff]   ;;  %v14140_v35 = vld [vmem:[%s17597_s0 + $0x7c] ss:$196 sps:$4 sm:$0xff]  }
 0x22c   : > { %12146 = vmatpush1.bf16.msra.mxu0 %v13943_v32  ;;  %11631 = vmatprep.subr.bf16.mxu1 %v13948_v33  ;;  %v14044_v32 = vld [vmem:[%s16648_s7 + $0x314] ss:$8 sps:$4 sm:$0xff]  }
 0x22d   : > { %12147 = vmatprep.subr.bf16.mxu0 %v13951_v34  ;;  %v14047_v33 = vld [vmem:[%s16648_s7 + $0xf14] ss:$8 sps:$4 sm:$0xff]  }
 0x22e   : > { %v14134_v34 = vld [vmem:[%s17597_s0 + $0x1c] ss:$196 sps:$4 sm:$0xff]  }
 0x22f   : > { %11632 = vmatpush1.bf16.msra.mxu1 %v13946_v36  ;;  %v14042_v36 = vld [vmem:[%s16648_s7 + $0x310] ss:$8 sps:$4 sm:$0xff]  }
 0x230   : > { %12148 = vmatpush1.bf16.msra.mxu0 %v13949_v37  ;;  %11633 = vmatprep.subr.bf16.mxu1 %v13954_v38  ;;  %v14045_v37 = vld [vmem:[%s16648_s7 + $0xf10] ss:$8 sps:$4 sm:$0xff]   ;;  %v14050_v38 = vld [vmem:[%s16648_s7 + $0x324] ss:$8 sps:$4 sm:$0xff]  }
 0x231   : > { %12149 = vmatprep.subr.bf16.mxu0 %v13957_v39  ;;  %v14053_v39 = vld [vmem:[%s16648_s7 + $0xf24] ss:$8 sps:$4 sm:$0xff]  }
 0x233   : > { %11634 = vmatpush1.bf16.msra.mxu1 %v13952_v40  ;;  %v14048_v40 = vld [vmem:[%s16648_s7 + $0x320] ss:$8 sps:$4 sm:$0xff]  }
 0x234   : > { %12150 = vmatpush1.bf16.msra.mxu0 %v13955_v41  ;;  %11635 = vmatprep.subr.bf16.mxu1 %v13960_v42  ;;  %v14051_v41 = vld [vmem:[%s16648_s7 + $0xf20] ss:$8 sps:$4 sm:$0xff]   ;;  %v14056_v42 = vld [vmem:[%s16648_s7 + $0x334] ss:$8 sps:$4 sm:$0xff]  }
 0x235   : > { %12151 = vmatprep.subr.bf16.mxu0 %v13963_v43  ;;  %v14059_v43 = vld [vmem:[%s16648_s7 + $0xf34] ss:$8 sps:$4 sm:$0xff]  }
 0x237   : > { %11636 = vmatpush1.bf16.msra.mxu1 %v13958_v44  ;;  %v14054_v44 = vld [vmem:[%s16648_s7 + $0x330] ss:$8 sps:$4 sm:$0xff]  }
 0x238   : > { %12152 = vmatpush1.bf16.msra.mxu0 %v13961_v45  ;;  %11637 = vmatprep.subr.bf16.mxu1 %v13966_v46  ;;  %v14057_v45 = vld [vmem:[%s16648_s7 + $0xf30] ss:$8 sps:$4 sm:$0xff]   ;;  %v14062_v46 = vld [vmem:[%s16648_s7 + $0x344] ss:$8 sps:$4 sm:$0xff]  }
 0x239   : > { %12153 = vmatprep.subr.bf16.mxu0 %v13969_v47  ;;  %v14065_v47 = vld [vmem:[%s16648_s7 + $0xf44] ss:$8 sps:$4 sm:$0xff]  }
 0x23b   : > { %11638 = vmatpush1.bf16.msra.mxu1 %v13964_v48  ;;  %v14060_v48 = vld [vmem:[%s16648_s7 + $0x340] ss:$8 sps:$4 sm:$0xff]  }
 0x23c   : > { %12154 = vmatpush1.bf16.msra.mxu0 %v13967_v49  ;;  %11639 = vmatprep.subr.bf16.mxu1 %v13972_v50  ;;  %v14063_v49 = vld [vmem:[%s16648_s7 + $0xf40] ss:$8 sps:$4 sm:$0xff]   ;;  %v14068_v50 = vld [vmem:[%s16648_s7 + $0x354] ss:$8 sps:$4 sm:$0xff]  }
 0x23d   : > { %12155 = vmatprep.subr.bf16.mxu0 %v13975_v51  ;;  %v14071_v51 = vld [vmem:[%s16648_s7 + $0xf54] ss:$8 sps:$4 sm:$0xff]  }
 0x23f   : > { %11640 = vmatpush1.bf16.msra.mxu1 %v13970_v52  ;;  %v14066_v52 = vld [vmem:[%s16648_s7 + $0x350] ss:$8 sps:$4 sm:$0xff]  }
 0x240   : > { %12156 = vmatpush1.bf16.msra.mxu0 %v13973_v53  ;;  %11641 = vmatprep.subr.bf16.mxu1 %v13978_v54  ;;  %v14069_v53 = vld [vmem:[%s16648_s7 + $0xf50] ss:$8 sps:$4 sm:$0xff]   ;;  %v14074_v54 = vld [vmem:[%s16648_s7 + $0x364] ss:$8 sps:$4 sm:$0xff]  }
 0x241   : > { %12157 = vmatprep.subr.bf16.mxu0 %v13981_v55  ;;  %v14077_v55 = vld [vmem:[%s16648_s7 + $0xf64] ss:$8 sps:$4 sm:$0xff]  }
 0x243   : > { %11642 = vmatpush1.bf16.msra.mxu1 %v13976_v56  ;;  %v14072_v56 = vld [vmem:[%s16648_s7 + $0x360] ss:$8 sps:$4 sm:$0xff]  }
 0x244   : > { %12158 = vmatpush1.bf16.msra.mxu0 %v13979_v57  ;;  %11643 = vmatprep.subr.bf16.mxu1 %v13984_v58  ;;  %v14075_v57 = vld [vmem:[%s16648_s7 + $0xf60] ss:$8 sps:$4 sm:$0xff]   ;;  %v14080_v58 = vld [vmem:[%s16648_s7 + $0x374] ss:$8 sps:$4 sm:$0xff]  }
 0x245   : > { %12159 = vmatprep.subr.bf16.mxu0 %v13987_v59  ;;  %v14083_v59 = vld [vmem:[%s16648_s7 + $0xf74] ss:$8 sps:$4 sm:$0xff]  }
 0x247   : > { %11644 = vmatpush1.bf16.msra.mxu1 %v13982_v60  ;;  %v14078_v60 = vld [vmem:[%s16648_s7 + $0x370] ss:$8 sps:$4 sm:$0xff]  }
 0x248   : > { %12160 = vmatpush1.bf16.msra.mxu0 %v13985_v61  ;;  %11645 = vmatprep.subr.bf16.mxu1 %v13990_v62  ;;  %v14081_v61 = vld [vmem:[%s16648_s7 + $0xf70] ss:$8 sps:$4 sm:$0xff]   ;;  %v14086_v62 = vld [vmem:[%s16648_s7 + $0x384] ss:$8 sps:$4 sm:$0xff]  }
 0x249   : > { %12161 = vmatprep.subr.bf16.mxu0 %v13993_v63  ;;  %v14089_v63 = vld [vmem:[%s16648_s7 + $0xf84] ss:$8 sps:$4 sm:$0xff]  }
 0x24b   : > { %11646 = vmatpush1.bf16.msra.mxu1 %v13988_v0  ;;  %v14084_v0 = vld [vmem:[%s16648_s7 + $0x380] ss:$8 sps:$4 sm:$0xff]  }
 0x24c   : > { %12162 = vmatpush1.bf16.msra.mxu0 %v13991_v1  ;;  %11647 = vmatprep.subr.bf16.mxu1 %v13996_v2  ;;  %v14087_v1 = vld [vmem:[%s16648_s7 + $0xf80] ss:$8 sps:$4 sm:$0xff]   ;;  %v14092_v2 = vld [vmem:[%s16648_s7 + $0x394] ss:$8 sps:$4 sm:$0xff]  }
 0x24d   : > { %12163 = vmatprep.subr.bf16.mxu0 %v13999_v3  ;;  %v14095_v3 = vld [vmem:[%s16648_s7 + $0xf94] ss:$8 sps:$4 sm:$0xff]  }
 0x24f   : > { %11648 = vmatpush1.bf16.msra.mxu1 %v13994_v4  ;;  %v14090_v4 = vld [vmem:[%s16648_s7 + $0x390] ss:$8 sps:$4 sm:$0xff]  }
 0x250   : > { %12164 = vmatpush1.bf16.msra.mxu0 %v13997_v5  ;;  %11649 = vmatprep.subr.bf16.mxu1 %v14002_v6  ;;  %v14093_v5 = vld [vmem:[%s16648_s7 + $0xf90] ss:$8 sps:$4 sm:$0xff]   ;;  %v14098_v6 = vld [vmem:[%s16648_s7 + $0x3a4] ss:$8 sps:$4 sm:$0xff]  }
 0x251   : > { %12165 = vmatprep.subr.bf16.mxu0 %v14005_v7  ;;  %v14101_v7 = vld [vmem:[%s16648_s7 + $0xfa4] ss:$8 sps:$4 sm:$0xff]  }
 0x253   : > { %11650 = vmatpush1.bf16.msra.mxu1 %v14000_v8  ;;  %v14096_v8 = vld [vmem:[%s16648_s7 + $0x3a0] ss:$8 sps:$4 sm:$0xff]  }
 0x254   : > { %12166 = vmatpush1.bf16.msra.mxu0 %v14003_v9  ;;  %11651 = vmatprep.subr.bf16.mxu1 %v14008_v10  ;;  %v14099_v9 = vld [vmem:[%s16648_s7 + $0xfa0] ss:$8 sps:$4 sm:$0xff]   ;;  %v14104_v10 = vld [vmem:[%s16648_s7 + $0x3b4] ss:$8 sps:$4 sm:$0xff]  }
 0x255   : > { %12167 = vmatprep.subr.bf16.mxu0 %v14011_v11  ;;  %v14107_v11 = vld [vmem:[%s16648_s7 + $0xfb4] ss:$8 sps:$4 sm:$0xff]  }
 0x257   : > { %11652 = vmatpush1.bf16.msra.mxu1 %v14006_v12  ;;  %v14102_v12 = vld [vmem:[%s16648_s7 + $0x3b0] ss:$8 sps:$4 sm:$0xff]  }
 0x258   : > { %12168 = vmatpush1.bf16.msra.mxu0 %v14009_v13  ;;  %11653 = vmatprep.subr.bf16.mxu1 %v14014_v14  ;;  %v14105_v13 = vld [vmem:[%s16648_s7 + $0xfb0] ss:$8 sps:$4 sm:$0xff]   ;;  %v14110_v14 = vld [vmem:[%s16648_s7 + $0x3c4] ss:$8 sps:$4 sm:$0xff]  }
 0x259   : > { %12169 = vmatprep.subr.bf16.mxu0 %v14017_v15  ;;  %v14113_v15 = vld [vmem:[%s16648_s7 + $0xfc4] ss:$8 sps:$4 sm:$0xff]  }
 0x25b   : > { %11654 = vmatpush1.bf16.msra.mxu1 %v14012_v16  ;;  %v14108_v16 = vld [vmem:[%s16648_s7 + $0x3c0] ss:$8 sps:$4 sm:$0xff]  }
 0x25c   : > { %12170 = vmatpush1.bf16.msra.mxu0 %v14015_v17  ;;  %11655 = vmatprep.subr.bf16.mxu1 %v14020_v18  ;;  %v14111_v17 = vld [vmem:[%s16648_s7 + $0xfc0] ss:$8 sps:$4 sm:$0xff]   ;;  %v14116_v18 = vld [vmem:[%s16648_s7 + $0x3d4] ss:$8 sps:$4 sm:$0xff]  }
 0x25d   : > { %12171 = vmatprep.subr.bf16.mxu0 %v14023_v19  ;;  %v14119_v19 = vld [vmem:[%s16648_s7 + $0xfd4] ss:$8 sps:$4 sm:$0xff]  }
 0x25f   : > { %11656 = vmatpush1.bf16.msra.mxu1 %v14018_v20  ;;  %v14114_v20 = vld [vmem:[%s16648_s7 + $0x3d0] ss:$8 sps:$4 sm:$0xff]  }
 0x260   : > { %12172 = vmatpush1.bf16.msra.mxu0 %v14021_v21  ;;  %11657 = vmatprep.subr.bf16.mxu1 %v14026_v22  ;;  %v14117_v21 = vld [vmem:[%s16648_s7 + $0xfd0] ss:$8 sps:$4 sm:$0xff]   ;;  %v14122_v22 = vld [vmem:[%s16648_s7 + $0x3e4] ss:$8 sps:$4 sm:$0xff]  }
 0x261   : > { %12173 = vmatprep.subr.bf16.mxu0 %v14029_v23  ;;  %v14125_v23 = vld [vmem:[%s16648_s7 + $0xfe4] ss:$8 sps:$4 sm:$0xff]  }
 0x263   : > { %11658 = vmatpush1.bf16.msra.mxu1 %v14024_v24  ;;  %v14120_v24 = vld [vmem:[%s16648_s7 + $0x3e0] ss:$8 sps:$4 sm:$0xff]  }
 0x264   : > { %12174 = vmatpush1.bf16.msra.mxu0 %v14027_v25  ;;  %11670 = vmatprep.subr.bf16.mxu1 %v14035_v26  ;;  %v14123_v25 = vld [vmem:[%s16648_s7 + $0xfe0] ss:$8 sps:$4 sm:$0xff]   ;;  %v14128_v26 = vld [vmem:[%s16648_s7 + $0x3f4] ss:$8 sps:$4 sm:$0xff]  }
 0x265   : > { %12186 = vmatprep.subr.bf16.mxu0 %v14041_v27  ;;  %v14131_v27 = vld [vmem:[%s16648_s7 + $0xff4] ss:$8 sps:$4 sm:$0xff]  }
 0x266   : > { %11660 = vmatmul.mubr.bf16.vlgmr.msra.gmra.mrb[0].mxu1 %v14030_v28  ;;  %v14126_v28 = vld [vmem:[%s16648_s7 + $0x3f0] ss:$8 sps:$4 sm:$0xff]  }
 0x267   : > { %12176 = vmatmul.mubr.bf16.vlgmr.msra.gmra.mrb[0].mxu0 %v14036_v30  ;;  %11671 = vmatpush1.bf16.msra.mxu1 %v14033_v29  ;;  %v14129_v29 = vld [vmem:[%s16648_s7 + $0xff0] ss:$8 sps:$4 sm:$0xff]   ;;  %v14137_v30 = vld [vmem:[%s16648_s7 + $0x404] ss:$8 sps:$4 sm:$0xff]  }
 0x268   : > { %12187 = vmatpush1.bf16.msra.mxu0 %v14039_v31  ;;  %11672 = vmatprep.subr.bf16.mxu1 %v14044_v32  ;;  %v14143_v31 = vld [vmem:[%s16648_s7 + $0x1004] ss:$8 sps:$4 sm:$0xff]   ;;  %v14132_v32 = vld [vmem:[%s17597_s0 + $0x18] ss:$196 sps:$4 sm:$0xff]  }
 0x269   : > { %12188 = vmatprep.subr.bf16.mxu0 %v14047_v33  ;;  %11702 = vmatprep.mubr.bf16.mxu1 %v14134_v34  ;;  %v14135_v33 = vld [vmem:[%s16648_s7 + $0x400] ss:$8 sps:$4 sm:$0xff]   ;;  %v14138_v34 = vld [vmem:[%s17597_s0 + $0x78] ss:$196 sps:$4 sm:$0xff]  }
 0x26a   : > { %12218 = vmatprep.mubr.bf16.mxu0 %v14140_v35  ;;  %v14141_v35 = vld [vmem:[%s16648_s7 + $0x1000] ss:$8 sps:$4 sm:$0xff]  }
 0x26b   : > { %11673 = vmatpush1.bf16.msra.mxu1 %v14042_v36  ;;  %v14146_v36 = vld [vmem:[%s16648_s7 + $0x414] ss:$8 sps:$4 sm:$0xff]  }
 0x26c   : > { %12189 = vmatpush1.bf16.msra.mxu0 %v14045_v37  ;;  %11674 = vmatprep.subr.bf16.mxu1 %v14050_v38  ;;  %v14149_v37 = vld [vmem:[%s16648_s7 + $0x1014] ss:$8 sps:$4 sm:$0xff]   ;;  %v14236_v38 = vld [vmem:[%s17597_s0 + $0x24] ss:$196 sps:$4 sm:$0xff]  }
 0x26d   : > { %12190 = vmatprep.subr.bf16.mxu0 %v14053_v39  ;;  %v14242_v39 = vld [vmem:[%s17597_s0 + $0x84] ss:$196 sps:$4 sm:$0xff]  }
 0x26f   : > { %11675 = vmatpush1.bf16.msra.mxu1 %v14048_v40  ;;  %v14144_v40 = vld [vmem:[%s16648_s7 + $0x410] ss:$8 sps:$4 sm:$0xff]  }
 0x270   : > { %12191 = vmatpush1.bf16.msra.mxu0 %v14051_v41  ;;  %11676 = vmatprep.subr.bf16.mxu1 %v14056_v42  ;;  %v14147_v41 = vld [vmem:[%s16648_s7 + $0x1010] ss:$8 sps:$4 sm:$0xff]   ;;  %v14152_v42 = vld [vmem:[%s16648_s7 + $0x424] ss:$8 sps:$4 sm:$0xff]  }
 0x271   : > { %12192 = vmatprep.subr.bf16.mxu0 %v14059_v43  ;;  %v14155_v43 = vld [vmem:[%s16648_s7 + $0x1024] ss:$8 sps:$4 sm:$0xff]  }
 0x273   : > { %11677 = vmatpush1.bf16.msra.mxu1 %v14054_v44  ;;  %v14150_v44 = vld [vmem:[%s16648_s7 + $0x420] ss:$8 sps:$4 sm:$0xff]  }
 0x274   : > { %12193 = vmatpush1.bf16.msra.mxu0 %v14057_v45  ;;  %11678 = vmatprep.subr.bf16.mxu1 %v14062_v46  ;;  %v14153_v45 = vld [vmem:[%s16648_s7 + $0x1020] ss:$8 sps:$4 sm:$0xff]   ;;  %v14158_v46 = vld [vmem:[%s16648_s7 + $0x434] ss:$8 sps:$4 sm:$0xff]  }
 0x275   : > { %12194 = vmatprep.subr.bf16.mxu0 %v14065_v47  ;;  %v14161_v47 = vld [vmem:[%s16648_s7 + $0x1034] ss:$8 sps:$4 sm:$0xff]  }
 0x277   : > { %11679 = vmatpush1.bf16.msra.mxu1 %v14060_v48  ;;  %v14156_v48 = vld [vmem:[%s16648_s7 + $0x430] ss:$8 sps:$4 sm:$0xff]  }
 0x278   : > { %12195 = vmatpush1.bf16.msra.mxu0 %v14063_v49  ;;  %11680 = vmatprep.subr.bf16.mxu1 %v14068_v50  ;;  %v14159_v49 = vld [vmem:[%s16648_s7 + $0x1030] ss:$8 sps:$4 sm:$0xff]   ;;  %v14164_v50 = vld [vmem:[%s16648_s7 + $0x444] ss:$8 sps:$4 sm:$0xff]  }
 0x279   : > { %12196 = vmatprep.subr.bf16.mxu0 %v14071_v51  ;;  %v14167_v51 = vld [vmem:[%s16648_s7 + $0x1044] ss:$8 sps:$4 sm:$0xff]  }
 0x27b   : > { %11681 = vmatpush1.bf16.msra.mxu1 %v14066_v52  ;;  %v14162_v52 = vld [vmem:[%s16648_s7 + $0x440] ss:$8 sps:$4 sm:$0xff]  }
 0x27c   : > { %12197 = vmatpush1.bf16.msra.mxu0 %v14069_v53  ;;  %11682 = vmatprep.subr.bf16.mxu1 %v14074_v54  ;;  %v14165_v53 = vld [vmem:[%s16648_s7 + $0x1040] ss:$8 sps:$4 sm:$0xff]   ;;  %v14170_v54 = vld [vmem:[%s16648_s7 + $0x454] ss:$8 sps:$4 sm:$0xff]  }
 0x27d   : > { %12198 = vmatprep.subr.bf16.mxu0 %v14077_v55  ;;  %v14173_v55 = vld [vmem:[%s16648_s7 + $0x1054] ss:$8 sps:$4 sm:$0xff]  }
 0x27f   : > { %11683 = vmatpush1.bf16.msra.mxu1 %v14072_v56  ;;  %v14168_v56 = vld [vmem:[%s16648_s7 + $0x450] ss:$8 sps:$4 sm:$0xff]  }
 0x280   : > { %12199 = vmatpush1.bf16.msra.mxu0 %v14075_v57  ;;  %11684 = vmatprep.subr.bf16.mxu1 %v14080_v58  ;;  %v14171_v57 = vld [vmem:[%s16648_s7 + $0x1050] ss:$8 sps:$4 sm:$0xff]   ;;  %v14176_v58 = vld [vmem:[%s16648_s7 + $0x464] ss:$8 sps:$4 sm:$0xff]  }
 0x281   : > { %12200 = vmatprep.subr.bf16.mxu0 %v14083_v59  ;;  %v14179_v59 = vld [vmem:[%s16648_s7 + $0x1064] ss:$8 sps:$4 sm:$0xff]  }
 0x283   : > { %11685 = vmatpush1.bf16.msra.mxu1 %v14078_v60  ;;  %v14174_v60 = vld [vmem:[%s16648_s7 + $0x460] ss:$8 sps:$4 sm:$0xff]  }
 0x284   : > { %12201 = vmatpush1.bf16.msra.mxu0 %v14081_v61  ;;  %11686 = vmatprep.subr.bf16.mxu1 %v14086_v62  ;;  %v14177_v61 = vld [vmem:[%s16648_s7 + $0x1060] ss:$8 sps:$4 sm:$0xff]   ;;  %v14182_v62 = vld [vmem:[%s16648_s7 + $0x474] ss:$8 sps:$4 sm:$0xff]  }
 0x285   : > { %12202 = vmatprep.subr.bf16.mxu0 %v14089_v63  ;;  %v14185_v63 = vld [vmem:[%s16648_s7 + $0x1074] ss:$8 sps:$4 sm:$0xff]  }
 0x287   : > { %11687 = vmatpush1.bf16.msra.mxu1 %v14084_v0  ;;  %v14180_v0 = vld [vmem:[%s16648_s7 + $0x470] ss:$8 sps:$4 sm:$0xff]  }
 0x288   : > { %12203 = vmatpush1.bf16.msra.mxu0 %v14087_v1  ;;  %11688 = vmatprep.subr.bf16.mxu1 %v14092_v2  ;;  %v14183_v1 = vld [vmem:[%s16648_s7 + $0x1070] ss:$8 sps:$4 sm:$0xff]   ;;  %v14188_v2 = vld [vmem:[%s16648_s7 + $0x484] ss:$8 sps:$4 sm:$0xff]  }
 0x289   : > { %12204 = vmatprep.subr.bf16.mxu0 %v14095_v3  ;;  %v14191_v3 = vld [vmem:[%s16648_s7 + $0x1084] ss:$8 sps:$4 sm:$0xff]  }
 0x28b   : > { %11689 = vmatpush1.bf16.msra.mxu1 %v14090_v4  ;;  %v14186_v4 = vld [vmem:[%s16648_s7 + $0x480] ss:$8 sps:$4 sm:$0xff]  }
 0x28c   : > { %12205 = vmatpush1.bf16.msra.mxu0 %v14093_v5  ;;  %11690 = vmatprep.subr.bf16.mxu1 %v14098_v6  ;;  %v14189_v5 = vld [vmem:[%s16648_s7 + $0x1080] ss:$8 sps:$4 sm:$0xff]   ;;  %v14194_v6 = vld [vmem:[%s16648_s7 + $0x494] ss:$8 sps:$4 sm:$0xff]  }
 0x28d   : > { %12206 = vmatprep.subr.bf16.mxu0 %v14101_v7  ;;  %v14197_v7 = vld [vmem:[%s16648_s7 + $0x1094] ss:$8 sps:$4 sm:$0xff]  }
 0x28f   : > { %11691 = vmatpush1.bf16.msra.mxu1 %v14096_v8  ;;  %v14192_v8 = vld [vmem:[%s16648_s7 + $0x490] ss:$8 sps:$4 sm:$0xff]  }
 0x290   : > { %12207 = vmatpush1.bf16.msra.mxu0 %v14099_v9  ;;  %11692 = vmatprep.subr.bf16.mxu1 %v14104_v10  ;;  %v14195_v9 = vld [vmem:[%s16648_s7 + $0x1090] ss:$8 sps:$4 sm:$0xff]   ;;  %v14200_v10 = vld [vmem:[%s16648_s7 + $0x4a4] ss:$8 sps:$4 sm:$0xff]  }
 0x291   : > { %12208 = vmatprep.subr.bf16.mxu0 %v14107_v11  ;;  %v14203_v11 = vld [vmem:[%s16648_s7 + $0x10a4] ss:$8 sps:$4 sm:$0xff]  }
 0x293   : > { %11693 = vmatpush1.bf16.msra.mxu1 %v14102_v12  ;;  %v14198_v12 = vld [vmem:[%s16648_s7 + $0x4a0] ss:$8 sps:$4 sm:$0xff]  }
 0x294   : > { %12209 = vmatpush1.bf16.msra.mxu0 %v14105_v13  ;;  %11694 = vmatprep.subr.bf16.mxu1 %v14110_v14  ;;  %v14201_v13 = vld [vmem:[%s16648_s7 + $0x10a0] ss:$8 sps:$4 sm:$0xff]   ;;  %v14206_v14 = vld [vmem:[%s16648_s7 + $0x4b4] ss:$8 sps:$4 sm:$0xff]  }
 0x295   : > { %12210 = vmatprep.subr.bf16.mxu0 %v14113_v15  ;;  %v14209_v15 = vld [vmem:[%s16648_s7 + $0x10b4] ss:$8 sps:$4 sm:$0xff]  }
 0x297   : > { %11695 = vmatpush1.bf16.msra.mxu1 %v14108_v16  ;;  %v14204_v16 = vld [vmem:[%s16648_s7 + $0x4b0] ss:$8 sps:$4 sm:$0xff]  }
 0x298   : > { %12211 = vmatpush1.bf16.msra.mxu0 %v14111_v17  ;;  %11696 = vmatprep.subr.bf16.mxu1 %v14116_v18  ;;  %v14207_v17 = vld [vmem:[%s16648_s7 + $0x10b0] ss:$8 sps:$4 sm:$0xff]   ;;  %v14212_v18 = vld [vmem:[%s16648_s7 + $0x4c4] ss:$8 sps:$4 sm:$0xff]  }
 0x299   : > { %12212 = vmatprep.subr.bf16.mxu0 %v14119_v19  ;;  %v14215_v19 = vld [vmem:[%s16648_s7 + $0x10c4] ss:$8 sps:$4 sm:$0xff]  }
 0x29b   : > { %11697 = vmatpush1.bf16.msra.mxu1 %v14114_v20  ;;  %v14210_v20 = vld [vmem:[%s16648_s7 + $0x4c0] ss:$8 sps:$4 sm:$0xff]  }
 0x29c   : > { %12213 = vmatpush1.bf16.msra.mxu0 %v14117_v21  ;;  %11698 = vmatprep.subr.bf16.mxu1 %v14122_v22  ;;  %v14213_v21 = vld [vmem:[%s16648_s7 + $0x10c0] ss:$8 sps:$4 sm:$0xff]   ;;  %v14218_v22 = vld [vmem:[%s16648_s7 + $0x4d4] ss:$8 sps:$4 sm:$0xff]  }
 0x29d   : > { %12214 = vmatprep.subr.bf16.mxu0 %v14125_v23  ;;  %v14221_v23 = vld [vmem:[%s16648_s7 + $0x10d4] ss:$8 sps:$4 sm:$0xff]  }
 0x29f   : > { %11699 = vmatpush1.bf16.msra.mxu1 %v14120_v24  ;;  %v14216_v24 = vld [vmem:[%s16648_s7 + $0x4d0] ss:$8 sps:$4 sm:$0xff]  }
 0x2a0   : > { %12215 = vmatpush1.bf16.msra.mxu0 %v14123_v25  ;;  %11700 = vmatprep.subr.bf16.mxu1 %v14128_v26  ;;  %v14219_v25 = vld [vmem:[%s16648_s7 + $0x10d0] ss:$8 sps:$4 sm:$0xff]   ;;  %v14224_v26 = vld [vmem:[%s16648_s7 + $0x4e4] ss:$8 sps:$4 sm:$0xff]  }
 0x2a1   : > { %12216 = vmatprep.subr.bf16.mxu0 %v14131_v27  ;;  %v14227_v27 = vld [vmem:[%s16648_s7 + $0x10e4] ss:$8 sps:$4 sm:$0xff]  }
 0x2a3   : > { %11701 = vmatpush1.bf16.msra.mxu1 %v14126_v28  ;;  %v14222_v28 = vld [vmem:[%s16648_s7 + $0x4e0] ss:$8 sps:$4 sm:$0xff]  }
 0x2a4   : > { %12217 = vmatpush1.bf16.msra.mxu0 %v14129_v29  ;;  %11713 = vmatprep.subr.bf16.mxu1 %v14137_v30  ;;  %v14225_v29 = vld [vmem:[%s16648_s7 + $0x10e0] ss:$8 sps:$4 sm:$0xff]   ;;  %v14230_v30 = vld [vmem:[%s16648_s7 + $0x4f4] ss:$8 sps:$4 sm:$0xff]  }
 0x2a5   : > { %12229 = vmatprep.subr.bf16.mxu0 %v14143_v31  ;;  %v14233_v31 = vld [vmem:[%s16648_s7 + $0x10f4] ss:$8 sps:$4 sm:$0xff]  }
 0x2a6   : > { %11703 = vmatmul.mubr.bf16.vlgmr.msra.gmra.mrb[0].mxu1 %v14132_v32  ;;  %v14228_v32 = vld [vmem:[%s16648_s7 + $0x4f0] ss:$8 sps:$4 sm:$0xff]  }
 0x2a7   : > { %12219 = vmatmul.mubr.bf16.vlgmr.msra.gmra.mrb[0].mxu0 %v14138_v34  ;;  %11714 = vmatpush1.bf16.msra.mxu1 %v14135_v33  ;;  %v14231_v33 = vld [vmem:[%s16648_s7 + $0x10f0] ss:$8 sps:$4 sm:$0xff]   ;;  %v14239_v34 = vld [vmem:[%s16648_s7 + $0x504] ss:$8 sps:$4 sm:$0xff]  }
 0x2a8   : > { %12230 = vmatpush1.bf16.msra.mxu0 %v14141_v35  ;;  %11715 = vmatprep.subr.bf16.mxu1 %v14146_v36  ;;  %v14234_v35 = vld [vmem:[%s17597_s0 + $0x20] ss:$196 sps:$4 sm:$0xff]  }
 0x2a9   : > { %12231 = vmatprep.subr.bf16.mxu0 %v14149_v37  ;;  %11745 = vmatprep.mubr.bf16.mxu1 %v14236_v38  ;;  %v14240_v36 = vld [vmem:[%s17597_s0 + $0x80] ss:$196 sps:$4 sm:$0xff]  }
 0x2aa   : > { %12261 = vmatprep.mubr.bf16.mxu0 %v14242_v39  ;;  %v14245_v37 = vld [vmem:[%s16648_s7 + $0x1104] ss:$8 sps:$4 sm:$0xff]   ;;  %v14237_v38 = vld [vmem:[%s16648_s7 + $0x500] ss:$8 sps:$4 sm:$0xff]  }
 0x2ab   : > { %11716 = vmatpush1.bf16.msra.mxu1 %v14144_v40  ;;  %v14243_v39 = vld [vmem:[%s16648_s7 + $0x1100] ss:$8 sps:$4 sm:$0xff]   ;;  %v14248_v40 = vld [vmem:[%s16648_s7 + $0x514] ss:$8 sps:$4 sm:$0xff]  }
 0x2ac   : > { %12232 = vmatpush1.bf16.msra.mxu0 %v14147_v41  ;;  %11717 = vmatprep.subr.bf16.mxu1 %v14152_v42  ;;  %v14251_v41 = vld [vmem:[%s16648_s7 + $0x1114] ss:$8 sps:$4 sm:$0xff]   ;;  %v14338_v42 = vld [vmem:[%s17597_s0 + $0x2c] ss:$196 sps:$4 sm:$0xff]  }
 0x2ad   : > { %12233 = vmatprep.subr.bf16.mxu0 %v14155_v43  ;;  %v14344_v43 = vld [vmem:[%s17597_s0 + $0x8c] ss:$196 sps:$4 sm:$0xff]  }
 0x2af   : > { %11718 = vmatpush1.bf16.msra.mxu1 %v14150_v44  ;;  %v14246_v44 = vld [vmem:[%s16648_s7 + $0x510] ss:$8 sps:$4 sm:$0xff]  }
 0x2b0   : > { %12234 = vmatpush1.bf16.msra.mxu0 %v14153_v45  ;;  %11719 = vmatprep.subr.bf16.mxu1 %v14158_v46  ;;  %v14249_v45 = vld [vmem:[%s16648_s7 + $0x1110] ss:$8 sps:$4 sm:$0xff]   ;;  %v14254_v46 = vld [vmem:[%s16648_s7 + $0x524] ss:$8 sps:$4 sm:$0xff]  }
 0x2b1   : > { %12235 = vmatprep.subr.bf16.mxu0 %v14161_v47  ;;  %v14257_v47 = vld [vmem:[%s16648_s7 + $0x1124] ss:$8 sps:$4 sm:$0xff]  }
 0x2b3   : > { %11720 = vmatpush1.bf16.msra.mxu1 %v14156_v48  ;;  %v14252_v48 = vld [vmem:[%s16648_s7 + $0x520] ss:$8 sps:$4 sm:$0xff]  }
 0x2b4   : > { %12236 = vmatpush1.bf16.msra.mxu0 %v14159_v49  ;;  %11721 = vmatprep.subr.bf16.mxu1 %v14164_v50  ;;  %v14255_v49 = vld [vmem:[%s16648_s7 + $0x1120] ss:$8 sps:$4 sm:$0xff]   ;;  %v14260_v50 = vld [vmem:[%s16648_s7 + $0x534] ss:$8 sps:$4 sm:$0xff]  }
 0x2b5   : > { %12237 = vmatprep.subr.bf16.mxu0 %v14167_v51  ;;  %v14263_v51 = vld [vmem:[%s16648_s7 + $0x1134] ss:$8 sps:$4 sm:$0xff]  }
 0x2b7   : > { %11722 = vmatpush1.bf16.msra.mxu1 %v14162_v52  ;;  %v14258_v52 = vld [vmem:[%s16648_s7 + $0x530] ss:$8 sps:$4 sm:$0xff]  }
 0x2b8   : > { %12238 = vmatpush1.bf16.msra.mxu0 %v14165_v53  ;;  %11723 = vmatprep.subr.bf16.mxu1 %v14170_v54  ;;  %v14261_v53 = vld [vmem:[%s16648_s7 + $0x1130] ss:$8 sps:$4 sm:$0xff]   ;;  %v14266_v54 = vld [vmem:[%s16648_s7 + $0x544] ss:$8 sps:$4 sm:$0xff]  }
 0x2b9   : > { %12239 = vmatprep.subr.bf16.mxu0 %v14173_v55  ;;  %v14269_v55 = vld [vmem:[%s16648_s7 + $0x1144] ss:$8 sps:$4 sm:$0xff]  }
 0x2bb   : > { %11724 = vmatpush1.bf16.msra.mxu1 %v14168_v56  ;;  %v14264_v56 = vld [vmem:[%s16648_s7 + $0x540] ss:$8 sps:$4 sm:$0xff]  }
 0x2bc   : > { %12240 = vmatpush1.bf16.msra.mxu0 %v14171_v57  ;;  %11725 = vmatprep.subr.bf16.mxu1 %v14176_v58  ;;  %v14267_v57 = vld [vmem:[%s16648_s7 + $0x1140] ss:$8 sps:$4 sm:$0xff]   ;;  %v14272_v58 = vld [vmem:[%s16648_s7 + $0x554] ss:$8 sps:$4 sm:$0xff]  }
 0x2bd   : > { %12241 = vmatprep.subr.bf16.mxu0 %v14179_v59  ;;  %v14275_v59 = vld [vmem:[%s16648_s7 + $0x1154] ss:$8 sps:$4 sm:$0xff]  }
 0x2bf   : > { %11726 = vmatpush1.bf16.msra.mxu1 %v14174_v60  ;;  %v14270_v60 = vld [vmem:[%s16648_s7 + $0x550] ss:$8 sps:$4 sm:$0xff]  }
 0x2c0   : > { %12242 = vmatpush1.bf16.msra.mxu0 %v14177_v61  ;;  %11727 = vmatprep.subr.bf16.mxu1 %v14182_v62  ;;  %v14273_v61 = vld [vmem:[%s16648_s7 + $0x1150] ss:$8 sps:$4 sm:$0xff]   ;;  %v14278_v62 = vld [vmem:[%s16648_s7 + $0x564] ss:$8 sps:$4 sm:$0xff]  }
 0x2c1   : > { %12243 = vmatprep.subr.bf16.mxu0 %v14185_v63  ;;  %v14281_v63 = vld [vmem:[%s16648_s7 + $0x1164] ss:$8 sps:$4 sm:$0xff]  }
 0x2c3   : > { %11728 = vmatpush1.bf16.msra.mxu1 %v14180_v0  ;;  %v14276_v0 = vld [vmem:[%s16648_s7 + $0x560] ss:$8 sps:$4 sm:$0xff]  }
 0x2c4   : > { %12244 = vmatpush1.bf16.msra.mxu0 %v14183_v1  ;;  %11729 = vmatprep.subr.bf16.mxu1 %v14188_v2  ;;  %v14279_v1 = vld [vmem:[%s16648_s7 + $0x1160] ss:$8 sps:$4 sm:$0xff]   ;;  %v14284_v2 = vld [vmem:[%s16648_s7 + $0x574] ss:$8 sps:$4 sm:$0xff]  }
 0x2c5   : > { %12245 = vmatprep.subr.bf16.mxu0 %v14191_v3  ;;  %v14287_v3 = vld [vmem:[%s16648_s7 + $0x1174] ss:$8 sps:$4 sm:$0xff]  }
 0x2c7   : > { %11730 = vmatpush1.bf16.msra.mxu1 %v14186_v4  ;;  %v14282_v4 = vld [vmem:[%s16648_s7 + $0x570] ss:$8 sps:$4 sm:$0xff]  }
 0x2c8   : > { %12246 = vmatpush1.bf16.msra.mxu0 %v14189_v5  ;;  %11731 = vmatprep.subr.bf16.mxu1 %v14194_v6  ;;  %v14285_v5 = vld [vmem:[%s16648_s7 + $0x1170] ss:$8 sps:$4 sm:$0xff]   ;;  %v14290_v6 = vld [vmem:[%s16648_s7 + $0x584] ss:$8 sps:$4 sm:$0xff]  }
 0x2c9   : > { %12247 = vmatprep.subr.bf16.mxu0 %v14197_v7  ;;  %v14293_v7 = vld [vmem:[%s16648_s7 + $0x1184] ss:$8 sps:$4 sm:$0xff]  }
 0x2cb   : > { %11732 = vmatpush1.bf16.msra.mxu1 %v14192_v8  ;;  %v14288_v8 = vld [vmem:[%s16648_s7 + $0x580] ss:$8 sps:$4 sm:$0xff]  }
 0x2cc   : > { %12248 = vmatpush1.bf16.msra.mxu0 %v14195_v9  ;;  %11733 = vmatprep.subr.bf16.mxu1 %v14200_v10  ;;  %v14291_v9 = vld [vmem:[%s16648_s7 + $0x1180] ss:$8 sps:$4 sm:$0xff]   ;;  %v14296_v10 = vld [vmem:[%s16648_s7 + $0x594] ss:$8 sps:$4 sm:$0xff]  }
 0x2cd   : > { %12249 = vmatprep.subr.bf16.mxu0 %v14203_v11  ;;  %v14299_v11 = vld [vmem:[%s16648_s7 + $0x1194] ss:$8 sps:$4 sm:$0xff]  }
 0x2cf   : > { %11734 = vmatpush1.bf16.msra.mxu1 %v14198_v12  ;;  %v14294_v12 = vld [vmem:[%s16648_s7 + $0x590] ss:$8 sps:$4 sm:$0xff]  }
 0x2d0   : > { %12250 = vmatpush1.bf16.msra.mxu0 %v14201_v13  ;;  %11735 = vmatprep.subr.bf16.mxu1 %v14206_v14  ;;  %v14297_v13 = vld [vmem:[%s16648_s7 + $0x1190] ss:$8 sps:$4 sm:$0xff]   ;;  %v14302_v14 = vld [vmem:[%s16648_s7 + $0x5a4] ss:$8 sps:$4 sm:$0xff]  }
 0x2d1   : > { %12251 = vmatprep.subr.bf16.mxu0 %v14209_v15  ;;  %v14305_v15 = vld [vmem:[%s16648_s7 + $0x11a4] ss:$8 sps:$4 sm:$0xff]  }
 0x2d3   : > { %11736 = vmatpush1.bf16.msra.mxu1 %v14204_v16  ;;  %v14300_v16 = vld [vmem:[%s16648_s7 + $0x5a0] ss:$8 sps:$4 sm:$0xff]  }
 0x2d4   : > { %12252 = vmatpush1.bf16.msra.mxu0 %v14207_v17  ;;  %11737 = vmatprep.subr.bf16.mxu1 %v14212_v18  ;;  %v14303_v17 = vld [vmem:[%s16648_s7 + $0x11a0] ss:$8 sps:$4 sm:$0xff]   ;;  %v14308_v18 = vld [vmem:[%s16648_s7 + $0x5b4] ss:$8 sps:$4 sm:$0xff]  }
 0x2d5   : > { %12253 = vmatprep.subr.bf16.mxu0 %v14215_v19  ;;  %v14311_v19 = vld [vmem:[%s16648_s7 + $0x11b4] ss:$8 sps:$4 sm:$0xff]  }
 0x2d7   : > { %11738 = vmatpush1.bf16.msra.mxu1 %v14210_v20  ;;  %v14306_v20 = vld [vmem:[%s16648_s7 + $0x5b0] ss:$8 sps:$4 sm:$0xff]  }
 0x2d8   : > { %12254 = vmatpush1.bf16.msra.mxu0 %v14213_v21  ;;  %11739 = vmatprep.subr.bf16.mxu1 %v14218_v22  ;;  %v14309_v21 = vld [vmem:[%s16648_s7 + $0x11b0] ss:$8 sps:$4 sm:$0xff]   ;;  %v14314_v22 = vld [vmem:[%s16648_s7 + $0x5c4] ss:$8 sps:$4 sm:$0xff]  }
 0x2d9   : > { %12255 = vmatprep.subr.bf16.mxu0 %v14221_v23  ;;  %v14317_v23 = vld [vmem:[%s16648_s7 + $0x11c4] ss:$8 sps:$4 sm:$0xff]  }
 0x2db   : > { %11740 = vmatpush1.bf16.msra.mxu1 %v14216_v24  ;;  %v14312_v24 = vld [vmem:[%s16648_s7 + $0x5c0] ss:$8 sps:$4 sm:$0xff]  }
 0x2dc   : > { %12256 = vmatpush1.bf16.msra.mxu0 %v14219_v25  ;;  %11741 = vmatprep.subr.bf16.mxu1 %v14224_v26  ;;  %v14315_v25 = vld [vmem:[%s16648_s7 + $0x11c0] ss:$8 sps:$4 sm:$0xff]   ;;  %v14320_v26 = vld [vmem:[%s16648_s7 + $0x5d4] ss:$8 sps:$4 sm:$0xff]  }
 0x2dd   : > { %12257 = vmatprep.subr.bf16.mxu0 %v14227_v27  ;;  %v14323_v27 = vld [vmem:[%s16648_s7 + $0x11d4] ss:$8 sps:$4 sm:$0xff]  }
 0x2df   : > { %11742 = vmatpush1.bf16.msra.mxu1 %v14222_v28  ;;  %v14318_v28 = vld [vmem:[%s16648_s7 + $0x5d0] ss:$8 sps:$4 sm:$0xff]  }
 0x2e0   : > { %12258 = vmatpush1.bf16.msra.mxu0 %v14225_v29  ;;  %11743 = vmatprep.subr.bf16.mxu1 %v14230_v30  ;;  %v14321_v29 = vld [vmem:[%s16648_s7 + $0x11d0] ss:$8 sps:$4 sm:$0xff]   ;;  %v14326_v30 = vld [vmem:[%s16648_s7 + $0x5e4] ss:$8 sps:$4 sm:$0xff]  }
 0x2e1   : > { %12259 = vmatprep.subr.bf16.mxu0 %v14233_v31  ;;  %v14329_v31 = vld [vmem:[%s16648_s7 + $0x11e4] ss:$8 sps:$4 sm:$0xff]  }
 0x2e3   : > { %11744 = vmatpush1.bf16.msra.mxu1 %v14228_v32  ;;  %v14324_v32 = vld [vmem:[%s16648_s7 + $0x5e0] ss:$8 sps:$4 sm:$0xff]  }
 0x2e4   : > { %12260 = vmatpush1.bf16.msra.mxu0 %v14231_v33  ;;  %11756 = vmatprep.subr.bf16.mxu1 %v14239_v34  ;;  %v14327_v33 = vld [vmem:[%s16648_s7 + $0x11e0] ss:$8 sps:$4 sm:$0xff]   ;;  %v14332_v34 = vld [vmem:[%s16648_s7 + $0x5f4] ss:$8 sps:$4 sm:$0xff]  }
 0x2e5   : > { %12272 = vmatprep.subr.bf16.mxu0 %v14245_v37  ;;  %v14333_v37 = vld [vmem:[%s16648_s7 + $0x11f0] ss:$8 sps:$4 sm:$0xff]  }
 0x2e6   : > { %11746 = vmatmul.mubr.bf16.vlgmr.msra.gmra.mrb[0].mxu1 %v14234_v35  ;;  %v14335_v35 = vld [vmem:[%s16648_s7 + $0x11f4] ss:$8 sps:$4 sm:$0xff]  }
 0x2e7   : > { %12262 = vmatmul.mubr.bf16.vlgmr.msra.gmra.mrb[0].mxu0 %v14240_v36  ;;  %11757 = vmatpush1.bf16.msra.mxu1 %v14237_v38  ;;  %v14330_v36 = vld [vmem:[%s16648_s7 + $0x5f0] ss:$8 sps:$4 sm:$0xff]   ;;  %v14341_v38 = vld [vmem:[%s16648_s7 + $0x604] ss:$8 sps:$4 sm:$0xff]  }
 0x2e8   : > { %12273 = vmatpush1.bf16.msra.mxu0 %v14243_v39  ;;  %11758 = vmatprep.subr.bf16.mxu1 %v14248_v40  ;;  %v14336_v39 = vld [vmem:[%s17597_s0 + $0x28] ss:$196 sps:$4 sm:$0xff]  }
 0x2e9   : > { %12274 = vmatprep.subr.bf16.mxu0 %v14251_v41  ;;  %11788 = vmatprep.mubr.bf16.mxu1 %v14338_v42  ;;  %v14342_v40 = vld [vmem:[%s17597_s0 + $0x88] ss:$196 sps:$4 sm:$0xff]  }
 0x2ea   : > { %12304 = vmatprep.mubr.bf16.mxu0 %v14344_v43  ;;  %v14347_v41 = vld [vmem:[%s16648_s7 + $0x1204] ss:$8 sps:$4 sm:$0xff]   ;;  %v14339_v42 = vld [vmem:[%s16648_s7 + $0x600] ss:$8 sps:$4 sm:$0xff]  }
 0x2eb   : > { %11759 = vmatpush1.bf16.msra.mxu1 %v14246_v44  ;;  %v14345_v43 = vld [vmem:[%s16648_s7 + $0x1200] ss:$8 sps:$4 sm:$0xff]   ;;  %v14350_v44 = vld [vmem:[%s16648_s7 + $0x614] ss:$8 sps:$4 sm:$0xff]  }
 0x2ec   : > { %12275 = vmatpush1.bf16.msra.mxu0 %v14249_v45  ;;  %11760 = vmatprep.subr.bf16.mxu1 %v14254_v46  ;;  %v14353_v45 = vld [vmem:[%s16648_s7 + $0x1214] ss:$8 sps:$4 sm:$0xff]  }
 0x2ed   : > { %12276 = vmatprep.subr.bf16.mxu0 %v14257_v47  ;;  %v14440_v46 = vld [vmem:[%s17597_s0 + $0x34] ss:$196 sps:$4 sm:$0xff]  }
 0x2ee   : > { %v14446_v47 = vld [vmem:[%s17597_s0 + $0x94] ss:$196 sps:$4 sm:$0xff]  }
 0x2ef   : > { %11761 = vmatpush1.bf16.msra.mxu1 %v14252_v48  ;;  %v14348_v48 = vld [vmem:[%s16648_s7 + $0x610] ss:$8 sps:$4 sm:$0xff]  }
 0x2f0   : > { %12277 = vmatpush1.bf16.msra.mxu0 %v14255_v49  ;;  %11762 = vmatprep.subr.bf16.mxu1 %v14260_v50  ;;  %v14351_v49 = vld [vmem:[%s16648_s7 + $0x1210] ss:$8 sps:$4 sm:$0xff]   ;;  %v14356_v50 = vld [vmem:[%s16648_s7 + $0x624] ss:$8 sps:$4 sm:$0xff]  }
 0x2f1   : > { %12278 = vmatprep.subr.bf16.mxu0 %v14263_v51  ;;  %v14359_v51 = vld [vmem:[%s16648_s7 + $0x1224] ss:$8 sps:$4 sm:$0xff]  }
 0x2f3   : > { %11763 = vmatpush1.bf16.msra.mxu1 %v14258_v52  ;;  %v14354_v52 = vld [vmem:[%s16648_s7 + $0x620] ss:$8 sps:$4 sm:$0xff]  }
 0x2f4   : > { %12279 = vmatpush1.bf16.msra.mxu0 %v14261_v53  ;;  %11764 = vmatprep.subr.bf16.mxu1 %v14266_v54  ;;  %v14357_v53 = vld [vmem:[%s16648_s7 + $0x1220] ss:$8 sps:$4 sm:$0xff]   ;;  %v14362_v54 = vld [vmem:[%s16648_s7 + $0x634] ss:$8 sps:$4 sm:$0xff]  }
 0x2f5   : > { %12280 = vmatprep.subr.bf16.mxu0 %v14269_v55  ;;  %v14365_v55 = vld [vmem:[%s16648_s7 + $0x1234] ss:$8 sps:$4 sm:$0xff]  }
 0x2f7   : > { %11765 = vmatpush1.bf16.msra.mxu1 %v14264_v56  ;;  %v14360_v56 = vld [vmem:[%s16648_s7 + $0x630] ss:$8 sps:$4 sm:$0xff]  }
 0x2f8   : > { %12281 = vmatpush1.bf16.msra.mxu0 %v14267_v57  ;;  %11766 = vmatprep.subr.bf16.mxu1 %v14272_v58  ;;  %v14363_v57 = vld [vmem:[%s16648_s7 + $0x1230] ss:$8 sps:$4 sm:$0xff]   ;;  %v14368_v58 = vld [vmem:[%s16648_s7 + $0x644] ss:$8 sps:$4 sm:$0xff]  }
 0x2f9   : > { %12282 = vmatprep.subr.bf16.mxu0 %v14275_v59  ;;  %v14371_v59 = vld [vmem:[%s16648_s7 + $0x1244] ss:$8 sps:$4 sm:$0xff]  }
 0x2fb   : > { %11767 = vmatpush1.bf16.msra.mxu1 %v14270_v60  ;;  %v14366_v60 = vld [vmem:[%s16648_s7 + $0x640] ss:$8 sps:$4 sm:$0xff]  }
 0x2fc   : > { %12283 = vmatpush1.bf16.msra.mxu0 %v14273_v61  ;;  %11768 = vmatprep.subr.bf16.mxu1 %v14278_v62  ;;  %v14369_v61 = vld [vmem:[%s16648_s7 + $0x1240] ss:$8 sps:$4 sm:$0xff]   ;;  %v14374_v62 = vld [vmem:[%s16648_s7 + $0x654] ss:$8 sps:$4 sm:$0xff]  }
 0x2fd   : > { %12284 = vmatprep.subr.bf16.mxu0 %v14281_v63  ;;  %v14377_v63 = vld [vmem:[%s16648_s7 + $0x1254] ss:$8 sps:$4 sm:$0xff]  }
 0x2ff   : > { %11769 = vmatpush1.bf16.msra.mxu1 %v14276_v0  ;;  %v14372_v0 = vld [vmem:[%s16648_s7 + $0x650] ss:$8 sps:$4 sm:$0xff]  }
 0x300   : > { %12285 = vmatpush1.bf16.msra.mxu0 %v14279_v1  ;;  %11770 = vmatprep.subr.bf16.mxu1 %v14284_v2  ;;  %v14375_v1 = vld [vmem:[%s16648_s7 + $0x1250] ss:$8 sps:$4 sm:$0xff]   ;;  %v14380_v2 = vld [vmem:[%s16648_s7 + $0x664] ss:$8 sps:$4 sm:$0xff]  }
 0x301   : > { %12286 = vmatprep.subr.bf16.mxu0 %v14287_v3  ;;  %v14383_v3 = vld [vmem:[%s16648_s7 + $0x1264] ss:$8 sps:$4 sm:$0xff]  }
 0x303   : > { %11771 = vmatpush1.bf16.msra.mxu1 %v14282_v4  ;;  %v14378_v4 = vld [vmem:[%s16648_s7 + $0x660] ss:$8 sps:$4 sm:$0xff]  }
 0x304   : > { %12287 = vmatpush1.bf16.msra.mxu0 %v14285_v5  ;;  %11772 = vmatprep.subr.bf16.mxu1 %v14290_v6  ;;  %v14381_v5 = vld [vmem:[%s16648_s7 + $0x1260] ss:$8 sps:$4 sm:$0xff]   ;;  %v14386_v6 = vld [vmem:[%s16648_s7 + $0x674] ss:$8 sps:$4 sm:$0xff]  }
 0x305   : > { %12288 = vmatprep.subr.bf16.mxu0 %v14293_v7  ;;  %v14389_v7 = vld [vmem:[%s16648_s7 + $0x1274] ss:$8 sps:$4 sm:$0xff]  }
 0x307   : > { %11773 = vmatpush1.bf16.msra.mxu1 %v14288_v8  ;;  %v14384_v8 = vld [vmem:[%s16648_s7 + $0x670] ss:$8 sps:$4 sm:$0xff]  }
 0x308   : > { %12289 = vmatpush1.bf16.msra.mxu0 %v14291_v9  ;;  %11774 = vmatprep.subr.bf16.mxu1 %v14296_v10  ;;  %v14387_v9 = vld [vmem:[%s16648_s7 + $0x1270] ss:$8 sps:$4 sm:$0xff]   ;;  %v14392_v10 = vld [vmem:[%s16648_s7 + $0x684] ss:$8 sps:$4 sm:$0xff]  }
 0x309   : > { %12290 = vmatprep.subr.bf16.mxu0 %v14299_v11  ;;  %v14395_v11 = vld [vmem:[%s16648_s7 + $0x1284] ss:$8 sps:$4 sm:$0xff]  }
 0x30b   : > { %11775 = vmatpush1.bf16.msra.mxu1 %v14294_v12  ;;  %v14390_v12 = vld [vmem:[%s16648_s7 + $0x680] ss:$8 sps:$4 sm:$0xff]  }
 0x30c   : > { %12291 = vmatpush1.bf16.msra.mxu0 %v14297_v13  ;;  %11776 = vmatprep.subr.bf16.mxu1 %v14302_v14  ;;  %v14393_v13 = vld [vmem:[%s16648_s7 + $0x1280] ss:$8 sps:$4 sm:$0xff]   ;;  %v14398_v14 = vld [vmem:[%s16648_s7 + $0x694] ss:$8 sps:$4 sm:$0xff]  }
 0x30d   : > { %12292 = vmatprep.subr.bf16.mxu0 %v14305_v15  ;;  %v14401_v15 = vld [vmem:[%s16648_s7 + $0x1294] ss:$8 sps:$4 sm:$0xff]  }
 0x30f   : > { %11777 = vmatpush1.bf16.msra.mxu1 %v14300_v16  ;;  %v14396_v16 = vld [vmem:[%s16648_s7 + $0x690] ss:$8 sps:$4 sm:$0xff]  }
 0x310   : > { %12293 = vmatpush1.bf16.msra.mxu0 %v14303_v17  ;;  %11778 = vmatprep.subr.bf16.mxu1 %v14308_v18  ;;  %v14399_v17 = vld [vmem:[%s16648_s7 + $0x1290] ss:$8 sps:$4 sm:$0xff]   ;;  %v14404_v18 = vld [vmem:[%s16648_s7 + $0x6a4] ss:$8 sps:$4 sm:$0xff]  }
 0x311   : > { %12294 = vmatprep.subr.bf16.mxu0 %v14311_v19  ;;  %v14407_v19 = vld [vmem:[%s16648_s7 + $0x12a4] ss:$8 sps:$4 sm:$0xff]  }
 0x313   : > { %11779 = vmatpush1.bf16.msra.mxu1 %v14306_v20  ;;  %v14402_v20 = vld [vmem:[%s16648_s7 + $0x6a0] ss:$8 sps:$4 sm:$0xff]  }
 0x314   : > { %12295 = vmatpush1.bf16.msra.mxu0 %v14309_v21  ;;  %11780 = vmatprep.subr.bf16.mxu1 %v14314_v22  ;;  %v14405_v21 = vld [vmem:[%s16648_s7 + $0x12a0] ss:$8 sps:$4 sm:$0xff]   ;;  %v14410_v22 = vld [vmem:[%s16648_s7 + $0x6b4] ss:$8 sps:$4 sm:$0xff]  }
 0x315   : > { %12296 = vmatprep.subr.bf16.mxu0 %v14317_v23  ;;  %v14413_v23 = vld [vmem:[%s16648_s7 + $0x12b4] ss:$8 sps:$4 sm:$0xff]  }
 0x317   : > { %11781 = vmatpush1.bf16.msra.mxu1 %v14312_v24  ;;  %v14408_v24 = vld [vmem:[%s16648_s7 + $0x6b0] ss:$8 sps:$4 sm:$0xff]  }
 0x318   : > { %12297 = vmatpush1.bf16.msra.mxu0 %v14315_v25  ;;  %11782 = vmatprep.subr.bf16.mxu1 %v14320_v26  ;;  %v14411_v25 = vld [vmem:[%s16648_s7 + $0x12b0] ss:$8 sps:$4 sm:$0xff]   ;;  %v14416_v26 = vld [vmem:[%s16648_s7 + $0x6c4] ss:$8 sps:$4 sm:$0xff]  }
 0x319   : > { %12298 = vmatprep.subr.bf16.mxu0 %v14323_v27  ;;  %v14419_v27 = vld [vmem:[%s16648_s7 + $0x12c4] ss:$8 sps:$4 sm:$0xff]  }
 0x31b   : > { %11783 = vmatpush1.bf16.msra.mxu1 %v14318_v28  ;;  %v14414_v28 = vld [vmem:[%s16648_s7 + $0x6c0] ss:$8 sps:$4 sm:$0xff]  }
 0x31c   : > { %12299 = vmatpush1.bf16.msra.mxu0 %v14321_v29  ;;  %11784 = vmatprep.subr.bf16.mxu1 %v14326_v30  ;;  %v14417_v29 = vld [vmem:[%s16648_s7 + $0x12c0] ss:$8 sps:$4 sm:$0xff]   ;;  %v14422_v30 = vld [vmem:[%s16648_s7 + $0x6d4] ss:$8 sps:$4 sm:$0xff]  }
 0x31d   : > { %12300 = vmatprep.subr.bf16.mxu0 %v14329_v31  ;;  %v14425_v31 = vld [vmem:[%s16648_s7 + $0x12d4] ss:$8 sps:$4 sm:$0xff]  }
 0x31f   : > { %11785 = vmatpush1.bf16.msra.mxu1 %v14324_v32  ;;  %v14420_v32 = vld [vmem:[%s16648_s7 + $0x6d0] ss:$8 sps:$4 sm:$0xff]  }
 0x320   : > { %12301 = vmatpush1.bf16.msra.mxu0 %v14327_v33  ;;  %11786 = vmatprep.subr.bf16.mxu1 %v14332_v34  ;;  %v14423_v33 = vld [vmem:[%s16648_s7 + $0x12d0] ss:$8 sps:$4 sm:$0xff]   ;;  %v14428_v34 = vld [vmem:[%s16648_s7 + $0x6e4] ss:$8 sps:$4 sm:$0xff]  }
 0x321   : > { %12302 = vmatprep.subr.bf16.mxu0 %v14335_v35  ;;  %v14431_v35 = vld [vmem:[%s16648_s7 + $0x12e4] ss:$8 sps:$4 sm:$0xff]  }
 0x323   : > { %11787 = vmatpush1.bf16.msra.mxu1 %v14330_v36  ;;  %v14426_v36 = vld [vmem:[%s16648_s7 + $0x6e0] ss:$8 sps:$4 sm:$0xff]  }
 0x324   : > { %12303 = vmatpush1.bf16.msra.mxu0 %v14333_v37  ;;  %11799 = vmatprep.subr.bf16.mxu1 %v14341_v38  ;;  %v14429_v37 = vld [vmem:[%s16648_s7 + $0x12e0] ss:$8 sps:$4 sm:$0xff]   ;;  %v14434_v38 = vld [vmem:[%s16648_s7 + $0x6f4] ss:$8 sps:$4 sm:$0xff]  }
 0x325   : > { %12315 = vmatprep.subr.bf16.mxu0 %v14347_v41  ;;  %v14435_v41 = vld [vmem:[%s16648_s7 + $0x12f0] ss:$8 sps:$4 sm:$0xff]  }
 0x326   : > { %11789 = vmatmul.mubr.bf16.vlgmr.msra.gmra.mrb[0].mxu1 %v14336_v39  ;;  %v14437_v39 = vld [vmem:[%s16648_s7 + $0x12f4] ss:$8 sps:$4 sm:$0xff]  }
 0x327   : > { %12305 = vmatmul.mubr.bf16.vlgmr.msra.gmra.mrb[0].mxu0 %v14342_v40  ;;  %11800 = vmatpush1.bf16.msra.mxu1 %v14339_v42  ;;  %v14432_v40 = vld [vmem:[%s16648_s7 + $0x6f0] ss:$8 sps:$4 sm:$0xff]   ;;  %v14443_v42 = vld [vmem:[%s16648_s7 + $0x704] ss:$8 sps:$4 sm:$0xff]  }
 0x328   : > { %12316 = vmatpush1.bf16.msra.mxu0 %v14345_v43  ;;  %11801 = vmatprep.subr.bf16.mxu1 %v14350_v44  ;;  %v14438_v43 = vld [vmem:[%s17597_s0 + $0x30] ss:$196 sps:$4 sm:$0xff]  }
 0x329   : > { %12317 = vmatprep.subr.bf16.mxu0 %v14353_v45  ;;  %11831 = vmatprep.mubr.bf16.mxu1 %v14440_v46  ;;  %v14444_v44 = vld [vmem:[%s17597_s0 + $0x90] ss:$196 sps:$4 sm:$0xff]   ;;  %v14449_v45 = vld [vmem:[%s16648_s7 + $0x1304] ss:$8 sps:$4 sm:$0xff]   ;;  %v14441_v46 = vld [vmem:[%s16648_s7 + $0x700] ss:$8 sps:$4 sm:$0xff]  }
 0x32a   : > { %12347 = vmatprep.mubr.bf16.mxu0 %v14446_v47  ;;  %v14447_v47 = vld [vmem:[%s16648_s7 + $0x1300] ss:$8 sps:$4 sm:$0xff]  }
 0x32b   : > { %11802 = vmatpush1.bf16.msra.mxu1 %v14348_v48  ;;  %v14452_v48 = vld [vmem:[%s16648_s7 + $0x714] ss:$8 sps:$4 sm:$0xff]  }
 0x32c   : > { %12318 = vmatpush1.bf16.msra.mxu0 %v14351_v49  ;;  %11803 = vmatprep.subr.bf16.mxu1 %v14356_v50  ;;  %v14455_v49 = vld [vmem:[%s16648_s7 + $0x1314] ss:$8 sps:$4 sm:$0xff]  }
 0x32d   : > { %12319 = vmatprep.subr.bf16.mxu0 %v14359_v51  ;;  %v14542_v50 = vld [vmem:[%s17597_s0 + $0x3c] ss:$196 sps:$4 sm:$0xff]  }
 0x32e   : > { %v14548_v51 = vld [vmem:[%s17597_s0 + $0x9c] ss:$196 sps:$4 sm:$0xff]  }
 0x32f   : > { %11804 = vmatpush1.bf16.msra.mxu1 %v14354_v52  ;;  %v14450_v52 = vld [vmem:[%s16648_s7 + $0x710] ss:$8 sps:$4 sm:$0xff]  }
 0x330   : > { %12320 = vmatpush1.bf16.msra.mxu0 %v14357_v53  ;;  %11805 = vmatprep.subr.bf16.mxu1 %v14362_v54  ;;  %v14453_v53 = vld [vmem:[%s16648_s7 + $0x1310] ss:$8 sps:$4 sm:$0xff]   ;;  %v14458_v54 = vld [vmem:[%s16648_s7 + $0x724] ss:$8 sps:$4 sm:$0xff]  }
 0x331   : > { %12321 = vmatprep.subr.bf16.mxu0 %v14365_v55  ;;  %v14461_v55 = vld [vmem:[%s16648_s7 + $0x1324] ss:$8 sps:$4 sm:$0xff]  }
 0x333   : > { %11806 = vmatpush1.bf16.msra.mxu1 %v14360_v56  ;;  %v14456_v56 = vld [vmem:[%s16648_s7 + $0x720] ss:$8 sps:$4 sm:$0xff]  }
 0x334   : > { %12322 = vmatpush1.bf16.msra.mxu0 %v14363_v57  ;;  %11807 = vmatprep.subr.bf16.mxu1 %v14368_v58  ;;  %v14459_v57 = vld [vmem:[%s16648_s7 + $0x1320] ss:$8 sps:$4 sm:$0xff]   ;;  %v14464_v58 = vld [vmem:[%s16648_s7 + $0x734] ss:$8 sps:$4 sm:$0xff]  }
 0x335   : > { %12323 = vmatprep.subr.bf16.mxu0 %v14371_v59  ;;  %v14467_v59 = vld [vmem:[%s16648_s7 + $0x1334] ss:$8 sps:$4 sm:$0xff]  }
 0x337   : > { %11808 = vmatpush1.bf16.msra.mxu1 %v14366_v60  ;;  %v14462_v60 = vld [vmem:[%s16648_s7 + $0x730] ss:$8 sps:$4 sm:$0xff]  }
 0x338   : > { %12324 = vmatpush1.bf16.msra.mxu0 %v14369_v61  ;;  %11809 = vmatprep.subr.bf16.mxu1 %v14374_v62  ;;  %v14465_v61 = vld [vmem:[%s16648_s7 + $0x1330] ss:$8 sps:$4 sm:$0xff]   ;;  %v14470_v62 = vld [vmem:[%s16648_s7 + $0x744] ss:$8 sps:$4 sm:$0xff]  }
 0x339   : > { %12325 = vmatprep.subr.bf16.mxu0 %v14377_v63  ;;  %v14473_v63 = vld [vmem:[%s16648_s7 + $0x1344] ss:$8 sps:$4 sm:$0xff]  }
 0x33b   : > { %11810 = vmatpush1.bf16.msra.mxu1 %v14372_v0  ;;  %v14468_v0 = vld [vmem:[%s16648_s7 + $0x740] ss:$8 sps:$4 sm:$0xff]  }
 0x33c   : > { %12326 = vmatpush1.bf16.msra.mxu0 %v14375_v1  ;;  %11811 = vmatprep.subr.bf16.mxu1 %v14380_v2  ;;  %v14471_v1 = vld [vmem:[%s16648_s7 + $0x1340] ss:$8 sps:$4 sm:$0xff]   ;;  %v14476_v2 = vld [vmem:[%s16648_s7 + $0x754] ss:$8 sps:$4 sm:$0xff]  }
 0x33d   : > { %12327 = vmatprep.subr.bf16.mxu0 %v14383_v3  ;;  %v14479_v3 = vld [vmem:[%s16648_s7 + $0x1354] ss:$8 sps:$4 sm:$0xff]  }
 0x33f   : > { %11812 = vmatpush1.bf16.msra.mxu1 %v14378_v4  ;;  %v14474_v4 = vld [vmem:[%s16648_s7 + $0x750] ss:$8 sps:$4 sm:$0xff]  }
 0x340   : > { %12328 = vmatpush1.bf16.msra.mxu0 %v14381_v5  ;;  %11813 = vmatprep.subr.bf16.mxu1 %v14386_v6  ;;  %v14477_v5 = vld [vmem:[%s16648_s7 + $0x1350] ss:$8 sps:$4 sm:$0xff]   ;;  %v14482_v6 = vld [vmem:[%s16648_s7 + $0x764] ss:$8 sps:$4 sm:$0xff]  }
 0x341   : > { %12329 = vmatprep.subr.bf16.mxu0 %v14389_v7  ;;  %v14485_v7 = vld [vmem:[%s16648_s7 + $0x1364] ss:$8 sps:$4 sm:$0xff]  }
 0x343   : > { %11814 = vmatpush1.bf16.msra.mxu1 %v14384_v8  ;;  %v14480_v8 = vld [vmem:[%s16648_s7 + $0x760] ss:$8 sps:$4 sm:$0xff]  }
 0x344   : > { %12330 = vmatpush1.bf16.msra.mxu0 %v14387_v9  ;;  %11815 = vmatprep.subr.bf16.mxu1 %v14392_v10  ;;  %v14483_v9 = vld [vmem:[%s16648_s7 + $0x1360] ss:$8 sps:$4 sm:$0xff]   ;;  %v14488_v10 = vld [vmem:[%s16648_s7 + $0x774] ss:$8 sps:$4 sm:$0xff]  }
 0x345   : > { %12331 = vmatprep.subr.bf16.mxu0 %v14395_v11  ;;  %v14491_v11 = vld [vmem:[%s16648_s7 + $0x1374] ss:$8 sps:$4 sm:$0xff]  }
 0x347   : > { %11816 = vmatpush1.bf16.msra.mxu1 %v14390_v12  ;;  %v14486_v12 = vld [vmem:[%s16648_s7 + $0x770] ss:$8 sps:$4 sm:$0xff]  }
 0x348   : > { %12332 = vmatpush1.bf16.msra.mxu0 %v14393_v13  ;;  %11817 = vmatprep.subr.bf16.mxu1 %v14398_v14  ;;  %v14489_v13 = vld [vmem:[%s16648_s7 + $0x1370] ss:$8 sps:$4 sm:$0xff]   ;;  %v14494_v14 = vld [vmem:[%s16648_s7 + $0x784] ss:$8 sps:$4 sm:$0xff]  }
 0x349   : > { %12333 = vmatprep.subr.bf16.mxu0 %v14401_v15  ;;  %v14497_v15 = vld [vmem:[%s16648_s7 + $0x1384] ss:$8 sps:$4 sm:$0xff]  }
 0x34b   : > { %11818 = vmatpush1.bf16.msra.mxu1 %v14396_v16  ;;  %v14492_v16 = vld [vmem:[%s16648_s7 + $0x780] ss:$8 sps:$4 sm:$0xff]  }
 0x34c   : > { %12334 = vmatpush1.bf16.msra.mxu0 %v14399_v17  ;;  %11819 = vmatprep.subr.bf16.mxu1 %v14404_v18  ;;  %v14495_v17 = vld [vmem:[%s16648_s7 + $0x1380] ss:$8 sps:$4 sm:$0xff]   ;;  %v14500_v18 = vld [vmem:[%s16648_s7 + $0x794] ss:$8 sps:$4 sm:$0xff]  }
 0x34d   : > { %12335 = vmatprep.subr.bf16.mxu0 %v14407_v19  ;;  %v14503_v19 = vld [vmem:[%s16648_s7 + $0x1394] ss:$8 sps:$4 sm:$0xff]  }
 0x34f   : > { %11820 = vmatpush1.bf16.msra.mxu1 %v14402_v20  ;;  %v14498_v20 = vld [vmem:[%s16648_s7 + $0x790] ss:$8 sps:$4 sm:$0xff]  }
 0x350   : > { %12336 = vmatpush1.bf16.msra.mxu0 %v14405_v21  ;;  %11821 = vmatprep.subr.bf16.mxu1 %v14410_v22  ;;  %v14501_v21 = vld [vmem:[%s16648_s7 + $0x1390] ss:$8 sps:$4 sm:$0xff]   ;;  %v14506_v22 = vld [vmem:[%s16648_s7 + $0x7a4] ss:$8 sps:$4 sm:$0xff]  }
 0x351   : > { %12337 = vmatprep.subr.bf16.mxu0 %v14413_v23  ;;  %v14509_v23 = vld [vmem:[%s16648_s7 + $0x13a4] ss:$8 sps:$4 sm:$0xff]  }
 0x353   : > { %11822 = vmatpush1.bf16.msra.mxu1 %v14408_v24  ;;  %v14504_v24 = vld [vmem:[%s16648_s7 + $0x7a0] ss:$8 sps:$4 sm:$0xff]  }
 0x354   : > { %12338 = vmatpush1.bf16.msra.mxu0 %v14411_v25  ;;  %11823 = vmatprep.subr.bf16.mxu1 %v14416_v26  ;;  %v14507_v25 = vld [vmem:[%s16648_s7 + $0x13a0] ss:$8 sps:$4 sm:$0xff]   ;;  %v14512_v26 = vld [vmem:[%s16648_s7 + $0x7b4] ss:$8 sps:$4 sm:$0xff]  }
 0x355   : > { %12339 = vmatprep.subr.bf16.mxu0 %v14419_v27  ;;  %v14515_v27 = vld [vmem:[%s16648_s7 + $0x13b4] ss:$8 sps:$4 sm:$0xff]  }
 0x357   : > { %11824 = vmatpush1.bf16.msra.mxu1 %v14414_v28  ;;  %v14510_v28 = vld [vmem:[%s16648_s7 + $0x7b0] ss:$8 sps:$4 sm:$0xff]  }
 0x358   : > { %12340 = vmatpush1.bf16.msra.mxu0 %v14417_v29  ;;  %11825 = vmatprep.subr.bf16.mxu1 %v14422_v30  ;;  %v14513_v29 = vld [vmem:[%s16648_s7 + $0x13b0] ss:$8 sps:$4 sm:$0xff]   ;;  %v14518_v30 = vld [vmem:[%s16648_s7 + $0x7c4] ss:$8 sps:$4 sm:$0xff]  }
 0x359   : > { %12341 = vmatprep.subr.bf16.mxu0 %v14425_v31  ;;  %v14521_v31 = vld [vmem:[%s16648_s7 + $0x13c4] ss:$8 sps:$4 sm:$0xff]  }
 0x35b   : > { %11826 = vmatpush1.bf16.msra.mxu1 %v14420_v32  ;;  %v14516_v32 = vld [vmem:[%s16648_s7 + $0x7c0] ss:$8 sps:$4 sm:$0xff]  }
 0x35c   : > { %12342 = vmatpush1.bf16.msra.mxu0 %v14423_v33  ;;  %11827 = vmatprep.subr.bf16.mxu1 %v14428_v34  ;;  %v14519_v33 = vld [vmem:[%s16648_s7 + $0x13c0] ss:$8 sps:$4 sm:$0xff]   ;;  %v14524_v34 = vld [vmem:[%s16648_s7 + $0x7d4] ss:$8 sps:$4 sm:$0xff]  }
 0x35d   : > { %12343 = vmatprep.subr.bf16.mxu0 %v14431_v35  ;;  %v14527_v35 = vld [vmem:[%s16648_s7 + $0x13d4] ss:$8 sps:$4 sm:$0xff]  }
 0x35f   : > { %11828 = vmatpush1.bf16.msra.mxu1 %v14426_v36  ;;  %v14522_v36 = vld [vmem:[%s16648_s7 + $0x7d0] ss:$8 sps:$4 sm:$0xff]  }
 0x360   : > { %12344 = vmatpush1.bf16.msra.mxu0 %v14429_v37  ;;  %11829 = vmatprep.subr.bf16.mxu1 %v14434_v38  ;;  %v14525_v37 = vld [vmem:[%s16648_s7 + $0x13d0] ss:$8 sps:$4 sm:$0xff]   ;;  %v14530_v38 = vld [vmem:[%s16648_s7 + $0x7e4] ss:$8 sps:$4 sm:$0xff]  }
 0x361   : > { %12345 = vmatprep.subr.bf16.mxu0 %v14437_v39  ;;  %v14533_v39 = vld [vmem:[%s16648_s7 + $0x13e4] ss:$8 sps:$4 sm:$0xff]  }
 0x363   : > { %11830 = vmatpush1.bf16.msra.mxu1 %v14432_v40  ;;  %v14528_v40 = vld [vmem:[%s16648_s7 + $0x7e0] ss:$8 sps:$4 sm:$0xff]  }
 0x364   : > { %12346 = vmatpush1.bf16.msra.mxu0 %v14435_v41  ;;  %11842 = vmatprep.subr.bf16.mxu1 %v14443_v42  ;;  %v14531_v41 = vld [vmem:[%s16648_s7 + $0x13e0] ss:$8 sps:$4 sm:$0xff]   ;;  %v14536_v42 = vld [vmem:[%s16648_s7 + $0x7f4] ss:$8 sps:$4 sm:$0xff]  }
 0x365   : > { %12358 = vmatprep.subr.bf16.mxu0 %v14449_v45  ;;  %v14537_v45 = vld [vmem:[%s16648_s7 + $0x13f0] ss:$8 sps:$4 sm:$0xff]  }
 0x366   : > { %11832 = vmatmul.mubr.bf16.vlgmr.msra.gmra.mrb[0].mxu1 %v14438_v43  ;;  %v14539_v43 = vld [vmem:[%s16648_s7 + $0x13f4] ss:$8 sps:$4 sm:$0xff]  }
 0x367   : > { %12348 = vmatmul.mubr.bf16.vlgmr.msra.gmra.mrb[0].mxu0 %v14444_v44  ;;  %11843 = vmatpush1.bf16.msra.mxu1 %v14441_v46  ;;  %v14534_v44 = vld [vmem:[%s16648_s7 + $0x7f0] ss:$8 sps:$4 sm:$0xff]   ;;  %v14545_v46 = vld [vmem:[%s16648_s7 + $0x804] ss:$8 sps:$4 sm:$0xff]  }
 0x368   : > { %12359 = vmatpush1.bf16.msra.mxu0 %v14447_v47  ;;  %11844 = vmatprep.subr.bf16.mxu1 %v14452_v48  ;;  %v14551_v47 = vld [vmem:[%s16648_s7 + $0x1404] ss:$8 sps:$4 sm:$0xff]   ;;  %v14540_v48 = vld [vmem:[%s17597_s0 + $0x38] ss:$196 sps:$4 sm:$0xff]  }
 0x369   : > { %12360 = vmatprep.subr.bf16.mxu0 %v14455_v49  ;;  %11874 = vmatprep.mubr.bf16.mxu1 %v14542_v50  ;;  %v14546_v49 = vld [vmem:[%s17597_s0 + $0x98] ss:$196 sps:$4 sm:$0xff]   ;;  %v14543_v50 = vld [vmem:[%s16648_s7 + $0x800] ss:$8 sps:$4 sm:$0xff]  }
 0x36a   : > { %12390 = vmatprep.mubr.bf16.mxu0 %v14548_v51  ;;  %v14549_v51 = vld [vmem:[%s16648_s7 + $0x1400] ss:$8 sps:$4 sm:$0xff]  }
 0x36b   : > { %11845 = vmatpush1.bf16.msra.mxu1 %v14450_v52  ;;  %v14554_v52 = vld [vmem:[%s16648_s7 + $0x814] ss:$8 sps:$4 sm:$0xff]  }
 0x36c   : > { %12361 = vmatpush1.bf16.msra.mxu0 %v14453_v53  ;;  %11846 = vmatprep.subr.bf16.mxu1 %v14458_v54  ;;  %v14557_v53 = vld [vmem:[%s16648_s7 + $0x1414] ss:$8 sps:$4 sm:$0xff]   ;;  %v14644_v54 = vld [vmem:[%s17597_s0 + $0x44] ss:$196 sps:$4 sm:$0xff]  }
 0x36d   : > { %12362 = vmatprep.subr.bf16.mxu0 %v14461_v55  ;;  %v14650_v55 = vld [vmem:[%s17597_s0 + $0xa4] ss:$196 sps:$4 sm:$0xff]  }
 0x36f   : > { %11847 = vmatpush1.bf16.msra.mxu1 %v14456_v56  ;;  %v14552_v56 = vld [vmem:[%s16648_s7 + $0x810] ss:$8 sps:$4 sm:$0xff]  }
 0x370   : > { %12363 = vmatpush1.bf16.msra.mxu0 %v14459_v57  ;;  %11848 = vmatprep.subr.bf16.mxu1 %v14464_v58  ;;  %v14555_v57 = vld [vmem:[%s16648_s7 + $0x1410] ss:$8 sps:$4 sm:$0xff]   ;;  %v14560_v58 = vld [vmem:[%s16648_s7 + $0x824] ss:$8 sps:$4 sm:$0xff]  }
 0x371   : > { %12364 = vmatprep.subr.bf16.mxu0 %v14467_v59  ;;  %v14563_v59 = vld [vmem:[%s16648_s7 + $0x1424] ss:$8 sps:$4 sm:$0xff]  }
 0x373   : > { %11849 = vmatpush1.bf16.msra.mxu1 %v14462_v60  ;;  %v14558_v60 = vld [vmem:[%s16648_s7 + $0x820] ss:$8 sps:$4 sm:$0xff]  }
 0x374   : > { %12365 = vmatpush1.bf16.msra.mxu0 %v14465_v61  ;;  %11850 = vmatprep.subr.bf16.mxu1 %v14470_v62  ;;  %v14561_v61 = vld [vmem:[%s16648_s7 + $0x1420] ss:$8 sps:$4 sm:$0xff]   ;;  %v14566_v62 = vld [vmem:[%s16648_s7 + $0x834] ss:$8 sps:$4 sm:$0xff]  }
 0x375   : > { %12366 = vmatprep.subr.bf16.mxu0 %v14473_v63  ;;  %v14569_v63 = vld [vmem:[%s16648_s7 + $0x1434] ss:$8 sps:$4 sm:$0xff]  }
 0x377   : > { %11851 = vmatpush1.bf16.msra.mxu1 %v14468_v0  ;;  %v14564_v0 = vld [vmem:[%s16648_s7 + $0x830] ss:$8 sps:$4 sm:$0xff]  }
 0x378   : > { %12367 = vmatpush1.bf16.msra.mxu0 %v14471_v1  ;;  %11852 = vmatprep.subr.bf16.mxu1 %v14476_v2  ;;  %v14567_v1 = vld [vmem:[%s16648_s7 + $0x1430] ss:$8 sps:$4 sm:$0xff]   ;;  %v14572_v2 = vld [vmem:[%s16648_s7 + $0x844] ss:$8 sps:$4 sm:$0xff]  }
 0x379   : > { %12368 = vmatprep.subr.bf16.mxu0 %v14479_v3  ;;  %v14575_v3 = vld [vmem:[%s16648_s7 + $0x1444] ss:$8 sps:$4 sm:$0xff]  }
 0x37b   : > { %11853 = vmatpush1.bf16.msra.mxu1 %v14474_v4  ;;  %v14570_v4 = vld [vmem:[%s16648_s7 + $0x840] ss:$8 sps:$4 sm:$0xff]  }
 0x37c   : > { %12369 = vmatpush1.bf16.msra.mxu0 %v14477_v5  ;;  %11854 = vmatprep.subr.bf16.mxu1 %v14482_v6  ;;  %v14573_v5 = vld [vmem:[%s16648_s7 + $0x1440] ss:$8 sps:$4 sm:$0xff]   ;;  %v14578_v6 = vld [vmem:[%s16648_s7 + $0x854] ss:$8 sps:$4 sm:$0xff]  }
 0x37d   : > { %12370 = vmatprep.subr.bf16.mxu0 %v14485_v7  ;;  %v14581_v7 = vld [vmem:[%s16648_s7 + $0x1454] ss:$8 sps:$4 sm:$0xff]  }
 0x37f   : > { %11855 = vmatpush1.bf16.msra.mxu1 %v14480_v8  ;;  %v14576_v8 = vld [vmem:[%s16648_s7 + $0x850] ss:$8 sps:$4 sm:$0xff]  }
 0x380   : > { %12371 = vmatpush1.bf16.msra.mxu0 %v14483_v9  ;;  %11856 = vmatprep.subr.bf16.mxu1 %v14488_v10  ;;  %v14579_v9 = vld [vmem:[%s16648_s7 + $0x1450] ss:$8 sps:$4 sm:$0xff]   ;;  %v14584_v10 = vld [vmem:[%s16648_s7 + $0x864] ss:$8 sps:$4 sm:$0xff]  }
 0x381   : > { %12372 = vmatprep.subr.bf16.mxu0 %v14491_v11  ;;  %v14587_v11 = vld [vmem:[%s16648_s7 + $0x1464] ss:$8 sps:$4 sm:$0xff]  }
 0x383   : > { %11857 = vmatpush1.bf16.msra.mxu1 %v14486_v12  ;;  %v14582_v12 = vld [vmem:[%s16648_s7 + $0x860] ss:$8 sps:$4 sm:$0xff]  }
 0x384   : > { %12373 = vmatpush1.bf16.msra.mxu0 %v14489_v13  ;;  %11858 = vmatprep.subr.bf16.mxu1 %v14494_v14  ;;  %v14585_v13 = vld [vmem:[%s16648_s7 + $0x1460] ss:$8 sps:$4 sm:$0xff]   ;;  %v14590_v14 = vld [vmem:[%s16648_s7 + $0x874] ss:$8 sps:$4 sm:$0xff]  }
 0x385   : > { %12374 = vmatprep.subr.bf16.mxu0 %v14497_v15  ;;  %v14593_v15 = vld [vmem:[%s16648_s7 + $0x1474] ss:$8 sps:$4 sm:$0xff]  }
 0x387   : > { %11859 = vmatpush1.bf16.msra.mxu1 %v14492_v16  ;;  %v14588_v16 = vld [vmem:[%s16648_s7 + $0x870] ss:$8 sps:$4 sm:$0xff]  }
 0x388   : > { %12375 = vmatpush1.bf16.msra.mxu0 %v14495_v17  ;;  %11860 = vmatprep.subr.bf16.mxu1 %v14500_v18  ;;  %v14591_v17 = vld [vmem:[%s16648_s7 + $0x1470] ss:$8 sps:$4 sm:$0xff]   ;;  %v14596_v18 = vld [vmem:[%s16648_s7 + $0x884] ss:$8 sps:$4 sm:$0xff]  }
 0x389   : > { %12376 = vmatprep.subr.bf16.mxu0 %v14503_v19  ;;  %v14599_v19 = vld [vmem:[%s16648_s7 + $0x1484] ss:$8 sps:$4 sm:$0xff]  }
 0x38b   : > { %11861 = vmatpush1.bf16.msra.mxu1 %v14498_v20  ;;  %v14594_v20 = vld [vmem:[%s16648_s7 + $0x880] ss:$8 sps:$4 sm:$0xff]  }
 0x38c   : > { %12377 = vmatpush1.bf16.msra.mxu0 %v14501_v21  ;;  %11862 = vmatprep.subr.bf16.mxu1 %v14506_v22  ;;  %v14597_v21 = vld [vmem:[%s16648_s7 + $0x1480] ss:$8 sps:$4 sm:$0xff]   ;;  %v14602_v22 = vld [vmem:[%s16648_s7 + $0x894] ss:$8 sps:$4 sm:$0xff]  }
 0x38d   : > { %12378 = vmatprep.subr.bf16.mxu0 %v14509_v23  ;;  %v14605_v23 = vld [vmem:[%s16648_s7 + $0x1494] ss:$8 sps:$4 sm:$0xff]  }
 0x38f   : > { %11863 = vmatpush1.bf16.msra.mxu1 %v14504_v24  ;;  %v14600_v24 = vld [vmem:[%s16648_s7 + $0x890] ss:$8 sps:$4 sm:$0xff]  }
 0x390   : > { %12379 = vmatpush1.bf16.msra.mxu0 %v14507_v25  ;;  %11864 = vmatprep.subr.bf16.mxu1 %v14512_v26  ;;  %v14603_v25 = vld [vmem:[%s16648_s7 + $0x1490] ss:$8 sps:$4 sm:$0xff]   ;;  %v14608_v26 = vld [vmem:[%s16648_s7 + $0x8a4] ss:$8 sps:$4 sm:$0xff]  }
 0x391   : > { %12380 = vmatprep.subr.bf16.mxu0 %v14515_v27  ;;  %v14611_v27 = vld [vmem:[%s16648_s7 + $0x14a4] ss:$8 sps:$4 sm:$0xff]  }
 0x393   : > { %11865 = vmatpush1.bf16.msra.mxu1 %v14510_v28  ;;  %v14606_v28 = vld [vmem:[%s16648_s7 + $0x8a0] ss:$8 sps:$4 sm:$0xff]  }
 0x394   : > { %12381 = vmatpush1.bf16.msra.mxu0 %v14513_v29  ;;  %11866 = vmatprep.subr.bf16.mxu1 %v14518_v30  ;;  %v14609_v29 = vld [vmem:[%s16648_s7 + $0x14a0] ss:$8 sps:$4 sm:$0xff]   ;;  %v14614_v30 = vld [vmem:[%s16648_s7 + $0x8b4] ss:$8 sps:$4 sm:$0xff]  }
 0x395   : > { %12382 = vmatprep.subr.bf16.mxu0 %v14521_v31  ;;  %v14617_v31 = vld [vmem:[%s16648_s7 + $0x14b4] ss:$8 sps:$4 sm:$0xff]  }
 0x397   : > { %11867 = vmatpush1.bf16.msra.mxu1 %v14516_v32  ;;  %v14612_v32 = vld [vmem:[%s16648_s7 + $0x8b0] ss:$8 sps:$4 sm:$0xff]  }
 0x398   : > { %12383 = vmatpush1.bf16.msra.mxu0 %v14519_v33  ;;  %11868 = vmatprep.subr.bf16.mxu1 %v14524_v34  ;;  %v14615_v33 = vld [vmem:[%s16648_s7 + $0x14b0] ss:$8 sps:$4 sm:$0xff]   ;;  %v14620_v34 = vld [vmem:[%s16648_s7 + $0x8c4] ss:$8 sps:$4 sm:$0xff]  }
 0x399   : > { %12384 = vmatprep.subr.bf16.mxu0 %v14527_v35  ;;  %v14623_v35 = vld [vmem:[%s16648_s7 + $0x14c4] ss:$8 sps:$4 sm:$0xff]  }
 0x39b   : > { %11869 = vmatpush1.bf16.msra.mxu1 %v14522_v36  ;;  %v14618_v36 = vld [vmem:[%s16648_s7 + $0x8c0] ss:$8 sps:$4 sm:$0xff]  }
 0x39c   : > { %12385 = vmatpush1.bf16.msra.mxu0 %v14525_v37  ;;  %11870 = vmatprep.subr.bf16.mxu1 %v14530_v38  ;;  %v14621_v37 = vld [vmem:[%s16648_s7 + $0x14c0] ss:$8 sps:$4 sm:$0xff]   ;;  %v14626_v38 = vld [vmem:[%s16648_s7 + $0x8d4] ss:$8 sps:$4 sm:$0xff]  }
 0x39d   : > { %12386 = vmatprep.subr.bf16.mxu0 %v14533_v39  ;;  %v14629_v39 = vld [vmem:[%s16648_s7 + $0x14d4] ss:$8 sps:$4 sm:$0xff]  }
 0x39f   : > { %11871 = vmatpush1.bf16.msra.mxu1 %v14528_v40  ;;  %v14624_v40 = vld [vmem:[%s16648_s7 + $0x8d0] ss:$8 sps:$4 sm:$0xff]  }
 0x3a0   : > { %12387 = vmatpush1.bf16.msra.mxu0 %v14531_v41  ;;  %11872 = vmatprep.subr.bf16.mxu1 %v14536_v42  ;;  %v14627_v41 = vld [vmem:[%s16648_s7 + $0x14d0] ss:$8 sps:$4 sm:$0xff]   ;;  %v14632_v42 = vld [vmem:[%s16648_s7 + $0x8e4] ss:$8 sps:$4 sm:$0xff]  }
 0x3a1   : > { %12388 = vmatprep.subr.bf16.mxu0 %v14539_v43  ;;  %v14635_v43 = vld [vmem:[%s16648_s7 + $0x14e4] ss:$8 sps:$4 sm:$0xff]  }
 0x3a3   : > { %11873 = vmatpush1.bf16.msra.mxu1 %v14534_v44  ;;  %v14630_v44 = vld [vmem:[%s16648_s7 + $0x8e0] ss:$8 sps:$4 sm:$0xff]  }
 0x3a4   : > { %12389 = vmatpush1.bf16.msra.mxu0 %v14537_v45  ;;  %11885 = vmatprep.subr.bf16.mxu1 %v14545_v46  ;;  %v14633_v45 = vld [vmem:[%s16648_s7 + $0x14e0] ss:$8 sps:$4 sm:$0xff]   ;;  %v14638_v46 = vld [vmem:[%s16648_s7 + $0x8f4] ss:$8 sps:$4 sm:$0xff]  }
 0x3a5   : > { %12401 = vmatprep.subr.bf16.mxu0 %v14551_v47  ;;  %v14641_v47 = vld [vmem:[%s16648_s7 + $0x14f4] ss:$8 sps:$4 sm:$0xff]  }
 0x3a6   : > { %11875 = vmatmul.mubr.bf16.vlgmr.msra.gmra.mrb[0].mxu1 %v14540_v48  ;;  %v14636_v48 = vld [vmem:[%s16648_s7 + $0x8f0] ss:$8 sps:$4 sm:$0xff]  }
 0x3a7   : > { %12391 = vmatmul.mubr.bf16.vlgmr.msra.gmra.mrb[0].mxu0 %v14546_v49  ;;  %11886 = vmatpush1.bf16.msra.mxu1 %v14543_v50  ;;  %v14639_v49 = vld [vmem:[%s16648_s7 + $0x14f0] ss:$8 sps:$4 sm:$0xff]   ;;  %v14647_v50 = vld [vmem:[%s16648_s7 + $0x904] ss:$8 sps:$4 sm:$0xff]  }
 0x3a8   : > { %12402 = vmatpush1.bf16.msra.mxu0 %v14549_v51  ;;  %11887 = vmatprep.subr.bf16.mxu1 %v14554_v52  ;;  %v14653_v51 = vld [vmem:[%s16648_s7 + $0x1504] ss:$8 sps:$4 sm:$0xff]  }
 0x3a9   : > { %12403 = vmatprep.subr.bf16.mxu0 %v14557_v53  ;;  %11917 = vmatprep.mubr.bf16.mxu1 %v14644_v54  ;;  %v14642_v52 = vld [vmem:[%s17597_s0 + $0x40] ss:$196 sps:$4 sm:$0xff]  }
 0x3aa   : > { %12433 = vmatprep.mubr.bf16.mxu0 %v14650_v55  ;;  %v14648_v53 = vld [vmem:[%s17597_s0 + $0xa0] ss:$196 sps:$4 sm:$0xff]  }
 0x3ab   : > { %11888 = vmatpush1.bf16.msra.mxu1 %v14552_v56  ;;  %v14645_v54 = vld [vmem:[%s16648_s7 + $0x900] ss:$8 sps:$4 sm:$0xff]   ;;  %v14656_v56 = vld [vmem:[%s16648_s7 + $0x914] ss:$8 sps:$4 sm:$0xff]  }
 0x3ac   : > { %12404 = vmatpush1.bf16.msra.mxu0 %v14555_v57  ;;  %11889 = vmatprep.subr.bf16.mxu1 %v14560_v58  ;;  %v14651_v55 = vld [vmem:[%s16648_s7 + $0x1500] ss:$8 sps:$4 sm:$0xff]   ;;  %v14659_v57 = vld [vmem:[%s16648_s7 + $0x1514] ss:$8 sps:$4 sm:$0xff]   ;;  %v14746_v58 = vld [vmem:[%s17597_s0 + $0x4c] ss:$196 sps:$4 sm:$0xff]  }
 0x3ad   : > { %12405 = vmatprep.subr.bf16.mxu0 %v14563_v59  ;;  %v14752_v59 = vld [vmem:[%s17597_s0 + $0xac] ss:$196 sps:$4 sm:$0xff]  }
 0x3af   : > { %11890 = vmatpush1.bf16.msra.mxu1 %v14558_v60  ;;  %v14654_v60 = vld [vmem:[%s16648_s7 + $0x910] ss:$8 sps:$4 sm:$0xff]  }
 0x3b0   : > { %12406 = vmatpush1.bf16.msra.mxu0 %v14561_v61  ;;  %11891 = vmatprep.subr.bf16.mxu1 %v14566_v62  ;;  %v14657_v61 = vld [vmem:[%s16648_s7 + $0x1510] ss:$8 sps:$4 sm:$0xff]   ;;  %v14662_v62 = vld [vmem:[%s16648_s7 + $0x924] ss:$8 sps:$4 sm:$0xff]  }
 0x3b1   : > { %12407 = vmatprep.subr.bf16.mxu0 %v14569_v63  ;;  %v14665_v63 = vld [vmem:[%s16648_s7 + $0x1524] ss:$8 sps:$4 sm:$0xff]  }
 0x3b3   : > { %11892 = vmatpush1.bf16.msra.mxu1 %v14564_v0  ;;  %v14660_v0 = vld [vmem:[%s16648_s7 + $0x920] ss:$8 sps:$4 sm:$0xff]  }
 0x3b4   : > { %12408 = vmatpush1.bf16.msra.mxu0 %v14567_v1  ;;  %11893 = vmatprep.subr.bf16.mxu1 %v14572_v2  ;;  %v14663_v1 = vld [vmem:[%s16648_s7 + $0x1520] ss:$8 sps:$4 sm:$0xff]   ;;  %v14668_v2 = vld [vmem:[%s16648_s7 + $0x934] ss:$8 sps:$4 sm:$0xff]  }
 0x3b5   : > { %12409 = vmatprep.subr.bf16.mxu0 %v14575_v3  ;;  %v14671_v3 = vld [vmem:[%s16648_s7 + $0x1534] ss:$8 sps:$4 sm:$0xff]  }
 0x3b7   : > { %11894 = vmatpush1.bf16.msra.mxu1 %v14570_v4  ;;  %v14666_v4 = vld [vmem:[%s16648_s7 + $0x930] ss:$8 sps:$4 sm:$0xff]  }
 0x3b8   : > { %12410 = vmatpush1.bf16.msra.mxu0 %v14573_v5  ;;  %11895 = vmatprep.subr.bf16.mxu1 %v14578_v6  ;;  %v14669_v5 = vld [vmem:[%s16648_s7 + $0x1530] ss:$8 sps:$4 sm:$0xff]   ;;  %v14674_v6 = vld [vmem:[%s16648_s7 + $0x944] ss:$8 sps:$4 sm:$0xff]  }
 0x3b9   : > { %12411 = vmatprep.subr.bf16.mxu0 %v14581_v7  ;;  %v14677_v7 = vld [vmem:[%s16648_s7 + $0x1544] ss:$8 sps:$4 sm:$0xff]  }
 0x3bb   : > { %11896 = vmatpush1.bf16.msra.mxu1 %v14576_v8  ;;  %v14672_v8 = vld [vmem:[%s16648_s7 + $0x940] ss:$8 sps:$4 sm:$0xff]  }
 0x3bc   : > { %12412 = vmatpush1.bf16.msra.mxu0 %v14579_v9  ;;  %11897 = vmatprep.subr.bf16.mxu1 %v14584_v10  ;;  %v14675_v9 = vld [vmem:[%s16648_s7 + $0x1540] ss:$8 sps:$4 sm:$0xff]   ;;  %v14680_v10 = vld [vmem:[%s16648_s7 + $0x954] ss:$8 sps:$4 sm:$0xff]  }
 0x3bd   : > { %12413 = vmatprep.subr.bf16.mxu0 %v14587_v11  ;;  %v14683_v11 = vld [vmem:[%s16648_s7 + $0x1554] ss:$8 sps:$4 sm:$0xff]  }
 0x3bf   : > { %11898 = vmatpush1.bf16.msra.mxu1 %v14582_v12  ;;  %v14678_v12 = vld [vmem:[%s16648_s7 + $0x950] ss:$8 sps:$4 sm:$0xff]  }
 0x3c0   : > { %12414 = vmatpush1.bf16.msra.mxu0 %v14585_v13  ;;  %11899 = vmatprep.subr.bf16.mxu1 %v14590_v14  ;;  %v14681_v13 = vld [vmem:[%s16648_s7 + $0x1550] ss:$8 sps:$4 sm:$0xff]   ;;  %v14686_v14 = vld [vmem:[%s16648_s7 + $0x964] ss:$8 sps:$4 sm:$0xff]  }
 0x3c1   : > { %12415 = vmatprep.subr.bf16.mxu0 %v14593_v15  ;;  %v14689_v15 = vld [vmem:[%s16648_s7 + $0x1564] ss:$8 sps:$4 sm:$0xff]  }
 0x3c3   : > { %11900 = vmatpush1.bf16.msra.mxu1 %v14588_v16  ;;  %v14684_v16 = vld [vmem:[%s16648_s7 + $0x960] ss:$8 sps:$4 sm:$0xff]  }
 0x3c4   : > { %12416 = vmatpush1.bf16.msra.mxu0 %v14591_v17  ;;  %11901 = vmatprep.subr.bf16.mxu1 %v14596_v18  ;;  %v14687_v17 = vld [vmem:[%s16648_s7 + $0x1560] ss:$8 sps:$4 sm:$0xff]   ;;  %v14692_v18 = vld [vmem:[%s16648_s7 + $0x974] ss:$8 sps:$4 sm:$0xff]  }
 0x3c5   : > { %12417 = vmatprep.subr.bf16.mxu0 %v14599_v19  ;;  %v14695_v19 = vld [vmem:[%s16648_s7 + $0x1574] ss:$8 sps:$4 sm:$0xff]  }
 0x3c7   : > { %11902 = vmatpush1.bf16.msra.mxu1 %v14594_v20  ;;  %v14690_v20 = vld [vmem:[%s16648_s7 + $0x970] ss:$8 sps:$4 sm:$0xff]  }
 0x3c8   : > { %12418 = vmatpush1.bf16.msra.mxu0 %v14597_v21  ;;  %11903 = vmatprep.subr.bf16.mxu1 %v14602_v22  ;;  %v14693_v21 = vld [vmem:[%s16648_s7 + $0x1570] ss:$8 sps:$4 sm:$0xff]   ;;  %v14698_v22 = vld [vmem:[%s16648_s7 + $0x984] ss:$8 sps:$4 sm:$0xff]  }
 0x3c9   : > { %12419 = vmatprep.subr.bf16.mxu0 %v14605_v23  ;;  %v14701_v23 = vld [vmem:[%s16648_s7 + $0x1584] ss:$8 sps:$4 sm:$0xff]  }
 0x3cb   : > { %11904 = vmatpush1.bf16.msra.mxu1 %v14600_v24  ;;  %v14696_v24 = vld [vmem:[%s16648_s7 + $0x980] ss:$8 sps:$4 sm:$0xff]  }
 0x3cc   : > { %12420 = vmatpush1.bf16.msra.mxu0 %v14603_v25  ;;  %11905 = vmatprep.subr.bf16.mxu1 %v14608_v26  ;;  %v14699_v25 = vld [vmem:[%s16648_s7 + $0x1580] ss:$8 sps:$4 sm:$0xff]   ;;  %v14704_v26 = vld [vmem:[%s16648_s7 + $0x994] ss:$8 sps:$4 sm:$0xff]  }
 0x3cd   : > { %12421 = vmatprep.subr.bf16.mxu0 %v14611_v27  ;;  %v14707_v27 = vld [vmem:[%s16648_s7 + $0x1594] ss:$8 sps:$4 sm:$0xff]  }
 0x3cf   : > { %11906 = vmatpush1.bf16.msra.mxu1 %v14606_v28  ;;  %v14702_v28 = vld [vmem:[%s16648_s7 + $0x990] ss:$8 sps:$4 sm:$0xff]  }
 0x3d0   : > { %12422 = vmatpush1.bf16.msra.mxu0 %v14609_v29  ;;  %11907 = vmatprep.subr.bf16.mxu1 %v14614_v30  ;;  %v14705_v29 = vld [vmem:[%s16648_s7 + $0x1590] ss:$8 sps:$4 sm:$0xff]   ;;  %v14710_v30 = vld [vmem:[%s16648_s7 + $0x9a4] ss:$8 sps:$4 sm:$0xff]  }
 0x3d1   : > { %12423 = vmatprep.subr.bf16.mxu0 %v14617_v31  ;;  %v14713_v31 = vld [vmem:[%s16648_s7 + $0x15a4] ss:$8 sps:$4 sm:$0xff]  }
 0x3d3   : > { %11908 = vmatpush1.bf16.msra.mxu1 %v14612_v32  ;;  %v14708_v32 = vld [vmem:[%s16648_s7 + $0x9a0] ss:$8 sps:$4 sm:$0xff]  }
 0x3d4   : > { %12424 = vmatpush1.bf16.msra.mxu0 %v14615_v33  ;;  %11909 = vmatprep.subr.bf16.mxu1 %v14620_v34  ;;  %v14711_v33 = vld [vmem:[%s16648_s7 + $0x15a0] ss:$8 sps:$4 sm:$0xff]   ;;  %v14716_v34 = vld [vmem:[%s16648_s7 + $0x9b4] ss:$8 sps:$4 sm:$0xff]  }
 0x3d5   : > { %12425 = vmatprep.subr.bf16.mxu0 %v14623_v35  ;;  %v14719_v35 = vld [vmem:[%s16648_s7 + $0x15b4] ss:$8 sps:$4 sm:$0xff]  }
 0x3d7   : > { %11910 = vmatpush1.bf16.msra.mxu1 %v14618_v36  ;;  %v14714_v36 = vld [vmem:[%s16648_s7 + $0x9b0] ss:$8 sps:$4 sm:$0xff]  }
 0x3d8   : > { %12426 = vmatpush1.bf16.msra.mxu0 %v14621_v37  ;;  %11911 = vmatprep.subr.bf16.mxu1 %v14626_v38  ;;  %v14717_v37 = vld [vmem:[%s16648_s7 + $0x15b0] ss:$8 sps:$4 sm:$0xff]   ;;  %v14722_v38 = vld [vmem:[%s16648_s7 + $0x9c4] ss:$8 sps:$4 sm:$0xff]  }
 0x3d9   : > { %12427 = vmatprep.subr.bf16.mxu0 %v14629_v39  ;;  %v14725_v39 = vld [vmem:[%s16648_s7 + $0x15c4] ss:$8 sps:$4 sm:$0xff]  }
 0x3db   : > { %11912 = vmatpush1.bf16.msra.mxu1 %v14624_v40  ;;  %v14720_v40 = vld [vmem:[%s16648_s7 + $0x9c0] ss:$8 sps:$4 sm:$0xff]  }
 0x3dc   : > { %12428 = vmatpush1.bf16.msra.mxu0 %v14627_v41  ;;  %11913 = vmatprep.subr.bf16.mxu1 %v14632_v42  ;;  %v14723_v41 = vld [vmem:[%s16648_s7 + $0x15c0] ss:$8 sps:$4 sm:$0xff]   ;;  %v14728_v42 = vld [vmem:[%s16648_s7 + $0x9d4] ss:$8 sps:$4 sm:$0xff]  }
 0x3dd   : > { %12429 = vmatprep.subr.bf16.mxu0 %v14635_v43  ;;  %v14731_v43 = vld [vmem:[%s16648_s7 + $0x15d4] ss:$8 sps:$4 sm:$0xff]  }
 0x3df   : > { %11914 = vmatpush1.bf16.msra.mxu1 %v14630_v44  ;;  %v14726_v44 = vld [vmem:[%s16648_s7 + $0x9d0] ss:$8 sps:$4 sm:$0xff]  }
 0x3e0   : > { %12430 = vmatpush1.bf16.msra.mxu0 %v14633_v45  ;;  %11915 = vmatprep.subr.bf16.mxu1 %v14638_v46  ;;  %v14729_v45 = vld [vmem:[%s16648_s7 + $0x15d0] ss:$8 sps:$4 sm:$0xff]   ;;  %v14734_v46 = vld [vmem:[%s16648_s7 + $0x9e4] ss:$8 sps:$4 sm:$0xff]  }
 0x3e1   : > { %12431 = vmatprep.subr.bf16.mxu0 %v14641_v47  ;;  %v14737_v47 = vld [vmem:[%s16648_s7 + $0x15e4] ss:$8 sps:$4 sm:$0xff]  }
 0x3e3   : > { %11916 = vmatpush1.bf16.msra.mxu1 %v14636_v48  ;;  %v14732_v48 = vld [vmem:[%s16648_s7 + $0x9e0] ss:$8 sps:$4 sm:$0xff]  }
 0x3e4   : > { %12432 = vmatpush1.bf16.msra.mxu0 %v14639_v49  ;;  %11928 = vmatprep.subr.bf16.mxu1 %v14647_v50  ;;  %v14735_v49 = vld [vmem:[%s16648_s7 + $0x15e0] ss:$8 sps:$4 sm:$0xff]   ;;  %v14740_v50 = vld [vmem:[%s16648_s7 + $0x9f4] ss:$8 sps:$4 sm:$0xff]  }
 0x3e5   : > { %12444 = vmatprep.subr.bf16.mxu0 %v14653_v51  ;;  %v14743_v51 = vld [vmem:[%s16648_s7 + $0x15f4] ss:$8 sps:$4 sm:$0xff]  }
 0x3e6   : > { %11918 = vmatmul.mubr.bf16.vlgmr.msra.gmra.mrb[0].mxu1 %v14642_v52  ;;  %v14738_v52 = vld [vmem:[%s16648_s7 + $0x9f0] ss:$8 sps:$4 sm:$0xff]  }
 0x3e7   : > { %12434 = vmatmul.mubr.bf16.vlgmr.msra.gmra.mrb[0].mxu0 %v14648_v53  ;;  %11929 = vmatpush1.bf16.msra.mxu1 %v14645_v54  ;;  %v14741_v53 = vld [vmem:[%s16648_s7 + $0x15f0] ss:$8 sps:$4 sm:$0xff]   ;;  %v14749_v54 = vld [vmem:[%s16648_s7 + $0xa04] ss:$8 sps:$4 sm:$0xff]  }
 0x3e8   : > { %12445 = vmatpush1.bf16.msra.mxu0 %v14651_v55  ;;  %11930 = vmatprep.subr.bf16.mxu1 %v14656_v56  ;;  %v14755_v55 = vld [vmem:[%s16648_s7 + $0x1604] ss:$8 sps:$4 sm:$0xff]  }
 0x3e9   : > { %12446 = vmatprep.subr.bf16.mxu0 %v14659_v57  ;;  %11960 = vmatprep.mubr.bf16.mxu1 %v14746_v58  ;;  %v14744_v56 = vld [vmem:[%s17597_s0 + $0x48] ss:$196 sps:$4 sm:$0xff]  }
 0x3ea   : > { %12476 = vmatprep.mubr.bf16.mxu0 %v14752_v59  ;;  %v14750_v57 = vld [vmem:[%s17597_s0 + $0xa8] ss:$196 sps:$4 sm:$0xff]  }
 0x3eb   : > { %11931 = vmatpush1.bf16.msra.mxu1 %v14654_v60  ;;  %v14747_v58 = vld [vmem:[%s16648_s7 + $0xa00] ss:$8 sps:$4 sm:$0xff]   ;;  %v14758_v60 = vld [vmem:[%s16648_s7 + $0xa14] ss:$8 sps:$4 sm:$0xff]  }
 0x3ec   : > { %12447 = vmatpush1.bf16.msra.mxu0 %v14657_v61  ;;  %11932 = vmatprep.subr.bf16.mxu1 %v14662_v62  ;;  %v14753_v59 = vld [vmem:[%s16648_s7 + $0x1600] ss:$8 sps:$4 sm:$0xff]   ;;  %v14761_v61 = vld [vmem:[%s16648_s7 + $0x1614] ss:$8 sps:$4 sm:$0xff]  }
 0x3ed   : > { %12448 = vmatprep.subr.bf16.mxu0 %v14665_v63  ;;  %v14848_v62 = vld [vmem:[%s17597_s0 + $0x54] ss:$196 sps:$4 sm:$0xff]  }
 0x3ee   : > { %v14854_v63 = vld [vmem:[%s17597_s0 + $0xb4] ss:$196 sps:$4 sm:$0xff]  }
 0x3ef   : > { %11933 = vmatpush1.bf16.msra.mxu1 %v14660_v0  ;;  %v14756_v0 = vld [vmem:[%s16648_s7 + $0xa10] ss:$8 sps:$4 sm:$0xff]  }
 0x3f0   : > { %12449 = vmatpush1.bf16.msra.mxu0 %v14663_v1  ;;  %11934 = vmatprep.subr.bf16.mxu1 %v14668_v2  ;;  %v14759_v1 = vld [vmem:[%s16648_s7 + $0x1610] ss:$8 sps:$4 sm:$0xff]   ;;  %v14764_v2 = vld [vmem:[%s16648_s7 + $0xa24] ss:$8 sps:$4 sm:$0xff]  }
 0x3f1   : > { %12450 = vmatprep.subr.bf16.mxu0 %v14671_v3  ;;  %v14767_v3 = vld [vmem:[%s16648_s7 + $0x1624] ss:$8 sps:$4 sm:$0xff]  }
 0x3f3   : > { %11935 = vmatpush1.bf16.msra.mxu1 %v14666_v4  ;;  %v14762_v4 = vld [vmem:[%s16648_s7 + $0xa20] ss:$8 sps:$4 sm:$0xff]  }
 0x3f4   : > { %12451 = vmatpush1.bf16.msra.mxu0 %v14669_v5  ;;  %11936 = vmatprep.subr.bf16.mxu1 %v14674_v6  ;;  %v14765_v5 = vld [vmem:[%s16648_s7 + $0x1620] ss:$8 sps:$4 sm:$0xff]   ;;  %v14770_v6 = vld [vmem:[%s16648_s7 + $0xa34] ss:$8 sps:$4 sm:$0xff]  }
 0x3f5   : > { %12452 = vmatprep.subr.bf16.mxu0 %v14677_v7  ;;  %v14773_v7 = vld [vmem:[%s16648_s7 + $0x1634] ss:$8 sps:$4 sm:$0xff]  }
 0x3f7   : > { %11937 = vmatpush1.bf16.msra.mxu1 %v14672_v8  ;;  %v14768_v8 = vld [vmem:[%s16648_s7 + $0xa30] ss:$8 sps:$4 sm:$0xff]  }
 0x3f8   : > { %12453 = vmatpush1.bf16.msra.mxu0 %v14675_v9  ;;  %11938 = vmatprep.subr.bf16.mxu1 %v14680_v10  ;;  %v14771_v9 = vld [vmem:[%s16648_s7 + $0x1630] ss:$8 sps:$4 sm:$0xff]   ;;  %v14776_v10 = vld [vmem:[%s16648_s7 + $0xa44] ss:$8 sps:$4 sm:$0xff]  }
 0x3f9   : > { %12454 = vmatprep.subr.bf16.mxu0 %v14683_v11  ;;  %v14779_v11 = vld [vmem:[%s16648_s7 + $0x1644] ss:$8 sps:$4 sm:$0xff]  }
 0x3fb   : > { %11939 = vmatpush1.bf16.msra.mxu1 %v14678_v12  ;;  %v14774_v12 = vld [vmem:[%s16648_s7 + $0xa40] ss:$8 sps:$4 sm:$0xff]  }
 0x3fc   : > { %12455 = vmatpush1.bf16.msra.mxu0 %v14681_v13  ;;  %11940 = vmatprep.subr.bf16.mxu1 %v14686_v14  ;;  %v14777_v13 = vld [vmem:[%s16648_s7 + $0x1640] ss:$8 sps:$4 sm:$0xff]   ;;  %v14782_v14 = vld [vmem:[%s16648_s7 + $0xa54] ss:$8 sps:$4 sm:$0xff]  }
 0x3fd   : > { %12456 = vmatprep.subr.bf16.mxu0 %v14689_v15  ;;  %v14785_v15 = vld [vmem:[%s16648_s7 + $0x1654] ss:$8 sps:$4 sm:$0xff]  }
 0x3ff   : > { %11941 = vmatpush1.bf16.msra.mxu1 %v14684_v16  ;;  %v14780_v16 = vld [vmem:[%s16648_s7 + $0xa50] ss:$8 sps:$4 sm:$0xff]  }
 0x400   : > { %12457 = vmatpush1.bf16.msra.mxu0 %v14687_v17  ;;  %11942 = vmatprep.subr.bf16.mxu1 %v14692_v18  ;;  %v14783_v17 = vld [vmem:[%s16648_s7 + $0x1650] ss:$8 sps:$4 sm:$0xff]   ;;  %v14788_v18 = vld [vmem:[%s16648_s7 + $0xa64] ss:$8 sps:$4 sm:$0xff]  }
 0x401   : > { %12458 = vmatprep.subr.bf16.mxu0 %v14695_v19  ;;  %v14791_v19 = vld [vmem:[%s16648_s7 + $0x1664] ss:$8 sps:$4 sm:$0xff]  }
 0x403   : > { %11943 = vmatpush1.bf16.msra.mxu1 %v14690_v20  ;;  %v14786_v20 = vld [vmem:[%s16648_s7 + $0xa60] ss:$8 sps:$4 sm:$0xff]  }
 0x404   : > { %12459 = vmatpush1.bf16.msra.mxu0 %v14693_v21  ;;  %11944 = vmatprep.subr.bf16.mxu1 %v14698_v22  ;;  %v14789_v21 = vld [vmem:[%s16648_s7 + $0x1660] ss:$8 sps:$4 sm:$0xff]   ;;  %v14794_v22 = vld [vmem:[%s16648_s7 + $0xa74] ss:$8 sps:$4 sm:$0xff]  }
 0x405   : > { %12460 = vmatprep.subr.bf16.mxu0 %v14701_v23  ;;  %v14797_v23 = vld [vmem:[%s16648_s7 + $0x1674] ss:$8 sps:$4 sm:$0xff]  }
 0x407   : > { %11945 = vmatpush1.bf16.msra.mxu1 %v14696_v24  ;;  %v14792_v24 = vld [vmem:[%s16648_s7 + $0xa70] ss:$8 sps:$4 sm:$0xff]  }
 0x408   : > { %12461 = vmatpush1.bf16.msra.mxu0 %v14699_v25  ;;  %11946 = vmatprep.subr.bf16.mxu1 %v14704_v26  ;;  %v14795_v25 = vld [vmem:[%s16648_s7 + $0x1670] ss:$8 sps:$4 sm:$0xff]   ;;  %v14800_v26 = vld [vmem:[%s16648_s7 + $0xa84] ss:$8 sps:$4 sm:$0xff]  }
 0x409   : > { %12462 = vmatprep.subr.bf16.mxu0 %v14707_v27  ;;  %v14803_v27 = vld [vmem:[%s16648_s7 + $0x1684] ss:$8 sps:$4 sm:$0xff]  }
 0x40b   : > { %11947 = vmatpush1.bf16.msra.mxu1 %v14702_v28  ;;  %v14798_v28 = vld [vmem:[%s16648_s7 + $0xa80] ss:$8 sps:$4 sm:$0xff]  }
 0x40c   : > { %12463 = vmatpush1.bf16.msra.mxu0 %v14705_v29  ;;  %11948 = vmatprep.subr.bf16.mxu1 %v14710_v30  ;;  %v14801_v29 = vld [vmem:[%s16648_s7 + $0x1680] ss:$8 sps:$4 sm:$0xff]   ;;  %v14806_v30 = vld [vmem:[%s16648_s7 + $0xa94] ss:$8 sps:$4 sm:$0xff]  }
 0x40d   : > { %12464 = vmatprep.subr.bf16.mxu0 %v14713_v31  ;;  %v14809_v31 = vld [vmem:[%s16648_s7 + $0x1694] ss:$8 sps:$4 sm:$0xff]  }
 0x40f   : > { %11949 = vmatpush1.bf16.msra.mxu1 %v14708_v32  ;;  %v14804_v32 = vld [vmem:[%s16648_s7 + $0xa90] ss:$8 sps:$4 sm:$0xff]  }
 0x410   : > { %12465 = vmatpush1.bf16.msra.mxu0 %v14711_v33  ;;  %11950 = vmatprep.subr.bf16.mxu1 %v14716_v34  ;;  %v14807_v33 = vld [vmem:[%s16648_s7 + $0x1690] ss:$8 sps:$4 sm:$0xff]   ;;  %v14812_v34 = vld [vmem:[%s16648_s7 + $0xaa4] ss:$8 sps:$4 sm:$0xff]  }
 0x411   : > { %12466 = vmatprep.subr.bf16.mxu0 %v14719_v35  ;;  %v14815_v35 = vld [vmem:[%s16648_s7 + $0x16a4] ss:$8 sps:$4 sm:$0xff]  }
 0x413   : > { %11951 = vmatpush1.bf16.msra.mxu1 %v14714_v36  ;;  %v14810_v36 = vld [vmem:[%s16648_s7 + $0xaa0] ss:$8 sps:$4 sm:$0xff]  }
 0x414   : > { %12467 = vmatpush1.bf16.msra.mxu0 %v14717_v37  ;;  %11952 = vmatprep.subr.bf16.mxu1 %v14722_v38  ;;  %v14813_v37 = vld [vmem:[%s16648_s7 + $0x16a0] ss:$8 sps:$4 sm:$0xff]   ;;  %v14818_v38 = vld [vmem:[%s16648_s7 + $0xab4] ss:$8 sps:$4 sm:$0xff]  }
 0x415   : > { %12468 = vmatprep.subr.bf16.mxu0 %v14725_v39  ;;  %v14821_v39 = vld [vmem:[%s16648_s7 + $0x16b4] ss:$8 sps:$4 sm:$0xff]  }
 0x417   : > { %11953 = vmatpush1.bf16.msra.mxu1 %v14720_v40  ;;  %v14816_v40 = vld [vmem:[%s16648_s7 + $0xab0] ss:$8 sps:$4 sm:$0xff]  }
 0x418   : > { %12469 = vmatpush1.bf16.msra.mxu0 %v14723_v41  ;;  %11954 = vmatprep.subr.bf16.mxu1 %v14728_v42  ;;  %v14819_v41 = vld [vmem:[%s16648_s7 + $0x16b0] ss:$8 sps:$4 sm:$0xff]   ;;  %v14824_v42 = vld [vmem:[%s16648_s7 + $0xac4] ss:$8 sps:$4 sm:$0xff]  }
 0x419   : > { %12470 = vmatprep.subr.bf16.mxu0 %v14731_v43  ;;  %v14827_v43 = vld [vmem:[%s16648_s7 + $0x16c4] ss:$8 sps:$4 sm:$0xff]  }
 0x41b   : > { %11955 = vmatpush1.bf16.msra.mxu1 %v14726_v44  ;;  %v14822_v44 = vld [vmem:[%s16648_s7 + $0xac0] ss:$8 sps:$4 sm:$0xff]  }
 0x41c   : > { %12471 = vmatpush1.bf16.msra.mxu0 %v14729_v45  ;;  %11956 = vmatprep.subr.bf16.mxu1 %v14734_v46  ;;  %v14825_v45 = vld [vmem:[%s16648_s7 + $0x16c0] ss:$8 sps:$4 sm:$0xff]   ;;  %v14830_v46 = vld [vmem:[%s16648_s7 + $0xad4] ss:$8 sps:$4 sm:$0xff]  }
 0x41d   : > { %12472 = vmatprep.subr.bf16.mxu0 %v14737_v47  ;;  %v14833_v47 = vld [vmem:[%s16648_s7 + $0x16d4] ss:$8 sps:$4 sm:$0xff]  }
 0x41f   : > { %11957 = vmatpush1.bf16.msra.mxu1 %v14732_v48  ;;  %v14828_v48 = vld [vmem:[%s16648_s7 + $0xad0] ss:$8 sps:$4 sm:$0xff]  }
 0x420   : > { %12473 = vmatpush1.bf16.msra.mxu0 %v14735_v49  ;;  %11958 = vmatprep.subr.bf16.mxu1 %v14740_v50  ;;  %v14831_v49 = vld [vmem:[%s16648_s7 + $0x16d0] ss:$8 sps:$4 sm:$0xff]   ;;  %v14836_v50 = vld [vmem:[%s16648_s7 + $0xae4] ss:$8 sps:$4 sm:$0xff]  }
 0x421   : > { %12474 = vmatprep.subr.bf16.mxu0 %v14743_v51  ;;  %v14839_v51 = vld [vmem:[%s16648_s7 + $0x16e4] ss:$8 sps:$4 sm:$0xff]  }
 0x423   : > { %11959 = vmatpush1.bf16.msra.mxu1 %v14738_v52  ;;  %v14834_v52 = vld [vmem:[%s16648_s7 + $0xae0] ss:$8 sps:$4 sm:$0xff]  }
 0x424   : > { %12475 = vmatpush1.bf16.msra.mxu0 %v14741_v53  ;;  %11971 = vmatprep.subr.bf16.mxu1 %v14749_v54  ;;  %v14837_v53 = vld [vmem:[%s16648_s7 + $0x16e0] ss:$8 sps:$4 sm:$0xff]   ;;  %v14842_v54 = vld [vmem:[%s16648_s7 + $0xaf4] ss:$8 sps:$4 sm:$0xff]  }
 0x425   : > { %12487 = vmatprep.subr.bf16.mxu0 %v14755_v55  ;;  %v14845_v55 = vld [vmem:[%s16648_s7 + $0x16f4] ss:$8 sps:$4 sm:$0xff]  }
 0x426   : > { %11961 = vmatmul.mubr.bf16.vlgmr.msra.gmra.mrb[0].mxu1 %v14744_v56  ;;  %v14840_v56 = vld [vmem:[%s16648_s7 + $0xaf0] ss:$8 sps:$4 sm:$0xff]  }
 0x427   : > { %12477 = vmatmul.mubr.bf16.vlgmr.msra.gmra.mrb[0].mxu0 %v14750_v57  ;;  %11972 = vmatpush1.bf16.msra.mxu1 %v14747_v58  ;;  %v14843_v57 = vld [vmem:[%s16648_s7 + $0x16f0] ss:$8 sps:$4 sm:$0xff]   ;;  %v14851_v58 = vld [vmem:[%s16648_s7 + $0xb04] ss:$8 sps:$4 sm:$0xff]  }
 0x428   : > { %12488 = vmatpush1.bf16.msra.mxu0 %v14753_v59  ;;  %11973 = vmatprep.subr.bf16.mxu1 %v14758_v60  ;;  %v14857_v59 = vld [vmem:[%s16648_s7 + $0x1704] ss:$8 sps:$4 sm:$0xff]   ;;  %v14846_v60 = vld [vmem:[%s17597_s0 + $0x50] ss:$196 sps:$4 sm:$0xff]  }
 0x429   : > { %12489 = vmatprep.subr.bf16.mxu0 %v14761_v61  ;;  %12003 = vmatprep.mubr.bf16.mxu1 %v14848_v62  ;;  %v14852_v61 = vld [vmem:[%s17597_s0 + $0xb0] ss:$196 sps:$4 sm:$0xff]   ;;  %v14849_v62 = vld [vmem:[%s16648_s7 + $0xb00] ss:$8 sps:$4 sm:$0xff]  }
 0x42a   : > { %12519 = vmatprep.mubr.bf16.mxu0 %v14854_v63  ;;  %v14855_v63 = vld [vmem:[%s16648_s7 + $0x1700] ss:$8 sps:$4 sm:$0xff]  }
 0x42b   : > { %11974 = vmatpush1.bf16.msra.mxu1 %v14756_v0  ;;  %v14860_v0 = vld [vmem:[%s16648_s7 + $0xb14] ss:$8 sps:$4 sm:$0xff]  }
 0x42c   : > { %12490 = vmatpush1.bf16.msra.mxu0 %v14759_v1  ;;  %11975 = vmatprep.subr.bf16.mxu1 %v14764_v2  ;;  %v14863_v1 = vld [vmem:[%s16648_s7 + $0x1714] ss:$8 sps:$4 sm:$0xff]  }
 0x42d   : > { %12491 = vmatprep.subr.bf16.mxu0 %v14767_v3  ;;  %v14950_v2 = vld [vmem:[%s17597_s0 + $0x5c] ss:$196 sps:$4 sm:$0xff]  }
 0x42e   : > { %v14953_v3 = vld [vmem:[%s17597_s0 + $0xbc] ss:$196 sps:$4 sm:$0xff]  }
 0x42f   : > { %11976 = vmatpush1.bf16.msra.mxu1 %v14762_v4  ;;  %v14858_v4 = vld [vmem:[%s16648_s7 + $0xb10] ss:$8 sps:$4 sm:$0xff]  }
 0x430   : > { %12492 = vmatpush1.bf16.msra.mxu0 %v14765_v5  ;;  %11977 = vmatprep.subr.bf16.mxu1 %v14770_v6  ;;  %v14861_v5 = vld [vmem:[%s16648_s7 + $0x1710] ss:$8 sps:$4 sm:$0xff]   ;;  %v14866_v6 = vld [vmem:[%s16648_s7 + $0xb24] ss:$8 sps:$4 sm:$0xff]  }
 0x431   : > { %12493 = vmatprep.subr.bf16.mxu0 %v14773_v7  ;;  %v14869_v7 = vld [vmem:[%s16648_s7 + $0x1724] ss:$8 sps:$4 sm:$0xff]  }
 0x433   : > { %11978 = vmatpush1.bf16.msra.mxu1 %v14768_v8  ;;  %v14864_v8 = vld [vmem:[%s16648_s7 + $0xb20] ss:$8 sps:$4 sm:$0xff]  }
 0x434   : > { %12494 = vmatpush1.bf16.msra.mxu0 %v14771_v9  ;;  %11979 = vmatprep.subr.bf16.mxu1 %v14776_v10  ;;  %v14867_v9 = vld [vmem:[%s16648_s7 + $0x1720] ss:$8 sps:$4 sm:$0xff]   ;;  %v14872_v10 = vld [vmem:[%s16648_s7 + $0xb34] ss:$8 sps:$4 sm:$0xff]  }
 0x435   : > { %12495 = vmatprep.subr.bf16.mxu0 %v14779_v11  ;;  %v14875_v11 = vld [vmem:[%s16648_s7 + $0x1734] ss:$8 sps:$4 sm:$0xff]  }
 0x437   : > { %11980 = vmatpush1.bf16.msra.mxu1 %v14774_v12  ;;  %v14870_v12 = vld [vmem:[%s16648_s7 + $0xb30] ss:$8 sps:$4 sm:$0xff]  }
 0x438   : > { %12496 = vmatpush1.bf16.msra.mxu0 %v14777_v13  ;;  %11981 = vmatprep.subr.bf16.mxu1 %v14782_v14  ;;  %v14873_v13 = vld [vmem:[%s16648_s7 + $0x1730] ss:$8 sps:$4 sm:$0xff]   ;;  %v14878_v14 = vld [vmem:[%s16648_s7 + $0xb44] ss:$8 sps:$4 sm:$0xff]  }
 0x439   : > { %12497 = vmatprep.subr.bf16.mxu0 %v14785_v15  ;;  %v14881_v15 = vld [vmem:[%s16648_s7 + $0x1744] ss:$8 sps:$4 sm:$0xff]  }
 0x43b   : > { %11982 = vmatpush1.bf16.msra.mxu1 %v14780_v16  ;;  %v14876_v16 = vld [vmem:[%s16648_s7 + $0xb40] ss:$8 sps:$4 sm:$0xff]  }
 0x43c   : > { %12498 = vmatpush1.bf16.msra.mxu0 %v14783_v17  ;;  %11983 = vmatprep.subr.bf16.mxu1 %v14788_v18  ;;  %v14879_v17 = vld [vmem:[%s16648_s7 + $0x1740] ss:$8 sps:$4 sm:$0xff]   ;;  %v14884_v18 = vld [vmem:[%s16648_s7 + $0xb54] ss:$8 sps:$4 sm:$0xff]  }
 0x43d   : > { %12499 = vmatprep.subr.bf16.mxu0 %v14791_v19  ;;  %v14887_v19 = vld [vmem:[%s16648_s7 + $0x1754] ss:$8 sps:$4 sm:$0xff]  }
 0x43f   : > { %11984 = vmatpush1.bf16.msra.mxu1 %v14786_v20  ;;  %v14882_v20 = vld [vmem:[%s16648_s7 + $0xb50] ss:$8 sps:$4 sm:$0xff]  }
 0x440   : > { %12500 = vmatpush1.bf16.msra.mxu0 %v14789_v21  ;;  %11985 = vmatprep.subr.bf16.mxu1 %v14794_v22  ;;  %v14885_v21 = vld [vmem:[%s16648_s7 + $0x1750] ss:$8 sps:$4 sm:$0xff]   ;;  %v14890_v22 = vld [vmem:[%s16648_s7 + $0xb64] ss:$8 sps:$4 sm:$0xff]  }
 0x441   : > { %12501 = vmatprep.subr.bf16.mxu0 %v14797_v23  ;;  %v14893_v23 = vld [vmem:[%s16648_s7 + $0x1764] ss:$8 sps:$4 sm:$0xff]  }
 0x443   : > { %11986 = vmatpush1.bf16.msra.mxu1 %v14792_v24  ;;  %v14888_v24 = vld [vmem:[%s16648_s7 + $0xb60] ss:$8 sps:$4 sm:$0xff]  }
 0x444   : > { %12502 = vmatpush1.bf16.msra.mxu0 %v14795_v25  ;;  %11987 = vmatprep.subr.bf16.mxu1 %v14800_v26  ;;  %v14891_v25 = vld [vmem:[%s16648_s7 + $0x1760] ss:$8 sps:$4 sm:$0xff]   ;;  %v14896_v26 = vld [vmem:[%s16648_s7 + $0xb74] ss:$8 sps:$4 sm:$0xff]  }
 0x445   : > { %12503 = vmatprep.subr.bf16.mxu0 %v14803_v27  ;;  %v14899_v27 = vld [vmem:[%s16648_s7 + $0x1774] ss:$8 sps:$4 sm:$0xff]  }
 0x447   : > { %11988 = vmatpush1.bf16.msra.mxu1 %v14798_v28  ;;  %v14894_v28 = vld [vmem:[%s16648_s7 + $0xb70] ss:$8 sps:$4 sm:$0xff]  }
 0x448   : > { %12504 = vmatpush1.bf16.msra.mxu0 %v14801_v29  ;;  %11989 = vmatprep.subr.bf16.mxu1 %v14806_v30  ;;  %v14897_v29 = vld [vmem:[%s16648_s7 + $0x1770] ss:$8 sps:$4 sm:$0xff]   ;;  %v14902_v30 = vld [vmem:[%s16648_s7 + $0xb84] ss:$8 sps:$4 sm:$0xff]  }
 0x449   : > { %12505 = vmatprep.subr.bf16.mxu0 %v14809_v31  ;;  %v14905_v31 = vld [vmem:[%s16648_s7 + $0x1784] ss:$8 sps:$4 sm:$0xff]  }
 0x44b   : > { %11990 = vmatpush1.bf16.msra.mxu1 %v14804_v32  ;;  %v14900_v32 = vld [vmem:[%s16648_s7 + $0xb80] ss:$8 sps:$4 sm:$0xff]  }
 0x44c   : > { %12506 = vmatpush1.bf16.msra.mxu0 %v14807_v33  ;;  %11991 = vmatprep.subr.bf16.mxu1 %v14812_v34  ;;  %v14903_v33 = vld [vmem:[%s16648_s7 + $0x1780] ss:$8 sps:$4 sm:$0xff]   ;;  %v14908_v34 = vld [vmem:[%s16648_s7 + $0xb94] ss:$8 sps:$4 sm:$0xff]  }
 0x44d   : > { %12507 = vmatprep.subr.bf16.mxu0 %v14815_v35  ;;  %v14911_v35 = vld [vmem:[%s16648_s7 + $0x1794] ss:$8 sps:$4 sm:$0xff]  }
 0x44f   : > { %11992 = vmatpush1.bf16.msra.mxu1 %v14810_v36  ;;  %v14906_v36 = vld [vmem:[%s16648_s7 + $0xb90] ss:$8 sps:$4 sm:$0xff]  }
 0x450   : > { %12508 = vmatpush1.bf16.msra.mxu0 %v14813_v37  ;;  %11993 = vmatprep.subr.bf16.mxu1 %v14818_v38  ;;  %v14909_v37 = vld [vmem:[%s16648_s7 + $0x1790] ss:$8 sps:$4 sm:$0xff]   ;;  %v14914_v38 = vld [vmem:[%s16648_s7 + $0xba4] ss:$8 sps:$4 sm:$0xff]  }
 0x451   : > { %12509 = vmatprep.subr.bf16.mxu0 %v14821_v39  ;;  %v14917_v39 = vld [vmem:[%s16648_s7 + $0x17a4] ss:$8 sps:$4 sm:$0xff]  }
 0x453   : > { %11994 = vmatpush1.bf16.msra.mxu1 %v14816_v40  ;;  %v14912_v40 = vld [vmem:[%s16648_s7 + $0xba0] ss:$8 sps:$4 sm:$0xff]  }
 0x454   : > { %12510 = vmatpush1.bf16.msra.mxu0 %v14819_v41  ;;  %11995 = vmatprep.subr.bf16.mxu1 %v14824_v42  ;;  %v14915_v41 = vld [vmem:[%s16648_s7 + $0x17a0] ss:$8 sps:$4 sm:$0xff]   ;;  %v14920_v42 = vld [vmem:[%s16648_s7 + $0xbb4] ss:$8 sps:$4 sm:$0xff]  }
 0x455   : > { %12511 = vmatprep.subr.bf16.mxu0 %v14827_v43  ;;  %v14923_v43 = vld [vmem:[%s16648_s7 + $0x17b4] ss:$8 sps:$4 sm:$0xff]  }
 0x457   : > { %11996 = vmatpush1.bf16.msra.mxu1 %v14822_v44  ;;  %v14918_v44 = vld [vmem:[%s16648_s7 + $0xbb0] ss:$8 sps:$4 sm:$0xff]  }
 0x458   : > { %12512 = vmatpush1.bf16.msra.mxu0 %v14825_v45  ;;  %11997 = vmatprep.subr.bf16.mxu1 %v14830_v46  ;;  %v14921_v45 = vld [vmem:[%s16648_s7 + $0x17b0] ss:$8 sps:$4 sm:$0xff]   ;;  %v14926_v46 = vld [vmem:[%s16648_s7 + $0xbc4] ss:$8 sps:$4 sm:$0xff]  }
 0x459   : > { %12513 = vmatprep.subr.bf16.mxu0 %v14833_v47  ;;  %v14929_v47 = vld [vmem:[%s16648_s7 + $0x17c4] ss:$8 sps:$4 sm:$0xff]  }
 0x45b   : > { %11998 = vmatpush1.bf16.msra.mxu1 %v14828_v48  ;;  %v14924_v48 = vld [vmem:[%s16648_s7 + $0xbc0] ss:$8 sps:$4 sm:$0xff]  }
 0x45c   : > { %12514 = vmatpush1.bf16.msra.mxu0 %v14831_v49  ;;  %11999 = vmatprep.subr.bf16.mxu1 %v14836_v50  ;;  %v14927_v49 = vld [vmem:[%s16648_s7 + $0x17c0] ss:$8 sps:$4 sm:$0xff]   ;;  %v14932_v50 = vld [vmem:[%s16648_s7 + $0xbd4] ss:$8 sps:$4 sm:$0xff]  }
 0x45d   : > { %12515 = vmatprep.subr.bf16.mxu0 %v14839_v51  ;;  %v14935_v51 = vld [vmem:[%s16648_s7 + $0x17d4] ss:$8 sps:$4 sm:$0xff]  }
 0x45f   : > { %12000 = vmatpush1.bf16.msra.mxu1 %v14834_v52  ;;  %v14930_v52 = vld [vmem:[%s16648_s7 + $0xbd0] ss:$8 sps:$4 sm:$0xff]  }
 0x460   : > { %12516 = vmatpush1.bf16.msra.mxu0 %v14837_v53  ;;  %12001 = vmatprep.subr.bf16.mxu1 %v14842_v54  ;;  %v14933_v53 = vld [vmem:[%s16648_s7 + $0x17d0] ss:$8 sps:$4 sm:$0xff]   ;;  %v14938_v54 = vld [vmem:[%s16648_s7 + $0xbe4] ss:$8 sps:$4 sm:$0xff]  }
 0x461   : > { %12517 = vmatprep.subr.bf16.mxu0 %v14845_v55  ;;  %v14941_v55 = vld [vmem:[%s16648_s7 + $0x17e4] ss:$8 sps:$4 sm:$0xff]  }
 0x463   : > { %12002 = vmatpush1.bf16.msra.mxu1 %v14840_v56  ;;  %v14936_v56 = vld [vmem:[%s16648_s7 + $0xbe0] ss:$8 sps:$4 sm:$0xff]  }
 0x464   : > { %12518 = vmatpush1.bf16.msra.mxu0 %v14843_v57  ;;  %12014 = vmatprep.subr.bf16.mxu1 %v14851_v58  ;;  %v14939_v57 = vld [vmem:[%s16648_s7 + $0x17e0] ss:$8 sps:$4 sm:$0xff]   ;;  %v14944_v58 = vld [vmem:[%s16648_s7 + $0xbf4] ss:$8 sps:$4 sm:$0xff]  }
 0x465   : > { %12530 = vmatprep.subr.bf16.mxu0 %v14857_v59  ;;  %v14947_v59 = vld [vmem:[%s16648_s7 + $0x17f4] ss:$8 sps:$4 sm:$0xff]  }
 0x466   : > { %12004 = vmatmul.mubr.bf16.vlgmr.msra.gmra.mrb[0].mxu1 %v14846_v60  ;;  %v14942_v60 = vld [vmem:[%s16648_s7 + $0xbf0] ss:$8 sps:$4 sm:$0xff]  }
 0x467   : > { %12520 = vmatmul.mubr.bf16.vlgmr.msra.gmra.mrb[0].mxu0 %v14852_v61  ;;  %12015 = vmatpush1.bf16.msra.mxu1 %v14849_v62  ;;  %v14945_v61 = vld [vmem:[%s16648_s7 + $0x17f0] ss:$8 sps:$4 sm:$0xff]   ;;  %v14956_v62 = vld [vmem:[%s16648_s7 + $0x1804] ss:$8 sps:$4 sm:$0xff]  }
 0x468   : > { %12531 = vmatpush1.bf16.msra.mxu0 %v14855_v63  ;;  %12016 = vmatprep.subr.bf16.mxu1 %v14860_v0  ;;  %v14948_v63 = vld [vmem:[%s17597_s0 + $0x58] ss:$196 sps:$4 sm:$0xff]  }
 0x469   : > { %12532 = vmatprep.subr.bf16.mxu0 %v14863_v1  ;;  %12046 = vmatprep.mubr.bf16.mxu1 %v14950_v2  ;;  %v14951_v0 = vld [vmem:[%s17597_s0 + $0xb8] ss:$196 sps:$4 sm:$0xff]   ;;  %v14954_v1 = vld [vmem:[%s16648_s7 + $0x1800] ss:$8 sps:$4 sm:$0xff]  }
 0x46a   : > { %12562 = vmatprep.mubr.bf16.mxu0 %v14953_v3  ;;  %v14959_v2 = vld [vmem:[%s16648_s7 + $0x1814] ss:$8 sps:$4 sm:$0xff]   ;;  %v14957_v3 = vld [vmem:[%s16648_s7 + $0x1810] ss:$8 sps:$4 sm:$0xff]  }
 0x46b   : > { %12017 = vmatpush1.bf16.msra.mxu1 %v14858_v4  ;;  %v15003_v4 = vmov 0  }
 0x46c   : > { %12533 = vmatpush1.bf16.msra.mxu0 %v14861_v5  ;;  %12018 = vmatprep.subr.bf16.mxu1 %v14866_v6  ;;  %v14962_v5 = vld [vmem:[%s16648_s7 + $0x1824] ss:$8 sps:$4 sm:$0xff]   ;;  %v14960_v6 = vld [vmem:[%s16648_s7 + $0x1820] ss:$8 sps:$4 sm:$0xff]  }
 0x46d   : > { %12534 = vmatprep.subr.bf16.mxu0 %v14869_v7  ;;  %v14965_v7 = vld [vmem:[%s16648_s7 + $0x1834] ss:$8 sps:$4 sm:$0xff]  }
 0x46f   : > { %12019 = vmatpush1.bf16.msra.mxu1 %v14864_v8  ;;  %v14963_v8 = vld [vmem:[%s16648_s7 + $0x1830] ss:$8 sps:$4 sm:$0xff]  }
 0x470   : > { %12535 = vmatpush1.bf16.msra.mxu0 %v14867_v9  ;;  %12020 = vmatprep.subr.bf16.mxu1 %v14872_v10  ;;  %v14968_v9 = vld [vmem:[%s16648_s7 + $0x1844] ss:$8 sps:$4 sm:$0xff]   ;;  %v14966_v10 = vld [vmem:[%s16648_s7 + $0x1840] ss:$8 sps:$4 sm:$0xff]  }
 0x471   : > { %12536 = vmatprep.subr.bf16.mxu0 %v14875_v11  ;;  %v14971_v11 = vld [vmem:[%s16648_s7 + $0x1854] ss:$8 sps:$4 sm:$0xff]  }
 0x473   : > { %12021 = vmatpush1.bf16.msra.mxu1 %v14870_v12  ;;  %v14969_v12 = vld [vmem:[%s16648_s7 + $0x1850] ss:$8 sps:$4 sm:$0xff]  }
 0x474   : > { %12537 = vmatpush1.bf16.msra.mxu0 %v14873_v13  ;;  %12022 = vmatprep.subr.bf16.mxu1 %v14878_v14  ;;  %v14974_v13 = vld [vmem:[%s16648_s7 + $0x1864] ss:$8 sps:$4 sm:$0xff]   ;;  %v14972_v14 = vld [vmem:[%s16648_s7 + $0x1860] ss:$8 sps:$4 sm:$0xff]  }
 0x475   : > { %12538 = vmatprep.subr.bf16.mxu0 %v14881_v15  ;;  %v14977_v15 = vld [vmem:[%s16648_s7 + $0x1874] ss:$8 sps:$4 sm:$0xff]  }
 0x477   : > { %12023 = vmatpush1.bf16.msra.mxu1 %v14876_v16  ;;  %v14975_v16 = vld [vmem:[%s16648_s7 + $0x1870] ss:$8 sps:$4 sm:$0xff]   ;;  %s6525_s7 = scalar_lea.vmem %s17599_s2, %s17606_s6 }
 0x478   : > { %12539 = vmatpush1.bf16.msra.mxu0 %v14879_v17  ;;  %12024 = vmatprep.subr.bf16.mxu1 %v14884_v18  ;;  %v14978_v17 = vld [vmem:[%s17597_s0 + $0xc0] ss:$196 sps:$4 sm:$0xff]  }
 0x479   : > { %12540 = vmatprep.subr.bf16.mxu0 %v14887_v19 }
 0x47b   : > { %12025 = vmatpush1.bf16.msra.mxu1 %v14882_v20 }
 0x47c   : > { %12541 = vmatpush1.bf16.msra.mxu0 %v14885_v21  ;;  %12026 = vmatprep.subr.bf16.mxu1 %v14890_v22  ;;  %v7365_v22 = vlaneseq }
 0x47d   : > { %12542 = vmatprep.subr.bf16.mxu0 %v14893_v23 }
 0x47e   : > { %v7366_v23 = vshrl.u32 %v7365_v22, 7 }
 0x47f   : > { %12027 = vmatpush1.bf16.msra.mxu1 %v14888_v24 }
 0x480   : > { %12543 = vmatpush1.bf16.msra.mxu0 %v14891_v25  ;;  %12028 = vmatprep.subr.bf16.mxu1 %v14896_v26  ;;  %v7367_v24 = vsub.s32 0, %v7366_v23  ;;  %v7363_v25 = vld [vmem:[%s6525_s7] sm:$0x3]  ;;  %v7371_v26 = vsub.s32 1, %v7366_v23 }
 0x481   : > { %12544 = vmatprep.subr.bf16.mxu0 %v14899_v27 }
 0x482   : > { %v7368_v27 = vrot.slane %v7363_v25, %v7367_v24 }
 0x483   : > { %12029 = vmatpush1.bf16.msra.mxu1 %v14894_v28  ;;  %v7372_v28 = vrot.slane %v7363_v25, %v7371_v26 }
 0x484   : > { %12545 = vmatpush1.bf16.msra.mxu0 %v14897_v29  ;;  %12030 = vmatprep.subr.bf16.mxu1 %v14902_v30 }
 0x485   : > { %12546 = vmatprep.subr.bf16.mxu0 %v14905_v31 }
 0x487   : > { %12031 = vmatpush1.bf16.msra.mxu1 %v14900_v32 }
 0x488   : > { %12547 = vmatpush1.bf16.msra.mxu0 %v14903_v33  ;;  %12032 = vmatprep.subr.bf16.mxu1 %v14908_v34 }
 0x489   : > { %12548 = vmatprep.subr.bf16.mxu0 %v14911_v35 }
 0x48b   : > { %12033 = vmatpush1.bf16.msra.mxu1 %v14906_v36 }
 0x48c   : > { %12549 = vmatpush1.bf16.msra.mxu0 %v14909_v37  ;;  %12034 = vmatprep.subr.bf16.mxu1 %v14914_v38 }
 0x48d   : > { %12550 = vmatprep.subr.bf16.mxu0 %v14917_v39 }
 0x48f   : > { %12035 = vmatpush1.bf16.msra.mxu1 %v14912_v40 }
 0x490   : > { %12551 = vmatpush1.bf16.msra.mxu0 %v14915_v41  ;;  %12036 = vmatprep.subr.bf16.mxu1 %v14920_v42 }
 0x491   : > { %12552 = vmatprep.subr.bf16.mxu0 %v14923_v43 }
 0x493   : > { %12037 = vmatpush1.bf16.msra.mxu1 %v14918_v44 }
 0x494   : > { %12553 = vmatpush1.bf16.msra.mxu0 %v14921_v45  ;;  %12038 = vmatprep.subr.bf16.mxu1 %v14926_v46 }
 0x495   : > { %12554 = vmatprep.subr.bf16.mxu0 %v14929_v47 }
 0x497   : > { %12039 = vmatpush1.bf16.msra.mxu1 %v14924_v48 }
 0x498   : > { %12555 = vmatpush1.bf16.msra.mxu0 %v14927_v49  ;;  %12040 = vmatprep.subr.bf16.mxu1 %v14932_v50 }
 0x499   : > { %12556 = vmatprep.subr.bf16.mxu0 %v14935_v51 }
 0x49b   : > { %12041 = vmatpush1.bf16.msra.mxu1 %v14930_v52 }
 0x49c   : > { %12557 = vmatpush1.bf16.msra.mxu0 %v14933_v53  ;;  %12042 = vmatprep.subr.bf16.mxu1 %v14938_v54 }
 0x49d   : > { %12558 = vmatprep.subr.bf16.mxu0 %v14941_v55 }
 0x49f   : > { %12043 = vmatpush1.bf16.msra.mxu1 %v14936_v56 }
 0x4a0   : > { %12559 = vmatpush1.bf16.msra.mxu0 %v14939_v57  ;;  %12044 = vmatprep.subr.bf16.mxu1 %v14944_v58 }
 0x4a1   : > { %12560 = vmatprep.subr.bf16.mxu0 %v14947_v59 }
 0x4a3   : > { %12045 = vmatpush1.bf16.msra.mxu1 %v14942_v60 }
 0x4a4   : > { %12561 = vmatpush1.bf16.msra.mxu0 %v14945_v61 }
 0x4a5   : > { %12573 = vmatprep.subr.bf16.mxu0 %v14956_v62 }
 0x4a6   : > { %12047 = vmatmul.mubr.bf16.vlgmr.msra.gmra.mrb[0].mxu1 %v14948_v63 }
 0x4a7   : > { %12563 = vmatmul.mubr.bf16.vlgmr.msra.gmra.mrb[0].mxu0 %v14951_v0 }
 0x4a8   : > { %12574 = vmatpush1.bf16.msra.mxu0 %v14954_v1  ;;  %12605 = vmatprep.mubr.bf16.mxu0 %v15003_v4 }
 0x4a9   : > { %12575 = vmatprep.subr.bf16.mxu0 %v14959_v2 }
 0x4ac   : > { %12576 = vmatpush1.bf16.msra.mxu0 %v14957_v3 }
 0x4ad   : > { %12577 = vmatprep.subr.bf16.mxu0 %v14962_v5 }
 0x4b0   : > { %12578 = vmatpush1.bf16.msra.mxu0 %v14960_v6 }
 0x4b1   : > { %12579 = vmatprep.subr.bf16.mxu0 %v14965_v7 }
 0x4b4   : > { %12580 = vmatpush1.bf16.msra.mxu0 %v14963_v8 }
 0x4b5   : > { %12581 = vmatprep.subr.bf16.mxu0 %v14968_v9 }
 0x4b8   : > { %12582 = vmatpush1.bf16.msra.mxu0 %v14966_v10 }
 0x4b9   : > { %12583 = vmatprep.subr.bf16.mxu0 %v14971_v11 }
 0x4bc   : > { %12584 = vmatpush1.bf16.msra.mxu0 %v14969_v12 }
 0x4bd   : > { %12585 = vmatprep.subr.bf16.mxu0 %v14974_v13 }
 0x4c0   : > { %12586 = vmatpush1.bf16.msra.mxu0 %v14972_v14 }
 0x4c1   : > { %12587 = vmatprep.subr.bf16.mxu0 %v14977_v15 }
 0x4c4   : > { %12588 = vmatpush1.bf16.msra.mxu0 %v14975_v16 }
 0x4c7   : > { %12606 = vmatmul.mubr.bf16.vlgmr.msra.gmra.mrb[0].mxu0 %v14978_v17 }
 0x579   : > { %v12048_v18 = vpop.f32.mrb[0].mxu1 }
 0x57a   : > { %v12050_v19 = vpop.f32.mrb[1].mxu1  ;;  %v13603_v29 = vadd.f32 %v12048_v18, %v7368_v27 }
 0x57b   : > { %v12052_v20 = vpop.f32.mrb[2].mxu1  ;;  %v13605_v30 = vadd.f32 %v12050_v19, %v7372_v28 }
 0x57c   : > { %v12054_v21 = vpop.f32.mrb[3].mxu1  ;;  %v13607_v32 = vadd.f32 %v12052_v20, %v7368_v27 }
 0x57d   : > { %v13609_v35 = vadd.f32 %v12054_v21, %v7372_v28 }
 0x59a   : > { %v12607_v31 = vpop.f32.mrb[0].mxu0 }
 0x59b   : > { %v13604_v33 = vadd.f32 %v13603_v29, %v12607_v31  ;;  %v12609_v34 = vpop.f32.mrb[1].mxu0 }
 0x59c   : > { %v13606_v36 = vadd.f32 %v13605_v30, %v12609_v34  ;;  %v12611_v37 = vpop.f32.mrb[2].mxu0  ;;  %12636 = sbr.rel (!%p15055_p5) target bundleno = 1451 (0x5ab), region = 88 }
 0x59d   : > { %v13608_v38 = vadd.f32 %v13607_v32, %v12611_v37  ;;  %v12613_v39 = vpop.f32.mrb[3].mxu0 }
 0x59e   : > { %v13600_v40 = vpack.c.bf16 %v13606_v36, %v13604_v33  ;;  %v13610_v41 = vadd.f32 %v13609_v35, %v12613_v39 }
 0x5a0   : > { %12628 = vst [vmem:[%s6520_s11] sm:$0xff] %v13600_v40  ;;  %v13601_v42 = vpack.c.bf16 %v13610_v41, %v13608_v38 }
 0x5a2   : > { %12629 = vst [vmem:[%s6520_s11 + $0x8] sm:$0xff] %v13601_v42 }
 0x5a7   : > { %v12669_v43 = vld [vmem:[%s6520_s11] sm:$0xff] }
 0x5a8   : > { %12670 = vst [vmem:[%s12639_s17] sm:$0xff] %v12669_v43 }
 0x5a9   : > { %v12671_v44 = vld [vmem:[%s6520_s11 + $0x8] sm:$0xff] }
 0x5aa   : > { %12672 = vst [vmem:[%s12639_s17 + $0x10] sm:$0xff] %v12671_v44 }
 0x5ab PF: > { %p10_p11 = scmp.ge.s32.totalorder %s15043_s16, 4   ;;  %s17602_s12 = smov %s14997_s13 }
 0x5ac   : > { %s17603_s13 = smov %s15053_s19  ;;  %s17604_s14 = smov %s15043_s16 }
 0x5ad   :  { %12 = sbr.rel (!%p10_p11) target bundleno = 2 (0x2), region = 166 }

</bundles_post_ra>
